<compile_context>
chip_gen: v5e
topology: v5e:2x2
jax: 0.10.0
libtpu: 0.0.40
codegen_flags: <defaults>
</compile_context>

<pallas_src>
import functools
import math

import jax
import jax.numpy as jnp
from jax import lax
from jax.experimental import pallas as pl
from jax.experimental.pallas import tpu as pltpu

_EPS = 1e-5
_PARALLEL = pltpu.CompilerParams(dimension_semantics=("parallel",))

# Fixed ordering of the stacked / shared weight tensors passed to the kernel.
_W_KEYS = (
    # encoder (stacked over n_enc layers)
    "e_in_w", "e_in_b", "e_out_w", "e_out_b", "e_ln1_g", "e_ln1_b",
    "e_w1", "e_b1", "e_w2", "e_b2", "e_ln2_g", "e_ln2_b",
    # final encoder LayerNorm
    "e_fn_g", "e_fn_b",
    # decoder (stacked over n_dec layers)
    "d_sa_in_w", "d_sa_in_b", "d_sa_out_w", "d_sa_out_b", "d_ln1_g", "d_ln1_b",
    "d_ca_in_w", "d_ca_in_b", "d_ca_out_w", "d_ca_out_b", "d_ln2_g", "d_ln2_b",
    "d_w1", "d_b1", "d_w2", "d_b2", "d_ln3_g", "d_ln3_b",
    # final decoder LayerNorm + output head (vocab padded to 128 lanes)
    "d_fn_g", "d_fn_b", "fc_w_pad", "fc_b_pad",
)


# ----------------------------- in-kernel helpers ----------------------------

def _mm_t(x, w):
    """x:(M,K) @ w:(N,K)^T -> (M,N) f32. Weight kept in PyTorch (out,in)
    layout; transposed contraction is free on the MXU. Operands cast to the
    weight dtype (bf16), f32 accumulation."""
    return lax.dot_general(x.astype(w.dtype), w, (((1,), (1,)), ((), ())),
                           preferred_element_type=jnp.float32)


def _layernorm_f32(x, g, b):
    mean = jnp.mean(x, axis=-1, keepdims=True)
    xc = x - mean
    var = jnp.mean(xc * xc, axis=-1, keepdims=True)
    return xc * lax.rsqrt(var + _EPS) * g + b


def _mha_core(q, k, v, nhead, scale):
    """q:(Sq,D), k/v:(Sk,D) f32. Per-head softmax attention fully in VMEM.
    Heads are static lane slices; outputs concatenated back to (Sq, D)."""
    D = q.shape[-1]
    dh = D // nhead
    outs = []
    for h in range(nhead):
        lo, hi = h * dh, (h + 1) * dh
        qh, kh, vh = q[:, lo:hi], k[:, lo:hi], v[:, lo:hi]
        s = lax.dot_general(qh, kh, (((1,), (1,)), ((), ())),
                            preferred_element_type=jnp.float32) * scale
        s = s - jnp.max(s, axis=-1, keepdims=True)
        p = jnp.exp(s)
        p = p / jnp.sum(p, axis=-1, keepdims=True)
        outs.append(jnp.dot(p, vh, preferred_element_type=jnp.float32))
    return jnp.concatenate(outs, axis=-1)


# ------------------------------ the fused kernel -----------------------------

def _transformer_kernel(
    src_ref, tgt_ref,
    # encoder (stacked over layers)
    e_in_w, e_in_b, e_out_w, e_out_b, e_ln1_g, e_ln1_b,
    e_w1, e_b1, e_w2, e_b2, e_ln2_g, e_ln2_b,
    e_fn_g, e_fn_b,
    # decoder (stacked over layers)
    d_sa_in_w, d_sa_in_b, d_sa_out_w, d_sa_out_b, d_ln1_g, d_ln1_b,
    d_ca_in_w, d_ca_in_b, d_ca_out_w, d_ca_out_b, d_ln2_g, d_ln2_b,
    d_w1, d_b1, d_w2, d_b2, d_ln3_g, d_ln3_b,
    d_fn_g, d_fn_b, fc_w, fc_b,
    o_ref, *, nhead, n_enc, n_dec):
    x = src_ref[0]                                        # (Ss, D) f32
    D = x.shape[-1]
    scale = 1.0 / math.sqrt(D // nhead)

    # ----------------------------- encoder stack -----------------------------
    for l in range(n_enc):
        qkv = _mm_t(x, e_in_w[l]) + e_in_b[l]             # fused QKV -> (Ss, 3D)
        attn = _mha_core(qkv[:, 0:D], qkv[:, D:2 * D], qkv[:, 2 * D:3 * D],
                         nhead, scale)
        x = _layernorm_f32(x + _mm_t(attn, e_out_w[l]) + e_out_b[l],
                           e_ln1_g[l], e_ln1_b[l])        # residual + LN (post-norm)
        h = jnp.maximum(_mm_t(x, e_w1[l]) + e_b1[l], 0.0)  # ReLU FFN
        x = _layernorm_f32(x + _mm_t(h, e_w2[l]) + e_b2[l],
                           e_ln2_g[l], e_ln2_b[l])
    mem = _layernorm_f32(x, e_fn_g[...], e_fn_b[...])     # nn.Transformer encoder norm

    # ----------------------------- decoder stack -----------------------------
    y = tgt_ref[0]                                        # (St, D) f32
    for l in range(n_dec):
        # self-attention
        qkv = _mm_t(y, d_sa_in_w[l]) + d_sa_in_b[l]
        attn = _mha_core(qkv[:, 0:D], qkv[:, D:2 * D], qkv[:, 2 * D:3 * D],
                         nhead, scale)
        y = _layernorm_f32(y + _mm_t(attn, d_sa_out_w[l]) + d_sa_out_b[l],
                           d_ln1_g[l], d_ln1_b[l])
        # cross-attention (Q from decoder, K/V from encoder memory)
        in_w = d_ca_in_w[l]                               # (3D, D)
        in_b = d_ca_in_b[l]                               # (1, 3D)
        q = _mm_t(y, in_w[0:D]) + in_b[:, 0:D]
        kv = _mm_t(mem, in_w[D:3 * D]) + in_b[:, D:3 * D]  # fused K/V -> (Ss, 2D)
        attn = _mha_core(q, kv[:, 0:D], kv[:, D:2 * D], nhead, scale)
        y = _layernorm_f32(y + _mm_t(attn, d_ca_out_w[l]) + d_ca_out_b[l],
                           d_ln2_g[l], d_ln2_b[l])
        # FFN
        h = jnp.maximum(_mm_t(y, d_w1[l]) + d_b1[l], 0.0)
        y = _layernorm_f32(y + _mm_t(h, d_w2[l]) + d_b2[l],
                           d_ln3_g[l], d_ln3_b[l])

    # ---------------- final decoder LN + fc_out + LogSoftmax ----------------
    y = _layernorm_f32(y, d_fn_g[...], d_fn_b[...])
    logits = _mm_t(y, fc_w[...]) + fc_b[...]              # (St, Vpad); pad cols ~ -1e30
    m = jnp.max(logits, axis=-1, keepdims=True)
    z = logits - m
    lse = jnp.log(jnp.sum(jnp.exp(z), axis=-1, keepdims=True))
    o_ref[0] = (z - lse).astype(o_ref.dtype)


# ------------------------------ pallas wrapper -------------------------------

def _bcast(shape):
    zeros = (0,) * len(shape)
    return pl.BlockSpec(shape, lambda b: zeros)           # shared across grid steps


def transformer_forward(params, src, tgt, *, nhead, vocab_size):
    B, Ss = src.shape
    _, St = tgt.shape
    D = params["embedding"].shape[1]
    Vp = params["fc_w_pad"].shape[0]
    n_enc = params["e_in_w"].shape[0]
    n_dec = params["d_sa_in_w"].shape[0]

    # TODO(synk): embedding gather + positional add left to XLA (dynamic
    # gather of token ids has no clean tiny-shape Pallas equivalent here).
    src_emb = params["embedding"][src] + params["pos"][:, :Ss, :]
    tgt_emb = params["embedding"][tgt] + params["pos"][:, :St, :]

    kernel = functools.partial(_transformer_kernel,
                               nhead=nhead, n_enc=n_enc, n_dec=n_dec)
    weights = [params[k] for k in _W_KEYS]

    out = pl.pallas_call(
        kernel,
        out_shape=jax.ShapeDtypeStruct((B, St, Vp), jnp.float32),
        grid=(B,),
        in_specs=[
            pl.BlockSpec((1, Ss, D), lambda b: (b, 0, 0)),
            pl.BlockSpec((1, St, D), lambda b: (b, 0, 0)),
        ] + [_bcast(w.shape) for w in weights],
        out_specs=pl.BlockSpec((1, St, Vp), lambda b: (b, 0, 0)),
        compiler_params=_PARALLEL,
    )(src_emb, tgt_emb, *weights)

    return out[:, :, :vocab_size]


# -------------------------------- parameter init -----------------------------

def init_params(key, vocab_size, d_model, nhead, n_enc, n_dec, dff):
    keys = iter(jax.random.split(key, 1024))

    def nrm(shape, scale=0.02, dtype=jnp.float32):
        return (scale * jax.random.normal(next(keys), shape)).astype(dtype)

    def w_stack(n, shape):          # bf16 matmul weights, stacked over layers
        return jnp.stack([nrm(shape, dtype=jnp.bfloat16) for _ in range(n)])

    def zeros(shape):
        return jnp.zeros(shape, jnp.float32)

    def ones(shape):
        return jnp.ones(shape, jnp.float32)

    D, F = d_model, dff
    p = dict(
        embedding=nrm((vocab_size, D), scale=1.0),
        pos=zeros((1, 100, D)),     # matches nn.Parameter(torch.zeros(1,100,d_model))
        # ------------------------------ encoder ------------------------------
        e_in_w=w_stack(n_enc, (3 * D, D)), e_in_b=zeros((n_enc, 1, 3 * D)),
        e_out_w=w_stack(n_enc, (D, D)),    e_out_b=zeros((n_enc, 1, D)),
        e_ln1_g=ones((n_enc, 1, D)),       e_ln1_b=zeros((n_enc, 1, D)),
        e_w1=w_stack(n_enc, (F, D)),       e_b1=zeros((n_enc, 1, F)),
        e_w2=w_stack(n_enc, (D, F)),       e_b2=zeros((n_enc, 1, D)),
        e_ln2_g=ones((n_enc, 1, D)),       e_ln2_b=zeros((n_enc, 1, D)),
        e_fn_g=ones((1, D)),               e_fn_b=zeros((1, D)),
        # ------------------------------ decoder ------------------------------
        d_sa_in_w=w_stack(n_dec, (3 * D, D)), d_sa_in_b=zeros((n_dec, 1, 3 * D)),
        d_sa_out_w=w_stack(n_dec, (D, D)),    d_sa_out_b=zeros((n_dec, 1, D)),
        d_ln1_g=ones((n_dec, 1, D)),          d_ln1_b=zeros((n_dec, 1, D)),
        d_ca_in_w=w_stack(n_dec, (3 * D, D)), d_ca_in_b=zeros((n_dec, 1, 3 * D)),
        d_ca_out_w=w_stack(n_dec, (D, D)),    d_ca_out_b=zeros((n_dec, 1, D)),
        d_ln2_g=ones((n_dec, 1, D)),          d_ln2_b=zeros((n_dec, 1, D)),
        d_w1=w_stack(n_dec, (F, D)),          d_b1=zeros((n_dec, 1, F)),
        d_w2=w_stack(n_dec, (D, F)),          d_b2=zeros((n_dec, 1, D)),
        d_ln3_g=ones((n_dec, 1, D)),          d_ln3_b=zeros((n_dec, 1, D)),
        d_fn_g=ones((1, D)),                  d_fn_b=zeros((1, D)),
    )

    # fc_out padded to a lane-dense 128-wide vocab; pad columns get -1e30 bias
    # so they contribute exp(.)=0 to the log-softmax and are sliced off outside.
    vpad = ((vocab_size + 127) // 128) * 128
    fc_w = nrm((vocab_size, D))
    p["fc_w_pad"] = (jnp.zeros((vpad, D), jnp.float32)
                     .at[:vocab_size, :].set(fc_w).astype(jnp.bfloat16))
    p["fc_b_pad"] = (jnp.full((1, vpad), -1e30, jnp.float32)
                     .at[0, :vocab_size].set(0.0))
    return p


# ------------------------------------- main ----------------------------------

if __name__ == "__main__":
    vocab_size = 50
    d_model = 32
    nhead = 4
    num_encoder_layers = 2
    num_decoder_layers = 2
    dim_feedforward = 64
    B, S_src, S_tgt = 2, 10, 8

    key = jax.random.PRNGKey(0)
    pkey, skey, tkey = jax.random.split(key, 3)
    params = init_params(pkey, vocab_size, d_model, nhead,
                         num_encoder_layers, num_decoder_layers,
                         dim_feedforward)

    src = jax.random.randint(skey, (B, S_src), 0, vocab_size, dtype=jnp.int32)
    tgt = jax.random.randint(tkey, (B, S_tgt), 0, vocab_size, dtype=jnp.int32)

    fwd = jax.jit(functools.partial(transformer_forward,
                                    nhead=nhead, vocab_size=vocab_size))
    out = jax.block_until_ready(fwd(params, src, tgt))

    assert out.shape == (B, S_tgt, vocab_size), out.shape
    assert bool(jnp.all(jnp.isfinite(out)))
    # log-softmax rows should exponentiate-sum to ~1
    row_sums = jnp.exp(out).sum(axis=-1)
    assert bool(jnp.allclose(row_sums, 1.0, atol=1e-4)), row_sums

    print("KERNEL_OK")
</pallas_src>

<mosaic_0001>
module attributes {stable_mosaic.version = 11 : i64} {
  func.func @_transformer_kernel(%arg0: i32, %arg1: memref<1x10x32xf32, #tpu.memory_space<vmem>>, %arg2: memref<1x8x32xf32, #tpu.memory_space<vmem>>, %arg3: memref<2x96x32xbf16, #tpu.memory_space<vmem>>, %arg4: memref<2x1x96xf32, #tpu.memory_space<vmem>>, %arg5: memref<2x32x32xbf16, #tpu.memory_space<vmem>>, %arg6: memref<2x1x32xf32, #tpu.memory_space<vmem>>, %arg7: memref<2x1x32xf32, #tpu.memory_space<vmem>>, %arg8: memref<2x1x32xf32, #tpu.memory_space<vmem>>, %arg9: memref<2x64x32xbf16, #tpu.memory_space<vmem>>, %arg10: memref<2x1x64xf32, #tpu.memory_space<vmem>>, %arg11: memref<2x32x64xbf16, #tpu.memory_space<vmem>>, %arg12: memref<2x1x32xf32, #tpu.memory_space<vmem>>, %arg13: memref<2x1x32xf32, #tpu.memory_space<vmem>>, %arg14: memref<2x1x32xf32, #tpu.memory_space<vmem>>, %arg15: memref<1x32xf32, #tpu.memory_space<vmem>>, %arg16: memref<1x32xf32, #tpu.memory_space<vmem>>, %arg17: memref<2x96x32xbf16, #tpu.memory_space<vmem>>, %arg18: memref<2x1x96xf32, #tpu.memory_space<vmem>>, %arg19: memref<2x32x32xbf16, #tpu.memory_space<vmem>>, %arg20: memref<2x1x32xf32, #tpu.memory_space<vmem>>, %arg21: memref<2x1x32xf32, #tpu.memory_space<vmem>>, %arg22: memref<2x1x32xf32, #tpu.memory_space<vmem>>, %arg23: memref<2x96x32xbf16, #tpu.memory_space<vmem>>, %arg24: memref<2x1x96xf32, #tpu.memory_space<vmem>>, %arg25: memref<2x32x32xbf16, #tpu.memory_space<vmem>>, %arg26: memref<2x1x32xf32, #tpu.memory_space<vmem>>, %arg27: memref<2x1x32xf32, #tpu.memory_space<vmem>>, %arg28: memref<2x1x32xf32, #tpu.memory_space<vmem>>, %arg29: memref<2x64x32xbf16, #tpu.memory_space<vmem>>, %arg30: memref<2x1x64xf32, #tpu.memory_space<vmem>>, %arg31: memref<2x32x64xbf16, #tpu.memory_space<vmem>>, %arg32: memref<2x1x32xf32, #tpu.memory_space<vmem>>, %arg33: memref<2x1x32xf32, #tpu.memory_space<vmem>>, %arg34: memref<2x1x32xf32, #tpu.memory_space<vmem>>, %arg35: memref<1x32xf32, #tpu.memory_space<vmem>>, %arg36: memref<1x32xf32, #tpu.memory_space<vmem>>, %arg37: memref<128x32xbf16, #tpu.memory_space<vmem>>, %arg38: memref<1x128xf32, #tpu.memory_space<vmem>>, %arg39: memref<1x8x128xf32, #tpu.memory_space<vmem>>) attributes {dimension_semantics = [#tpu.dimension_semantics<parallel>], iteration_bounds = array<i64: 2>, scalar_prefetch = 0 : i64, scratch_operands = 0 : i64, tpu.core_type = #tpu.core_type<tc>, window_params = [{transform_indices = @transform_0, window_bounds = array<i64: 1, 10, 32>}, {transform_indices = @transform_1, window_bounds = array<i64: 1, 8, 32>}, {pipeline_mode = #tpu.pipeline_mode<synchronous>, transform_indices = @transform_2, window_bounds = array<i64: 2, 96, 32>}, {pipeline_mode = #tpu.pipeline_mode<synchronous>, transform_indices = @transform_3, window_bounds = array<i64: 2, 1, 96>}, {pipeline_mode = #tpu.pipeline_mode<synchronous>, transform_indices = @transform_4, window_bounds = array<i64: 2, 32, 32>}, {pipeline_mode = #tpu.pipeline_mode<synchronous>, transform_indices = @transform_5, window_bounds = array<i64: 2, 1, 32>}, {pipeline_mode = #tpu.pipeline_mode<synchronous>, transform_indices = @transform_6, window_bounds = array<i64: 2, 1, 32>}, {pipeline_mode = #tpu.pipeline_mode<synchronous>, transform_indices = @transform_7, window_bounds = array<i64: 2, 1, 32>}, {pipeline_mode = #tpu.pipeline_mode<synchronous>, transform_indices = @transform_8, window_bounds = array<i64: 2, 64, 32>}, {pipeline_mode = #tpu.pipeline_mode<synchronous>, transform_indices = @transform_9, window_bounds = array<i64: 2, 1, 64>}, {pipeline_mode = #tpu.pipeline_mode<synchronous>, transform_indices = @transform_10, window_bounds = array<i64: 2, 32, 64>}, {pipeline_mode = #tpu.pipeline_mode<synchronous>, transform_indices = @transform_11, window_bounds = array<i64: 2, 1, 32>}, {pipeline_mode = #tpu.pipeline_mode<synchronous>, transform_indices = @transform_12, window_bounds = array<i64: 2, 1, 32>}, {pipeline_mode = #tpu.pipeline_mode<synchronous>, transform_indices = @transform_13, window_bounds = array<i64: 2, 1, 32>}, {pipeline_mode = #tpu.pipeline_mode<synchronous>, transform_indices = @transform_14, window_bounds = array<i64: 1, 32>}, {pipeline_mode = #tpu.pipeline_mode<synchronous>, transform_indices = @transform_15, window_bounds = array<i64: 1, 32>}, {pipeline_mode = #tpu.pipeline_mode<synchronous>, transform_indices = @transform_16, window_bounds = array<i64: 2, 96, 32>}, {pipeline_mode = #tpu.pipeline_mode<synchronous>, transform_indices = @transform_17, window_bounds = array<i64: 2, 1, 96>}, {pipeline_mode = #tpu.pipeline_mode<synchronous>, transform_indices = @transform_18, window_bounds = array<i64: 2, 32, 32>}, {pipeline_mode = #tpu.pipeline_mode<synchronous>, transform_indices = @transform_19, window_bounds = array<i64: 2, 1, 32>}, {pipeline_mode = #tpu.pipeline_mode<synchronous>, transform_indices = @transform_20, window_bounds = array<i64: 2, 1, 32>}, {pipeline_mode = #tpu.pipeline_mode<synchronous>, transform_indices = @transform_21, window_bounds = array<i64: 2, 1, 32>}, {pipeline_mode = #tpu.pipeline_mode<synchronous>, transform_indices = @transform_22, window_bounds = array<i64: 2, 96, 32>}, {pipeline_mode = #tpu.pipeline_mode<synchronous>, transform_indices = @transform_23, window_bounds = array<i64: 2, 1, 96>}, {pipeline_mode = #tpu.pipeline_mode<synchronous>, transform_indices = @transform_24, window_bounds = array<i64: 2, 32, 32>}, {pipeline_mode = #tpu.pipeline_mode<synchronous>, transform_indices = @transform_25, window_bounds = array<i64: 2, 1, 32>}, {pipeline_mode = #tpu.pipeline_mode<synchronous>, transform_indices = @transform_26, window_bounds = array<i64: 2, 1, 32>}, {pipeline_mode = #tpu.pipeline_mode<synchronous>, transform_indices = @transform_27, window_bounds = array<i64: 2, 1, 32>}, {pipeline_mode = #tpu.pipeline_mode<synchronous>, transform_indices = @transform_28, window_bounds = array<i64: 2, 64, 32>}, {pipeline_mode = #tpu.pipeline_mode<synchronous>, transform_indices = @transform_29, window_bounds = array<i64: 2, 1, 64>}, {pipeline_mode = #tpu.pipeline_mode<synchronous>, transform_indices = @transform_30, window_bounds = array<i64: 2, 32, 64>}, {pipeline_mode = #tpu.pipeline_mode<synchronous>, transform_indices = @transform_31, window_bounds = array<i64: 2, 1, 32>}, {pipeline_mode = #tpu.pipeline_mode<synchronous>, transform_indices = @transform_32, window_bounds = array<i64: 2, 1, 32>}, {pipeline_mode = #tpu.pipeline_mode<synchronous>, transform_indices = @transform_33, window_bounds = array<i64: 2, 1, 32>}, {pipeline_mode = #tpu.pipeline_mode<synchronous>, transform_indices = @transform_34, window_bounds = array<i64: 1, 32>}, {pipeline_mode = #tpu.pipeline_mode<synchronous>, transform_indices = @transform_35, window_bounds = array<i64: 1, 32>}, {pipeline_mode = #tpu.pipeline_mode<synchronous>, transform_indices = @transform_36, window_bounds = array<i64: 128, 32>}, {pipeline_mode = #tpu.pipeline_mode<synchronous>, transform_indices = @transform_37, window_bounds = array<i64: 1, 128>}, {transform_indices = @transform_38, window_bounds = array<i64: 1, 8, 128>}]} {
    %c0 = arith.constant 0 : index
    %c0_0 = arith.constant 0 : index
    %c0_1 = arith.constant 0 : index
    %0 = vector.load %arg1[%c0, %c0_0, %c0_1] : memref<1x10x32xf32, #tpu.memory_space<vmem>>, vector<1x10x32xf32>
    %1 = vector.shape_cast %0 : vector<1x10x32xf32> to vector<10x32xf32>
    %c0_2 = arith.constant 0 : index
    %c0_3 = arith.constant 0 : index
    %c0_4 = arith.constant 0 : index
    %2 = vector.load %arg3[%c0_2, %c0_3, %c0_4] : memref<2x96x32xbf16, #tpu.memory_space<vmem>>, vector<1x96x32xbf16>
    %3 = vector.shape_cast %2 : vector<1x96x32xbf16> to vector<96x32xbf16>
    %4 = arith.truncf %1 : vector<10x32xf32> to vector<10x32xbf16>
    %cst = arith.constant dense<0.000000e+00> : vector<10x96xf32>
    %5 = tpu.matmul %4, %3, %cst {dimension_numbers = #tpu.dot_dimension_numbers<[1], [1], [0], [0], [0, 0, 1, 0], [], []>} : vector<10x32xbf16>, vector<96x32xbf16>, vector<10x96xf32> -> vector<10x96xf32>
    %c0_5 = arith.constant 0 : index
    %c0_6 = arith.constant 0 : index
    %c0_7 = arith.constant 0 : index
    %6 = vector.load %arg4[%c0_5, %c0_6, %c0_7] : memref<2x1x96xf32, #tpu.memory_space<vmem>>, vector<1x1x96xf32>
    %7 = vector.shape_cast %6 : vector<1x1x96xf32> to vector<1x96xf32>
    %8 = vector.broadcast %7 : vector<1x96xf32> to vector<10x96xf32>
    %9 = arith.addf %5, %8 : vector<10x96xf32>
    %10 = vector.extract_strided_slice %9 {offsets = [0, 0], sizes = [10, 32], strides = [1, 1]} : vector<10x96xf32> to vector<10x32xf32>
    %11 = vector.extract_strided_slice %9 {offsets = [0, 32], sizes = [10, 32], strides = [1, 1]} : vector<10x96xf32> to vector<10x32xf32>
    %12 = vector.extract_strided_slice %9 {offsets = [0, 64], sizes = [10, 32], strides = [1, 1]} : vector<10x96xf32> to vector<10x32xf32>
    %13 = vector.extract_strided_slice %10 {offsets = [0, 0], sizes = [10, 8], strides = [1, 1]} : vector<10x32xf32> to vector<10x8xf32>
    %14 = vector.extract_strided_slice %11 {offsets = [0, 0], sizes = [10, 8], strides = [1, 1]} : vector<10x32xf32> to vector<10x8xf32>
    %15 = vector.extract_strided_slice %12 {offsets = [0, 0], sizes = [10, 8], strides = [1, 1]} : vector<10x32xf32> to vector<10x8xf32>
    %cst_8 = arith.constant dense<0.000000e+00> : vector<10x10xf32>
    %16 = tpu.matmul %13, %14, %cst_8 {dimension_numbers = #tpu.dot_dimension_numbers<[1], [1], [0], [0], [0, 0, 1, 0], [], []>} : vector<10x8xf32>, vector<10x8xf32>, vector<10x10xf32> -> vector<10x10xf32>
    %cst_9 = arith.constant 0.353553385 : f32
    %17 = vector.broadcast %cst_9 : f32 to vector<10x10xf32>
    %18 = arith.mulf %16, %17 : vector<10x10xf32>
    %cst_10 = arith.constant dense<0xFF800000> : vector<10xf32>
    %19 = vector.multi_reduction <maximumf>, %18, %cst_10 [1] : vector<10x10xf32> to vector<10xf32>
    %20 = vector.shape_cast %19 : vector<10xf32> to vector<10x1xf32>
    %21 = vector.broadcast %20 : vector<10x1xf32> to vector<10x10xf32>
    %22 = arith.subf %18, %21 : vector<10x10xf32>
    %23 = math.exp %22 : vector<10x10xf32>
    %cst_11 = arith.constant dense<0.000000e+00> : vector<10xf32>
    %24 = vector.multi_reduction <add>, %23, %cst_11 [1] : vector<10x10xf32> to vector<10xf32>
    %25 = vector.shape_cast %24 : vector<10xf32> to vector<10x1xf32>
    %26 = vector.broadcast %25 : vector<10x1xf32> to vector<10x10xf32>
    %27 = arith.divf %23, %26 : vector<10x10xf32>
    %cst_12 = arith.constant dense<0.000000e+00> : vector<10x8xf32>
    %28 = tpu.matmul %27, %15, %cst_12 {dimension_numbers = #tpu.dot_dimension_numbers<[1], [0], [0], [1], [0, 0, 1, 1], [], []>} : vector<10x10xf32>, vector<10x8xf32>, vector<10x8xf32> -> vector<10x8xf32>
    %29 = vector.extract_strided_slice %10 {offsets = [0, 8], sizes = [10, 8], strides = [1, 1]} : vector<10x32xf32> to vector<10x8xf32>
    %30 = vector.extract_strided_slice %11 {offsets = [0, 8], sizes = [10, 8], strides = [1, 1]} : vector<10x32xf32> to vector<10x8xf32>
    %31 = vector.extract_strided_slice %12 {offsets = [0, 8], sizes = [10, 8], strides = [1, 1]} : vector<10x32xf32> to vector<10x8xf32>
    %cst_13 = arith.constant dense<0.000000e+00> : vector<10x10xf32>
    %32 = tpu.matmul %29, %30, %cst_13 {dimension_numbers = #tpu.dot_dimension_numbers<[1], [1], [0], [0], [0, 0, 1, 0], [], []>} : vector<10x8xf32>, vector<10x8xf32>, vector<10x10xf32> -> vector<10x10xf32>
    %cst_14 = arith.constant 0.353553385 : f32
    %33 = vector.broadcast %cst_14 : f32 to vector<10x10xf32>
    %34 = arith.mulf %32, %33 : vector<10x10xf32>
    %cst_15 = arith.constant dense<0xFF800000> : vector<10xf32>
    %35 = vector.multi_reduction <maximumf>, %34, %cst_15 [1] : vector<10x10xf32> to vector<10xf32>
    %36 = vector.shape_cast %35 : vector<10xf32> to vector<10x1xf32>
    %37 = vector.broadcast %36 : vector<10x1xf32> to vector<10x10xf32>
    %38 = arith.subf %34, %37 : vector<10x10xf32>
    %39 = math.exp %38 : vector<10x10xf32>
    %cst_16 = arith.constant dense<0.000000e+00> : vector<10xf32>
    %40 = vector.multi_reduction <add>, %39, %cst_16 [1] : vector<10x10xf32> to vector<10xf32>
    %41 = vector.shape_cast %40 : vector<10xf32> to vector<10x1xf32>
    %42 = vector.broadcast %41 : vector<10x1xf32> to vector<10x10xf32>
    %43 = arith.divf %39, %42 : vector<10x10xf32>
    %cst_17 = arith.constant dense<0.000000e+00> : vector<10x8xf32>
    %44 = tpu.matmul %43, %31, %cst_17 {dimension_numbers = #tpu.dot_dimension_numbers<[1], [0], [0], [1], [0, 0, 1, 1], [], []>} : vector<10x10xf32>, vector<10x8xf32>, vector<10x8xf32> -> vector<10x8xf32>
    %45 = vector.extract_strided_slice %10 {offsets = [0, 16], sizes = [10, 8], strides = [1, 1]} : vector<10x32xf32> to vector<10x8xf32>
    %46 = vector.extract_strided_slice %11 {offsets = [0, 16], sizes = [10, 8], strides = [1, 1]} : vector<10x32xf32> to vector<10x8xf32>
    %47 = vector.extract_strided_slice %12 {offsets = [0, 16], sizes = [10, 8], strides = [1, 1]} : vector<10x32xf32> to vector<10x8xf32>
    %cst_18 = arith.constant dense<0.000000e+00> : vector<10x10xf32>
    %48 = tpu.matmul %45, %46, %cst_18 {dimension_numbers = #tpu.dot_dimension_numbers<[1], [1], [0], [0], [0, 0, 1, 0], [], []>} : vector<10x8xf32>, vector<10x8xf32>, vector<10x10xf32> -> vector<10x10xf32>
    %cst_19 = arith.constant 0.353553385 : f32
    %49 = vector.broadcast %cst_19 : f32 to vector<10x10xf32>
    %50 = arith.mulf %48, %49 : vector<10x10xf32>
    %cst_20 = arith.constant dense<0xFF800000> : vector<10xf32>
    %51 = vector.multi_reduction <maximumf>, %50, %cst_20 [1] : vector<10x10xf32> to vector<10xf32>
    %52 = vector.shape_cast %51 : vector<10xf32> to vector<10x1xf32>
    %53 = vector.broadcast %52 : vector<10x1xf32> to vector<10x10xf32>
    %54 = arith.subf %50, %53 : vector<10x10xf32>
    %55 = math.exp %54 : vector<10x10xf32>
    %cst_21 = arith.constant dense<0.000000e+00> : vector<10xf32>
    %56 = vector.multi_reduction <add>, %55, %cst_21 [1] : vector<10x10xf32> to vector<10xf32>
    %57 = vector.shape_cast %56 : vector<10xf32> to vector<10x1xf32>
    %58 = vector.broadcast %57 : vector<10x1xf32> to vector<10x10xf32>
    %59 = arith.divf %55, %58 : vector<10x10xf32>
    %cst_22 = arith.constant dense<0.000000e+00> : vector<10x8xf32>
    %60 = tpu.matmul %59, %47, %cst_22 {dimension_numbers = #tpu.dot_dimension_numbers<[1], [0], [0], [1], [0, 0, 1, 1], [], []>} : vector<10x10xf32>, vector<10x8xf32>, vector<10x8xf32> -> vector<10x8xf32>
    %61 = vector.extract_strided_slice %10 {offsets = [0, 24], sizes = [10, 8], strides = [1, 1]} : vector<10x32xf32> to vector<10x8xf32>
    %62 = vector.extract_strided_slice %11 {offsets = [0, 24], sizes = [10, 8], strides = [1, 1]} : vector<10x32xf32> to vector<10x8xf32>
    %63 = vector.extract_strided_slice %12 {offsets = [0, 24], sizes = [10, 8], strides = [1, 1]} : vector<10x32xf32> to vector<10x8xf32>
    %cst_23 = arith.constant dense<0.000000e+00> : vector<10x10xf32>
    %64 = tpu.matmul %61, %62, %cst_23 {dimension_numbers = #tpu.dot_dimension_numbers<[1], [1], [0], [0], [0, 0, 1, 0], [], []>} : vector<10x8xf32>, vector<10x8xf32>, vector<10x10xf32> -> vector<10x10xf32>
    %cst_24 = arith.constant 0.353553385 : f32
    %65 = vector.broadcast %cst_24 : f32 to vector<10x10xf32>
    %66 = arith.mulf %64, %65 : vector<10x10xf32>
    %cst_25 = arith.constant dense<0xFF800000> : vector<10xf32>
    %67 = vector.multi_reduction <maximumf>, %66, %cst_25 [1] : vector<10x10xf32> to vector<10xf32>
    %68 = vector.shape_cast %67 : vector<10xf32> to vector<10x1xf32>
    %69 = vector.broadcast %68 : vector<10x1xf32> to vector<10x10xf32>
    %70 = arith.subf %66, %69 : vector<10x10xf32>
    %71 = math.exp %70 : vector<10x10xf32>
    %cst_26 = arith.constant dense<0.000000e+00> : vector<10xf32>
    %72 = vector.multi_reduction <add>, %71, %cst_26 [1] : vector<10x10xf32> to vector<10xf32>
    %73 = vector.shape_cast %72 : vector<10xf32> to vector<10x1xf32>
    %74 = vector.broadcast %73 : vector<10x1xf32> to vector<10x10xf32>
    %75 = arith.divf %71, %74 : vector<10x10xf32>
    %cst_27 = arith.constant dense<0.000000e+00> : vector<10x8xf32>
    %76 = tpu.matmul %75, %63, %cst_27 {dimension_numbers = #tpu.dot_dimension_numbers<[1], [0], [0], [1], [0, 0, 1, 1], [], []>} : vector<10x10xf32>, vector<10x8xf32>, vector<10x8xf32> -> vector<10x8xf32>
    %77 = tpu.concatenate %28, %44, %60, %76 in 1 : vector<10x8xf32>, vector<10x8xf32>, vector<10x8xf32>, vector<10x8xf32> -> vector<10x32xf32>
    %c0_28 = arith.constant 0 : index
    %c0_29 = arith.constant 0 : index
    %c0_30 = arith.constant 0 : index
    %78 = vector.load %arg5[%c0_28, %c0_29, %c0_30] : memref<2x32x32xbf16, #tpu.memory_space<vmem>>, vector<1x32x32xbf16>
    %79 = vector.shape_cast %78 : vector<1x32x32xbf16> to vector<32x32xbf16>
    %80 = arith.truncf %77 : vector<10x32xf32> to vector<10x32xbf16>
    %cst_31 = arith.constant dense<0.000000e+00> : vector<10x32xf32>
    %81 = tpu.matmul %80, %79, %cst_31 {dimension_numbers = #tpu.dot_dimension_numbers<[1], [1], [0], [0], [0, 0, 1, 0], [], []>} : vector<10x32xbf16>, vector<32x32xbf16>, vector<10x32xf32> -> vector<10x32xf32>
    %82 = arith.addf %1, %81 : vector<10x32xf32>
    %c0_32 = arith.constant 0 : index
    %c0_33 = arith.constant 0 : index
    %c0_34 = arith.constant 0 : index
    %83 = vector.load %arg6[%c0_32, %c0_33, %c0_34] : memref<2x1x32xf32, #tpu.memory_space<vmem>>, vector<1x1x32xf32>
    %84 = vector.shape_cast %83 : vector<1x1x32xf32> to vector<1x32xf32>
    %85 = vector.broadcast %84 : vector<1x32xf32> to vector<10x32xf32>
    %86 = arith.addf %82, %85 : vector<10x32xf32>
    %c0_35 = arith.constant 0 : index
    %c0_36 = arith.constant 0 : index
    %c0_37 = arith.constant 0 : index
    %87 = vector.load %arg7[%c0_35, %c0_36, %c0_37] : memref<2x1x32xf32, #tpu.memory_space<vmem>>, vector<1x1x32xf32>
    %88 = vector.shape_cast %87 : vector<1x1x32xf32> to vector<1x32xf32>
    %c0_38 = arith.constant 0 : index
    %c0_39 = arith.constant 0 : index
    %c0_40 = arith.constant 0 : index
    %89 = vector.load %arg8[%c0_38, %c0_39, %c0_40] : memref<2x1x32xf32, #tpu.memory_space<vmem>>, vector<1x1x32xf32>
    %90 = vector.shape_cast %89 : vector<1x1x32xf32> to vector<1x32xf32>
    %cst_41 = arith.constant dense<0.000000e+00> : vector<10xf32>
    %91 = vector.multi_reduction <add>, %86, %cst_41 [1] : vector<10x32xf32> to vector<10xf32>
    %92 = vector.shape_cast %91 : vector<10xf32> to vector<10x1xf32>
    %cst_42 = arith.constant 3.200000e+01 : f32
    %93 = vector.broadcast %cst_42 : f32 to vector<10x1xf32>
    %94 = arith.divf %92, %93 : vector<10x1xf32>
    %95 = vector.broadcast %94 : vector<10x1xf32> to vector<10x32xf32>
    %96 = arith.subf %86, %95 : vector<10x32xf32>
    %97 = arith.mulf %96, %96 : vector<10x32xf32>
    %cst_43 = arith.constant dense<0.000000e+00> : vector<10xf32>
    %98 = vector.multi_reduction <add>, %97, %cst_43 [1] : vector<10x32xf32> to vector<10xf32>
    %99 = vector.shape_cast %98 : vector<10xf32> to vector<10x1xf32>
    %cst_44 = arith.constant 3.200000e+01 : f32
    %100 = vector.broadcast %cst_44 : f32 to vector<10x1xf32>
    %101 = arith.divf %99, %100 : vector<10x1xf32>
    %cst_45 = arith.constant 9.99999974E-6 : f32
    %102 = vector.broadcast %cst_45 : f32 to vector<10x1xf32>
    %103 = arith.addf %101, %102 : vector<10x1xf32>
    %104 = math.rsqrt %103 : vector<10x1xf32>
    %105 = vector.broadcast %104 : vector<10x1xf32> to vector<10x32xf32>
    %106 = arith.mulf %96, %105 : vector<10x32xf32>
    %107 = vector.broadcast %88 : vector<1x32xf32> to vector<10x32xf32>
    %108 = arith.mulf %106, %107 : vector<10x32xf32>
    %109 = vector.broadcast %90 : vector<1x32xf32> to vector<10x32xf32>
    %110 = arith.addf %108, %109 : vector<10x32xf32>
    %c0_46 = arith.constant 0 : index
    %c0_47 = arith.constant 0 : index
    %c0_48 = arith.constant 0 : index
    %111 = vector.load %arg9[%c0_46, %c0_47, %c0_48] : memref<2x64x32xbf16, #tpu.memory_space<vmem>>, vector<1x64x32xbf16>
    %112 = vector.shape_cast %111 : vector<1x64x32xbf16> to vector<64x32xbf16>
    %113 = arith.truncf %110 : vector<10x32xf32> to vector<10x32xbf16>
    %cst_49 = arith.constant dense<0.000000e+00> : vector<10x64xf32>
    %114 = tpu.matmul %113, %112, %cst_49 {dimension_numbers = #tpu.dot_dimension_numbers<[1], [1], [0], [0], [0, 0, 1, 0], [], []>} : vector<10x32xbf16>, vector<64x32xbf16>, vector<10x64xf32> -> vector<10x64xf32>
    %c0_50 = arith.constant 0 : index
    %c0_51 = arith.constant 0 : index
    %c0_52 = arith.constant 0 : index
    %115 = vector.load %arg10[%c0_50, %c0_51, %c0_52] : memref<2x1x64xf32, #tpu.memory_space<vmem>>, vector<1x1x64xf32>
    %116 = vector.shape_cast %115 : vector<1x1x64xf32> to vector<1x64xf32>
    %117 = vector.broadcast %116 : vector<1x64xf32> to vector<10x64xf32>
    %118 = arith.addf %114, %117 : vector<10x64xf32>
    %cst_53 = arith.constant 0.000000e+00 : f32
    %119 = vector.broadcast %cst_53 : f32 to vector<10x64xf32>
    %120 = arith.maximumf %118, %119 : vector<10x64xf32>
    %c0_54 = arith.constant 0 : index
    %c0_55 = arith.constant 0 : index
    %c0_56 = arith.constant 0 : index
    %121 = vector.load %arg11[%c0_54, %c0_55, %c0_56] : memref<2x32x64xbf16, #tpu.memory_space<vmem>>, vector<1x32x64xbf16>
    %122 = vector.shape_cast %121 : vector<1x32x64xbf16> to vector<32x64xbf16>
    %123 = arith.truncf %120 : vector<10x64xf32> to vector<10x64xbf16>
    %cst_57 = arith.constant dense<0.000000e+00> : vector<10x32xf32>
    %124 = tpu.matmul %123, %122, %cst_57 {dimension_numbers = #tpu.dot_dimension_numbers<[1], [1], [0], [0], [0, 0, 1, 0], [], []>} : vector<10x64xbf16>, vector<32x64xbf16>, vector<10x32xf32> -> vector<10x32xf32>
    %125 = arith.addf %110, %124 : vector<10x32xf32>
    %c0_58 = arith.constant 0 : index
    %c0_59 = arith.constant 0 : index
    %c0_60 = arith.constant 0 : index
    %126 = vector.load %arg12[%c0_58, %c0_59, %c0_60] : memref<2x1x32xf32, #tpu.memory_space<vmem>>, vector<1x1x32xf32>
    %127 = vector.shape_cast %126 : vector<1x1x32xf32> to vector<1x32xf32>
    %128 = vector.broadcast %127 : vector<1x32xf32> to vector<10x32xf32>
    %129 = arith.addf %125, %128 : vector<10x32xf32>
    %c0_61 = arith.constant 0 : index
    %c0_62 = arith.constant 0 : index
    %c0_63 = arith.constant 0 : index
    %130 = vector.load %arg13[%c0_61, %c0_62, %c0_63] : memref<2x1x32xf32, #tpu.memory_space<vmem>>, vector<1x1x32xf32>
    %131 = vector.shape_cast %130 : vector<1x1x32xf32> to vector<1x32xf32>
    %c0_64 = arith.constant 0 : index
    %c0_65 = arith.constant 0 : index
    %c0_66 = arith.constant 0 : index
    %132 = vector.load %arg14[%c0_64, %c0_65, %c0_66] : memref<2x1x32xf32, #tpu.memory_space<vmem>>, vector<1x1x32xf32>
    %133 = vector.shape_cast %132 : vector<1x1x32xf32> to vector<1x32xf32>
    %cst_67 = arith.constant dense<0.000000e+00> : vector<10xf32>
    %134 = vector.multi_reduction <add>, %129, %cst_67 [1] : vector<10x32xf32> to vector<10xf32>
    %135 = vector.shape_cast %134 : vector<10xf32> to vector<10x1xf32>
    %cst_68 = arith.constant 3.200000e+01 : f32
    %136 = vector.broadcast %cst_68 : f32 to vector<10x1xf32>
    %137 = arith.divf %135, %136 : vector<10x1xf32>
    %138 = vector.broadcast %137 : vector<10x1xf32> to vector<10x32xf32>
    %139 = arith.subf %129, %138 : vector<10x32xf32>
    %140 = arith.mulf %139, %139 : vector<10x32xf32>
    %cst_69 = arith.constant dense<0.000000e+00> : vector<10xf32>
    %141 = vector.multi_reduction <add>, %140, %cst_69 [1] : vector<10x32xf32> to vector<10xf32>
    %142 = vector.shape_cast %141 : vector<10xf32> to vector<10x1xf32>
    %cst_70 = arith.constant 3.200000e+01 : f32
    %143 = vector.broadcast %cst_70 : f32 to vector<10x1xf32>
    %144 = arith.divf %142, %143 : vector<10x1xf32>
    %cst_71 = arith.constant 9.99999974E-6 : f32
    %145 = vector.broadcast %cst_71 : f32 to vector<10x1xf32>
    %146 = arith.addf %144, %145 : vector<10x1xf32>
    %147 = math.rsqrt %146 : vector<10x1xf32>
    %148 = vector.broadcast %147 : vector<10x1xf32> to vector<10x32xf32>
    %149 = arith.mulf %139, %148 : vector<10x32xf32>
    %150 = vector.broadcast %131 : vector<1x32xf32> to vector<10x32xf32>
    %151 = arith.mulf %149, %150 : vector<10x32xf32>
    %152 = vector.broadcast %133 : vector<1x32xf32> to vector<10x32xf32>
    %153 = arith.addf %151, %152 : vector<10x32xf32>
    %c1 = arith.constant 1 : index
    %c0_72 = arith.constant 0 : index
    %c0_73 = arith.constant 0 : index
    %154 = vector.load %arg3[%c1, %c0_72, %c0_73] : memref<2x96x32xbf16, #tpu.memory_space<vmem>>, vector<1x96x32xbf16>
    %155 = vector.shape_cast %154 : vector<1x96x32xbf16> to vector<96x32xbf16>
    %156 = arith.truncf %153 : vector<10x32xf32> to vector<10x32xbf16>
    %cst_74 = arith.constant dense<0.000000e+00> : vector<10x96xf32>
    %157 = tpu.matmul %156, %155, %cst_74 {dimension_numbers = #tpu.dot_dimension_numbers<[1], [1], [0], [0], [0, 0, 1, 0], [], []>} : vector<10x32xbf16>, vector<96x32xbf16>, vector<10x96xf32> -> vector<10x96xf32>
    %c1_75 = arith.constant 1 : index
    %c0_76 = arith.constant 0 : index
    %c0_77 = arith.constant 0 : index
    %158 = vector.load %arg4[%c1_75, %c0_76, %c0_77] : memref<2x1x96xf32, #tpu.memory_space<vmem>>, vector<1x1x96xf32>
    %159 = vector.shape_cast %158 : vector<1x1x96xf32> to vector<1x96xf32>
    %160 = vector.broadcast %159 : vector<1x96xf32> to vector<10x96xf32>
    %161 = arith.addf %157, %160 : vector<10x96xf32>
    %162 = vector.extract_strided_slice %161 {offsets = [0, 0], sizes = [10, 32], strides = [1, 1]} : vector<10x96xf32> to vector<10x32xf32>
    %163 = vector.extract_strided_slice %161 {offsets = [0, 32], sizes = [10, 32], strides = [1, 1]} : vector<10x96xf32> to vector<10x32xf32>
    %164 = vector.extract_strided_slice %161 {offsets = [0, 64], sizes = [10, 32], strides = [1, 1]} : vector<10x96xf32> to vector<10x32xf32>
    %165 = vector.extract_strided_slice %162 {offsets = [0, 0], sizes = [10, 8], strides = [1, 1]} : vector<10x32xf32> to vector<10x8xf32>
    %166 = vector.extract_strided_slice %163 {offsets = [0, 0], sizes = [10, 8], strides = [1, 1]} : vector<10x32xf32> to vector<10x8xf32>
    %167 = vector.extract_strided_slice %164 {offsets = [0, 0], sizes = [10, 8], strides = [1, 1]} : vector<10x32xf32> to vector<10x8xf32>
    %cst_78 = arith.constant dense<0.000000e+00> : vector<10x10xf32>
    %168 = tpu.matmul %165, %166, %cst_78 {dimension_numbers = #tpu.dot_dimension_numbers<[1], [1], [0], [0], [0, 0, 1, 0], [], []>} : vector<10x8xf32>, vector<10x8xf32>, vector<10x10xf32> -> vector<10x10xf32>
    %cst_79 = arith.constant 0.353553385 : f32
    %169 = vector.broadcast %cst_79 : f32 to vector<10x10xf32>
    %170 = arith.mulf %168, %169 : vector<10x10xf32>
    %cst_80 = arith.constant dense<0xFF800000> : vector<10xf32>
    %171 = vector.multi_reduction <maximumf>, %170, %cst_80 [1] : vector<10x10xf32> to vector<10xf32>
    %172 = vector.shape_cast %171 : vector<10xf32> to vector<10x1xf32>
    %173 = vector.broadcast %172 : vector<10x1xf32> to vector<10x10xf32>
    %174 = arith.subf %170, %173 : vector<10x10xf32>
    %175 = math.exp %174 : vector<10x10xf32>
    %cst_81 = arith.constant dense<0.000000e+00> : vector<10xf32>
    %176 = vector.multi_reduction <add>, %175, %cst_81 [1] : vector<10x10xf32> to vector<10xf32>
    %177 = vector.shape_cast %176 : vector<10xf32> to vector<10x1xf32>
    %178 = vector.broadcast %177 : vector<10x1xf32> to vector<10x10xf32>
    %179 = arith.divf %175, %178 : vector<10x10xf32>
    %cst_82 = arith.constant dense<0.000000e+00> : vector<10x8xf32>
    %180 = tpu.matmul %179, %167, %cst_82 {dimension_numbers = #tpu.dot_dimension_numbers<[1], [0], [0], [1], [0, 0, 1, 1], [], []>} : vector<10x10xf32>, vector<10x8xf32>, vector<10x8xf32> -> vector<10x8xf32>
    %181 = vector.extract_strided_slice %162 {offsets = [0, 8], sizes = [10, 8], strides = [1, 1]} : vector<10x32xf32> to vector<10x8xf32>
    %182 = vector.extract_strided_slice %163 {offsets = [0, 8], sizes = [10, 8], strides = [1, 1]} : vector<10x32xf32> to vector<10x8xf32>
    %183 = vector.extract_strided_slice %164 {offsets = [0, 8], sizes = [10, 8], strides = [1, 1]} : vector<10x32xf32> to vector<10x8xf32>
    %cst_83 = arith.constant dense<0.000000e+00> : vector<10x10xf32>
    %184 = tpu.matmul %181, %182, %cst_83 {dimension_numbers = #tpu.dot_dimension_numbers<[1], [1], [0], [0], [0, 0, 1, 0], [], []>} : vector<10x8xf32>, vector<10x8xf32>, vector<10x10xf32> -> vector<10x10xf32>
    %cst_84 = arith.constant 0.353553385 : f32
    %185 = vector.broadcast %cst_84 : f32 to vector<10x10xf32>
    %186 = arith.mulf %184, %185 : vector<10x10xf32>
    %cst_85 = arith.constant dense<0xFF800000> : vector<10xf32>
    %187 = vector.multi_reduction <maximumf>, %186, %cst_85 [1] : vector<10x10xf32> to vector<10xf32>
    %188 = vector.shape_cast %187 : vector<10xf32> to vector<10x1xf32>
    %189 = vector.broadcast %188 : vector<10x1xf32> to vector<10x10xf32>
    %190 = arith.subf %186, %189 : vector<10x10xf32>
    %191 = math.exp %190 : vector<10x10xf32>
    %cst_86 = arith.constant dense<0.000000e+00> : vector<10xf32>
    %192 = vector.multi_reduction <add>, %191, %cst_86 [1] : vector<10x10xf32> to vector<10xf32>
    %193 = vector.shape_cast %192 : vector<10xf32> to vector<10x1xf32>
    %194 = vector.broadcast %193 : vector<10x1xf32> to vector<10x10xf32>
    %195 = arith.divf %191, %194 : vector<10x10xf32>
    %cst_87 = arith.constant dense<0.000000e+00> : vector<10x8xf32>
    %196 = tpu.matmul %195, %183, %cst_87 {dimension_numbers = #tpu.dot_dimension_numbers<[1], [0], [0], [1], [0, 0, 1, 1], [], []>} : vector<10x10xf32>, vector<10x8xf32>, vector<10x8xf32> -> vector<10x8xf32>
    %197 = vector.extract_strided_slice %162 {offsets = [0, 16], sizes = [10, 8], strides = [1, 1]} : vector<10x32xf32> to vector<10x8xf32>
    %198 = vector.extract_strided_slice %163 {offsets = [0, 16], sizes = [10, 8], strides = [1, 1]} : vector<10x32xf32> to vector<10x8xf32>
    %199 = vector.extract_strided_slice %164 {offsets = [0, 16], sizes = [10, 8], strides = [1, 1]} : vector<10x32xf32> to vector<10x8xf32>
    %cst_88 = arith.constant dense<0.000000e+00> : vector<10x10xf32>
    %200 = tpu.matmul %197, %198, %cst_88 {dimension_numbers = #tpu.dot_dimension_numbers<[1], [1], [0], [0], [0, 0, 1, 0], [], []>} : vector<10x8xf32>, vector<10x8xf32>, vector<10x10xf32> -> vector<10x10xf32>
    %cst_89 = arith.constant 0.353553385 : f32
    %201 = vector.broadcast %cst_89 : f32 to vector<10x10xf32>
    %202 = arith.mulf %200, %201 : vector<10x10xf32>
    %cst_90 = arith.constant dense<0xFF800000> : vector<10xf32>
    %203 = vector.multi_reduction <maximumf>, %202, %cst_90 [1] : vector<10x10xf32> to vector<10xf32>
    %204 = vector.shape_cast %203 : vector<10xf32> to vector<10x1xf32>
    %205 = vector.broadcast %204 : vector<10x1xf32> to vector<10x10xf32>
    %206 = arith.subf %202, %205 : vector<10x10xf32>
    %207 = math.exp %206 : vector<10x10xf32>
    %cst_91 = arith.constant dense<0.000000e+00> : vector<10xf32>
    %208 = vector.multi_reduction <add>, %207, %cst_91 [1] : vector<10x10xf32> to vector<10xf32>
    %209 = vector.shape_cast %208 : vector<10xf32> to vector<10x1xf32>
    %210 = vector.broadcast %209 : vector<10x1xf32> to vector<10x10xf32>
    %211 = arith.divf %207, %210 : vector<10x10xf32>
    %cst_92 = arith.constant dense<0.000000e+00> : vector<10x8xf32>
    %212 = tpu.matmul %211, %199, %cst_92 {dimension_numbers = #tpu.dot_dimension_numbers<[1], [0], [0], [1], [0, 0, 1, 1], [], []>} : vector<10x10xf32>, vector<10x8xf32>, vector<10x8xf32> -> vector<10x8xf32>
    %213 = vector.extract_strided_slice %162 {offsets = [0, 24], sizes = [10, 8], strides = [1, 1]} : vector<10x32xf32> to vector<10x8xf32>
    %214 = vector.extract_strided_slice %163 {offsets = [0, 24], sizes = [10, 8], strides = [1, 1]} : vector<10x32xf32> to vector<10x8xf32>
    %215 = vector.extract_strided_slice %164 {offsets = [0, 24], sizes = [10, 8], strides = [1, 1]} : vector<10x32xf32> to vector<10x8xf32>
    %cst_93 = arith.constant dense<0.000000e+00> : vector<10x10xf32>
    %216 = tpu.matmul %213, %214, %cst_93 {dimension_numbers = #tpu.dot_dimension_numbers<[1], [1], [0], [0], [0, 0, 1, 0], [], []>} : vector<10x8xf32>, vector<10x8xf32>, vector<10x10xf32> -> vector<10x10xf32>
    %cst_94 = arith.constant 0.353553385 : f32
    %217 = vector.broadcast %cst_94 : f32 to vector<10x10xf32>
    %218 = arith.mulf %216, %217 : vector<10x10xf32>
    %cst_95 = arith.constant dense<0xFF800000> : vector<10xf32>
    %219 = vector.multi_reduction <maximumf>, %218, %cst_95 [1] : vector<10x10xf32> to vector<10xf32>
    %220 = vector.shape_cast %219 : vector<10xf32> to vector<10x1xf32>
    %221 = vector.broadcast %220 : vector<10x1xf32> to vector<10x10xf32>
    %222 = arith.subf %218, %221 : vector<10x10xf32>
    %223 = math.exp %222 : vector<10x10xf32>
    %cst_96 = arith.constant dense<0.000000e+00> : vector<10xf32>
    %224 = vector.multi_reduction <add>, %223, %cst_96 [1] : vector<10x10xf32> to vector<10xf32>
    %225 = vector.shape_cast %224 : vector<10xf32> to vector<10x1xf32>
    %226 = vector.broadcast %225 : vector<10x1xf32> to vector<10x10xf32>
    %227 = arith.divf %223, %226 : vector<10x10xf32>
    %cst_97 = arith.constant dense<0.000000e+00> : vector<10x8xf32>
    %228 = tpu.matmul %227, %215, %cst_97 {dimension_numbers = #tpu.dot_dimension_numbers<[1], [0], [0], [1], [0, 0, 1, 1], [], []>} : vector<10x10xf32>, vector<10x8xf32>, vector<10x8xf32> -> vector<10x8xf32>
    %229 = tpu.concatenate %180, %196, %212, %228 in 1 : vector<10x8xf32>, vector<10x8xf32>, vector<10x8xf32>, vector<10x8xf32> -> vector<10x32xf32>
    %c1_98 = arith.constant 1 : index
    %c0_99 = arith.constant 0 : index
    %c0_100 = arith.constant 0 : index
    %230 = vector.load %arg5[%c1_98, %c0_99, %c0_100] : memref<2x32x32xbf16, #tpu.memory_space<vmem>>, vector<1x32x32xbf16>
    %231 = vector.shape_cast %230 : vector<1x32x32xbf16> to vector<32x32xbf16>
    %232 = arith.truncf %229 : vector<10x32xf32> to vector<10x32xbf16>
    %cst_101 = arith.constant dense<0.000000e+00> : vector<10x32xf32>
    %233 = tpu.matmul %232, %231, %cst_101 {dimension_numbers = #tpu.dot_dimension_numbers<[1], [1], [0], [0], [0, 0, 1, 0], [], []>} : vector<10x32xbf16>, vector<32x32xbf16>, vector<10x32xf32> -> vector<10x32xf32>
    %234 = arith.addf %153, %233 : vector<10x32xf32>
    %c1_102 = arith.constant 1 : index
    %c0_103 = arith.constant 0 : index
    %c0_104 = arith.constant 0 : index
    %235 = vector.load %arg6[%c1_102, %c0_103, %c0_104] : memref<2x1x32xf32, #tpu.memory_space<vmem>>, vector<1x1x32xf32>
    %236 = vector.shape_cast %235 : vector<1x1x32xf32> to vector<1x32xf32>
    %237 = vector.broadcast %236 : vector<1x32xf32> to vector<10x32xf32>
    %238 = arith.addf %234, %237 : vector<10x32xf32>
    %c1_105 = arith.constant 1 : index
    %c0_106 = arith.constant 0 : index
    %c0_107 = arith.constant 0 : index
    %239 = vector.load %arg7[%c1_105, %c0_106, %c0_107] : memref<2x1x32xf32, #tpu.memory_space<vmem>>, vector<1x1x32xf32>
    %240 = vector.shape_cast %239 : vector<1x1x32xf32> to vector<1x32xf32>
    %c1_108 = arith.constant 1 : index
    %c0_109 = arith.constant 0 : index
    %c0_110 = arith.constant 0 : index
    %241 = vector.load %arg8[%c1_108, %c0_109, %c0_110] : memref<2x1x32xf32, #tpu.memory_space<vmem>>, vector<1x1x32xf32>
    %242 = vector.shape_cast %241 : vector<1x1x32xf32> to vector<1x32xf32>
    %cst_111 = arith.constant dense<0.000000e+00> : vector<10xf32>
    %243 = vector.multi_reduction <add>, %238, %cst_111 [1] : vector<10x32xf32> to vector<10xf32>
    %244 = vector.shape_cast %243 : vector<10xf32> to vector<10x1xf32>
    %cst_112 = arith.constant 3.200000e+01 : f32
    %245 = vector.broadcast %cst_112 : f32 to vector<10x1xf32>
    %246 = arith.divf %244, %245 : vector<10x1xf32>
    %247 = vector.broadcast %246 : vector<10x1xf32> to vector<10x32xf32>
    %248 = arith.subf %238, %247 : vector<10x32xf32>
    %249 = arith.mulf %248, %248 : vector<10x32xf32>
    %cst_113 = arith.constant dense<0.000000e+00> : vector<10xf32>
    %250 = vector.multi_reduction <add>, %249, %cst_113 [1] : vector<10x32xf32> to vector<10xf32>
    %251 = vector.shape_cast %250 : vector<10xf32> to vector<10x1xf32>
    %cst_114 = arith.constant 3.200000e+01 : f32
    %252 = vector.broadcast %cst_114 : f32 to vector<10x1xf32>
    %253 = arith.divf %251, %252 : vector<10x1xf32>
    %cst_115 = arith.constant 9.99999974E-6 : f32
    %254 = vector.broadcast %cst_115 : f32 to vector<10x1xf32>
    %255 = arith.addf %253, %254 : vector<10x1xf32>
    %256 = math.rsqrt %255 : vector<10x1xf32>
    %257 = vector.broadcast %256 : vector<10x1xf32> to vector<10x32xf32>
    %258 = arith.mulf %248, %257 : vector<10x32xf32>
    %259 = vector.broadcast %240 : vector<1x32xf32> to vector<10x32xf32>
    %260 = arith.mulf %258, %259 : vector<10x32xf32>
    %261 = vector.broadcast %242 : vector<1x32xf32> to vector<10x32xf32>
    %262 = arith.addf %260, %261 : vector<10x32xf32>
    %c1_116 = arith.constant 1 : index
    %c0_117 = arith.constant 0 : index
    %c0_118 = arith.constant 0 : index
    %263 = vector.load %arg9[%c1_116, %c0_117, %c0_118] : memref<2x64x32xbf16, #tpu.memory_space<vmem>>, vector<1x64x32xbf16>
    %264 = vector.shape_cast %263 : vector<1x64x32xbf16> to vector<64x32xbf16>
    %265 = arith.truncf %262 : vector<10x32xf32> to vector<10x32xbf16>
    %cst_119 = arith.constant dense<0.000000e+00> : vector<10x64xf32>
    %266 = tpu.matmul %265, %264, %cst_119 {dimension_numbers = #tpu.dot_dimension_numbers<[1], [1], [0], [0], [0, 0, 1, 0], [], []>} : vector<10x32xbf16>, vector<64x32xbf16>, vector<10x64xf32> -> vector<10x64xf32>
    %c1_120 = arith.constant 1 : index
    %c0_121 = arith.constant 0 : index
    %c0_122 = arith.constant 0 : index
    %267 = vector.load %arg10[%c1_120, %c0_121, %c0_122] : memref<2x1x64xf32, #tpu.memory_space<vmem>>, vector<1x1x64xf32>
    %268 = vector.shape_cast %267 : vector<1x1x64xf32> to vector<1x64xf32>
    %269 = vector.broadcast %268 : vector<1x64xf32> to vector<10x64xf32>
    %270 = arith.addf %266, %269 : vector<10x64xf32>
    %cst_123 = arith.constant 0.000000e+00 : f32
    %271 = vector.broadcast %cst_123 : f32 to vector<10x64xf32>
    %272 = arith.maximumf %270, %271 : vector<10x64xf32>
    %c1_124 = arith.constant 1 : index
    %c0_125 = arith.constant 0 : index
    %c0_126 = arith.constant 0 : index
    %273 = vector.load %arg11[%c1_124, %c0_125, %c0_126] : memref<2x32x64xbf16, #tpu.memory_space<vmem>>, vector<1x32x64xbf16>
    %274 = vector.shape_cast %273 : vector<1x32x64xbf16> to vector<32x64xbf16>
    %275 = arith.truncf %272 : vector<10x64xf32> to vector<10x64xbf16>
    %cst_127 = arith.constant dense<0.000000e+00> : vector<10x32xf32>
    %276 = tpu.matmul %275, %274, %cst_127 {dimension_numbers = #tpu.dot_dimension_numbers<[1], [1], [0], [0], [0, 0, 1, 0], [], []>} : vector<10x64xbf16>, vector<32x64xbf16>, vector<10x32xf32> -> vector<10x32xf32>
    %277 = arith.addf %262, %276 : vector<10x32xf32>
    %c1_128 = arith.constant 1 : index
    %c0_129 = arith.constant 0 : index
    %c0_130 = arith.constant 0 : index
    %278 = vector.load %arg12[%c1_128, %c0_129, %c0_130] : memref<2x1x32xf32, #tpu.memory_space<vmem>>, vector<1x1x32xf32>
    %279 = vector.shape_cast %278 : vector<1x1x32xf32> to vector<1x32xf32>
    %280 = vector.broadcast %279 : vector<1x32xf32> to vector<10x32xf32>
    %281 = arith.addf %277, %280 : vector<10x32xf32>
    %c1_131 = arith.constant 1 : index
    %c0_132 = arith.constant 0 : index
    %c0_133 = arith.constant 0 : index
    %282 = vector.load %arg13[%c1_131, %c0_132, %c0_133] : memref<2x1x32xf32, #tpu.memory_space<vmem>>, vector<1x1x32xf32>
    %283 = vector.shape_cast %282 : vector<1x1x32xf32> to vector<1x32xf32>
    %c1_134 = arith.constant 1 : index
    %c0_135 = arith.constant 0 : index
    %c0_136 = arith.constant 0 : index
    %284 = vector.load %arg14[%c1_134, %c0_135, %c0_136] : memref<2x1x32xf32, #tpu.memory_space<vmem>>, vector<1x1x32xf32>
    %285 = vector.shape_cast %284 : vector<1x1x32xf32> to vector<1x32xf32>
    %cst_137 = arith.constant dense<0.000000e+00> : vector<10xf32>
    %286 = vector.multi_reduction <add>, %281, %cst_137 [1] : vector<10x32xf32> to vector<10xf32>
    %287 = vector.shape_cast %286 : vector<10xf32> to vector<10x1xf32>
    %cst_138 = arith.constant 3.200000e+01 : f32
    %288 = vector.broadcast %cst_138 : f32 to vector<10x1xf32>
    %289 = arith.divf %287, %288 : vector<10x1xf32>
    %290 = vector.broadcast %289 : vector<10x1xf32> to vector<10x32xf32>
    %291 = arith.subf %281, %290 : vector<10x32xf32>
    %292 = arith.mulf %291, %291 : vector<10x32xf32>
    %cst_139 = arith.constant dense<0.000000e+00> : vector<10xf32>
    %293 = vector.multi_reduction <add>, %292, %cst_139 [1] : vector<10x32xf32> to vector<10xf32>
    %294 = vector.shape_cast %293 : vector<10xf32> to vector<10x1xf32>
    %cst_140 = arith.constant 3.200000e+01 : f32
    %295 = vector.broadcast %cst_140 : f32 to vector<10x1xf32>
    %296 = arith.divf %294, %295 : vector<10x1xf32>
    %cst_141 = arith.constant 9.99999974E-6 : f32
    %297 = vector.broadcast %cst_141 : f32 to vector<10x1xf32>
    %298 = arith.addf %296, %297 : vector<10x1xf32>
    %299 = math.rsqrt %298 : vector<10x1xf32>
    %300 = vector.broadcast %299 : vector<10x1xf32> to vector<10x32xf32>
    %301 = arith.mulf %291, %300 : vector<10x32xf32>
    %302 = vector.broadcast %283 : vector<1x32xf32> to vector<10x32xf32>
    %303 = arith.mulf %301, %302 : vector<10x32xf32>
    %304 = vector.broadcast %285 : vector<1x32xf32> to vector<10x32xf32>
    %305 = arith.addf %303, %304 : vector<10x32xf32>
    %c0_142 = arith.constant 0 : index
    %c0_143 = arith.constant 0 : index
    %306 = vector.load %arg15[%c0_142, %c0_143] : memref<1x32xf32, #tpu.memory_space<vmem>>, vector<1x32xf32>
    %c0_144 = arith.constant 0 : index
    %c0_145 = arith.constant 0 : index
    %307 = vector.load %arg16[%c0_144, %c0_145] : memref<1x32xf32, #tpu.memory_space<vmem>>, vector<1x32xf32>
    %cst_146 = arith.constant dense<0.000000e+00> : vector<10xf32>
    %308 = vector.multi_reduction <add>, %305, %cst_146 [1] : vector<10x32xf32> to vector<10xf32>
    %309 = vector.shape_cast %308 : vector<10xf32> to vector<10x1xf32>
    %cst_147 = arith.constant 3.200000e+01 : f32
    %310 = vector.broadcast %cst_147 : f32 to vector<10x1xf32>
    %311 = arith.divf %309, %310 : vector<10x1xf32>
    %312 = vector.broadcast %311 : vector<10x1xf32> to vector<10x32xf32>
    %313 = arith.subf %305, %312 : vector<10x32xf32>
    %314 = arith.mulf %313, %313 : vector<10x32xf32>
    %cst_148 = arith.constant dense<0.000000e+00> : vector<10xf32>
    %315 = vector.multi_reduction <add>, %314, %cst_148 [1] : vector<10x32xf32> to vector<10xf32>
    %316 = vector.shape_cast %315 : vector<10xf32> to vector<10x1xf32>
    %cst_149 = arith.constant 3.200000e+01 : f32
    %317 = vector.broadcast %cst_149 : f32 to vector<10x1xf32>
    %318 = arith.divf %316, %317 : vector<10x1xf32>
    %cst_150 = arith.constant 9.99999974E-6 : f32
    %319 = vector.broadcast %cst_150 : f32 to vector<10x1xf32>
    %320 = arith.addf %318, %319 : vector<10x1xf32>
    %321 = math.rsqrt %320 : vector<10x1xf32>
    %322 = vector.broadcast %321 : vector<10x1xf32> to vector<10x32xf32>
    %323 = arith.mulf %313, %322 : vector<10x32xf32>
    %324 = vector.broadcast %306 : vector<1x32xf32> to vector<10x32xf32>
    %325 = arith.mulf %323, %324 : vector<10x32xf32>
    %326 = vector.broadcast %307 : vector<1x32xf32> to vector<10x32xf32>
    %327 = arith.addf %325, %326 : vector<10x32xf32>
    %c0_151 = arith.constant 0 : index
    %c0_152 = arith.constant 0 : index
    %c0_153 = arith.constant 0 : index
    %328 = vector.load %arg2[%c0_151, %c0_152, %c0_153] : memref<1x8x32xf32, #tpu.memory_space<vmem>>, vector<1x8x32xf32>
    %329 = vector.shape_cast %328 : vector<1x8x32xf32> to vector<8x32xf32>
    %c0_154 = arith.constant 0 : index
    %c0_155 = arith.constant 0 : index
    %c0_156 = arith.constant 0 : index
    %330 = vector.load %arg17[%c0_154, %c0_155, %c0_156] : memref<2x96x32xbf16, #tpu.memory_space<vmem>>, vector<1x96x32xbf16>
    %331 = vector.shape_cast %330 : vector<1x96x32xbf16> to vector<96x32xbf16>
    %332 = arith.truncf %329 : vector<8x32xf32> to vector<8x32xbf16>
    %cst_157 = arith.constant dense<0.000000e+00> : vector<8x96xf32>
    %333 = tpu.matmul %332, %331, %cst_157 {dimension_numbers = #tpu.dot_dimension_numbers<[1], [1], [0], [0], [0, 0, 1, 0], [], []>} : vector<8x32xbf16>, vector<96x32xbf16>, vector<8x96xf32> -> vector<8x96xf32>
    %c0_158 = arith.constant 0 : index
    %c0_159 = arith.constant 0 : index
    %c0_160 = arith.constant 0 : index
    %334 = vector.load %arg18[%c0_158, %c0_159, %c0_160] : memref<2x1x96xf32, #tpu.memory_space<vmem>>, vector<1x1x96xf32>
    %335 = vector.shape_cast %334 : vector<1x1x96xf32> to vector<1x96xf32>
    %336 = vector.broadcast %335 : vector<1x96xf32> to vector<8x96xf32>
    %337 = arith.addf %333, %336 : vector<8x96xf32>
    %338 = vector.extract_strided_slice %337 {offsets = [0, 0], sizes = [8, 32], strides = [1, 1]} : vector<8x96xf32> to vector<8x32xf32>
    %339 = vector.extract_strided_slice %337 {offsets = [0, 32], sizes = [8, 32], strides = [1, 1]} : vector<8x96xf32> to vector<8x32xf32>
    %340 = vector.extract_strided_slice %337 {offsets = [0, 64], sizes = [8, 32], strides = [1, 1]} : vector<8x96xf32> to vector<8x32xf32>
    %341 = vector.extract_strided_slice %338 {offsets = [0, 0], sizes = [8, 8], strides = [1, 1]} : vector<8x32xf32> to vector<8x8xf32>
    %342 = vector.extract_strided_slice %339 {offsets = [0, 0], sizes = [8, 8], strides = [1, 1]} : vector<8x32xf32> to vector<8x8xf32>
    %343 = vector.extract_strided_slice %340 {offsets = [0, 0], sizes = [8, 8], strides = [1, 1]} : vector<8x32xf32> to vector<8x8xf32>
    %cst_161 = arith.constant dense<0.000000e+00> : vector<8x8xf32>
    %344 = tpu.matmul %341, %342, %cst_161 {dimension_numbers = #tpu.dot_dimension_numbers<[1], [1], [0], [0], [0, 0, 1, 0], [], []>} : vector<8x8xf32>, vector<8x8xf32>, vector<8x8xf32> -> vector<8x8xf32>
    %cst_162 = arith.constant 0.353553385 : f32
    %345 = vector.broadcast %cst_162 : f32 to vector<8x8xf32>
    %346 = arith.mulf %344, %345 : vector<8x8xf32>
    %cst_163 = arith.constant dense<0xFF800000> : vector<8xf32>
    %347 = vector.multi_reduction <maximumf>, %346, %cst_163 [1] : vector<8x8xf32> to vector<8xf32>
    %348 = vector.shape_cast %347 : vector<8xf32> to vector<8x1xf32>
    %349 = vector.broadcast %348 : vector<8x1xf32> to vector<8x8xf32>
    %350 = arith.subf %346, %349 : vector<8x8xf32>
    %351 = math.exp %350 : vector<8x8xf32>
    %cst_164 = arith.constant dense<0.000000e+00> : vector<8xf32>
    %352 = vector.multi_reduction <add>, %351, %cst_164 [1] : vector<8x8xf32> to vector<8xf32>
    %353 = vector.shape_cast %352 : vector<8xf32> to vector<8x1xf32>
    %354 = vector.broadcast %353 : vector<8x1xf32> to vector<8x8xf32>
    %355 = arith.divf %351, %354 : vector<8x8xf32>
    %cst_165 = arith.constant dense<0.000000e+00> : vector<8x8xf32>
    %356 = tpu.matmul %355, %343, %cst_165 {dimension_numbers = #tpu.dot_dimension_numbers<[1], [0], [0], [1], [0, 0, 1, 1], [], []>} : vector<8x8xf32>, vector<8x8xf32>, vector<8x8xf32> -> vector<8x8xf32>
    %357 = vector.extract_strided_slice %338 {offsets = [0, 8], sizes = [8, 8], strides = [1, 1]} : vector<8x32xf32> to vector<8x8xf32>
    %358 = vector.extract_strided_slice %339 {offsets = [0, 8], sizes = [8, 8], strides = [1, 1]} : vector<8x32xf32> to vector<8x8xf32>
    %359 = vector.extract_strided_slice %340 {offsets = [0, 8], sizes = [8, 8], strides = [1, 1]} : vector<8x32xf32> to vector<8x8xf32>
    %cst_166 = arith.constant dense<0.000000e+00> : vector<8x8xf32>
    %360 = tpu.matmul %357, %358, %cst_166 {dimension_numbers = #tpu.dot_dimension_numbers<[1], [1], [0], [0], [0, 0, 1, 0], [], []>} : vector<8x8xf32>, vector<8x8xf32>, vector<8x8xf32> -> vector<8x8xf32>
    %cst_167 = arith.constant 0.353553385 : f32
    %361 = vector.broadcast %cst_167 : f32 to vector<8x8xf32>
    %362 = arith.mulf %360, %361 : vector<8x8xf32>
    %cst_168 = arith.constant dense<0xFF800000> : vector<8xf32>
    %363 = vector.multi_reduction <maximumf>, %362, %cst_168 [1] : vector<8x8xf32> to vector<8xf32>
    %364 = vector.shape_cast %363 : vector<8xf32> to vector<8x1xf32>
    %365 = vector.broadcast %364 : vector<8x1xf32> to vector<8x8xf32>
    %366 = arith.subf %362, %365 : vector<8x8xf32>
    %367 = math.exp %366 : vector<8x8xf32>
    %cst_169 = arith.constant dense<0.000000e+00> : vector<8xf32>
    %368 = vector.multi_reduction <add>, %367, %cst_169 [1] : vector<8x8xf32> to vector<8xf32>
    %369 = vector.shape_cast %368 : vector<8xf32> to vector<8x1xf32>
    %370 = vector.broadcast %369 : vector<8x1xf32> to vector<8x8xf32>
    %371 = arith.divf %367, %370 : vector<8x8xf32>
    %cst_170 = arith.constant dense<0.000000e+00> : vector<8x8xf32>
    %372 = tpu.matmul %371, %359, %cst_170 {dimension_numbers = #tpu.dot_dimension_numbers<[1], [0], [0], [1], [0, 0, 1, 1], [], []>} : vector<8x8xf32>, vector<8x8xf32>, vector<8x8xf32> -> vector<8x8xf32>
    %373 = vector.extract_strided_slice %338 {offsets = [0, 16], sizes = [8, 8], strides = [1, 1]} : vector<8x32xf32> to vector<8x8xf32>
    %374 = vector.extract_strided_slice %339 {offsets = [0, 16], sizes = [8, 8], strides = [1, 1]} : vector<8x32xf32> to vector<8x8xf32>
    %375 = vector.extract_strided_slice %340 {offsets = [0, 16], sizes = [8, 8], strides = [1, 1]} : vector<8x32xf32> to vector<8x8xf32>
    %cst_171 = arith.constant dense<0.000000e+00> : vector<8x8xf32>
    %376 = tpu.matmul %373, %374, %cst_171 {dimension_numbers = #tpu.dot_dimension_numbers<[1], [1], [0], [0], [0, 0, 1, 0], [], []>} : vector<8x8xf32>, vector<8x8xf32>, vector<8x8xf32> -> vector<8x8xf32>
    %cst_172 = arith.constant 0.353553385 : f32
    %377 = vector.broadcast %cst_172 : f32 to vector<8x8xf32>
    %378 = arith.mulf %376, %377 : vector<8x8xf32>
    %cst_173 = arith.constant dense<0xFF800000> : vector<8xf32>
    %379 = vector.multi_reduction <maximumf>, %378, %cst_173 [1] : vector<8x8xf32> to vector<8xf32>
    %380 = vector.shape_cast %379 : vector<8xf32> to vector<8x1xf32>
    %381 = vector.broadcast %380 : vector<8x1xf32> to vector<8x8xf32>
    %382 = arith.subf %378, %381 : vector<8x8xf32>
    %383 = math.exp %382 : vector<8x8xf32>
    %cst_174 = arith.constant dense<0.000000e+00> : vector<8xf32>
    %384 = vector.multi_reduction <add>, %383, %cst_174 [1] : vector<8x8xf32> to vector<8xf32>
    %385 = vector.shape_cast %384 : vector<8xf32> to vector<8x1xf32>
    %386 = vector.broadcast %385 : vector<8x1xf32> to vector<8x8xf32>
    %387 = arith.divf %383, %386 : vector<8x8xf32>
    %cst_175 = arith.constant dense<0.000000e+00> : vector<8x8xf32>
    %388 = tpu.matmul %387, %375, %cst_175 {dimension_numbers = #tpu.dot_dimension_numbers<[1], [0], [0], [1], [0, 0, 1, 1], [], []>} : vector<8x8xf32>, vector<8x8xf32>, vector<8x8xf32> -> vector<8x8xf32>
    %389 = vector.extract_strided_slice %338 {offsets = [0, 24], sizes = [8, 8], strides = [1, 1]} : vector<8x32xf32> to vector<8x8xf32>
    %390 = vector.extract_strided_slice %339 {offsets = [0, 24], sizes = [8, 8], strides = [1, 1]} : vector<8x32xf32> to vector<8x8xf32>
    %391 = vector.extract_strided_slice %340 {offsets = [0, 24], sizes = [8, 8], strides = [1, 1]} : vector<8x32xf32> to vector<8x8xf32>
    %cst_176 = arith.constant dense<0.000000e+00> : vector<8x8xf32>
    %392 = tpu.matmul %389, %390, %cst_176 {dimension_numbers = #tpu.dot_dimension_numbers<[1], [1], [0], [0], [0, 0, 1, 0], [], []>} : vector<8x8xf32>, vector<8x8xf32>, vector<8x8xf32> -> vector<8x8xf32>
    %cst_177 = arith.constant 0.353553385 : f32
    %393 = vector.broadcast %cst_177 : f32 to vector<8x8xf32>
    %394 = arith.mulf %392, %393 : vector<8x8xf32>
    %cst_178 = arith.constant dense<0xFF800000> : vector<8xf32>
    %395 = vector.multi_reduction <maximumf>, %394, %cst_178 [1] : vector<8x8xf32> to vector<8xf32>
    %396 = vector.shape_cast %395 : vector<8xf32> to vector<8x1xf32>
    %397 = vector.broadcast %396 : vector<8x1xf32> to vector<8x8xf32>
    %398 = arith.subf %394, %397 : vector<8x8xf32>
    %399 = math.exp %398 : vector<8x8xf32>
    %cst_179 = arith.constant dense<0.000000e+00> : vector<8xf32>
    %400 = vector.multi_reduction <add>, %399, %cst_179 [1] : vector<8x8xf32> to vector<8xf32>
    %401 = vector.shape_cast %400 : vector<8xf32> to vector<8x1xf32>
    %402 = vector.broadcast %401 : vector<8x1xf32> to vector<8x8xf32>
    %403 = arith.divf %399, %402 : vector<8x8xf32>
    %cst_180 = arith.constant dense<0.000000e+00> : vector<8x8xf32>
    %404 = tpu.matmul %403, %391, %cst_180 {dimension_numbers = #tpu.dot_dimension_numbers<[1], [0], [0], [1], [0, 0, 1, 1], [], []>} : vector<8x8xf32>, vector<8x8xf32>, vector<8x8xf32> -> vector<8x8xf32>
    %405 = tpu.concatenate %356, %372, %388, %404 in 1 : vector<8x8xf32>, vector<8x8xf32>, vector<8x8xf32>, vector<8x8xf32> -> vector<8x32xf32>
    %c0_181 = arith.constant 0 : index
    %c0_182 = arith.constant 0 : index
    %c0_183 = arith.constant 0 : index
    %406 = vector.load %arg19[%c0_181, %c0_182, %c0_183] : memref<2x32x32xbf16, #tpu.memory_space<vmem>>, vector<1x32x32xbf16>
    %407 = vector.shape_cast %406 : vector<1x32x32xbf16> to vector<32x32xbf16>
    %408 = arith.truncf %405 : vector<8x32xf32> to vector<8x32xbf16>
    %cst_184 = arith.constant dense<0.000000e+00> : vector<8x32xf32>
    %409 = tpu.matmul %408, %407, %cst_184 {dimension_numbers = #tpu.dot_dimension_numbers<[1], [1], [0], [0], [0, 0, 1, 0], [], []>} : vector<8x32xbf16>, vector<32x32xbf16>, vector<8x32xf32> -> vector<8x32xf32>
    %410 = arith.addf %329, %409 : vector<8x32xf32>
    %c0_185 = arith.constant 0 : index
    %c0_186 = arith.constant 0 : index
    %c0_187 = arith.constant 0 : index
    %411 = vector.load %arg20[%c0_185, %c0_186, %c0_187] : memref<2x1x32xf32, #tpu.memory_space<vmem>>, vector<1x1x32xf32>
    %412 = vector.shape_cast %411 : vector<1x1x32xf32> to vector<1x32xf32>
    %413 = vector.broadcast %412 : vector<1x32xf32> to vector<8x32xf32>
    %414 = arith.addf %410, %413 : vector<8x32xf32>
    %c0_188 = arith.constant 0 : index
    %c0_189 = arith.constant 0 : index
    %c0_190 = arith.constant 0 : index
    %415 = vector.load %arg21[%c0_188, %c0_189, %c0_190] : memref<2x1x32xf32, #tpu.memory_space<vmem>>, vector<1x1x32xf32>
    %416 = vector.shape_cast %415 : vector<1x1x32xf32> to vector<1x32xf32>
    %c0_191 = arith.constant 0 : index
    %c0_192 = arith.constant 0 : index
    %c0_193 = arith.constant 0 : index
    %417 = vector.load %arg22[%c0_191, %c0_192, %c0_193] : memref<2x1x32xf32, #tpu.memory_space<vmem>>, vector<1x1x32xf32>
    %418 = vector.shape_cast %417 : vector<1x1x32xf32> to vector<1x32xf32>
    %cst_194 = arith.constant dense<0.000000e+00> : vector<8xf32>
    %419 = vector.multi_reduction <add>, %414, %cst_194 [1] : vector<8x32xf32> to vector<8xf32>
    %420 = vector.shape_cast %419 : vector<8xf32> to vector<8x1xf32>
    %cst_195 = arith.constant 3.200000e+01 : f32
    %421 = vector.broadcast %cst_195 : f32 to vector<8x1xf32>
    %422 = arith.divf %420, %421 : vector<8x1xf32>
    %423 = vector.broadcast %422 : vector<8x1xf32> to vector<8x32xf32>
    %424 = arith.subf %414, %423 : vector<8x32xf32>
    %425 = arith.mulf %424, %424 : vector<8x32xf32>
    %cst_196 = arith.constant dense<0.000000e+00> : vector<8xf32>
    %426 = vector.multi_reduction <add>, %425, %cst_196 [1] : vector<8x32xf32> to vector<8xf32>
    %427 = vector.shape_cast %426 : vector<8xf32> to vector<8x1xf32>
    %cst_197 = arith.constant 3.200000e+01 : f32
    %428 = vector.broadcast %cst_197 : f32 to vector<8x1xf32>
    %429 = arith.divf %427, %428 : vector<8x1xf32>
    %cst_198 = arith.constant 9.99999974E-6 : f32
    %430 = vector.broadcast %cst_198 : f32 to vector<8x1xf32>
    %431 = arith.addf %429, %430 : vector<8x1xf32>
    %432 = math.rsqrt %431 : vector<8x1xf32>
    %433 = vector.broadcast %432 : vector<8x1xf32> to vector<8x32xf32>
    %434 = arith.mulf %424, %433 : vector<8x32xf32>
    %435 = vector.broadcast %416 : vector<1x32xf32> to vector<8x32xf32>
    %436 = arith.mulf %434, %435 : vector<8x32xf32>
    %437 = vector.broadcast %418 : vector<1x32xf32> to vector<8x32xf32>
    %438 = arith.addf %436, %437 : vector<8x32xf32>
    %c0_199 = arith.constant 0 : index
    %c0_200 = arith.constant 0 : index
    %c0_201 = arith.constant 0 : index
    %439 = vector.load %arg23[%c0_199, %c0_200, %c0_201] : memref<2x96x32xbf16, #tpu.memory_space<vmem>>, vector<1x96x32xbf16>
    %440 = vector.shape_cast %439 : vector<1x96x32xbf16> to vector<96x32xbf16>
    %c0_202 = arith.constant 0 : index
    %c0_203 = arith.constant 0 : index
    %c0_204 = arith.constant 0 : index
    %441 = vector.load %arg24[%c0_202, %c0_203, %c0_204] : memref<2x1x96xf32, #tpu.memory_space<vmem>>, vector<1x1x96xf32>
    %442 = vector.shape_cast %441 : vector<1x1x96xf32> to vector<1x96xf32>
    %443 = vector.extract_strided_slice %440 {offsets = [0, 0], sizes = [32, 32], strides = [1, 1]} : vector<96x32xbf16> to vector<32x32xbf16>
    %444 = arith.truncf %438 : vector<8x32xf32> to vector<8x32xbf16>
    %cst_205 = arith.constant dense<0.000000e+00> : vector<8x32xf32>
    %445 = tpu.matmul %444, %443, %cst_205 {dimension_numbers = #tpu.dot_dimension_numbers<[1], [1], [0], [0], [0, 0, 1, 0], [], []>} : vector<8x32xbf16>, vector<32x32xbf16>, vector<8x32xf32> -> vector<8x32xf32>
    %446 = vector.extract_strided_slice %442 {offsets = [0, 0], sizes = [1, 32], strides = [1, 1]} : vector<1x96xf32> to vector<1x32xf32>
    %447 = vector.broadcast %446 : vector<1x32xf32> to vector<8x32xf32>
    %448 = arith.addf %445, %447 : vector<8x32xf32>
    %449 = vector.extract_strided_slice %440 {offsets = [32, 0], sizes = [64, 32], strides = [1, 1]} : vector<96x32xbf16> to vector<64x32xbf16>
    %450 = arith.truncf %327 : vector<10x32xf32> to vector<10x32xbf16>
    %cst_206 = arith.constant dense<0.000000e+00> : vector<10x64xf32>
    %451 = tpu.matmul %450, %449, %cst_206 {dimension_numbers = #tpu.dot_dimension_numbers<[1], [1], [0], [0], [0, 0, 1, 0], [], []>} : vector<10x32xbf16>, vector<64x32xbf16>, vector<10x64xf32> -> vector<10x64xf32>
    %452 = vector.extract_strided_slice %442 {offsets = [0, 32], sizes = [1, 64], strides = [1, 1]} : vector<1x96xf32> to vector<1x64xf32>
    %453 = vector.broadcast %452 : vector<1x64xf32> to vector<10x64xf32>
    %454 = arith.addf %451, %453 : vector<10x64xf32>
    %455 = vector.extract_strided_slice %454 {offsets = [0, 0], sizes = [10, 32], strides = [1, 1]} : vector<10x64xf32> to vector<10x32xf32>
    %456 = vector.extract_strided_slice %454 {offsets = [0, 32], sizes = [10, 32], strides = [1, 1]} : vector<10x64xf32> to vector<10x32xf32>
    %457 = vector.extract_strided_slice %448 {offsets = [0, 0], sizes = [8, 8], strides = [1, 1]} : vector<8x32xf32> to vector<8x8xf32>
    %458 = vector.extract_strided_slice %455 {offsets = [0, 0], sizes = [10, 8], strides = [1, 1]} : vector<10x32xf32> to vector<10x8xf32>
    %459 = vector.extract_strided_slice %456 {offsets = [0, 0], sizes = [10, 8], strides = [1, 1]} : vector<10x32xf32> to vector<10x8xf32>
    %cst_207 = arith.constant dense<0.000000e+00> : vector<8x10xf32>
    %460 = tpu.matmul %457, %458, %cst_207 {dimension_numbers = #tpu.dot_dimension_numbers<[1], [1], [0], [0], [0, 0, 1, 0], [], []>} : vector<8x8xf32>, vector<10x8xf32>, vector<8x10xf32> -> vector<8x10xf32>
    %cst_208 = arith.constant 0.353553385 : f32
    %461 = vector.broadcast %cst_208 : f32 to vector<8x10xf32>
    %462 = arith.mulf %460, %461 : vector<8x10xf32>
    %cst_209 = arith.constant dense<0xFF800000> : vector<8xf32>
    %463 = vector.multi_reduction <maximumf>, %462, %cst_209 [1] : vector<8x10xf32> to vector<8xf32>
    %464 = vector.shape_cast %463 : vector<8xf32> to vector<8x1xf32>
    %465 = vector.broadcast %464 : vector<8x1xf32> to vector<8x10xf32>
    %466 = arith.subf %462, %465 : vector<8x10xf32>
    %467 = math.exp %466 : vector<8x10xf32>
    %cst_210 = arith.constant dense<0.000000e+00> : vector<8xf32>
    %468 = vector.multi_reduction <add>, %467, %cst_210 [1] : vector<8x10xf32> to vector<8xf32>
    %469 = vector.shape_cast %468 : vector<8xf32> to vector<8x1xf32>
    %470 = vector.broadcast %469 : vector<8x1xf32> to vector<8x10xf32>
    %471 = arith.divf %467, %470 : vector<8x10xf32>
    %cst_211 = arith.constant dense<0.000000e+00> : vector<8x8xf32>
    %472 = tpu.matmul %471, %459, %cst_211 {dimension_numbers = #tpu.dot_dimension_numbers<[1], [0], [0], [1], [0, 0, 1, 1], [], []>} : vector<8x10xf32>, vector<10x8xf32>, vector<8x8xf32> -> vector<8x8xf32>
    %473 = vector.extract_strided_slice %448 {offsets = [0, 8], sizes = [8, 8], strides = [1, 1]} : vector<8x32xf32> to vector<8x8xf32>
    %474 = vector.extract_strided_slice %455 {offsets = [0, 8], sizes = [10, 8], strides = [1, 1]} : vector<10x32xf32> to vector<10x8xf32>
    %475 = vector.extract_strided_slice %456 {offsets = [0, 8], sizes = [10, 8], strides = [1, 1]} : vector<10x32xf32> to vector<10x8xf32>
    %cst_212 = arith.constant dense<0.000000e+00> : vector<8x10xf32>
    %476 = tpu.matmul %473, %474, %cst_212 {dimension_numbers = #tpu.dot_dimension_numbers<[1], [1], [0], [0], [0, 0, 1, 0], [], []>} : vector<8x8xf32>, vector<10x8xf32>, vector<8x10xf32> -> vector<8x10xf32>
    %cst_213 = arith.constant 0.353553385 : f32
    %477 = vector.broadcast %cst_213 : f32 to vector<8x10xf32>
    %478 = arith.mulf %476, %477 : vector<8x10xf32>
    %cst_214 = arith.constant dense<0xFF800000> : vector<8xf32>
    %479 = vector.multi_reduction <maximumf>, %478, %cst_214 [1] : vector<8x10xf32> to vector<8xf32>
    %480 = vector.shape_cast %479 : vector<8xf32> to vector<8x1xf32>
    %481 = vector.broadcast %480 : vector<8x1xf32> to vector<8x10xf32>
    %482 = arith.subf %478, %481 : vector<8x10xf32>
    %483 = math.exp %482 : vector<8x10xf32>
    %cst_215 = arith.constant dense<0.000000e+00> : vector<8xf32>
    %484 = vector.multi_reduction <add>, %483, %cst_215 [1] : vector<8x10xf32> to vector<8xf32>
    %485 = vector.shape_cast %484 : vector<8xf32> to vector<8x1xf32>
    %486 = vector.broadcast %485 : vector<8x1xf32> to vector<8x10xf32>
    %487 = arith.divf %483, %486 : vector<8x10xf32>
    %cst_216 = arith.constant dense<0.000000e+00> : vector<8x8xf32>
    %488 = tpu.matmul %487, %475, %cst_216 {dimension_numbers = #tpu.dot_dimension_numbers<[1], [0], [0], [1], [0, 0, 1, 1], [], []>} : vector<8x10xf32>, vector<10x8xf32>, vector<8x8xf32> -> vector<8x8xf32>
    %489 = vector.extract_strided_slice %448 {offsets = [0, 16], sizes = [8, 8], strides = [1, 1]} : vector<8x32xf32> to vector<8x8xf32>
    %490 = vector.extract_strided_slice %455 {offsets = [0, 16], sizes = [10, 8], strides = [1, 1]} : vector<10x32xf32> to vector<10x8xf32>
    %491 = vector.extract_strided_slice %456 {offsets = [0, 16], sizes = [10, 8], strides = [1, 1]} : vector<10x32xf32> to vector<10x8xf32>
    %cst_217 = arith.constant dense<0.000000e+00> : vector<8x10xf32>
    %492 = tpu.matmul %489, %490, %cst_217 {dimension_numbers = #tpu.dot_dimension_numbers<[1], [1], [0], [0], [0, 0, 1, 0], [], []>} : vector<8x8xf32>, vector<10x8xf32>, vector<8x10xf32> -> vector<8x10xf32>
    %cst_218 = arith.constant 0.353553385 : f32
    %493 = vector.broadcast %cst_218 : f32 to vector<8x10xf32>
    %494 = arith.mulf %492, %493 : vector<8x10xf32>
    %cst_219 = arith.constant dense<0xFF800000> : vector<8xf32>
    %495 = vector.multi_reduction <maximumf>, %494, %cst_219 [1] : vector<8x10xf32> to vector<8xf32>
    %496 = vector.shape_cast %495 : vector<8xf32> to vector<8x1xf32>
    %497 = vector.broadcast %496 : vector<8x1xf32> to vector<8x10xf32>
    %498 = arith.subf %494, %497 : vector<8x10xf32>
    %499 = math.exp %498 : vector<8x10xf32>
    %cst_220 = arith.constant dense<0.000000e+00> : vector<8xf32>
    %500 = vector.multi_reduction <add>, %499, %cst_220 [1] : vector<8x10xf32> to vector<8xf32>
    %501 = vector.shape_cast %500 : vector<8xf32> to vector<8x1xf32>
    %502 = vector.broadcast %501 : vector<8x1xf32> to vector<8x10xf32>
    %503 = arith.divf %499, %502 : vector<8x10xf32>
    %cst_221 = arith.constant dense<0.000000e+00> : vector<8x8xf32>
    %504 = tpu.matmul %503, %491, %cst_221 {dimension_numbers = #tpu.dot_dimension_numbers<[1], [0], [0], [1], [0, 0, 1, 1], [], []>} : vector<8x10xf32>, vector<10x8xf32>, vector<8x8xf32> -> vector<8x8xf32>
    %505 = vector.extract_strided_slice %448 {offsets = [0, 24], sizes = [8, 8], strides = [1, 1]} : vector<8x32xf32> to vector<8x8xf32>
    %506 = vector.extract_strided_slice %455 {offsets = [0, 24], sizes = [10, 8], strides = [1, 1]} : vector<10x32xf32> to vector<10x8xf32>
    %507 = vector.extract_strided_slice %456 {offsets = [0, 24], sizes = [10, 8], strides = [1, 1]} : vector<10x32xf32> to vector<10x8xf32>
    %cst_222 = arith.constant dense<0.000000e+00> : vector<8x10xf32>
    %508 = tpu.matmul %505, %506, %cst_222 {dimension_numbers = #tpu.dot_dimension_numbers<[1], [1], [0], [0], [0, 0, 1, 0], [], []>} : vector<8x8xf32>, vector<10x8xf32>, vector<8x10xf32> -> vector<8x10xf32>
    %cst_223 = arith.constant 0.353553385 : f32
    %509 = vector.broadcast %cst_223 : f32 to vector<8x10xf32>
    %510 = arith.mulf %508, %509 : vector<8x10xf32>
    %cst_224 = arith.constant dense<0xFF800000> : vector<8xf32>
    %511 = vector.multi_reduction <maximumf>, %510, %cst_224 [1] : vector<8x10xf32> to vector<8xf32>
    %512 = vector.shape_cast %511 : vector<8xf32> to vector<8x1xf32>
    %513 = vector.broadcast %512 : vector<8x1xf32> to vector<8x10xf32>
    %514 = arith.subf %510, %513 : vector<8x10xf32>
    %515 = math.exp %514 : vector<8x10xf32>
    %cst_225 = arith.constant dense<0.000000e+00> : vector<8xf32>
    %516 = vector.multi_reduction <add>, %515, %cst_225 [1] : vector<8x10xf32> to vector<8xf32>
    %517 = vector.shape_cast %516 : vector<8xf32> to vector<8x1xf32>
    %518 = vector.broadcast %517 : vector<8x1xf32> to vector<8x10xf32>
    %519 = arith.divf %515, %518 : vector<8x10xf32>
    %cst_226 = arith.constant dense<0.000000e+00> : vector<8x8xf32>
    %520 = tpu.matmul %519, %507, %cst_226 {dimension_numbers = #tpu.dot_dimension_numbers<[1], [0], [0], [1], [0, 0, 1, 1], [], []>} : vector<8x10xf32>, vector<10x8xf32>, vector<8x8xf32> -> vector<8x8xf32>
    %521 = tpu.concatenate %472, %488, %504, %520 in 1 : vector<8x8xf32>, vector<8x8xf32>, vector<8x8xf32>, vector<8x8xf32> -> vector<8x32xf32>
    %c0_227 = arith.constant 0 : index
    %c0_228 = arith.constant 0 : index
    %c0_229 = arith.constant 0 : index
    %522 = vector.load %arg25[%c0_227, %c0_228, %c0_229] : memref<2x32x32xbf16, #tpu.memory_space<vmem>>, vector<1x32x32xbf16>
    %523 = vector.shape_cast %522 : vector<1x32x32xbf16> to vector<32x32xbf16>
    %524 = arith.truncf %521 : vector<8x32xf32> to vector<8x32xbf16>
    %cst_230 = arith.constant dense<0.000000e+00> : vector<8x32xf32>
    %525 = tpu.matmul %524, %523, %cst_230 {dimension_numbers = #tpu.dot_dimension_numbers<[1], [1], [0], [0], [0, 0, 1, 0], [], []>} : vector<8x32xbf16>, vector<32x32xbf16>, vector<8x32xf32> -> vector<8x32xf32>
    %526 = arith.addf %438, %525 : vector<8x32xf32>
    %c0_231 = arith.constant 0 : index
    %c0_232 = arith.constant 0 : index
    %c0_233 = arith.constant 0 : index
    %527 = vector.load %arg26[%c0_231, %c0_232, %c0_233] : memref<2x1x32xf32, #tpu.memory_space<vmem>>, vector<1x1x32xf32>
    %528 = vector.shape_cast %527 : vector<1x1x32xf32> to vector<1x32xf32>
    %529 = vector.broadcast %528 : vector<1x32xf32> to vector<8x32xf32>
    %530 = arith.addf %526, %529 : vector<8x32xf32>
    %c0_234 = arith.constant 0 : index
    %c0_235 = arith.constant 0 : index
    %c0_236 = arith.constant 0 : index
    %531 = vector.load %arg27[%c0_234, %c0_235, %c0_236] : memref<2x1x32xf32, #tpu.memory_space<vmem>>, vector<1x1x32xf32>
    %532 = vector.shape_cast %531 : vector<1x1x32xf32> to vector<1x32xf32>
    %c0_237 = arith.constant 0 : index
    %c0_238 = arith.constant 0 : index
    %c0_239 = arith.constant 0 : index
    %533 = vector.load %arg28[%c0_237, %c0_238, %c0_239] : memref<2x1x32xf32, #tpu.memory_space<vmem>>, vector<1x1x32xf32>
    %534 = vector.shape_cast %533 : vector<1x1x32xf32> to vector<1x32xf32>
    %cst_240 = arith.constant dense<0.000000e+00> : vector<8xf32>
    %535 = vector.multi_reduction <add>, %530, %cst_240 [1] : vector<8x32xf32> to vector<8xf32>
    %536 = vector.shape_cast %535 : vector<8xf32> to vector<8x1xf32>
    %cst_241 = arith.constant 3.200000e+01 : f32
    %537 = vector.broadcast %cst_241 : f32 to vector<8x1xf32>
    %538 = arith.divf %536, %537 : vector<8x1xf32>
    %539 = vector.broadcast %538 : vector<8x1xf32> to vector<8x32xf32>
    %540 = arith.subf %530, %539 : vector<8x32xf32>
    %541 = arith.mulf %540, %540 : vector<8x32xf32>
    %cst_242 = arith.constant dense<0.000000e+00> : vector<8xf32>
    %542 = vector.multi_reduction <add>, %541, %cst_242 [1] : vector<8x32xf32> to vector<8xf32>
    %543 = vector.shape_cast %542 : vector<8xf32> to vector<8x1xf32>
    %cst_243 = arith.constant 3.200000e+01 : f32
    %544 = vector.broadcast %cst_243 : f32 to vector<8x1xf32>
    %545 = arith.divf %543, %544 : vector<8x1xf32>
    %cst_244 = arith.constant 9.99999974E-6 : f32
    %546 = vector.broadcast %cst_244 : f32 to vector<8x1xf32>
    %547 = arith.addf %545, %546 : vector<8x1xf32>
    %548 = math.rsqrt %547 : vector<8x1xf32>
    %549 = vector.broadcast %548 : vector<8x1xf32> to vector<8x32xf32>
    %550 = arith.mulf %540, %549 : vector<8x32xf32>
    %551 = vector.broadcast %532 : vector<1x32xf32> to vector<8x32xf32>
    %552 = arith.mulf %550, %551 : vector<8x32xf32>
    %553 = vector.broadcast %534 : vector<1x32xf32> to vector<8x32xf32>
    %554 = arith.addf %552, %553 : vector<8x32xf32>
    %c0_245 = arith.constant 0 : index
    %c0_246 = arith.constant 0 : index
    %c0_247 = arith.constant 0 : index
    %555 = vector.load %arg29[%c0_245, %c0_246, %c0_247] : memref<2x64x32xbf16, #tpu.memory_space<vmem>>, vector<1x64x32xbf16>
    %556 = vector.shape_cast %555 : vector<1x64x32xbf16> to vector<64x32xbf16>
    %557 = arith.truncf %554 : vector<8x32xf32> to vector<8x32xbf16>
    %cst_248 = arith.constant dense<0.000000e+00> : vector<8x64xf32>
    %558 = tpu.matmul %557, %556, %cst_248 {dimension_numbers = #tpu.dot_dimension_numbers<[1], [1], [0], [0], [0, 0, 1, 0], [], []>} : vector<8x32xbf16>, vector<64x32xbf16>, vector<8x64xf32> -> vector<8x64xf32>
    %c0_249 = arith.constant 0 : index
    %c0_250 = arith.constant 0 : index
    %c0_251 = arith.constant 0 : index
    %559 = vector.load %arg30[%c0_249, %c0_250, %c0_251] : memref<2x1x64xf32, #tpu.memory_space<vmem>>, vector<1x1x64xf32>
    %560 = vector.shape_cast %559 : vector<1x1x64xf32> to vector<1x64xf32>
    %561 = vector.broadcast %560 : vector<1x64xf32> to vector<8x64xf32>
    %562 = arith.addf %558, %561 : vector<8x64xf32>
    %cst_252 = arith.constant 0.000000e+00 : f32
    %563 = vector.broadcast %cst_252 : f32 to vector<8x64xf32>
    %564 = arith.maximumf %562, %563 : vector<8x64xf32>
    %c0_253 = arith.constant 0 : index
    %c0_254 = arith.constant 0 : index
    %c0_255 = arith.constant 0 : index
    %565 = vector.load %arg31[%c0_253, %c0_254, %c0_255] : memref<2x32x64xbf16, #tpu.memory_space<vmem>>, vector<1x32x64xbf16>
    %566 = vector.shape_cast %565 : vector<1x32x64xbf16> to vector<32x64xbf16>
    %567 = arith.truncf %564 : vector<8x64xf32> to vector<8x64xbf16>
    %cst_256 = arith.constant dense<0.000000e+00> : vector<8x32xf32>
    %568 = tpu.matmul %567, %566, %cst_256 {dimension_numbers = #tpu.dot_dimension_numbers<[1], [1], [0], [0], [0, 0, 1, 0], [], []>} : vector<8x64xbf16>, vector<32x64xbf16>, vector<8x32xf32> -> vector<8x32xf32>
    %569 = arith.addf %554, %568 : vector<8x32xf32>
    %c0_257 = arith.constant 0 : index
    %c0_258 = arith.constant 0 : index
    %c0_259 = arith.constant 0 : index
    %570 = vector.load %arg32[%c0_257, %c0_258, %c0_259] : memref<2x1x32xf32, #tpu.memory_space<vmem>>, vector<1x1x32xf32>
    %571 = vector.shape_cast %570 : vector<1x1x32xf32> to vector<1x32xf32>
    %572 = vector.broadcast %571 : vector<1x32xf32> to vector<8x32xf32>
    %573 = arith.addf %569, %572 : vector<8x32xf32>
    %c0_260 = arith.constant 0 : index
    %c0_261 = arith.constant 0 : index
    %c0_262 = arith.constant 0 : index
    %574 = vector.load %arg33[%c0_260, %c0_261, %c0_262] : memref<2x1x32xf32, #tpu.memory_space<vmem>>, vector<1x1x32xf32>
    %575 = vector.shape_cast %574 : vector<1x1x32xf32> to vector<1x32xf32>
    %c0_263 = arith.constant 0 : index
    %c0_264 = arith.constant 0 : index
    %c0_265 = arith.constant 0 : index
    %576 = vector.load %arg34[%c0_263, %c0_264, %c0_265] : memref<2x1x32xf32, #tpu.memory_space<vmem>>, vector<1x1x32xf32>
    %577 = vector.shape_cast %576 : vector<1x1x32xf32> to vector<1x32xf32>
    %cst_266 = arith.constant dense<0.000000e+00> : vector<8xf32>
    %578 = vector.multi_reduction <add>, %573, %cst_266 [1] : vector<8x32xf32> to vector<8xf32>
    %579 = vector.shape_cast %578 : vector<8xf32> to vector<8x1xf32>
    %cst_267 = arith.constant 3.200000e+01 : f32
    %580 = vector.broadcast %cst_267 : f32 to vector<8x1xf32>
    %581 = arith.divf %579, %580 : vector<8x1xf32>
    %582 = vector.broadcast %581 : vector<8x1xf32> to vector<8x32xf32>
    %583 = arith.subf %573, %582 : vector<8x32xf32>
    %584 = arith.mulf %583, %583 : vector<8x32xf32>
    %cst_268 = arith.constant dense<0.000000e+00> : vector<8xf32>
    %585 = vector.multi_reduction <add>, %584, %cst_268 [1] : vector<8x32xf32> to vector<8xf32>
    %586 = vector.shape_cast %585 : vector<8xf32> to vector<8x1xf32>
    %cst_269 = arith.constant 3.200000e+01 : f32
    %587 = vector.broadcast %cst_269 : f32 to vector<8x1xf32>
    %588 = arith.divf %586, %587 : vector<8x1xf32>
    %cst_270 = arith.constant 9.99999974E-6 : f32
    %589 = vector.broadcast %cst_270 : f32 to vector<8x1xf32>
    %590 = arith.addf %588, %589 : vector<8x1xf32>
    %591 = math.rsqrt %590 : vector<8x1xf32>
    %592 = vector.broadcast %591 : vector<8x1xf32> to vector<8x32xf32>
    %593 = arith.mulf %583, %592 : vector<8x32xf32>
    %594 = vector.broadcast %575 : vector<1x32xf32> to vector<8x32xf32>
    %595 = arith.mulf %593, %594 : vector<8x32xf32>
    %596 = vector.broadcast %577 : vector<1x32xf32> to vector<8x32xf32>
    %597 = arith.addf %595, %596 : vector<8x32xf32>
    %c1_271 = arith.constant 1 : index
    %c0_272 = arith.constant 0 : index
    %c0_273 = arith.constant 0 : index
    %598 = vector.load %arg17[%c1_271, %c0_272, %c0_273] : memref<2x96x32xbf16, #tpu.memory_space<vmem>>, vector<1x96x32xbf16>
    %599 = vector.shape_cast %598 : vector<1x96x32xbf16> to vector<96x32xbf16>
    %600 = arith.truncf %597 : vector<8x32xf32> to vector<8x32xbf16>
    %cst_274 = arith.constant dense<0.000000e+00> : vector<8x96xf32>
    %601 = tpu.matmul %600, %599, %cst_274 {dimension_numbers = #tpu.dot_dimension_numbers<[1], [1], [0], [0], [0, 0, 1, 0], [], []>} : vector<8x32xbf16>, vector<96x32xbf16>, vector<8x96xf32> -> vector<8x96xf32>
    %c1_275 = arith.constant 1 : index
    %c0_276 = arith.constant 0 : index
    %c0_277 = arith.constant 0 : index
    %602 = vector.load %arg18[%c1_275, %c0_276, %c0_277] : memref<2x1x96xf32, #tpu.memory_space<vmem>>, vector<1x1x96xf32>
    %603 = vector.shape_cast %602 : vector<1x1x96xf32> to vector<1x96xf32>
    %604 = vector.broadcast %603 : vector<1x96xf32> to vector<8x96xf32>
    %605 = arith.addf %601, %604 : vector<8x96xf32>
    %606 = vector.extract_strided_slice %605 {offsets = [0, 0], sizes = [8, 32], strides = [1, 1]} : vector<8x96xf32> to vector<8x32xf32>
    %607 = vector.extract_strided_slice %605 {offsets = [0, 32], sizes = [8, 32], strides = [1, 1]} : vector<8x96xf32> to vector<8x32xf32>
    %608 = vector.extract_strided_slice %605 {offsets = [0, 64], sizes = [8, 32], strides = [1, 1]} : vector<8x96xf32> to vector<8x32xf32>
    %609 = vector.extract_strided_slice %606 {offsets = [0, 0], sizes = [8, 8], strides = [1, 1]} : vector<8x32xf32> to vector<8x8xf32>
    %610 = vector.extract_strided_slice %607 {offsets = [0, 0], sizes = [8, 8], strides = [1, 1]} : vector<8x32xf32> to vector<8x8xf32>
    %611 = vector.extract_strided_slice %608 {offsets = [0, 0], sizes = [8, 8], strides = [1, 1]} : vector<8x32xf32> to vector<8x8xf32>
    %cst_278 = arith.constant dense<0.000000e+00> : vector<8x8xf32>
    %612 = tpu.matmul %609, %610, %cst_278 {dimension_numbers = #tpu.dot_dimension_numbers<[1], [1], [0], [0], [0, 0, 1, 0], [], []>} : vector<8x8xf32>, vector<8x8xf32>, vector<8x8xf32> -> vector<8x8xf32>
    %cst_279 = arith.constant 0.353553385 : f32
    %613 = vector.broadcast %cst_279 : f32 to vector<8x8xf32>
    %614 = arith.mulf %612, %613 : vector<8x8xf32>
    %cst_280 = arith.constant dense<0xFF800000> : vector<8xf32>
    %615 = vector.multi_reduction <maximumf>, %614, %cst_280 [1] : vector<8x8xf32> to vector<8xf32>
    %616 = vector.shape_cast %615 : vector<8xf32> to vector<8x1xf32>
    %617 = vector.broadcast %616 : vector<8x1xf32> to vector<8x8xf32>
    %618 = arith.subf %614, %617 : vector<8x8xf32>
    %619 = math.exp %618 : vector<8x8xf32>
    %cst_281 = arith.constant dense<0.000000e+00> : vector<8xf32>
    %620 = vector.multi_reduction <add>, %619, %cst_281 [1] : vector<8x8xf32> to vector<8xf32>
    %621 = vector.shape_cast %620 : vector<8xf32> to vector<8x1xf32>
    %622 = vector.broadcast %621 : vector<8x1xf32> to vector<8x8xf32>
    %623 = arith.divf %619, %622 : vector<8x8xf32>
    %cst_282 = arith.constant dense<0.000000e+00> : vector<8x8xf32>
    %624 = tpu.matmul %623, %611, %cst_282 {dimension_numbers = #tpu.dot_dimension_numbers<[1], [0], [0], [1], [0, 0, 1, 1], [], []>} : vector<8x8xf32>, vector<8x8xf32>, vector<8x8xf32> -> vector<8x8xf32>
    %625 = vector.extract_strided_slice %606 {offsets = [0, 8], sizes = [8, 8], strides = [1, 1]} : vector<8x32xf32> to vector<8x8xf32>
    %626 = vector.extract_strided_slice %607 {offsets = [0, 8], sizes = [8, 8], strides = [1, 1]} : vector<8x32xf32> to vector<8x8xf32>
    %627 = vector.extract_strided_slice %608 {offsets = [0, 8], sizes = [8, 8], strides = [1, 1]} : vector<8x32xf32> to vector<8x8xf32>
    %cst_283 = arith.constant dense<0.000000e+00> : vector<8x8xf32>
    %628 = tpu.matmul %625, %626, %cst_283 {dimension_numbers = #tpu.dot_dimension_numbers<[1], [1], [0], [0], [0, 0, 1, 0], [], []>} : vector<8x8xf32>, vector<8x8xf32>, vector<8x8xf32> -> vector<8x8xf32>
    %cst_284 = arith.constant 0.353553385 : f32
    %629 = vector.broadcast %cst_284 : f32 to vector<8x8xf32>
    %630 = arith.mulf %628, %629 : vector<8x8xf32>
    %cst_285 = arith.constant dense<0xFF800000> : vector<8xf32>
    %631 = vector.multi_reduction <maximumf>, %630, %cst_285 [1] : vector<8x8xf32> to vector<8xf32>
    %632 = vector.shape_cast %631 : vector<8xf32> to vector<8x1xf32>
    %633 = vector.broadcast %632 : vector<8x1xf32> to vector<8x8xf32>
    %634 = arith.subf %630, %633 : vector<8x8xf32>
    %635 = math.exp %634 : vector<8x8xf32>
    %cst_286 = arith.constant dense<0.000000e+00> : vector<8xf32>
    %636 = vector.multi_reduction <add>, %635, %cst_286 [1] : vector<8x8xf32> to vector<8xf32>
    %637 = vector.shape_cast %636 : vector<8xf32> to vector<8x1xf32>
    %638 = vector.broadcast %637 : vector<8x1xf32> to vector<8x8xf32>
    %639 = arith.divf %635, %638 : vector<8x8xf32>
    %cst_287 = arith.constant dense<0.000000e+00> : vector<8x8xf32>
    %640 = tpu.matmul %639, %627, %cst_287 {dimension_numbers = #tpu.dot_dimension_numbers<[1], [0], [0], [1], [0, 0, 1, 1], [], []>} : vector<8x8xf32>, vector<8x8xf32>, vector<8x8xf32> -> vector<8x8xf32>
    %641 = vector.extract_strided_slice %606 {offsets = [0, 16], sizes = [8, 8], strides = [1, 1]} : vector<8x32xf32> to vector<8x8xf32>
    %642 = vector.extract_strided_slice %607 {offsets = [0, 16], sizes = [8, 8], strides = [1, 1]} : vector<8x32xf32> to vector<8x8xf32>
    %643 = vector.extract_strided_slice %608 {offsets = [0, 16], sizes = [8, 8], strides = [1, 1]} : vector<8x32xf32> to vector<8x8xf32>
    %cst_288 = arith.constant dense<0.000000e+00> : vector<8x8xf32>
    %644 = tpu.matmul %641, %642, %cst_288 {dimension_numbers = #tpu.dot_dimension_numbers<[1], [1], [0], [0], [0, 0, 1, 0], [], []>} : vector<8x8xf32>, vector<8x8xf32>, vector<8x8xf32> -> vector<8x8xf32>
    %cst_289 = arith.constant 0.353553385 : f32
    %645 = vector.broadcast %cst_289 : f32 to vector<8x8xf32>
    %646 = arith.mulf %644, %645 : vector<8x8xf32>
    %cst_290 = arith.constant dense<0xFF800000> : vector<8xf32>
    %647 = vector.multi_reduction <maximumf>, %646, %cst_290 [1] : vector<8x8xf32> to vector<8xf32>
    %648 = vector.shape_cast %647 : vector<8xf32> to vector<8x1xf32>
    %649 = vector.broadcast %648 : vector<8x1xf32> to vector<8x8xf32>
    %650 = arith.subf %646, %649 : vector<8x8xf32>
    %651 = math.exp %650 : vector<8x8xf32>
    %cst_291 = arith.constant dense<0.000000e+00> : vector<8xf32>
    %652 = vector.multi_reduction <add>, %651, %cst_291 [1] : vector<8x8xf32> to vector<8xf32>
    %653 = vector.shape_cast %652 : vector<8xf32> to vector<8x1xf32>
    %654 = vector.broadcast %653 : vector<8x1xf32> to vector<8x8xf32>
    %655 = arith.divf %651, %654 : vector<8x8xf32>
    %cst_292 = arith.constant dense<0.000000e+00> : vector<8x8xf32>
    %656 = tpu.matmul %655, %643, %cst_292 {dimension_numbers = #tpu.dot_dimension_numbers<[1], [0], [0], [1], [0, 0, 1, 1], [], []>} : vector<8x8xf32>, vector<8x8xf32>, vector<8x8xf32> -> vector<8x8xf32>
    %657 = vector.extract_strided_slice %606 {offsets = [0, 24], sizes = [8, 8], strides = [1, 1]} : vector<8x32xf32> to vector<8x8xf32>
    %658 = vector.extract_strided_slice %607 {offsets = [0, 24], sizes = [8, 8], strides = [1, 1]} : vector<8x32xf32> to vector<8x8xf32>
    %659 = vector.extract_strided_slice %608 {offsets = [0, 24], sizes = [8, 8], strides = [1, 1]} : vector<8x32xf32> to vector<8x8xf32>
    %cst_293 = arith.constant dense<0.000000e+00> : vector<8x8xf32>
    %660 = tpu.matmul %657, %658, %cst_293 {dimension_numbers = #tpu.dot_dimension_numbers<[1], [1], [0], [0], [0, 0, 1, 0], [], []>} : vector<8x8xf32>, vector<8x8xf32>, vector<8x8xf32> -> vector<8x8xf32>
    %cst_294 = arith.constant 0.353553385 : f32
    %661 = vector.broadcast %cst_294 : f32 to vector<8x8xf32>
    %662 = arith.mulf %660, %661 : vector<8x8xf32>
    %cst_295 = arith.constant dense<0xFF800000> : vector<8xf32>
    %663 = vector.multi_reduction <maximumf>, %662, %cst_295 [1] : vector<8x8xf32> to vector<8xf32>
    %664 = vector.shape_cast %663 : vector<8xf32> to vector<8x1xf32>
    %665 = vector.broadcast %664 : vector<8x1xf32> to vector<8x8xf32>
    %666 = arith.subf %662, %665 : vector<8x8xf32>
    %667 = math.exp %666 : vector<8x8xf32>
    %cst_296 = arith.constant dense<0.000000e+00> : vector<8xf32>
    %668 = vector.multi_reduction <add>, %667, %cst_296 [1] : vector<8x8xf32> to vector<8xf32>
    %669 = vector.shape_cast %668 : vector<8xf32> to vector<8x1xf32>
    %670 = vector.broadcast %669 : vector<8x1xf32> to vector<8x8xf32>
    %671 = arith.divf %667, %670 : vector<8x8xf32>
    %cst_297 = arith.constant dense<0.000000e+00> : vector<8x8xf32>
    %672 = tpu.matmul %671, %659, %cst_297 {dimension_numbers = #tpu.dot_dimension_numbers<[1], [0], [0], [1], [0, 0, 1, 1], [], []>} : vector<8x8xf32>, vector<8x8xf32>, vector<8x8xf32> -> vector<8x8xf32>
    %673 = tpu.concatenate %624, %640, %656, %672 in 1 : vector<8x8xf32>, vector<8x8xf32>, vector<8x8xf32>, vector<8x8xf32> -> vector<8x32xf32>
    %c1_298 = arith.constant 1 : index
    %c0_299 = arith.constant 0 : index
    %c0_300 = arith.constant 0 : index
    %674 = vector.load %arg19[%c1_298, %c0_299, %c0_300] : memref<2x32x32xbf16, #tpu.memory_space<vmem>>, vector<1x32x32xbf16>
    %675 = vector.shape_cast %674 : vector<1x32x32xbf16> to vector<32x32xbf16>
    %676 = arith.truncf %673 : vector<8x32xf32> to vector<8x32xbf16>
    %cst_301 = arith.constant dense<0.000000e+00> : vector<8x32xf32>
    %677 = tpu.matmul %676, %675, %cst_301 {dimension_numbers = #tpu.dot_dimension_numbers<[1], [1], [0], [0], [0, 0, 1, 0], [], []>} : vector<8x32xbf16>, vector<32x32xbf16>, vector<8x32xf32> -> vector<8x32xf32>
    %678 = arith.addf %597, %677 : vector<8x32xf32>
    %c1_302 = arith.constant 1 : index
    %c0_303 = arith.constant 0 : index
    %c0_304 = arith.constant 0 : index
    %679 = vector.load %arg20[%c1_302, %c0_303, %c0_304] : memref<2x1x32xf32, #tpu.memory_space<vmem>>, vector<1x1x32xf32>
    %680 = vector.shape_cast %679 : vector<1x1x32xf32> to vector<1x32xf32>
    %681 = vector.broadcast %680 : vector<1x32xf32> to vector<8x32xf32>
    %682 = arith.addf %678, %681 : vector<8x32xf32>
    %c1_305 = arith.constant 1 : index
    %c0_306 = arith.constant 0 : index
    %c0_307 = arith.constant 0 : index
    %683 = vector.load %arg21[%c1_305, %c0_306, %c0_307] : memref<2x1x32xf32, #tpu.memory_space<vmem>>, vector<1x1x32xf32>
    %684 = vector.shape_cast %683 : vector<1x1x32xf32> to vector<1x32xf32>
    %c1_308 = arith.constant 1 : index
    %c0_309 = arith.constant 0 : index
    %c0_310 = arith.constant 0 : index
    %685 = vector.load %arg22[%c1_308, %c0_309, %c0_310] : memref<2x1x32xf32, #tpu.memory_space<vmem>>, vector<1x1x32xf32>
    %686 = vector.shape_cast %685 : vector<1x1x32xf32> to vector<1x32xf32>
    %cst_311 = arith.constant dense<0.000000e+00> : vector<8xf32>
    %687 = vector.multi_reduction <add>, %682, %cst_311 [1] : vector<8x32xf32> to vector<8xf32>
    %688 = vector.shape_cast %687 : vector<8xf32> to vector<8x1xf32>
    %cst_312 = arith.constant 3.200000e+01 : f32
    %689 = vector.broadcast %cst_312 : f32 to vector<8x1xf32>
    %690 = arith.divf %688, %689 : vector<8x1xf32>
    %691 = vector.broadcast %690 : vector<8x1xf32> to vector<8x32xf32>
    %692 = arith.subf %682, %691 : vector<8x32xf32>
    %693 = arith.mulf %692, %692 : vector<8x32xf32>
    %cst_313 = arith.constant dense<0.000000e+00> : vector<8xf32>
    %694 = vector.multi_reduction <add>, %693, %cst_313 [1] : vector<8x32xf32> to vector<8xf32>
    %695 = vector.shape_cast %694 : vector<8xf32> to vector<8x1xf32>
    %cst_314 = arith.constant 3.200000e+01 : f32
    %696 = vector.broadcast %cst_314 : f32 to vector<8x1xf32>
    %697 = arith.divf %695, %696 : vector<8x1xf32>
    %cst_315 = arith.constant 9.99999974E-6 : f32
    %698 = vector.broadcast %cst_315 : f32 to vector<8x1xf32>
    %699 = arith.addf %697, %698 : vector<8x1xf32>
    %700 = math.rsqrt %699 : vector<8x1xf32>
    %701 = vector.broadcast %700 : vector<8x1xf32> to vector<8x32xf32>
    %702 = arith.mulf %692, %701 : vector<8x32xf32>
    %703 = vector.broadcast %684 : vector<1x32xf32> to vector<8x32xf32>
    %704 = arith.mulf %702, %703 : vector<8x32xf32>
    %705 = vector.broadcast %686 : vector<1x32xf32> to vector<8x32xf32>
    %706 = arith.addf %704, %705 : vector<8x32xf32>
    %c1_316 = arith.constant 1 : index
    %c0_317 = arith.constant 0 : index
    %c0_318 = arith.constant 0 : index
    %707 = vector.load %arg23[%c1_316, %c0_317, %c0_318] : memref<2x96x32xbf16, #tpu.memory_space<vmem>>, vector<1x96x32xbf16>
    %708 = vector.shape_cast %707 : vector<1x96x32xbf16> to vector<96x32xbf16>
    %c1_319 = arith.constant 1 : index
    %c0_320 = arith.constant 0 : index
    %c0_321 = arith.constant 0 : index
    %709 = vector.load %arg24[%c1_319, %c0_320, %c0_321] : memref<2x1x96xf32, #tpu.memory_space<vmem>>, vector<1x1x96xf32>
    %710 = vector.shape_cast %709 : vector<1x1x96xf32> to vector<1x96xf32>
    %711 = vector.extract_strided_slice %708 {offsets = [0, 0], sizes = [32, 32], strides = [1, 1]} : vector<96x32xbf16> to vector<32x32xbf16>
    %712 = arith.truncf %706 : vector<8x32xf32> to vector<8x32xbf16>
    %cst_322 = arith.constant dense<0.000000e+00> : vector<8x32xf32>
    %713 = tpu.matmul %712, %711, %cst_322 {dimension_numbers = #tpu.dot_dimension_numbers<[1], [1], [0], [0], [0, 0, 1, 0], [], []>} : vector<8x32xbf16>, vector<32x32xbf16>, vector<8x32xf32> -> vector<8x32xf32>
    %714 = vector.extract_strided_slice %710 {offsets = [0, 0], sizes = [1, 32], strides = [1, 1]} : vector<1x96xf32> to vector<1x32xf32>
    %715 = vector.broadcast %714 : vector<1x32xf32> to vector<8x32xf32>
    %716 = arith.addf %713, %715 : vector<8x32xf32>
    %717 = vector.extract_strided_slice %708 {offsets = [32, 0], sizes = [64, 32], strides = [1, 1]} : vector<96x32xbf16> to vector<64x32xbf16>
    %718 = arith.truncf %327 : vector<10x32xf32> to vector<10x32xbf16>
    %cst_323 = arith.constant dense<0.000000e+00> : vector<10x64xf32>
    %719 = tpu.matmul %718, %717, %cst_323 {dimension_numbers = #tpu.dot_dimension_numbers<[1], [1], [0], [0], [0, 0, 1, 0], [], []>} : vector<10x32xbf16>, vector<64x32xbf16>, vector<10x64xf32> -> vector<10x64xf32>
    %720 = vector.extract_strided_slice %710 {offsets = [0, 32], sizes = [1, 64], strides = [1, 1]} : vector<1x96xf32> to vector<1x64xf32>
    %721 = vector.broadcast %720 : vector<1x64xf32> to vector<10x64xf32>
    %722 = arith.addf %719, %721 : vector<10x64xf32>
    %723 = vector.extract_strided_slice %722 {offsets = [0, 0], sizes = [10, 32], strides = [1, 1]} : vector<10x64xf32> to vector<10x32xf32>
    %724 = vector.extract_strided_slice %722 {offsets = [0, 32], sizes = [10, 32], strides = [1, 1]} : vector<10x64xf32> to vector<10x32xf32>
    %725 = vector.extract_strided_slice %716 {offsets = [0, 0], sizes = [8, 8], strides = [1, 1]} : vector<8x32xf32> to vector<8x8xf32>
    %726 = vector.extract_strided_slice %723 {offsets = [0, 0], sizes = [10, 8], strides = [1, 1]} : vector<10x32xf32> to vector<10x8xf32>
    %727 = vector.extract_strided_slice %724 {offsets = [0, 0], sizes = [10, 8], strides = [1, 1]} : vector<10x32xf32> to vector<10x8xf32>
    %cst_324 = arith.constant dense<0.000000e+00> : vector<8x10xf32>
    %728 = tpu.matmul %725, %726, %cst_324 {dimension_numbers = #tpu.dot_dimension_numbers<[1], [1], [0], [0], [0, 0, 1, 0], [], []>} : vector<8x8xf32>, vector<10x8xf32>, vector<8x10xf32> -> vector<8x10xf32>
    %cst_325 = arith.constant 0.353553385 : f32
    %729 = vector.broadcast %cst_325 : f32 to vector<8x10xf32>
    %730 = arith.mulf %728, %729 : vector<8x10xf32>
    %cst_326 = arith.constant dense<0xFF800000> : vector<8xf32>
    %731 = vector.multi_reduction <maximumf>, %730, %cst_326 [1] : vector<8x10xf32> to vector<8xf32>
    %732 = vector.shape_cast %731 : vector<8xf32> to vector<8x1xf32>
    %733 = vector.broadcast %732 : vector<8x1xf32> to vector<8x10xf32>
    %734 = arith.subf %730, %733 : vector<8x10xf32>
    %735 = math.exp %734 : vector<8x10xf32>
    %cst_327 = arith.constant dense<0.000000e+00> : vector<8xf32>
    %736 = vector.multi_reduction <add>, %735, %cst_327 [1] : vector<8x10xf32> to vector<8xf32>
    %737 = vector.shape_cast %736 : vector<8xf32> to vector<8x1xf32>
    %738 = vector.broadcast %737 : vector<8x1xf32> to vector<8x10xf32>
    %739 = arith.divf %735, %738 : vector<8x10xf32>
    %cst_328 = arith.constant dense<0.000000e+00> : vector<8x8xf32>
    %740 = tpu.matmul %739, %727, %cst_328 {dimension_numbers = #tpu.dot_dimension_numbers<[1], [0], [0], [1], [0, 0, 1, 1], [], []>} : vector<8x10xf32>, vector<10x8xf32>, vector<8x8xf32> -> vector<8x8xf32>
    %741 = vector.extract_strided_slice %716 {offsets = [0, 8], sizes = [8, 8], strides = [1, 1]} : vector<8x32xf32> to vector<8x8xf32>
    %742 = vector.extract_strided_slice %723 {offsets = [0, 8], sizes = [10, 8], strides = [1, 1]} : vector<10x32xf32> to vector<10x8xf32>
    %743 = vector.extract_strided_slice %724 {offsets = [0, 8], sizes = [10, 8], strides = [1, 1]} : vector<10x32xf32> to vector<10x8xf32>
    %cst_329 = arith.constant dense<0.000000e+00> : vector<8x10xf32>
    %744 = tpu.matmul %741, %742, %cst_329 {dimension_numbers = #tpu.dot_dimension_numbers<[1], [1], [0], [0], [0, 0, 1, 0], [], []>} : vector<8x8xf32>, vector<10x8xf32>, vector<8x10xf32> -> vector<8x10xf32>
    %cst_330 = arith.constant 0.353553385 : f32
    %745 = vector.broadcast %cst_330 : f32 to vector<8x10xf32>
    %746 = arith.mulf %744, %745 : vector<8x10xf32>
    %cst_331 = arith.constant dense<0xFF800000> : vector<8xf32>
    %747 = vector.multi_reduction <maximumf>, %746, %cst_331 [1] : vector<8x10xf32> to vector<8xf32>
    %748 = vector.shape_cast %747 : vector<8xf32> to vector<8x1xf32>
    %749 = vector.broadcast %748 : vector<8x1xf32> to vector<8x10xf32>
    %750 = arith.subf %746, %749 : vector<8x10xf32>
    %751 = math.exp %750 : vector<8x10xf32>
    %cst_332 = arith.constant dense<0.000000e+00> : vector<8xf32>
    %752 = vector.multi_reduction <add>, %751, %cst_332 [1] : vector<8x10xf32> to vector<8xf32>
    %753 = vector.shape_cast %752 : vector<8xf32> to vector<8x1xf32>
    %754 = vector.broadcast %753 : vector<8x1xf32> to vector<8x10xf32>
    %755 = arith.divf %751, %754 : vector<8x10xf32>
    %cst_333 = arith.constant dense<0.000000e+00> : vector<8x8xf32>
    %756 = tpu.matmul %755, %743, %cst_333 {dimension_numbers = #tpu.dot_dimension_numbers<[1], [0], [0], [1], [0, 0, 1, 1], [], []>} : vector<8x10xf32>, vector<10x8xf32>, vector<8x8xf32> -> vector<8x8xf32>
    %757 = vector.extract_strided_slice %716 {offsets = [0, 16], sizes = [8, 8], strides = [1, 1]} : vector<8x32xf32> to vector<8x8xf32>
    %758 = vector.extract_strided_slice %723 {offsets = [0, 16], sizes = [10, 8], strides = [1, 1]} : vector<10x32xf32> to vector<10x8xf32>
    %759 = vector.extract_strided_slice %724 {offsets = [0, 16], sizes = [10, 8], strides = [1, 1]} : vector<10x32xf32> to vector<10x8xf32>
    %cst_334 = arith.constant dense<0.000000e+00> : vector<8x10xf32>
    %760 = tpu.matmul %757, %758, %cst_334 {dimension_numbers = #tpu.dot_dimension_numbers<[1], [1], [0], [0], [0, 0, 1, 0], [], []>} : vector<8x8xf32>, vector<10x8xf32>, vector<8x10xf32> -> vector<8x10xf32>
    %cst_335 = arith.constant 0.353553385 : f32
    %761 = vector.broadcast %cst_335 : f32 to vector<8x10xf32>
    %762 = arith.mulf %760, %761 : vector<8x10xf32>
    %cst_336 = arith.constant dense<0xFF800000> : vector<8xf32>
    %763 = vector.multi_reduction <maximumf>, %762, %cst_336 [1] : vector<8x10xf32> to vector<8xf32>
    %764 = vector.shape_cast %763 : vector<8xf32> to vector<8x1xf32>
    %765 = vector.broadcast %764 : vector<8x1xf32> to vector<8x10xf32>
    %766 = arith.subf %762, %765 : vector<8x10xf32>
    %767 = math.exp %766 : vector<8x10xf32>
    %cst_337 = arith.constant dense<0.000000e+00> : vector<8xf32>
    %768 = vector.multi_reduction <add>, %767, %cst_337 [1] : vector<8x10xf32> to vector<8xf32>
    %769 = vector.shape_cast %768 : vector<8xf32> to vector<8x1xf32>
    %770 = vector.broadcast %769 : vector<8x1xf32> to vector<8x10xf32>
    %771 = arith.divf %767, %770 : vector<8x10xf32>
    %cst_338 = arith.constant dense<0.000000e+00> : vector<8x8xf32>
    %772 = tpu.matmul %771, %759, %cst_338 {dimension_numbers = #tpu.dot_dimension_numbers<[1], [0], [0], [1], [0, 0, 1, 1], [], []>} : vector<8x10xf32>, vector<10x8xf32>, vector<8x8xf32> -> vector<8x8xf32>
    %773 = vector.extract_strided_slice %716 {offsets = [0, 24], sizes = [8, 8], strides = [1, 1]} : vector<8x32xf32> to vector<8x8xf32>
    %774 = vector.extract_strided_slice %723 {offsets = [0, 24], sizes = [10, 8], strides = [1, 1]} : vector<10x32xf32> to vector<10x8xf32>
    %775 = vector.extract_strided_slice %724 {offsets = [0, 24], sizes = [10, 8], strides = [1, 1]} : vector<10x32xf32> to vector<10x8xf32>
    %cst_339 = arith.constant dense<0.000000e+00> : vector<8x10xf32>
    %776 = tpu.matmul %773, %774, %cst_339 {dimension_numbers = #tpu.dot_dimension_numbers<[1], [1], [0], [0], [0, 0, 1, 0], [], []>} : vector<8x8xf32>, vector<10x8xf32>, vector<8x10xf32> -> vector<8x10xf32>
    %cst_340 = arith.constant 0.353553385 : f32
    %777 = vector.broadcast %cst_340 : f32 to vector<8x10xf32>
    %778 = arith.mulf %776, %777 : vector<8x10xf32>
    %cst_341 = arith.constant dense<0xFF800000> : vector<8xf32>
    %779 = vector.multi_reduction <maximumf>, %778, %cst_341 [1] : vector<8x10xf32> to vector<8xf32>
    %780 = vector.shape_cast %779 : vector<8xf32> to vector<8x1xf32>
    %781 = vector.broadcast %780 : vector<8x1xf32> to vector<8x10xf32>
    %782 = arith.subf %778, %781 : vector<8x10xf32>
    %783 = math.exp %782 : vector<8x10xf32>
    %cst_342 = arith.constant dense<0.000000e+00> : vector<8xf32>
    %784 = vector.multi_reduction <add>, %783, %cst_342 [1] : vector<8x10xf32> to vector<8xf32>
    %785 = vector.shape_cast %784 : vector<8xf32> to vector<8x1xf32>
    %786 = vector.broadcast %785 : vector<8x1xf32> to vector<8x10xf32>
    %787 = arith.divf %783, %786 : vector<8x10xf32>
    %cst_343 = arith.constant dense<0.000000e+00> : vector<8x8xf32>
    %788 = tpu.matmul %787, %775, %cst_343 {dimension_numbers = #tpu.dot_dimension_numbers<[1], [0], [0], [1], [0, 0, 1, 1], [], []>} : vector<8x10xf32>, vector<10x8xf32>, vector<8x8xf32> -> vector<8x8xf32>
    %789 = tpu.concatenate %740, %756, %772, %788 in 1 : vector<8x8xf32>, vector<8x8xf32>, vector<8x8xf32>, vector<8x8xf32> -> vector<8x32xf32>
    %c1_344 = arith.constant 1 : index
    %c0_345 = arith.constant 0 : index
    %c0_346 = arith.constant 0 : index
    %790 = vector.load %arg25[%c1_344, %c0_345, %c0_346] : memref<2x32x32xbf16, #tpu.memory_space<vmem>>, vector<1x32x32xbf16>
    %791 = vector.shape_cast %790 : vector<1x32x32xbf16> to vector<32x32xbf16>
    %792 = arith.truncf %789 : vector<8x32xf32> to vector<8x32xbf16>
    %cst_347 = arith.constant dense<0.000000e+00> : vector<8x32xf32>
    %793 = tpu.matmul %792, %791, %cst_347 {dimension_numbers = #tpu.dot_dimension_numbers<[1], [1], [0], [0], [0, 0, 1, 0], [], []>} : vector<8x32xbf16>, vector<32x32xbf16>, vector<8x32xf32> -> vector<8x32xf32>
    %794 = arith.addf %706, %793 : vector<8x32xf32>
    %c1_348 = arith.constant 1 : index
    %c0_349 = arith.constant 0 : index
    %c0_350 = arith.constant 0 : index
    %795 = vector.load %arg26[%c1_348, %c0_349, %c0_350] : memref<2x1x32xf32, #tpu.memory_space<vmem>>, vector<1x1x32xf32>
    %796 = vector.shape_cast %795 : vector<1x1x32xf32> to vector<1x32xf32>
    %797 = vector.broadcast %796 : vector<1x32xf32> to vector<8x32xf32>
    %798 = arith.addf %794, %797 : vector<8x32xf32>
    %c1_351 = arith.constant 1 : index
    %c0_352 = arith.constant 0 : index
    %c0_353 = arith.constant 0 : index
    %799 = vector.load %arg27[%c1_351, %c0_352, %c0_353] : memref<2x1x32xf32, #tpu.memory_space<vmem>>, vector<1x1x32xf32>
    %800 = vector.shape_cast %799 : vector<1x1x32xf32> to vector<1x32xf32>
    %c1_354 = arith.constant 1 : index
    %c0_355 = arith.constant 0 : index
    %c0_356 = arith.constant 0 : index
    %801 = vector.load %arg28[%c1_354, %c0_355, %c0_356] : memref<2x1x32xf32, #tpu.memory_space<vmem>>, vector<1x1x32xf32>
    %802 = vector.shape_cast %801 : vector<1x1x32xf32> to vector<1x32xf32>
    %cst_357 = arith.constant dense<0.000000e+00> : vector<8xf32>
    %803 = vector.multi_reduction <add>, %798, %cst_357 [1] : vector<8x32xf32> to vector<8xf32>
    %804 = vector.shape_cast %803 : vector<8xf32> to vector<8x1xf32>
    %cst_358 = arith.constant 3.200000e+01 : f32
    %805 = vector.broadcast %cst_358 : f32 to vector<8x1xf32>
    %806 = arith.divf %804, %805 : vector<8x1xf32>
    %807 = vector.broadcast %806 : vector<8x1xf32> to vector<8x32xf32>
    %808 = arith.subf %798, %807 : vector<8x32xf32>
    %809 = arith.mulf %808, %808 : vector<8x32xf32>
    %cst_359 = arith.constant dense<0.000000e+00> : vector<8xf32>
    %810 = vector.multi_reduction <add>, %809, %cst_359 [1] : vector<8x32xf32> to vector<8xf32>
    %811 = vector.shape_cast %810 : vector<8xf32> to vector<8x1xf32>
    %cst_360 = arith.constant 3.200000e+01 : f32
    %812 = vector.broadcast %cst_360 : f32 to vector<8x1xf32>
    %813 = arith.divf %811, %812 : vector<8x1xf32>
    %cst_361 = arith.constant 9.99999974E-6 : f32
    %814 = vector.broadcast %cst_361 : f32 to vector<8x1xf32>
    %815 = arith.addf %813, %814 : vector<8x1xf32>
    %816 = math.rsqrt %815 : vector<8x1xf32>
    %817 = vector.broadcast %816 : vector<8x1xf32> to vector<8x32xf32>
    %818 = arith.mulf %808, %817 : vector<8x32xf32>
    %819 = vector.broadcast %800 : vector<1x32xf32> to vector<8x32xf32>
    %820 = arith.mulf %818, %819 : vector<8x32xf32>
    %821 = vector.broadcast %802 : vector<1x32xf32> to vector<8x32xf32>
    %822 = arith.addf %820, %821 : vector<8x32xf32>
    %c1_362 = arith.constant 1 : index
    %c0_363 = arith.constant 0 : index
    %c0_364 = arith.constant 0 : index
    %823 = vector.load %arg29[%c1_362, %c0_363, %c0_364] : memref<2x64x32xbf16, #tpu.memory_space<vmem>>, vector<1x64x32xbf16>
    %824 = vector.shape_cast %823 : vector<1x64x32xbf16> to vector<64x32xbf16>
    %825 = arith.truncf %822 : vector<8x32xf32> to vector<8x32xbf16>
    %cst_365 = arith.constant dense<0.000000e+00> : vector<8x64xf32>
    %826 = tpu.matmul %825, %824, %cst_365 {dimension_numbers = #tpu.dot_dimension_numbers<[1], [1], [0], [0], [0, 0, 1, 0], [], []>} : vector<8x32xbf16>, vector<64x32xbf16>, vector<8x64xf32> -> vector<8x64xf32>
    %c1_366 = arith.constant 1 : index
    %c0_367 = arith.constant 0 : index
    %c0_368 = arith.constant 0 : index
    %827 = vector.load %arg30[%c1_366, %c0_367, %c0_368] : memref<2x1x64xf32, #tpu.memory_space<vmem>>, vector<1x1x64xf32>
    %828 = vector.shape_cast %827 : vector<1x1x64xf32> to vector<1x64xf32>
    %829 = vector.broadcast %828 : vector<1x64xf32> to vector<8x64xf32>
    %830 = arith.addf %826, %829 : vector<8x64xf32>
    %cst_369 = arith.constant 0.000000e+00 : f32
    %831 = vector.broadcast %cst_369 : f32 to vector<8x64xf32>
    %832 = arith.maximumf %830, %831 : vector<8x64xf32>
    %c1_370 = arith.constant 1 : index
    %c0_371 = arith.constant 0 : index
    %c0_372 = arith.constant 0 : index
    %833 = vector.load %arg31[%c1_370, %c0_371, %c0_372] : memref<2x32x64xbf16, #tpu.memory_space<vmem>>, vector<1x32x64xbf16>
    %834 = vector.shape_cast %833 : vector<1x32x64xbf16> to vector<32x64xbf16>
    %835 = arith.truncf %832 : vector<8x64xf32> to vector<8x64xbf16>
    %cst_373 = arith.constant dense<0.000000e+00> : vector<8x32xf32>
    %836 = tpu.matmul %835, %834, %cst_373 {dimension_numbers = #tpu.dot_dimension_numbers<[1], [1], [0], [0], [0, 0, 1, 0], [], []>} : vector<8x64xbf16>, vector<32x64xbf16>, vector<8x32xf32> -> vector<8x32xf32>
    %837 = arith.addf %822, %836 : vector<8x32xf32>
    %c1_374 = arith.constant 1 : index
    %c0_375 = arith.constant 0 : index
    %c0_376 = arith.constant 0 : index
    %838 = vector.load %arg32[%c1_374, %c0_375, %c0_376] : memref<2x1x32xf32, #tpu.memory_space<vmem>>, vector<1x1x32xf32>
    %839 = vector.shape_cast %838 : vector<1x1x32xf32> to vector<1x32xf32>
    %840 = vector.broadcast %839 : vector<1x32xf32> to vector<8x32xf32>
    %841 = arith.addf %837, %840 : vector<8x32xf32>
    %c1_377 = arith.constant 1 : index
    %c0_378 = arith.constant 0 : index
    %c0_379 = arith.constant 0 : index
    %842 = vector.load %arg33[%c1_377, %c0_378, %c0_379] : memref<2x1x32xf32, #tpu.memory_space<vmem>>, vector<1x1x32xf32>
    %843 = vector.shape_cast %842 : vector<1x1x32xf32> to vector<1x32xf32>
    %c1_380 = arith.constant 1 : index
    %c0_381 = arith.constant 0 : index
    %c0_382 = arith.constant 0 : index
    %844 = vector.load %arg34[%c1_380, %c0_381, %c0_382] : memref<2x1x32xf32, #tpu.memory_space<vmem>>, vector<1x1x32xf32>
    %845 = vector.shape_cast %844 : vector<1x1x32xf32> to vector<1x32xf32>
    %cst_383 = arith.constant dense<0.000000e+00> : vector<8xf32>
    %846 = vector.multi_reduction <add>, %841, %cst_383 [1] : vector<8x32xf32> to vector<8xf32>
    %847 = vector.shape_cast %846 : vector<8xf32> to vector<8x1xf32>
    %cst_384 = arith.constant 3.200000e+01 : f32
    %848 = vector.broadcast %cst_384 : f32 to vector<8x1xf32>
    %849 = arith.divf %847, %848 : vector<8x1xf32>
    %850 = vector.broadcast %849 : vector<8x1xf32> to vector<8x32xf32>
    %851 = arith.subf %841, %850 : vector<8x32xf32>
    %852 = arith.mulf %851, %851 : vector<8x32xf32>
    %cst_385 = arith.constant dense<0.000000e+00> : vector<8xf32>
    %853 = vector.multi_reduction <add>, %852, %cst_385 [1] : vector<8x32xf32> to vector<8xf32>
    %854 = vector.shape_cast %853 : vector<8xf32> to vector<8x1xf32>
    %cst_386 = arith.constant 3.200000e+01 : f32
    %855 = vector.broadcast %cst_386 : f32 to vector<8x1xf32>
    %856 = arith.divf %854, %855 : vector<8x1xf32>
    %cst_387 = arith.constant 9.99999974E-6 : f32
    %857 = vector.broadcast %cst_387 : f32 to vector<8x1xf32>
    %858 = arith.addf %856, %857 : vector<8x1xf32>
    %859 = math.rsqrt %858 : vector<8x1xf32>
    %860 = vector.broadcast %859 : vector<8x1xf32> to vector<8x32xf32>
    %861 = arith.mulf %851, %860 : vector<8x32xf32>
    %862 = vector.broadcast %843 : vector<1x32xf32> to vector<8x32xf32>
    %863 = arith.mulf %861, %862 : vector<8x32xf32>
    %864 = vector.broadcast %845 : vector<1x32xf32> to vector<8x32xf32>
    %865 = arith.addf %863, %864 : vector<8x32xf32>
    %c0_388 = arith.constant 0 : index
    %c0_389 = arith.constant 0 : index
    %866 = vector.load %arg35[%c0_388, %c0_389] : memref<1x32xf32, #tpu.memory_space<vmem>>, vector<1x32xf32>
    %c0_390 = arith.constant 0 : index
    %c0_391 = arith.constant 0 : index
    %867 = vector.load %arg36[%c0_390, %c0_391] : memref<1x32xf32, #tpu.memory_space<vmem>>, vector<1x32xf32>
    %cst_392 = arith.constant dense<0.000000e+00> : vector<8xf32>
    %868 = vector.multi_reduction <add>, %865, %cst_392 [1] : vector<8x32xf32> to vector<8xf32>
    %869 = vector.shape_cast %868 : vector<8xf32> to vector<8x1xf32>
    %cst_393 = arith.constant 3.200000e+01 : f32
    %870 = vector.broadcast %cst_393 : f32 to vector<8x1xf32>
    %871 = arith.divf %869, %870 : vector<8x1xf32>
    %872 = vector.broadcast %871 : vector<8x1xf32> to vector<8x32xf32>
    %873 = arith.subf %865, %872 : vector<8x32xf32>
    %874 = arith.mulf %873, %873 : vector<8x32xf32>
    %cst_394 = arith.constant dense<0.000000e+00> : vector<8xf32>
    %875 = vector.multi_reduction <add>, %874, %cst_394 [1] : vector<8x32xf32> to vector<8xf32>
    %876 = vector.shape_cast %875 : vector<8xf32> to vector<8x1xf32>
    %cst_395 = arith.constant 3.200000e+01 : f32
    %877 = vector.broadcast %cst_395 : f32 to vector<8x1xf32>
    %878 = arith.divf %876, %877 : vector<8x1xf32>
    %cst_396 = arith.constant 9.99999974E-6 : f32
    %879 = vector.broadcast %cst_396 : f32 to vector<8x1xf32>
    %880 = arith.addf %878, %879 : vector<8x1xf32>
    %881 = math.rsqrt %880 : vector<8x1xf32>
    %882 = vector.broadcast %881 : vector<8x1xf32> to vector<8x32xf32>
    %883 = arith.mulf %873, %882 : vector<8x32xf32>
    %884 = vector.broadcast %866 : vector<1x32xf32> to vector<8x32xf32>
    %885 = arith.mulf %883, %884 : vector<8x32xf32>
    %886 = vector.broadcast %867 : vector<1x32xf32> to vector<8x32xf32>
    %887 = arith.addf %885, %886 : vector<8x32xf32>
    %c0_397 = arith.constant 0 : index
    %c0_398 = arith.constant 0 : index
    %888 = vector.load %arg37[%c0_397, %c0_398] : memref<128x32xbf16, #tpu.memory_space<vmem>>, vector<128x32xbf16>
    %889 = arith.truncf %887 : vector<8x32xf32> to vector<8x32xbf16>
    %cst_399 = arith.constant dense<0.000000e+00> : vector<8x128xf32>
    %890 = tpu.matmul %889, %888, %cst_399 {dimension_numbers = #tpu.dot_dimension_numbers<[1], [1], [0], [0], [0, 0, 1, 0], [], []>} : vector<8x32xbf16>, vector<128x32xbf16>, vector<8x128xf32> -> vector<8x128xf32>
    %c0_400 = arith.constant 0 : index
    %c0_401 = arith.constant 0 : index
    %891 = vector.load %arg38[%c0_400, %c0_401] : memref<1x128xf32, #tpu.memory_space<vmem>>, vector<1x128xf32>
    %892 = vector.broadcast %891 : vector<1x128xf32> to vector<8x128xf32>
    %893 = arith.addf %890, %892 : vector<8x128xf32>
    %cst_402 = arith.constant dense<0xFF800000> : vector<8xf32>
    %894 = vector.multi_reduction <maximumf>, %893, %cst_402 [1] : vector<8x128xf32> to vector<8xf32>
    %895 = vector.shape_cast %894 : vector<8xf32> to vector<8x1xf32>
    %896 = vector.broadcast %895 : vector<8x1xf32> to vector<8x128xf32>
    %897 = arith.subf %893, %896 : vector<8x128xf32>
    %898 = math.exp %897 : vector<8x128xf32>
    %cst_403 = arith.constant dense<0.000000e+00> : vector<8xf32>
    %899 = vector.multi_reduction <add>, %898, %cst_403 [1] : vector<8x128xf32> to vector<8xf32>
    %900 = vector.shape_cast %899 : vector<8xf32> to vector<8x1xf32>
    %901 = math.log %900 : vector<8x1xf32>
    %902 = vector.broadcast %901 : vector<8x1xf32> to vector<8x128xf32>
    %903 = arith.subf %897, %902 : vector<8x128xf32>
    %c0_404 = arith.constant 0 : index
    %c0_405 = arith.constant 0 : index
    %c0_406 = arith.constant 0 : index
    %904 = vector.load %arg39[%c0_404, %c0_405, %c0_406] : memref<1x8x128xf32, #tpu.memory_space<vmem>>, vector<1x8x128xf32>
    %905 = vector.shape_cast %904 : vector<1x8x128xf32> to vector<8x128xf32>
    %906 = vector.shape_cast %903 : vector<8x128xf32> to vector<1x8x128xf32>
    tpu.vector_store %arg39[%c0_404, %c0_405, %c0_406], %906 {strides = array<i32>} : memref<1x8x128xf32, #tpu.memory_space<vmem>>, vector<1x8x128xf32>,
    return
  }
  func.func @transform_0(%arg0: i32) -> (i32, i32, i32) {
    %c0_i32 = arith.constant 0 : i32
    %c0_i32_0 = arith.constant 0 : i32
    %c0_i32_1 = arith.constant 0 : i32
    return %arg0, %c0_i32, %c0_i32_0 : i32, i32, i32
  }
  func.func @transform_1(%arg0: i32) -> (i32, i32, i32) {
    %c0_i32 = arith.constant 0 : i32
    %c0_i32_0 = arith.constant 0 : i32
    %c0_i32_1 = arith.constant 0 : i32
    return %arg0, %c0_i32, %c0_i32_0 : i32, i32, i32
  }
  func.func @transform_2(%arg0: i32) -> (i32, i32, i32) {
    %c0_i32 = arith.constant 0 : i32
    %c0_i32_0 = arith.constant 0 : i32
    %c0_i32_1 = arith.constant 0 : i32
    %c0_i32_2 = arith.constant 0 : i32
    return %c0_i32, %c0_i32_0, %c0_i32_1 : i32, i32, i32
  }
  func.func @transform_3(%arg0: i32) -> (i32, i32, i32) {
    %c0_i32 = arith.constant 0 : i32
    %c0_i32_0 = arith.constant 0 : i32
    %c0_i32_1 = arith.constant 0 : i32
    %c0_i32_2 = arith.constant 0 : i32
    return %c0_i32, %c0_i32_0, %c0_i32_1 : i32, i32, i32
  }
  func.func @transform_4(%arg0: i32) -> (i32, i32, i32) {
    %c0_i32 = arith.constant 0 : i32
    %c0_i32_0 = arith.constant 0 : i32
    %c0_i32_1 = arith.constant 0 : i32
    %c0_i32_2 = arith.constant 0 : i32
    return %c0_i32, %c0_i32_0, %c0_i32_1 : i32, i32, i32
  }
  func.func @transform_5(%arg0: i32) -> (i32, i32, i32) {
    %c0_i32 = arith.constant 0 : i32
    %c0_i32_0 = arith.constant 0 : i32
    %c0_i32_1 = arith.constant 0 : i32
    %c0_i32_2 = arith.constant 0 : i32
    return %c0_i32, %c0_i32_0, %c0_i32_1 : i32, i32, i32
  }
  func.func @transform_6(%arg0: i32) -> (i32, i32, i32) {
    %c0_i32 = arith.constant 0 : i32
    %c0_i32_0 = arith.constant 0 : i32
    %c0_i32_1 = arith.constant 0 : i32
    %c0_i32_2 = arith.constant 0 : i32
    return %c0_i32, %c0_i32_0, %c0_i32_1 : i32, i32, i32
  }
  func.func @transform_7(%arg0: i32) -> (i32, i32, i32) {
    %c0_i32 = arith.constant 0 : i32
    %c0_i32_0 = arith.constant 0 : i32
    %c0_i32_1 = arith.constant 0 : i32
    %c0_i32_2 = arith.constant 0 : i32
    return %c0_i32, %c0_i32_0, %c0_i32_1 : i32, i32, i32
  }
  func.func @transform_8(%arg0: i32) -> (i32, i32, i32) {
    %c0_i32 = arith.constant 0 : i32
    %c0_i32_0 = arith.constant 0 : i32
    %c0_i32_1 = arith.constant 0 : i32
    %c0_i32_2 = arith.constant 0 : i32
    return %c0_i32, %c0_i32_0, %c0_i32_1 : i32, i32, i32
  }
  func.func @transform_9(%arg0: i32) -> (i32, i32, i32) {
    %c0_i32 = arith.constant 0 : i32
    %c0_i32_0 = arith.constant 0 : i32
    %c0_i32_1 = arith.constant 0 : i32
    %c0_i32_2 = arith.constant 0 : i32
    return %c0_i32, %c0_i32_0, %c0_i32_1 : i32, i32, i32
  }
  func.func @transform_10(%arg0: i32) -> (i32, i32, i32) {
    %c0_i32 = arith.constant 0 : i32
    %c0_i32_0 = arith.constant 0 : i32
    %c0_i32_1 = arith.constant 0 : i32
    %c0_i32_2 = arith.constant 0 : i32
    return %c0_i32, %c0_i32_0, %c0_i32_1 : i32, i32, i32
  }
  func.func @transform_11(%arg0: i32) -> (i32, i32, i32) {
    %c0_i32 = arith.constant 0 : i32
    %c0_i32_0 = arith.constant 0 : i32
    %c0_i32_1 = arith.constant 0 : i32
    %c0_i32_2 = arith.constant 0 : i32
    return %c0_i32, %c0_i32_0, %c0_i32_1 : i32, i32, i32
  }
  func.func @transform_12(%arg0: i32) -> (i32, i32, i32) {
    %c0_i32 = arith.constant 0 : i32
    %c0_i32_0 = arith.constant 0 : i32
    %c0_i32_1 = arith.constant 0 : i32
    %c0_i32_2 = arith.constant 0 : i32
    return %c0_i32, %c0_i32_0, %c0_i32_1 : i32, i32, i32
  }
  func.func @transform_13(%arg0: i32) -> (i32, i32, i32) {
    %c0_i32 = arith.constant 0 : i32
    %c0_i32_0 = arith.constant 0 : i32
    %c0_i32_1 = arith.constant 0 : i32
    %c0_i32_2 = arith.constant 0 : i32
    return %c0_i32, %c0_i32_0, %c0_i32_1 : i32, i32, i32
  }
  func.func @transform_14(%arg0: i32) -> (i32, i32) {
    %c0_i32 = arith.constant 0 : i32
    %c0_i32_0 = arith.constant 0 : i32
    %c0_i32_1 = arith.constant 0 : i32
    return %c0_i32, %c0_i32_0 : i32, i32
  }
  func.func @transform_15(%arg0: i32) -> (i32, i32) {
    %c0_i32 = arith.constant 0 : i32
    %c0_i32_0 = arith.constant 0 : i32
    %c0_i32_1 = arith.constant 0 : i32
    return %c0_i32, %c0_i32_0 : i32, i32
  }
  func.func @transform_16(%arg0: i32) -> (i32, i32, i32) {
    %c0_i32 = arith.constant 0 : i32
    %c0_i32_0 = arith.constant 0 : i32
    %c0_i32_1 = arith.constant 0 : i32
    %c0_i32_2 = arith.constant 0 : i32
    return %c0_i32, %c0_i32_0, %c0_i32_1 : i32, i32, i32
  }
  func.func @transform_17(%arg0: i32) -> (i32, i32, i32) {
    %c0_i32 = arith.constant 0 : i32
    %c0_i32_0 = arith.constant 0 : i32
    %c0_i32_1 = arith.constant 0 : i32
    %c0_i32_2 = arith.constant 0 : i32
    return %c0_i32, %c0_i32_0, %c0_i32_1 : i32, i32, i32
  }
  func.func @transform_18(%arg0: i32) -> (i32, i32, i32) {
    %c0_i32 = arith.constant 0 : i32
    %c0_i32_0 = arith.constant 0 : i32
    %c0_i32_1 = arith.constant 0 : i32
    %c0_i32_2 = arith.constant 0 : i32
    return %c0_i32, %c0_i32_0, %c0_i32_1 : i32, i32, i32
  }
  func.func @transform_19(%arg0: i32) -> (i32, i32, i32) {
    %c0_i32 = arith.constant 0 : i32
    %c0_i32_0 = arith.constant 0 : i32
    %c0_i32_1 = arith.constant 0 : i32
    %c0_i32_2 = arith.constant 0 : i32
    return %c0_i32, %c0_i32_0, %c0_i32_1 : i32, i32, i32
  }
  func.func @transform_20(%arg0: i32) -> (i32, i32, i32) {
    %c0_i32 = arith.constant 0 : i32
    %c0_i32_0 = arith.constant 0 : i32
    %c0_i32_1 = arith.constant 0 : i32
    %c0_i32_2 = arith.constant 0 : i32
    return %c0_i32, %c0_i32_0, %c0_i32_1 : i32, i32, i32
  }
  func.func @transform_21(%arg0: i32) -> (i32, i32, i32) {
    %c0_i32 = arith.constant 0 : i32
    %c0_i32_0 = arith.constant 0 : i32
    %c0_i32_1 = arith.constant 0 : i32
    %c0_i32_2 = arith.constant 0 : i32
    return %c0_i32, %c0_i32_0, %c0_i32_1 : i32, i32, i32
  }
  func.func @transform_22(%arg0: i32) -> (i32, i32, i32) {
    %c0_i32 = arith.constant 0 : i32
    %c0_i32_0 = arith.constant 0 : i32
    %c0_i32_1 = arith.constant 0 : i32
    %c0_i32_2 = arith.constant 0 : i32
    return %c0_i32, %c0_i32_0, %c0_i32_1 : i32, i32, i32
  }
  func.func @transform_23(%arg0: i32) -> (i32, i32, i32) {
    %c0_i32 = arith.constant 0 : i32
    %c0_i32_0 = arith.constant 0 : i32
    %c0_i32_1 = arith.constant 0 : i32
    %c0_i32_2 = arith.constant 0 : i32
    return %c0_i32, %c0_i32_0, %c0_i32_1 : i32, i32, i32
  }
  func.func @transform_24(%arg0: i32) -> (i32, i32, i32) {
    %c0_i32 = arith.constant 0 : i32
    %c0_i32_0 = arith.constant 0 : i32
    %c0_i32_1 = arith.constant 0 : i32
    %c0_i32_2 = arith.constant 0 : i32
    return %c0_i32, %c0_i32_0, %c0_i32_1 : i32, i32, i32
  }
  func.func @transform_25(%arg0: i32) -> (i32, i32, i32) {
    %c0_i32 = arith.constant 0 : i32
    %c0_i32_0 = arith.constant 0 : i32
    %c0_i32_1 = arith.constant 0 : i32
    %c0_i32_2 = arith.constant 0 : i32
    return %c0_i32, %c0_i32_0, %c0_i32_1 : i32, i32, i32
  }
  func.func @transform_26(%arg0: i32) -> (i32, i32, i32) {
    %c0_i32 = arith.constant 0 : i32
    %c0_i32_0 = arith.constant 0 : i32
    %c0_i32_1 = arith.constant 0 : i32
    %c0_i32_2 = arith.constant 0 : i32
    return %c0_i32, %c0_i32_0, %c0_i32_1 : i32, i32, i32
  }
  func.func @transform_27(%arg0: i32) -> (i32, i32, i32) {
    %c0_i32 = arith.constant 0 : i32
    %c0_i32_0 = arith.constant 0 : i32
    %c0_i32_1 = arith.constant 0 : i32
    %c0_i32_2 = arith.constant 0 : i32
    return %c0_i32, %c0_i32_0, %c0_i32_1 : i32, i32, i32
  }
  func.func @transform_28(%arg0: i32) -> (i32, i32, i32) {
    %c0_i32 = arith.constant 0 : i32
    %c0_i32_0 = arith.constant 0 : i32
    %c0_i32_1 = arith.constant 0 : i32
    %c0_i32_2 = arith.constant 0 : i32
    return %c0_i32, %c0_i32_0, %c0_i32_1 : i32, i32, i32
  }
  func.func @transform_29(%arg0: i32) -> (i32, i32, i32) {
    %c0_i32 = arith.constant 0 : i32
    %c0_i32_0 = arith.constant 0 : i32
    %c0_i32_1 = arith.constant 0 : i32
    %c0_i32_2 = arith.constant 0 : i32
    return %c0_i32, %c0_i32_0, %c0_i32_1 : i32, i32, i32
  }
  func.func @transform_30(%arg0: i32) -> (i32, i32, i32) {
    %c0_i32 = arith.constant 0 : i32
    %c0_i32_0 = arith.constant 0 : i32
    %c0_i32_1 = arith.constant 0 : i32
    %c0_i32_2 = arith.constant 0 : i32
    return %c0_i32, %c0_i32_0, %c0_i32_1 : i32, i32, i32
  }
  func.func @transform_31(%arg0: i32) -> (i32, i32, i32) {
    %c0_i32 = arith.constant 0 : i32
    %c0_i32_0 = arith.constant 0 : i32
    %c0_i32_1 = arith.constant 0 : i32
    %c0_i32_2 = arith.constant 0 : i32
    return %c0_i32, %c0_i32_0, %c0_i32_1 : i32, i32, i32
  }
  func.func @transform_32(%arg0: i32) -> (i32, i32, i32) {
    %c0_i32 = arith.constant 0 : i32
    %c0_i32_0 = arith.constant 0 : i32
    %c0_i32_1 = arith.constant 0 : i32
    %c0_i32_2 = arith.constant 0 : i32
    return %c0_i32, %c0_i32_0, %c0_i32_1 : i32, i32, i32
  }
  func.func @transform_33(%arg0: i32) -> (i32, i32, i32) {
    %c0_i32 = arith.constant 0 : i32
    %c0_i32_0 = arith.constant 0 : i32
    %c0_i32_1 = arith.constant 0 : i32
    %c0_i32_2 = arith.constant 0 : i32
    return %c0_i32, %c0_i32_0, %c0_i32_1 : i32, i32, i32
  }
  func.func @transform_34(%arg0: i32) -> (i32, i32) {
    %c0_i32 = arith.constant 0 : i32
    %c0_i32_0 = arith.constant 0 : i32
    %c0_i32_1 = arith.constant 0 : i32
    return %c0_i32, %c0_i32_0 : i32, i32
  }
  func.func @transform_35(%arg0: i32) -> (i32, i32) {
    %c0_i32 = arith.constant 0 : i32
    %c0_i32_0 = arith.constant 0 : i32
    %c0_i32_1 = arith.constant 0 : i32
    return %c0_i32, %c0_i32_0 : i32, i32
  }
  func.func @transform_36(%arg0: i32) -> (i32, i32) {
    %c0_i32 = arith.constant 0 : i32
    %c0_i32_0 = arith.constant 0 : i32
    %c0_i32_1 = arith.constant 0 : i32
    return %c0_i32, %c0_i32_0 : i32, i32
  }
  func.func @transform_37(%arg0: i32) -> (i32, i32) {
    %c0_i32 = arith.constant 0 : i32
    %c0_i32_0 = arith.constant 0 : i32
    %c0_i32_1 = arith.constant 0 : i32
    return %c0_i32, %c0_i32_0 : i32, i32
  }
  func.func @transform_38(%arg0: i32) -> (i32, i32, i32) {
    %c0_i32 = arith.constant 0 : i32
    %c0_i32_0 = arith.constant 0 : i32
    %c0_i32_1 = arith.constant 0 : i32
    return %arg0, %c0_i32, %c0_i32_0 : i32, i32, i32
  }
}

</mosaic_0001>

<bundles_post_ra>
// kernel: transformer_forward.1
= control target key start
LH: loop header
LB: loop body
LE: loop exit
PB: predicated region body
PF: predicated region fallthrough
CT: control target
= control target key end

     0   :  { %s6666_s6 = smov 1   ;;  %s6667_s10 = smov 2   ;;  %s7926_s0 = inlined_call_operand.smem [shape: u32[39], index: -1, kind: input, shape index: {}] }
   0x1   :  { %s6727_s5 = sld [smem:[%s7926_s0]]   ;;  %s6668_s14 = smov 3  }
   0x2   :  { %s6732_s9 = sld [smem:[%s7926_s0 + %s6666_s6]]   ;;  %s6669_s18 = smov 4  }
   0x3   :  { %s6737_s13 = sld [smem:[%s7926_s0 + %s6667_s10]]   ;;  %s6670_s22 = smov 5  }
   0x4   :  { %s6742_s17 = sld [smem:[%s7926_s0 + %s6668_s14]]   ;;  %s6671_s26 = smov 6  }
   0x5   :  { %s6747_s21 = sld [smem:[%s7926_s0 + %s6669_s18]]   ;;  %s6672_s30 = smov 7  }
   0x6   :  { %s6752_s25 = sld [smem:[%s7926_s0 + %s6670_s22]]   ;;  %s6673_s4 = smov 8  }
   0x7   :  { %7997 = sst [smem:[#allocation5_spill]] %s6727_s5  ;;  %s6674_s10 = smov 9  }
   0x8   :  { %7998 = sst [smem:[#allocation6_spill]] %s6732_s9  ;;  %s6675_s15 = smov 10  }
   0x9   :  { %7999 = sst [smem:[#allocation7_spill]] %s6737_s13  ;;  %s6676_s20 = smov 11  }
   0xa   :  { %8000 = sst [smem:[#allocation8_spill]] %s6742_s17  ;;  %s6678_s1 = smov 13  }
   0xb   :  { %8001 = sst [smem:[#allocation9_spill]] %s6747_s21  ;;  %s6679_s7 = smov 14  }
   0xc   :  { %8002 = sst [smem:[#allocation10_spill]] %s6752_s25  ;;  %s6681_s22 = smov 16  }
   0xd   :  { %s6757_s29 = sld [smem:[%s7926_s0 + %s6671_s26]]   ;;  %s6677_s26 = smov 12  }
   0xe   :  { %s6762_s3 = sld [smem:[%s7926_s0 + %s6672_s30]]   ;;  %s6682_s28 = smov 17  }
   0xf   :  { %s6767_s8 = sld [smem:[%s7926_s0 + %s6673_s4]]  }
  0x10   :  { %s6772_s14 = sld [smem:[%s7926_s0 + %s6674_s10]]  }
  0x11   :  { %s6777_s19 = sld [smem:[%s7926_s0 + %s6675_s15]]   ;;  %s6680_s15 = smov 15  }
  0x12   :  { %s6782_s24 = sld [smem:[%s7926_s0 + %s6676_s20]]  }
  0x13   :  { %8003 = sst [smem:[#allocation11_spill]] %s6757_s29 }
  0x14   :  { %8004 = sst [smem:[#allocation12_spill]] %s6762_s3 }
  0x15   :  { %8005 = sst [smem:[#allocation13_spill]] %s6767_s8 }
  0x16   :  { %8006 = sst [smem:[#allocation14_spill]] %s6772_s14 }
  0x17   :  { %8007 = sst [smem:[#allocation15_spill]] %s6777_s19 }
  0x18   :  { %8008 = sst [smem:[#allocation16_spill]] %s6782_s24 }
  0x19   :  { %s6787_s30 = sld [smem:[%s7926_s0 + %s6677_s26]]  }
  0x1a   :  { %s6792_s6 = sld [smem:[%s7926_s0 + %s6678_s1]]  }
  0x1b   :  { %s6797_s12 = sld [smem:[%s7926_s0 + %s6679_s7]]   ;;  %s6683_s7 = smov 18  }
  0x1c   :  { %s6802_s20 = sld [smem:[%s7926_s0 + %s6680_s15]]   ;;  %s6684_s15 = smov 19  }
  0x1d   :  { %s6807_s27 = sld [smem:[%s7926_s0 + %s6681_s22]]   ;;  %s6685_s22 = smov 20  }
  0x1e   :  { %s6812_s4 = sld [smem:[%s7926_s0 + %s6682_s28]]   ;;  %s6686_s28 = smov 21  }
  0x1f   :  { %8009 = sst [smem:[#allocation17_spill]] %s6787_s30 }
  0x20   :  { %8010 = sst [smem:[#allocation18_spill]] %s6792_s6 }
  0x21   :  { %8011 = sst [smem:[#allocation19_spill]] %s6797_s12 }
  0x22   :  { %8012 = sst [smem:[#allocation20_spill]] %s6802_s20 }
  0x23   :  { %s6817_s12 = sld [smem:[%s7926_s0 + %s6683_s7]]   ;;  %s6687_s7 = smov 22  }
  0x24   :  { %8013 = sst [smem:[#allocation21_spill]] %s6812_s4 }
  0x25   :  { %s6822_s20 = sld [smem:[%s7926_s0 + %s6684_s15]]   ;;  %s6688_s15 = smov 23  }
  0x26   :  { %s6827_s9 = sld [smem:[%s7926_s0 + %s6685_s22]]   ;;  %s6689_s22 = smov 24  }
  0x27   :  { %s6832_s4 = sld [smem:[%s7926_s0 + %s6686_s28]]   ;;  %s6690_s28 = smov 25  }
  0x29   :  { %8014 = sst [smem:[#allocation22_spill]] %s6817_s12 }
  0x2a   :  { %s6837_s12 = sld [smem:[%s7926_s0 + %s6687_s7]]   ;;  %s6691_s7 = smov 26  }
  0x2b   :  { %8015 = sst [smem:[#allocation23_spill]] %s6822_s20 }
  0x2c   :  { %8016 = sst [smem:[#allocation24_spill]] %s6827_s9 }
  0x2d   :  { %8017 = sst [smem:[#allocation25_spill]] %s6832_s4 }
  0x2e   :  { %s6842_s20 = sld [smem:[%s7926_s0 + %s6688_s15]]   ;;  %s6692_s15 = smov 27  }
  0x2f   :  { %s6847_s9 = sld [smem:[%s7926_s0 + %s6689_s22]]   ;;  %s6693_s22 = smov 28  }
  0x30   :  { %8018 = sst [smem:[#allocation26_spill]] %s6837_s12 }
  0x31   :  { %s6852_s4 = sld [smem:[%s7926_s0 + %s6690_s28]]   ;;  %s6694_s28 = smov 29  }
  0x32   :  { %s6857_s12 = sld [smem:[%s7926_s0 + %s6691_s7]]   ;;  %s6695_s7 = smov 30  }
  0x34   :  { %8019 = sst [smem:[#allocation27_spill]] %s6842_s20 }
  0x35   :  { %8020 = sst [smem:[#allocation28_spill]] %s6847_s9 }
  0x36   :  { %s6862_s20 = sld [smem:[%s7926_s0 + %s6692_s15]]   ;;  %s6696_s15 = smov 31  }
  0x37   :  { %8021 = sst [smem:[#allocation29_spill]] %s6852_s4 }
  0x38   :  { %8022 = sst [smem:[#allocation30_spill]] %s6857_s12 }
  0x39   :  { %s6867_s9 = sld [smem:[%s7926_s0 + %s6693_s22]]   ;;  %s6697_s22 = smov 32  }
  0x3a   :  { %s6872_s4 = sld [smem:[%s7926_s0 + %s6694_s28]]   ;;  %s6698_s28 = smov 33  }
  0x3b   :  { %s6877_s12 = sld [smem:[%s7926_s0 + %s6695_s7]]   ;;  %s6699_s7 = smov 34  }
  0x3c   :  { %8023 = sst [smem:[#allocation31_spill]] %s6862_s20 }
  0x3d   :  { %s6882_s20 = sld [smem:[%s7926_s0 + %s6696_s15]]   ;;  %s6700_s15 = smov 35  }
  0x3f   :  { %8024 = sst [smem:[#allocation32_spill]] %s6867_s9 }
  0x40   :  { %8025 = sst [smem:[#allocation33_spill]] %s6872_s4 }
  0x41   :  { %8026 = sst [smem:[#allocation34_spill]] %s6877_s12 }
  0x42   :  { %s6887_s9 = sld [smem:[%s7926_s0 + %s6697_s22]]   ;;  %s6701_s22 = smov 36  }
  0x43   :  { %8027 = sst [smem:[#allocation35_spill]] %s6882_s20 }
  0x44   :  { %s6892_s4 = sld [smem:[%s7926_s0 + %s6698_s28]]   ;;  %s6702_s28 = smov 37  }
  0x45   :  { %s6897_s12 = sld [smem:[%s7926_s0 + %s6699_s7]]   ;;  %s6703_s7 = smov 38  }
  0x46   :  { %s6902_s20 = sld [smem:[%s7926_s0 + %s6700_s15]]  }
  0x48   :  { %8028 = sst [smem:[#allocation36_spill]] %s6887_s9 }
  0x49   :  { %s6907_s9 = sld [smem:[%s7926_s0 + %s6701_s22]]  }
  0x4a   :  { %8029 = sst [smem:[#allocation37_spill]] %s6892_s4 }
  0x4b   :  { %8030 = sst [smem:[#allocation38_spill]] %s6897_s12 }
  0x4c   :  { %8031 = sst [smem:[#allocation39_spill]] %s6902_s20 }
  0x4d   :  { %s6912_s4 = sld [smem:[%s7926_s0 + %s6702_s28]]  }
  0x4e   :  { %s6917_s12 = sld [smem:[%s7926_s0 + %s6703_s7]]  }
  0x4f   :  { %8032 = sst [smem:[#allocation40_spill]] %s6907_s9 }
  0x53   :  { %8033 = sst [smem:[#allocation41_spill]] %s6912_s4 }
  0x54   :  { %8034 = sst [smem:[#allocation42_spill]] %s6917_s12 }
  0x55   :  { %82 = vsyncpa [#allocation3], 0 }
  0x56   :  { %84 = vsyncpa [#allocation3 + $0x1], 0  ;;  %s6919_s15 = smov 0   ;;  %s6921_s16 = smov 0  }
  0x57   :  { %s6923_s18 = smov 0   ;;  %s6925_s22 = smov 0  }
  0x58 LB: > { %s8035_s30 = sld [smem:[#allocation17_spill]]  ;;  %s6940_s0 = sadd.s32 4294967295, %s6664_s22   ;;  %s6664_s22 = sphi %s6925_s22, %s8115_s22   ;;  %s6660_s18 = sphi %s6923_s18, %s8118_s18   ;;  %s6656_s16 = sphi %s6921_s16, %s8117_s16   ;;  %s6652_s15 = sphi %s6919_s15, %s8116_s15  }
  0x59   : > { %s8036_s29 = sld [smem:[#allocation11_spill]]  ;;  %s5617_s23 = sadd.s32 4294967294, %s6664_s22  }
  0x5a   : > { %s8037_s25 = sld [smem:[#allocation10_spill]]  ;;  %s6944_s26 = sadd.s32 1, %s6664_s22  }
  0x5b   : > { %s8038_s24 = sld [smem:[#allocation16_spill]]  ;;  %s905_s28 = sadd.s32 1, %s6660_s18 }
  0x5c   : > { %s8039_s19 = sld [smem:[#allocation15_spill]]  ;;  %s902_s1 = ssub.s32 %s6664_s22, %s6944_s26 }
  0x5d   : > { %s8040_s14 = sld [smem:[#allocation14_spill]]  ;;  %p915_p0 = scmp.ne.s32.totalorder %s6660_s18, %s6656_s16 }
  0x5e   : > { %s8041_s8 = sld [smem:[#allocation13_spill]]  ;;  %p903_p1 = scmp.eq.s32.totalorder %s902_s1, 0 }
  0x5f   : > { %s8042_s6 = sld [smem:[#allocation18_spill]]  ;;  %p916_p2 = scmp.eq.s32.totalorder %s6940_s0, 1 }
  0x60   : > { %s8043_s3 = sld [smem:[#allocation12_spill]]  ;;  %p921_p3 = scmp.ne.s32.totalorder %s6656_s16, %s6652_s15 }
  0x61   : > { %s8044_s21 = sld [smem:[#allocation9_spill]]  ;;  %p922_p4 = scmp.eq.s32.totalorder %s5617_s23, 1 }
  0x62   : > { %s8045_s17 = sld [smem:[#allocation8_spill]]  ;;  %p6957_p5 = por %p916_p2, %p915_p0 }
  0x63   : > { %s8046_s13 = sld [smem:[#allocation7_spill]]  ;;  %p6961_p6 = por %p922_p4, %p921_p3 }
  0x64   : > { %8047 = sst [smem:[#allocation43_spill]] %s6652_s15  ;;  %p5620_p7 = scmp.ge.s32.totalorder %s6664_s22, 1 }
  0x65   : > { %8048 = sst [smem:[#allocation44_spill]] %s6656_s16  ;;  %p1063_p8 = scmp.lt.s32.totalorder %s6664_s22, 3 }
  0x66   : > { %8049 = sst [smem:[#allocation45_spill]] %s6660_s18 }
  0x67   : > { %8050 = sst [smem:[#allocation46_spill]] %s6664_s22  ;;  %p1064_p9 = pnand %p5620_p7, %p1063_p8 }
  0x68   : > { %8051 = sst [smem:[#allocation47_spill]] %s6940_s0  ;;  %p1161_p10 = scmp.lt.s32.totalorder (!%p1064_p9), %s6940_s0, 1 }
  0x69   : > { %8052 = sst [smem:[#allocation48_spill]] %s6944_s26  ;;  %s7971_s1 = smov (!%p1064_p9), 96  }
  0x6a   : > { %s6955_s2 = scalar_select %p903_p1, %s6660_s18, %s905_s28  }
  0x6b   : > { %s8054_s7 = scalar_select %p6957_p5, 1, 0 }
  0x6c   : > { %8053 = sst [smem:[#allocation49_spill]] %s6955_s2  ;;  %1067 = sbr.rel (%p1064_p9) target bundleno = 13155 (0x3363), region = 172 }
  0x6d   : > { %8055 = sst [smem:[#allocation50_spill]] %s8054_s7  ;;  %s7944_s2 = smov (!%p1064_p9), 80  }
  0x6e   : > { %s8056_s10 = scalar_select %p6961_p6, 1, 0 }
  0x6f   : > { %s8058_s5 = sld [smem:[#allocation5_spill]] (!%p1064_p9)  ;;  %s8066_s18 = smov (!%p1064_p9), 48  }
  0x70   : > { %8057 = sst [smem:[#allocation51_spill]] %s8056_s10  ;;  %s8067_s26 = smov (!%p1064_p9), 40  }
  0x71   : > { %v6190_v0 = vld [vmem:[%s8046_s13 + $0x28] sm:$0xff]  ;;  %vm1220_vm0 = vcmask 261120   ;;  %v6189_v1 = vld [vmem:[%s8046_s13 + $0x20] sm:$0xff]  ;;  %v6188_v4 = vld [vmem:[%s8046_s13 + $0x18] sm:$0xff]  ;;  %s6979_s11 = scalar_select %p1161_p10, %s6940_s0, 1  ;;  %vm1262_vm1 = vcmask 64512  }
  0x72   : > { %v1240_v2 = vsel %vm1220_vm0, %v6190_v0, 0  ;;  %v1237_v3 = vsel %vm1220_vm0, %v6189_v1, 0  ;;  %v1234_v5 = vsel %vm1220_vm0, %v6188_v4, 0  ;;  %v6187_v6 = vld [vmem:[%s8046_s13 + $0x10] sm:$0xff]  ;;  %v6186_v8 = vld [vmem:[%s8046_s13 + $0x8] sm:$0xff]  ;;  %v6185_v10 = vld [vmem:[%s8046_s13] sm:$0xff] }
  0x73   : > { %1244 = vmatpush.bf16.xpose.msra.mxu0 %v1240_v2  ;;  %v1231_v7 = vsel %vm1220_vm0, %v6187_v6, 0  ;;  %v1228_v9 = vsel %vm1220_vm0, %v6186_v8, 0  ;;  %s6184_s23 = sshll.u32 %s6979_s11, 4  ;;  %v1225_v11 = vsel %vm1220_vm0, %v6185_v10, 0  ;;  %v6389_v16 = vld [vmem:[%s8045_s17] ss:$0 sm:$0xff] }
  0x74   : > { %vm7978_vm2 = vcmask 1041408   ;;  %vm1296_vm3 = vcmask 80896   ;;  %vm1300_vm4 = vcmask 74752   ;;  %s8068_s10 = smov 8   ;;  %s8069_s15 = smov 24  }
  0x75   : > { %s1165_s28 = scalar_lea.vmem %s8058_s5, %s6184_s23  ;;  %s7946_s23 = smov 64  }
  0x76   : > { %v6985_v12 = vld [vmem:[%s1165_s28] sm:$0xff]  ;;  %v6987_v13 = vld [vmem:[%s1165_s28 + $0x8] sm:$0x3]  ;;  %s7950_s28 = smov 88   ;;  %s7948_s5 = smov 120  }
  0x77   : > { %v1185_v14 = vpack.c.bf16 %v6987_v13, %v6985_v12  ;;  %s8070_s22 = smov 16   ;;  %s8071_s7 = sld [smem:[#allocation6_spill]] }
  0x78   : > { %s8090_s0 = sld [smem:[#allocation30_spill]] }
  0x79   : > { %s8091_s16 = sld [smem:[#allocation31_spill]] }
  0x7a   : > { %s8093_s20 = sld [smem:[#allocation33_spill]] }
  0x7b   : > { %1245 = vmatpush.bf16.xpose.msra.mxu0 %v1237_v3  ;;  %s8094_s9 = sld [smem:[#allocation35_spill]] }
  0x7f   : > { %s8092_s4 = smov %s8091_s16 }
  0x83   : > { %1246 = vmatpush.bf16.xpose.msra.mxu0 %v1234_v5 }
  0x8b   : > { %1247 = vmatpush.bf16.xpose.msra.mxu0 %v1231_v7 }
  0x93   : > { %1248 = vmatpush.bf16.xpose.msra.mxu0 %v1228_v9 }
  0x9b   : > { %1249 = vmatpush.bf16.xpose.msra.mxu0 %v1225_v11 }
  0xa2   : > { %5649 = vmatmul.msk.bf16.vlgmr.msra.gmra.mxu0 %vm1220_vm0, %v1185_v14 }
 0x11f   : > { %v1251_v15 = vpop.f32.mrf.mxu0 }
 0x120   : > { %v6997_v19 = vadd.f32 %v6389_v16, %v1251_v15 }
 0x127   : > { %v1253_v17 = vpop.f32.mrf.mxu0 }
 0x128   : > { %v6993_v18 = vadd.f32 %v6389_v16, %v1253_v17 }
 0x12a   : > { %1260 = vrot.lane.b32.xlu0 %v6993_v18, %s7971_s1 }
 0x132   : > { %1258 = vrot.lane.b32.xlu0 %v6997_v19, %s7971_s1 }
 0x13a   : > { %1348 = vrot.lane.b32.xlu0 %v6993_v18, %s7946_s23 }
 0x142   : > { %1387 = vrot.lane.b32.xlu0 %v6997_v19, %s7950_s28 }
 0x14a   : > { %1383 = vrot.lane.b32.xlu0 %v6997_v19, %s7948_s5 }
 0x152   : > { %1385 = vrot.lane.b32.xlu0 %v6993_v18, %s7948_s5  ;;  %s7952_s5 = smov 112  }
 0x15a   : > { %1514 = vrot.lane.b32.xlu0 %v6993_v18, %s7944_s2 }
 0x162   : > { %1512 = vrot.lane.b32.xlu0 %v6997_v19, %s7944_s2  ;;  %s7969_s2 = smov 56  }
 0x19c   : > { %v1261_v20 = vpop.permute.xlu0 %1260 }
 0x19d   : > { %5650 = vmatpush.xpose.msk.msra.mxu1 %vm1262_vm1, %v1261_v20 }
 0x1a4   : > { %v1259_v21 = vpop.permute.xlu0 %1258 }
 0x1a5   : > { %5651 = vmatpush.xpose.msk.msra.mxu1 %vm1262_vm1, %v1259_v21 }
 0x1a8   : > { %5652 = vmatmul.msk.f32.vlgmr.msra.gmra.mxu1 %vm1262_vm1, %v6997_v19 }
 0x1ac   : > { %v1349_v22 = vpop.permute.xlu0 %1348 }
 0x1ad   : > { %5654 = vmatpush.msk.msra.mxu3 %vm7978_vm2, %v1349_v22 }
 0x1b0   : > { %5653 = vmatmul.msk.f32.gmra.mxu1 %vm1262_vm1, %v6993_v18 }
 0x1b4   : > { %v7020_v23 = vpop.permute.xlu0 %1387 }
 0x1bc   : > { %v7022_v24 = vpop.permute.xlu0 %1383 }
 0x1c4   : > { %v7024_v25 = vpop.permute.xlu0 %1385 }
 0x1cc   : > { %v1515_v26 = vpop.permute.xlu0 %1514 }
 0x1cd   : > { %5664 = vmatpush.xpose.msk.msrb.mxu1 %vm1262_vm1, %v1515_v26 }
 0x1d4   : > { %v1513_v27 = vpop.permute.xlu0 %1512 }
 0x1d5   : > { %5665 = vmatpush.xpose.msk.msrb.mxu1 %vm1262_vm1, %v1513_v27 }
 0x225   : > { %v1288_v28 = vpop.f32.mrf.mxu1 }
 0x226   : > { %v1294_v29 = vmul.f32 0.35355338, %v1288_v28 }
 0x228   : > { %v1297_v30 = vsel %vm1296_vm3, %v1294_v29, -inf }
 0x229   : > { %1298 = vmax.xlane.f32.xlu1 %v1297_v30 }
 0x22d   : > { %v1291_v31 = vpop.f32.mrf.mxu1 }
 0x22e   : > { %v1295_v32 = vmul.f32 0.35355338, %v1291_v31 }
 0x230   : > { %v1301_v33 = vsel %vm1300_vm4, %v1295_v32, -inf }
 0x231   : > { %1302 = vmax.xlane.f32.xlu1 %v1301_v33 }
 0x24a   : > { %1346 = vrot.lane.b32.xlu1 %v6997_v19, %s7946_s23  ;;  %s7956_s23 = smov 72  }
 0x29c   : > { %v1299_v34 = vpop.xlane.xlu1 %1298 }
 0x29d   : > { %v1304_v35 = vsub.f32 %v1294_v29, %v1299_v34 }
 0x29f   : > { %v1306_v36 = vmul.f32 1.442695, %v1304_v35 }
 0x2a1   : > { %6434 = vpow2.f32 %v1306_v36 }
 0x2a4   : > { %v1303_v37 = vpop.xlane.xlu1 %1302 }
 0x2a5   : > { %v1305_v38 = vsub.f32 %v1295_v32, %v1303_v37 }
 0x2a7   : > { %v6435_v39 = vpop.eup %6434  ;;  %v1308_v40 = vmul.f32 1.442695, %v1305_v38 }
 0x2a8   : > { %v1310_v41 = vsel %vm1296_vm3, %v6435_v39, 0.0 }
 0x2a9   : > { %6436 = vpow2.f32 %v1308_v40  ;;  %1311 = vadd.xlane.f32.xlu2 %v1310_v41 }
 0x2af   : > { %v6437_v42 = vpop.eup %6436 }
 0x2b0   : > { %v1313_v43 = vsel %vm1300_vm4, %v6437_v42, 0.0 }
 0x2b1   : > { %1314 = vadd.xlane.f32.xlu2 %v1313_v43 }
 0x2bc   : > { %v1347_v44 = vpop.permute.xlu1 %1346 }
 0x2bd   : > { %1375 = vmatpush.msra.mxu3 %v1347_v44 }
 0x2c9   : > { %1389 = vrot.lane.b32.xlu2 %v6993_v18, %s7950_s28  ;;  %s7954_s28 = smov 104  }
 0x31c   : > { %v1312_v45 = vpop.xlane.xlu2 %1311 }
 0x31d   : > { %6438 = vrcp.f32 %v1312_v45  ;;  %v1327_v50 = vand.u32 2147483648, %v1312_v45  ;;  %v1325_v52 = vand.u32 2147483647, %v1312_v45  ;;  %vm1321_vm6 = vweird.f32 %v1312_v45 }
 0x31f   : > { %v1328_v55 = vor.u32 1.1754944e-38, %v1327_v50  ;;  %vm1326_vm8 = vcmp.eq.f32.partialorder %v1325_v52, 8.507059e+37 }
 0x323   : > { %v6439_v46 = vpop.eup %6438 }
 0x324   : > { %v1317_v47 = vmul.f32 %v6439_v46, %v1312_v45  ;;  %v1315_v48 = vpop.xlane.xlu2 %1314  ;;  %vm1322_vm5 = vweird.f32 %v6439_v46 }
 0x325   : > { %6440 = vrcp.f32 %v1315_v48  ;;  %vm1323_vm7 = vmor %vm1321_vm6, %vm1322_vm5  ;;  %v1342_v62 = vand.u32 2147483648, %v1315_v48  ;;  %v1340_v0 = vand.u32 2147483647, %v1315_v48  ;;  %vm1336_vm10 = vweird.f32 %v1315_v48 }
 0x326   : > { %v1318_v49 = vsub.f32 1.0, %v1317_v47 }
 0x327   : > { %v1343_v2 = vor.u32 1.1754944e-38, %v1342_v62  ;;  %vm1341_vm12 = vcmp.eq.f32.partialorder %v1340_v0, 8.507059e+37 }
 0x328   : > { %v1319_v51 = vmul.f32 %v6439_v46, %v1318_v49 }
 0x32a   : > { %v1320_v53 = vadd.f32 %v6439_v46, %v1319_v51 }
 0x32b   : > { %v6441_v54 = vpop.eup %6440 }
 0x32c   : > { %v1332_v56 = vmul.f32 %v6441_v54, %v1315_v48  ;;  %v1390_v57 = vpop.permute.xlu2 %1389  ;;  %v1324_v58 = vsel %vm1323_vm7, %v6439_v46, %v1320_v53  ;;  %vm1337_vm9 = vweird.f32 %v6441_v54 }
 0x32d   : > { %5657 = vmatpush.xpose.msk.msrb.mxu3 %vm1262_vm1, %v1390_v57  ;;  %v1329_v59 = vsel %vm1326_vm8, %v1328_v55, %v1324_v58  ;;  %vm1338_vm11 = vmor %vm1336_vm10, %vm1337_vm9 }
 0x32e   : > { %v1333_v60 = vsub.f32 1.0, %v1332_v56  ;;  %v1330_v61 = vmul.f32 %v6435_v39, %v1329_v59 }
 0x330   : > { %5655 = vmatmul.msk.f32.vlgmr.msra.gmra.mxu3 %vm1296_vm3, %v1330_v61  ;;  %v1334_v63 = vmul.f32 %v6441_v54, %v1333_v60 }
 0x331   : > { %5658 = vmatpush.xpose.msk.msrb.mxu3 %vm1262_vm1, %v7020_v23 }
 0x332   : > { %v1335_v1 = vadd.f32 %v6441_v54, %v1334_v63 }
 0x334   : > { %v1339_v3 = vsel %vm1338_vm11, %v6441_v54, %v1335_v1 }
 0x335   : > { %v1344_v4 = vsel %vm1341_vm12, %v1343_v2, %v1339_v3 }
 0x336   : > { %v1345_v5 = vmul.f32 %v6437_v42, %v1344_v4 }
 0x338   : > { %5656 = vmatmul.msk.f32.gmra.mxu3 %vm1296_vm3, %v1345_v5 }
 0x340   : > { %5659 = vmatmul.msk.f32.vlgmr.msrb.gmra.mxu3 %vm1262_vm1, %v7022_v24 }
 0x348   : > { %5660 = vmatmul.msk.f32.gmra.mxu3 %vm1262_vm1, %v7024_v25 }
 0x3b3   : > { %v7045_v6 = vpop.f32.mrf.mxu3 }
 0x3bb   : > { %v7047_v7 = vpop.f32.mrf.mxu3 }
 0x3c3   : > { %v1416_v8 = vpop.f32.mrf.mxu3 }
 0x3c4   : > { %v1422_v9 = vmul.f32 0.35355338, %v1416_v8 }
 0x3c6   : > { %v1424_v10 = vsel %vm1296_vm3, %v1422_v9, -inf }
 0x3c7   : > { %1425 = vmax.xlane.f32.xlu2 %v1424_v10 }
 0x3cb   : > { %v1419_v11 = vpop.f32.mrf.mxu3 }
 0x3cc   : > { %v1423_v14 = vmul.f32 0.35355338, %v1419_v11 }
 0x3ce   : > { %v1427_v15 = vsel %vm1300_vm4, %v1423_v14, -inf }
 0x3cf   : > { %1428 = vmax.xlane.f32.xlu1 %v1427_v15 }
 0x3df   : > { %1472 = vrot.lane.b32.xlu2 %v6997_v19, %s7969_s2 }
 0x3e7   : > { %1637 = vrot.lane.b32.xlu2 %v6997_v19, %s7956_s23 }
 0x3e8   : > { %1474 = vrot.lane.b32.xlu1 %v6993_v18, %s7969_s2 }
 0x3f0   : > { %1639 = vrot.lane.b32.xlu1 %v6993_v18, %s7956_s23  ;;  %s7958_s23 = smov 8  }
 0x3f8   : > { %1508 = vrot.lane.b32.xlu1 %v6997_v19, %s7952_s5 }
 0x400   : > { %1635 = vrot.lane.b32.xlu1 %v6993_v18, %s7954_s28 }
 0x43a   : > { %v1426_v16 = vpop.xlane.xlu2 %1425 }
 0x43b   : > { %v1430_v17 = vsub.f32 %v1422_v9, %v1426_v16 }
 0x43d   : > { %v1432_v20 = vmul.f32 1.442695, %v1430_v17 }
 0x43f   : > { %6442 = vpow2.f32 %v1432_v20 }
 0x442   : > { %v1429_v21 = vpop.xlane.xlu1 %1428  ;;  %v1473_v29 = vpop.permute.xlu2 %1472 }
 0x443   : > { %v1431_v22 = vsub.f32 %v1423_v14, %v1429_v21 }
 0x445   : > { %v6443_v23 = vpop.eup %6442  ;;  %v1434_v24 = vmul.f32 1.442695, %v1431_v22 }
 0x446   : > { %v1436_v25 = vsel %vm1296_vm3, %v6443_v23, 0.0 }
 0x447   : > { %6444 = vpow2.f32 %v1434_v24  ;;  %1437 = vadd.xlane.f32.xlu0 %v1436_v25 }
 0x44a   : > { %v1638_v31 = vpop.permute.xlu2 %1637 }
 0x44d   : > { %v6445_v26 = vpop.eup %6444 }
 0x44e   : > { %v1439_v27 = vsel %vm1300_vm4, %v6445_v26, 0.0 }
 0x44f   : > { %1440 = vadd.xlane.f32.xlu2 %v1439_v27 }
 0x45a   : > { %v1475_v28 = vpop.permute.xlu1 %1474 }
 0x45b   : > { %1633 = vrot.lane.b32.xlu0 %v6997_v19, %s7954_s28  ;;  %5661 = vmatpush.msk.msra.mxu2 %vm7978_vm2, %v1475_v28  ;;  %s7960_s28 = smov 40  }
 0x45d   : > { %1500 = vmatpush.msra.mxu2 %v1473_v29 }
 0x462   : > { %v1640_v30 = vpop.permute.xlu1 %1639 }
 0x463   : > { %5671 = vmatpush.xpose.msk.msrb.mxu2 %vm1262_vm1, %v1640_v30 }
 0x467   : > { %1510 = vrot.lane.b32.xlu2 %v6993_v18, %s7952_s5  ;;  %5672 = vmatpush.xpose.msk.msrb.mxu2 %vm1262_vm1, %v1638_v31  ;;  %s7966_s5 = smov 48  }
 0x46a   : > { %v1509_v32 = vpop.permute.xlu1 %1508 }
 0x46b   : > { %5666 = vmatmul.msk.f32.vlgmr.msrb.gmra.mxu1 %vm1262_vm1, %v1509_v32 }
 0x472   : > { %v1636_v59 = vpop.permute.xlu1 %1635 }
 0x4ba   : > { %v1438_v33 = vpop.xlane.xlu0 %1437 }
 0x4bb   : > { %6446 = vrcp.f32 %v1438_v33  ;;  %v1453_v38 = vand.u32 2147483648, %v1438_v33  ;;  %v1451_v40 = vand.u32 2147483647, %v1438_v33  ;;  %vm1447_vm14 = vweird.f32 %v1438_v33 }
 0x4bd   : > { %v1454_v43 = vor.u32 1.1754944e-38, %v1453_v38  ;;  %vm1452_vm5 = vcmp.eq.f32.partialorder %v1451_v40, 8.507059e+37 }
 0x4c1   : > { %v6447_v34 = vpop.eup %6446 }
 0x4c2   : > { %v1443_v35 = vmul.f32 %v6447_v34, %v1438_v33  ;;  %v1441_v36 = vpop.xlane.xlu2 %1440  ;;  %vm1448_vm13 = vweird.f32 %v6447_v34 }
 0x4c3   : > { %6448 = vrcp.f32 %v1441_v36  ;;  %vm1449_vm15 = vmor %vm1447_vm14, %vm1448_vm13  ;;  %v1468_v50 = vand.u32 2147483648, %v1441_v36  ;;  %v1466_v52 = vand.u32 2147483647, %v1441_v36  ;;  %vm1462_vm7 = vweird.f32 %v1441_v36 }
 0x4c4   : > { %v1444_v37 = vsub.f32 1.0, %v1443_v35 }
 0x4c5   : > { %v1469_v54 = vor.u32 1.1754944e-38, %v1468_v50  ;;  %vm1467_vm9 = vcmp.eq.f32.partialorder %v1466_v52, 8.507059e+37 }
 0x4c6   : > { %v1445_v39 = vmul.f32 %v6447_v34, %v1444_v37 }
 0x4c8   : > { %v1446_v41 = vadd.f32 %v6447_v34, %v1445_v39 }
 0x4c9   : > { %v6449_v42 = vpop.eup %6448 }
 0x4ca   : > { %v1458_v44 = vmul.f32 %v6449_v42, %v1441_v36  ;;  %v1511_v45 = vpop.permute.xlu2 %1510  ;;  %v1450_v46 = vsel %vm1449_vm15, %v6447_v34, %v1446_v41  ;;  %vm1463_vm6 = vweird.f32 %v6449_v42 }
 0x4cb   : > { %5667 = vmatmul.msk.f32.gmra.mxu1 %vm1262_vm1, %v1511_v45  ;;  %v1455_v47 = vsel %vm1452_vm5, %v1454_v43, %v1450_v46  ;;  %vm1464_vm8 = vmor %vm1462_vm7, %vm1463_vm6 }
 0x4cc   : > { %v1459_v48 = vsub.f32 1.0, %v1458_v44  ;;  %v1456_v49 = vmul.f32 %v6443_v23, %v1455_v47 }
 0x4cd   : > { %v1634_v58 = vpop.permute.xlu0 %1633 }
 0x4ce   : > { %5662 = vmatmul.msk.f32.vlgmr.msra.gmra.mxu2 %vm1296_vm3, %v1456_v49  ;;  %v1460_v51 = vmul.f32 %v6449_v42, %v1459_v48 }
 0x4d0   : > { %v1461_v53 = vadd.f32 %v6449_v42, %v1460_v51 }
 0x4d2   : > { %v1465_v55 = vsel %vm1464_vm8, %v6449_v42, %v1461_v53 }
 0x4d3   : > { %v1470_v56 = vsel %vm1467_vm9, %v1469_v54, %v1465_v55 }
 0x4d4   : > { %v1471_v57 = vmul.f32 %v6445_v26, %v1470_v56 }
 0x4d6   : > { %5663 = vmatmul.msk.f32.gmra.mxu2 %vm1296_vm3, %v1471_v57 }
 0x4de   : > { %5673 = vmatmul.msk.f32.vlgmr.msrb.gmra.mxu2 %vm1262_vm1, %v1634_v58 }
 0x4e6   : > { %5674 = vmatmul.msk.f32.gmra.mxu2 %vm1262_vm1, %v1636_v59 }
 0x4e8   : > { %v1541_v60 = vpop.f32.mrf.mxu1 }
 0x4e9   : > { %v1547_v61 = vmul.f32 0.35355338, %v1541_v60 }
 0x4eb   : > { %v1549_v62 = vsel %vm1296_vm3, %v1547_v61, -inf }
 0x4ec   : > { %1550 = vmax.xlane.f32.xlu0 %v1549_v62 }
 0x548   : > { %v1544_v63 = vpop.f32.mrf.mxu1 }
 0x549   : > { %v1548_v0 = vmul.f32 0.35355338, %v1544_v63 }
 0x54b   : > { %v1552_v1 = vsel %vm1300_vm4, %v1548_v0, -inf }
 0x54c   : > { %1553 = vmax.xlane.f32.xlu1 %v1552_v1 }
 0x551   : > { %v1502_v2 = vpop.f32.mrf.mxu2 }
 0x559   : > { %v1505_v3 = vpop.f32.mrf.mxu2 }
 0x55a   : > { %v6359_v36 = vpack.i.bf16 %v1505_v3, %v1502_v2 }
 0x55f   : > { %v1551_v4 = vpop.xlane.xlu0 %1550 }
 0x560   : > { %v1555_v5 = vsub.f32 %v1547_v61, %v1551_v4 }
 0x561   : > { %v1666_v8 = vpop.f32.mrf.mxu2 }
 0x562   : > { %v1557_v9 = vmul.f32 1.442695, %v1555_v5  ;;  %v1672_v10 = vmul.f32 0.35355338, %v1666_v8 }
 0x564   : > { %6450 = vpow2.f32 %v1557_v9  ;;  %v1674_v11 = vsel %vm1296_vm3, %v1672_v10, -inf }
 0x565   : > { %1675 = vmax.xlane.f32.xlu2 %v1674_v11 }
 0x569   : > { %v1669_v14 = vpop.f32.mrf.mxu2 }
 0x56a   : > { %v7081_v15 = vpop.eup %6450  ;;  %v1673_v16 = vmul.f32 0.35355338, %v1669_v14 }
 0x56b   : > { %v1561_v17 = vsel %vm1296_vm3, %v7081_v15, 0.0 }
 0x56c   : > { %v1677_v20 = vsel %vm1300_vm4, %v1673_v16, -inf }
 0x56d   : > { %1678 = vmax.xlane.f32.xlu0 %v1677_v20  ;;  %1562 = vadd.xlane.f32.xlu2 %v1561_v17 }
 0x5bf   : > { %v1554_v21 = vpop.xlane.xlu1 %1553 }
 0x5c0   : > { %v1556_v22 = vsub.f32 %v1548_v0, %v1554_v21 }
 0x5c2   : > { %v1559_v23 = vmul.f32 1.442695, %v1556_v22 }
 0x5c4   : > { %6452 = vpow2.f32 %v1559_v23 }
 0x5ca   : > { %v7086_v24 = vpop.eup %6452 }
 0x5cb   : > { %v1564_v25 = vsel %vm1300_vm4, %v7086_v24, 0.0 }
 0x5cc   : > { %1565 = vadd.xlane.f32.xlu0 %v1564_v25 }
 0x5d8   : > { %v1676_v26 = vpop.xlane.xlu2 %1675 }
 0x5d9   : > { %v1680_v27 = vsub.f32 %v1672_v10, %v1676_v26 }
 0x5db   : > { %v1682_v28 = vmul.f32 1.442695, %v1680_v27 }
 0x5dd   : > { %6454 = vpow2.f32 %v1682_v28 }
 0x5e0   : > { %1597 = vrot.lane.b32.xlu0 %v6997_v19, %s7966_s5  ;;  %v1679_v29 = vpop.xlane.xlu0 %1678  ;;  %v1563_v37 = vpop.xlane.xlu2 %1562 }
 0x5e1   : > { %v1681_v30 = vsub.f32 %v1673_v16, %v1679_v29  ;;  %v1578_v58 = vand.u32 2147483648, %v1563_v37  ;;  %vm1572_vm15 = vweird.f32 %v1563_v37  ;;  %v1576_v62 = vand.u32 2147483647, %v1563_v37 }
 0x5e3   : > { %v6455_v31 = vpop.eup %6454  ;;  %v1684_v32 = vmul.f32 1.442695, %v1681_v30  ;;  %v1579_v5 = vor.u32 1.1754944e-38, %v1578_v58  ;;  %vm1577_vm7 = vcmp.eq.f32.partialorder %v1576_v62, 8.507059e+37 }
 0x5e4   : > { %v1686_v33 = vsel %vm1296_vm3, %v6455_v31, 0.0 }
 0x5e5   : > { %1687 = vadd.xlane.f32.xlu1 %v1686_v33  ;;  %6456 = vpow2.f32 %v1684_v32 }
 0x5e6   : > { %6458 = vrcp.f32 %v1563_v37 }
 0x5e8   : > { %1722 = vrot.lane.b32.xlu0 %v6997_v19, %s7960_s28 }
 0x5eb   : > { %v7095_v34 = vpop.eup %6456 }
 0x5ec   : > { %v1689_v35 = vsel %vm1300_vm4, %v7095_v34, 0.0  ;;  %v6459_v38 = vpop.eup %6458 }
 0x5ed   : > { %1690 = vadd.xlane.f32.xlu2 %v1689_v35  ;;  %v1568_v40 = vmul.f32 %v6459_v38, %v1563_v37  ;;  %vm1573_vm12 = vweird.f32 %v6459_v38 }
 0x5ee   : > { %vm1574_vm5 = vmor %vm1572_vm15, %vm1573_vm12  ;;  %vm1784_vm15 = vcmask 130048  }
 0x5ef   : > { %v1569_v42 = vsub.f32 1.0, %v1568_v40 }
 0x5f1   : > { %v1570_v47 = vmul.f32 %v6459_v38, %v1569_v42 }
 0x5f3   : > { %v1571_v55 = vadd.f32 %v6459_v38, %v1570_v47 }
 0x5f5   : > { %v1575_v2 = vsel %vm1574_vm5, %v6459_v38, %v1571_v55  ;;  %v6191_v38 = vld [vmem:[%s8044_s21] sm:$0xff]  ;;  %vm1787_vm5 = vcmask 195584  }
 0x5f6   : > { %v1580_v10 = vsel %vm1577_vm7, %v1579_v5, %v1575_v2 }
 0x5f7   : > { %v1581_v22 = vmul.f32 %v7081_v15, %v1580_v10 }
 0x5fe   : > { %1599 = vrot.lane.b32.xlu1 %v6993_v18, %s7966_s5  ;;  %s8061_s5 = smov 64  }
 0x605   : > { %1724 = vrot.lane.b32.xlu2 %v6993_v18, %s7960_s28  ;;  %s7962_s28 = smov 16  }
 0x606   : > { %6360 = vrot.lane.b32.xlu1 %v6359_v36, %s7958_s23  ;;  %s7964_s23 = smov 24   ;;  %v6192_v36 = vld [vmem:[%s8044_s21 + $0x8] sm:$0xff] }
 0x607   : > { %v1812_v37 = vsel %vm1220_vm0, %v6192_v36, 0 }
 0x63f   : > { %v7104_v19 = vpop.xlane.xlu0 %1565 }
 0x640   : > { %v1593_v21 = vand.u32 2147483648, %v7104_v19  ;;  %vm1587_vm12 = vweird.f32 %v7104_v19  ;;  %v1591_v25 = vand.u32 2147483647, %v7104_v19 }
 0x642   : > { %v1594_v28 = vor.u32 1.1754944e-38, %v1593_v21 }
 0x652   : > { %v1598_v45 = vpop.permute.xlu0 %1597 }
 0x658   : > { %v1688_v39 = vpop.xlane.xlu1 %1687 }
 0x659   : > { %6460 = vrcp.f32 %v1688_v39  ;;  %v1703_v48 = vand.u32 2147483648, %v1688_v39  ;;  %v1701_v51 = vand.u32 2147483647, %v1688_v39  ;;  %vm1697_vm11 = vweird.f32 %v1688_v39 }
 0x65a   : > { %6462 = vrcp.f32 %v7104_v19  ;;  %v1723_v0 = vpop.permute.xlu0 %1722 }
 0x65b   : > { %v1704_v53 = vor.u32 1.1754944e-38, %v1703_v48  ;;  %vm1702_vm14 = vcmp.eq.f32.partialorder %v1701_v51, 8.507059e+37 }
 0x65f   : > { %v6461_v41 = vpop.eup %6460 }
 0x660   : > { %v1693_v43 = vmul.f32 %v6461_v41, %v1688_v39  ;;  %v7107_v44 = vpop.eup %6462  ;;  %v1691_v18 = vpop.xlane.xlu2 %1690  ;;  %vm1698_vm10 = vweird.f32 %v6461_v41 }
 0x661   : > { %6464 = vrcp.f32 %v1691_v18  ;;  %v1583_v49 = vmul.f32 %v7107_v44, %v7104_v19  ;;  %vm1699_vm13 = vmor %vm1697_vm11, %vm1698_vm10  ;;  %v1718_v3 = vand.u32 2147483648, %v1691_v18  ;;  %v1716_v9 = vand.u32 2147483647, %v1691_v18 }
 0x662   : > { %v1694_v46 = vsub.f32 1.0, %v1693_v43  ;;  %vm1712_vm8 = vweird.f32 %v1691_v18  ;;  %vm1588_vm10 = vweird.f32 %v7107_v44 }
 0x663   : > { %v1584_v56 = vsub.f32 1.0, %v1583_v49  ;;  %v1719_v16 = vor.u32 1.1754944e-38, %v1718_v3  ;;  %vm1717_vm11 = vcmp.eq.f32.partialorder %v1716_v9, 8.507059e+37 }
 0x664   : > { %v1695_v50 = vmul.f32 %v6461_v41, %v1694_v46 }
 0x665   : > { %v1585_v4 = vmul.f32 %v7107_v44, %v1584_v56 }
 0x666   : > { %v1696_v52 = vadd.f32 %v6461_v41, %v1695_v50 }
 0x667   : > { %v6465_v54 = vpop.eup %6464  ;;  %v1586_v17 = vadd.f32 %v7107_v44, %v1585_v4 }
 0x668   : > { %v1700_v57 = vsel %vm1699_vm13, %v6461_v41, %v1696_v52  ;;  %v1708_v59 = vmul.f32 %v6465_v54, %v1691_v18  ;;  %v1725_v60 = vpop.permute.xlu2 %1724  ;;  %vm1713_vm6 = vweird.f32 %v6465_v54  ;;  %vm1589_vm13 = vmor %vm1587_vm12, %vm1588_vm10 }
 0x669   : > { %v1705_v61 = vsel %vm1702_vm14, %v1704_v53, %v1700_v57  ;;  %5675 = vmatpush.msk.msra.mxu1 %vm7978_vm2, %v1725_v60  ;;  %vm1714_vm9 = vmor %vm1712_vm8, %vm1713_vm6  ;;  %v1590_v27 = vsel %vm1589_vm13, %v7107_v44, %v1586_v17  ;;  %vm1592_vm14 = vcmp.eq.f32.partialorder %v1591_v25, 8.507059e+37  ;;  %v6390_v53 = vld [vmem:[%s8037_s25] ss:$0 sm:$0xff]  ;;  %vm1841_vm6 = vcmask 254976  }
 0x66a   : > { %v1706_v63 = vmul.f32 %v6455_v31, %v1705_v61  ;;  %v1709_v1 = vsub.f32 1.0, %v1708_v59  ;;  %v1595_v29 = vsel %vm1592_vm14, %v1594_v28, %v1590_v27  ;;  %v6718_v60 = vmov 32.0   ;;  %v6193_v25 = vld [vmem:[%s8041_s8] sm:$0xff] }
 0x66b   : > { %1750 = vmatpush.msra.mxu1 %v1723_v0  ;;  %v1596_v15 = vmul.f32 %v7086_v24, %v1595_v29  ;;  %v1809_v24 = vsel %vm1220_vm0, %v6191_v38, 0  ;;  %6466 = vrcp.f32 %v6718_v60  ;;  %v1937_v27 = vsel %vm1220_vm0, %v6193_v25, 0 }
 0x66c   : > { %5676 = vmatmul.msk.f32.vlgmr.msra.gmra.mxu1 %vm1296_vm3, %v1706_v63  ;;  %v1710_v8 = vmul.f32 %v6465_v54, %v1709_v1  ;;  %vm1979_vm14 = vcmask 523264  }
 0x66e   : > { %v1711_v11 = vadd.f32 %v6465_v54, %v1710_v8 }
 0x670   : > { %v1600_v14 = vpop.permute.xlu1 %1599  ;;  %v1715_v20 = vsel %vm1714_vm9, %v6465_v54, %v1711_v11 }
 0x671   : > { %5668 = vmatpush.msk.msra.mxu3 %vm7978_vm2, %v1600_v14  ;;  %v1720_v23 = vsel %vm1717_vm11, %v1719_v16, %v1715_v20  ;;  %v6467_v61 = vpop.eup %6466  ;;  %v6196_v16 = vld [vmem:[%s8041_s8 + $0x18] sm:$0xff]  ;;  %v6195_v20 = vld [vmem:[%s8041_s8 + $0x10] sm:$0xff] }
 0x672   : > { %v1721_v26 = vmul.f32 %v7095_v34, %v1720_v23  ;;  %v1846_v62 = vmul.f32 32.0, %v6467_v61  ;;  %vm1850_vm7 = vweird.f32 %v6467_v61  ;;  %v1946_v17 = vsel %vm1220_vm0, %v6196_v16, 0 }
 0x673   : > { %1625 = vmatpush.msra.mxu3 %v1598_v45  ;;  %1952 = vmatpush.bf16.xpose.msra.mxu2 %v1946_v17  ;;  %v1943_v21 = vsel %vm1220_vm0, %v6195_v20, 0 }
 0x674   : > { %5669 = vmatmul.msk.f32.vlgmr.msra.gmra.mxu3 %vm1296_vm3, %v1581_v22  ;;  %5677 = vmatmul.msk.f32.gmra.mxu1 %vm1296_vm3, %v1721_v26  ;;  %v1847_v63 = vsub.f32 1.0, %v1846_v62  ;;  %v6194_v22 = vld [vmem:[%s8041_s8 + $0x8] sm:$0xff]  ;;  %v6394_v62 = vld [vmem:[%s8038_s24] ss:$0 sm:$0xff] }
 0x675   : > { %1820 = vmatpush.bf16.xpose.msrb.mxu3 %v1812_v37  ;;  %v1940_v23 = vsel %vm1220_vm0, %v6194_v22, 0 }
 0x676   : > { %v1848_v0 = vmul.f32 %v6467_v61, %v1847_v63 }
 0x678   : > { %v6361_v19 = vpop.permute.xlu1 %6360 }
 0x679   : > { %v6363_v40 = vunpack.i.h.bf16 %v6361_v19  ;;  %v6362_v41 = vunpack.i.l.bf16 %v6361_v19 }
 0x67b   : > { %v1783_v45 = vsel %vm1262_vm1, %v7047_v7, %v6363_v40  ;;  %v1782_v18 = vsel %vm1262_vm1, %v7045_v6, %v6362_v41  ;;  %1953 = vmatpush.bf16.xpose.msra.mxu2 %v1943_v21 }
 0x67c   : > { %5670 = vmatmul.msk.f32.gmra.mxu3 %vm1296_vm3, %v1596_v15 }
 0x67d   : > { %1821 = vmatpush.bf16.xpose.msrb.mxu3 %v1809_v24 }
 0x683   : > { %1954 = vmatpush.bf16.xpose.msra.mxu2 %v1940_v23 }
 0x68b   : > { %1955 = vmatpush.bf16.xpose.msra.mxu2 %v1937_v27 }
 0x6e9   : > { %v1752_v30 = vpop.f32.mrf.mxu1 }
 0x6f1   : > { %v1755_v31 = vpop.f32.mrf.mxu1 }
 0x6f2   : > { %v6369_v32 = vpack.i.bf16 %v1755_v31, %v1752_v30 }
 0x6f4   : > { %6370 = vrot.lane.b32.xlu0 %v6369_v32, %s7964_s23  ;;  %s8060_s23 = smov 120  }
 0x6f7   : > { %v1627_v33 = vpop.f32.mrf.mxu3 }
 0x6ff   : > { %v1630_v34 = vpop.f32.mrf.mxu3 }
 0x700   : > { %v6364_v35 = vpack.i.bf16 %v1630_v34, %v1627_v33 }
 0x702   : > { %6365 = vrot.lane.b32.xlu2 %v6364_v35, %s7962_s28  ;;  %s8059_s28 = smov 88  }
 0x75c   : > { %v6366_v39 = vpop.permute.xlu2 %6365 }
 0x75d   : > { %v6368_v42 = vunpack.i.h.bf16 %v6366_v39  ;;  %v6367_v43 = vunpack.i.l.bf16 %v6366_v39 }
 0x75f   : > { %v1786_v48 = vsel %vm1784_vm15, %v1783_v45, %v6368_v42  ;;  %v1785_v49 = vsel %vm1784_vm15, %v1782_v18, %v6367_v43  ;;  %v6391_v42 = vld [vmem:[%s8036_s29] ss:$0 sm:$0xff] }
 0x766   : > { %v6371_v44 = vpop.permute.xlu0 %6370 }
 0x767   : > { %v6373_v46 = vunpack.i.h.bf16 %v6371_v44  ;;  %v6372_v47 = vunpack.i.l.bf16 %v6371_v44 }
 0x769   : > { %v1789_v50 = vsel %vm1787_vm5, %v1786_v48, %v6373_v46  ;;  %v1788_v51 = vsel %vm1787_vm5, %v1785_v49, %v6372_v47  ;;  %v6392_v47 = vld [vmem:[%s8043_s3] ss:$0 sm:$0xff] }
 0x76a   : > { %v1794_v52 = vpack.c.bf16 %v1789_v50, %v1788_v51 }
 0x76c   : > { %5686 = vmatmul.msk.bf16.vlgmr.msrb.gmra.mxu3 %vm1220_vm0, %v1794_v52  ;;  %v6198_v52 = vld [vmem:[%s8039_s19 + $0x8] sm:$0xff] }
 0x7ef   : > { %v1823_v54 = vpop.f32.mrf.mxu3 }
 0x7f0   : > { %v1828_v7 = vadd.f32 %v1823_v54, %v6985_v12  ;;  %v1849_v12 = vadd.f32 %v6467_v61, %v1848_v0  ;;  %v6197_v54 = vld [vmem:[%s8039_s19] sm:$0xff] }
 0x7f2   : > { %v1834_v55 = vadd.f32 %v6390_v53, %v1828_v7  ;;  %v7148_v1 = vsel %vm1850_vm7, %v6467_v61, %v1849_v12  ;;  %v1984_v7 = vsel %vm1979_vm14, %v6197_v54, 0 }
 0x7f4   : > { %v1838_v6 = vsel %vm1220_vm0, %v1834_v55, 0.0 }
 0x7f5   : > { %1839 = vadd.xlane.f32.xlu1 %v1838_v6  ;;  %v6393_v6 = vld [vmem:[%s8040_s14] ss:$0 sm:$0xff] }
 0x7f7   : > { %v1825_v56 = vpop.f32.mrf.mxu3 }
 0x7f8   : > { %v1829_v57 = vadd.f32 %v1825_v56, %v6987_v13 }
 0x7fa   : > { %v1835_v58 = vadd.f32 %v6390_v53, %v1829_v57  ;;  %v1987_v53 = vsel %vm1979_vm14, %v6198_v52, 0 }
 0x7fb   : > { %1995 = vmatpush.bf16.xpose.msrb.mxu1 %v1987_v53 }
 0x7fc   : > { %v1842_v59 = vsel %vm1841_vm6, %v1835_v58, 0.0 }
 0x7fd   : > { %1843 = vadd.xlane.f32.xlu2 %v1842_v59 }
 0x803   : > { %1996 = vmatpush.bf16.xpose.msrb.mxu1 %v1984_v7 }
 0x868   : > { %v1840_v2 = vpop.xlane.xlu1 %1839 }
 0x869   : > { %v1852_v13 = vmul.f32 %v7148_v1, %v1840_v2 }
 0x86b   : > { %v1854_v3 = vsub.f32 %v1834_v55, %v1852_v13 }
 0x86d   : > { %v1856_v4 = vmul.f32 %v1854_v3, %v1854_v3 }
 0x86f   : > { %v1858_v5 = vsel %vm1220_vm0, %v1856_v4, 0.0 }
 0x870   : > { %1859 = vadd.xlane.f32.xlu0 %v1858_v5  ;;  %v1844_v8 = vpop.xlane.xlu2 %1843 }
 0x871   : > { %v1853_v9 = vmul.f32 %v7148_v1, %v1844_v8  ;;  %v6204_v8 = vld [vmem:[%s8046_s13 + $0x58] sm:$0xff] }
 0x873   : > { %v1855_v10 = vsub.f32 %v1835_v58, %v1853_v9  ;;  %v2135_v9 = vsel %vm1220_vm0, %v6204_v8, 0 }
 0x874   : > { %2139 = vmatpush.bf16.xpose.msra.mxu3 %v2135_v9 }
 0x875   : > { %v1857_v11 = vmul.f32 %v1855_v10, %v1855_v10 }
 0x877   : > { %v1861_v14 = vsel %vm1841_vm6, %v1857_v11, 0.0 }
 0x878   : > { %1862 = vadd.xlane.f32.xlu1 %v1861_v14 }
 0x8e3   : > { %v1860_v26 = vpop.xlane.xlu0 %1859 }
 0x8e4   : > { %v1864_v28 = vmul.f32 %v1860_v26, %v7148_v1 }
 0x8e6   : > { %v1866_v29 = vadd.f32 1e-05, %v1864_v28  ;;  %v6202_v28 = vld [vmem:[%s8046_s13 + $0x48] sm:$0xff] }
 0x8e8   : > { %6468 = vrsqrt.f32 %v1866_v29  ;;  %vm1874_vm9 = vweird.f32 %v1866_v29 }
 0x8eb   : > { %v1863_v15 = vpop.xlane.xlu1 %1862 }
 0x8ec   : > { %v1865_v30 = vmul.f32 %v1863_v15, %v7148_v1  ;;  %v6201_v15 = vld [vmem:[%s8046_s13 + $0x40] sm:$0xff] }
 0x8ee   : > { %v6469_v31 = vpop.eup %6468  ;;  %v1867_v32 = vadd.f32 1e-05, %v1865_v30  ;;  %v2126_v30 = vsel %vm1220_vm0, %v6201_v15, 0 }
 0x8ef   : > { %v1869_v33 = vmul.f32 %v6469_v31, %v1866_v29  ;;  %vm1875_vm8 = vweird.f32 %v6469_v31  ;;  %v2129_v29 = vsel %vm1220_vm0, %v6202_v28, 0 }
 0x8f0   : > { %6470 = vrsqrt.f32 %v1867_v32  ;;  %vm1876_vm10 = vmor %vm1874_vm9, %vm1875_vm8  ;;  %vm1884_vm12 = vweird.f32 %v1867_v32 }
 0x8f1   : > { %v1870_v34 = vmul.f32 %v6469_v31, %v1869_v33  ;;  %v6199_v33 = vld [vmem:[%s8046_s13 + $0x30] sm:$0xff] }
 0x8f3   : > { %v1871_v35 = vmul.f32 0.5, %v1870_v34 }
 0x8f5   : > { %v1872_v36 = vsub.f32 1.5, %v1871_v35  ;;  %v2120_v35 = vsel %vm1220_vm0, %v6199_v33, 0 }
 0x8f6   : > { %v6471_v37 = vpop.eup %6470 }
 0x8f7   : > { %v1873_v38 = vmul.f32 %v6469_v31, %v1872_v36  ;;  %v1879_v24 = vmul.f32 %v6471_v37, %v1867_v32  ;;  %vm1885_vm11 = vweird.f32 %v6471_v37 }
 0x8f8   : > { %vm1886_vm13 = vmor %vm1884_vm12, %vm1885_vm11 }
 0x8f9   : > { %v1880_v19 = vmul.f32 %v6471_v37, %v1879_v24  ;;  %v1877_v39 = vsel %vm1876_vm10, %v6469_v31, %v1873_v38  ;;  %v6200_v31 = vld [vmem:[%s8046_s13 + $0x38] sm:$0xff] }
 0x8fa   : > { %v1888_v43 = vmul.f32 %v1877_v39, %v1854_v3  ;;  %v2123_v32 = vsel %vm1220_vm0, %v6200_v31, 0 }
 0x8fb   : > { %v1881_v40 = vmul.f32 0.5, %v1880_v19 }
 0x8fc   : > { %v1893_v18 = vmul.f32 %v6391_v42, %v1888_v43 }
 0x8fd   : > { %v1882_v41 = vsub.f32 1.5, %v1881_v40 }
 0x8fe   : > { %v1898_v49 = vadd.f32 %v6392_v47, %v1893_v18 }
 0x8ff   : > { %v1883_v44 = vmul.f32 %v6471_v37, %v1882_v41 }
 0x901   : > { %v1887_v45 = vsel %vm1886_vm13, %v6471_v37, %v1883_v44 }
 0x902   : > { %v1889_v46 = vmul.f32 %v1887_v45, %v1855_v10  ;;  %v6203_v10 = vld [vmem:[%s8046_s13 + $0x50] sm:$0xff]  ;;  %s8062_s13 = smov 72  }
 0x903   : > { %v2132_v11 = vsel %vm1220_vm0, %v6203_v10, 0 }
 0x904   : > { %v1894_v48 = vmul.f32 %v6391_v42, %v1889_v46  ;;  %2140 = vmatpush.bf16.xpose.msra.mxu3 %v2132_v11 }
 0x906   : > { %v1899_v50 = vadd.f32 %v6392_v47, %v1894_v48 }
 0x908   : > { %v1908_v51 = vpack.c.bf16 %v1899_v50, %v1898_v49 }
 0x90a   : > { %5703 = vmatmul.msk.bf16.vlgmr.msra.gmra.mxu2 %vm1220_vm0, %v1908_v51 }
 0x90c   : > { %2141 = vmatpush.bf16.xpose.msra.mxu3 %v2129_v29 }
 0x914   : > { %2142 = vmatpush.bf16.xpose.msra.mxu3 %v2126_v30 }
 0x91c   : > { %2143 = vmatpush.bf16.xpose.msra.mxu3 %v2123_v32 }
 0x924   : > { %2144 = vmatpush.bf16.xpose.msra.mxu3 %v2120_v35 }
 0x98d   : > { %v1957_v55 = vpop.f32.mrf.mxu2 }
 0x98e   : > { %v1958_v56 = vadd.f32 %v6393_v6, %v1957_v55  ;;  %v6396_v55 = vld [vmem:[%s8042_s6] ss:$0 sm:$0xff] }
 0x990   : > { %v1962_v59 = vmax.f32 %v1958_v56, 0.0 }
 0x995   : > { %v1959_v57 = vpop.f32.mrf.mxu2 }
 0x996   : > { %v1960_v58 = vadd.f32 %v6393_v6, %v1959_v57 }
 0x998   : > { %v1963_v60 = vmax.f32 %v1960_v58, 0.0 }
 0x99a   : > { %v1968_v61 = vpack.c.bf16 %v1963_v60, %v1962_v59  ;;  %v6397_v59 = vld [vmem:[%s8045_s17 + $0x1] ss:$0 sm:$0xff]  ;;  %s8065_s17 = smov 112  }
 0x99c   : > { %5712 = vmatmul.msk.bf16.vlgmr.msrb.gmra.mxu1 %vm1979_vm14, %v1968_v61 }
 0xa19   : > { %v1998_v63 = vpop.f32.mrf.mxu1 }
 0xa1a   : > { %v2003_v0 = vadd.f32 %v1998_v63, %v1898_v49 }
 0xa1c   : > { %v2009_v12 = vadd.f32 %v6394_v62, %v2003_v0 }
 0xa1e   : > { %v2013_v2 = vsel %vm1220_vm0, %v2009_v12, 0.0 }
 0xa1f   : > { %2014 = vadd.xlane.f32.xlu2 %v2013_v2 }
 0xa21   : > { %v2000_v13 = vpop.f32.mrf.mxu1 }
 0xa22   : > { %v2004_v3 = vadd.f32 %v2000_v13, %v1899_v50  ;;  %v6395_v50 = vld [vmem:[%s8035_s30] ss:$0 sm:$0xff] }
 0xa24   : > { %v2010_v4 = vadd.f32 %v6394_v62, %v2004_v3 }
 0xa26   : > { %v2016_v5 = vsel %vm1841_vm6, %v2010_v4, 0.0 }
 0xa27   : > { %2017 = vadd.xlane.f32.xlu0 %v2016_v5 }
 0xa92   : > { %v2015_v14 = vpop.xlane.xlu2 %2014 }
 0xa93   : > { %v2019_v16 = vmul.f32 %v2015_v14, %v7148_v1 }
 0xa95   : > { %v2021_v17 = vsub.f32 %v2009_v12, %v2019_v16 }
 0xa97   : > { %v2023_v20 = vmul.f32 %v2021_v17, %v2021_v17 }
 0xa99   : > { %v2025_v21 = vsel %vm1220_vm0, %v2023_v20, 0.0 }
 0xa9a   : > { %2026 = vadd.xlane.f32.xlu1 %v2025_v21  ;;  %v2018_v22 = vpop.xlane.xlu0 %2017 }
 0xa9b   : > { %v2020_v23 = vmul.f32 %v2018_v22, %v7148_v1 }
 0xa9d   : > { %v2022_v25 = vsub.f32 %v2010_v4, %v2020_v23 }
 0xa9f   : > { %v2024_v26 = vmul.f32 %v2022_v25, %v2022_v25 }
 0xaa1   : > { %v2028_v27 = vsel %vm1841_vm6, %v2024_v26, 0.0 }
 0xaa2   : > { %2029 = vadd.xlane.f32.xlu2 %v2028_v27 }
 0xb0d   : > { %v2027_v34 = vpop.xlane.xlu1 %2026 }
 0xb0e   : > { %v2031_v36 = vmul.f32 %v2027_v34, %v7148_v1 }
 0xb10   : > { %v2033_v37 = vadd.f32 1e-05, %v2031_v36 }
 0xb12   : > { %6472 = vrsqrt.f32 %v2033_v37  ;;  %vm2041_vm8 = vweird.f32 %v2033_v37 }
 0xb15   : > { %v2030_v38 = vpop.xlane.xlu2 %2029 }
 0xb16   : > { %v2032_v24 = vmul.f32 %v2030_v38, %v7148_v1 }
 0xb18   : > { %v6473_v19 = vpop.eup %6472  ;;  %v2034_v39 = vadd.f32 1e-05, %v2032_v24 }
 0xb19   : > { %v2036_v40 = vmul.f32 %v6473_v19, %v2033_v37  ;;  %vm2042_vm7 = vweird.f32 %v6473_v19 }
 0xb1a   : > { %6474 = vrsqrt.f32 %v2034_v39  ;;  %vm2043_vm9 = vmor %vm2041_vm8, %vm2042_vm7  ;;  %vm2051_vm11 = vweird.f32 %v2034_v39 }
 0xb1b   : > { %v2037_v41 = vmul.f32 %v6473_v19, %v2036_v40 }
 0xb1d   : > { %v2038_v42 = vmul.f32 0.5, %v2037_v41 }
 0xb1f   : > { %v2039_v43 = vsub.f32 1.5, %v2038_v42 }
 0xb20   : > { %v6475_v44 = vpop.eup %6474 }
 0xb21   : > { %v2040_v45 = vmul.f32 %v6473_v19, %v2039_v43  ;;  %v2046_v18 = vmul.f32 %v6475_v44, %v2034_v39  ;;  %vm2052_vm10 = vweird.f32 %v6475_v44 }
 0xb22   : > { %vm2053_vm12 = vmor %vm2051_vm11, %vm2052_vm10 }
 0xb23   : > { %v2047_v46 = vmul.f32 %v6475_v44, %v2046_v18  ;;  %v2044_v47 = vsel %vm2043_vm9, %v6473_v19, %v2040_v45 }
 0xb24   : > { %v2055_v51 = vmul.f32 %v2044_v47, %v2021_v17 }
 0xb25   : > { %v2048_v48 = vmul.f32 0.5, %v2047_v46 }
 0xb26   : > { %v2060_v54 = vmul.f32 %v6395_v50, %v2055_v51 }
 0xb27   : > { %v2049_v49 = vsub.f32 1.5, %v2048_v48 }
 0xb28   : > { %v7196_v56 = vadd.f32 %v6396_v55, %v2060_v54 }
 0xb29   : > { %v2050_v52 = vmul.f32 %v6475_v44, %v2049_v49 }
 0xb2b   : > { %v2054_v53 = vsel %vm2053_vm12, %v6475_v44, %v2050_v52 }
 0xb2c   : > { %v2056_v7 = vmul.f32 %v2054_v53, %v2022_v25 }
 0xb2e   : > { %v2061_v6 = vmul.f32 %v6395_v50, %v2056_v7 }
 0xb30   : > { %v7198_v57 = vadd.f32 %v6396_v55, %v2061_v6 }
 0xb32   : > { %v2080_v58 = vpack.c.bf16 %v7198_v57, %v7196_v56 }
 0xb34   : > { %5750 = vmatmul.msk.bf16.vlgmr.msra.gmra.mxu3 %vm1220_vm0, %v2080_v58 }
 0xbb7   : > { %v2146_v60 = vpop.f32.mrf.mxu3 }
 0xbb8   : > { %v7204_v61 = vadd.f32 %v6397_v59, %v2146_v60 }
 0xbba   : > { %2153 = vrot.lane.b32.xlu1 %v7204_v61, %s7971_s1 }
 0xbbf   : > { %v2148_v62 = vpop.f32.mrf.mxu3 }
 0xbc0   : > { %v7208_v63 = vadd.f32 %v6397_v59, %v2148_v62 }
 0xbc2   : > { %2280 = vrot.lane.b32.xlu2 %v7208_v63, %s8059_s28  ;;  %2155 = vrot.lane.b32.xlu0 %v7208_v63, %s7971_s1  ;;  %s8064_s1 = smov 104  }
 0xbc3   : > { %2276 = vrot.lane.b32.xlu1 %v7208_v63, %s8060_s23 }
 0xbca   : > { %2363 = vrot.lane.b32.xlu2 %v7204_v61, %s7969_s2  ;;  %2278 = vrot.lane.b32.xlu0 %v7204_v61, %s8059_s28 }
 0xbcb   : > { %2365 = vrot.lane.b32.xlu1 %v7208_v63, %s7969_s2  ;;  %s8063_s2 = smov 80  }
 0xbd2   : > { %2238 = vrot.lane.b32.xlu2 %v7204_v61, %s8061_s5  ;;  %2274 = vrot.lane.b32.xlu0 %v7204_v61, %s8060_s23 }
 0xbd3   : > { %2530 = vrot.lane.b32.xlu1 %v7208_v63, %s8062_s13 }
 0xbda   : > { %2240 = vrot.lane.b32.xlu0 %v7208_v63, %s8061_s5 }
 0xc1c   : > { %v2281_v2 = vpop.permute.xlu2 %2280 }
 0xc24   : > { %v2364_v5 = vpop.permute.xlu2 %2363 }
 0xc2c   : > { %v2154_v0 = vpop.permute.xlu1 %2153  ;;  %v2239_v11 = vpop.permute.xlu2 %2238 }
 0xc34   : > { %v2156_v12 = vpop.permute.xlu0 %2155 }
 0xc35   : > { %v2277_v13 = vpop.permute.xlu1 %2276  ;;  %5751 = vmatpush.xpose.msk.msrb.mxu0 %vm1262_vm1, %v2156_v12  ;;  %6265 = vmatpush.xpose.msk.msrb.mxu2 %vm1262_vm1, %v2156_v12 }
 0xc39   : > { %5752 = vmatpush.xpose.msk.msrb.mxu0 %vm1262_vm1, %v2154_v0  ;;  %6266 = vmatpush.xpose.msk.msrb.mxu2 %vm1262_vm1, %v2154_v0 }
 0xc3c   : > { %v2279_v3 = vpop.permute.xlu0 %2278  ;;  %5753 = vmatmul.msk.f32.vlgmr.msrb.gmra.mxu0 %vm1262_vm1, %v7204_v61  ;;  %5754 = vmatmul.msk.f32.vlgmr.msrb.gmra.mxu2 %vm1262_vm1, %v7208_v63 }
 0xc3d   : > { %5758 = vmatpush.xpose.msk.msra.mxu0 %vm1262_vm1, %v2281_v2  ;;  %v2366_v4 = vpop.permute.xlu1 %2365 }
 0xc3e   : > { %5762 = vmatpush.msk.msra.mxu2 %vm7978_vm2, %v2366_v4 }
 0xc40   : > { %2391 = vmatpush.msra.mxu2 %v2364_v5 }
 0xc41   : > { %5759 = vmatpush.xpose.msk.msra.mxu0 %vm1262_vm1, %v2279_v3 }
 0xc44   : > { %v2275_v8 = vpop.permute.xlu0 %2274 }
 0xc45   : > { %v2531_v9 = vpop.permute.xlu1 %2530  ;;  %5760 = vmatmul.msk.f32.vlgmr.msra.gmra.mxu0 %vm1262_vm1, %v2275_v8 }
 0xc46   : > { %5772 = vmatpush.xpose.msk.msrb.mxu2 %vm1262_vm1, %v2531_v9 }
 0xc4c   : > { %v2241_v10 = vpop.permute.xlu0 %2240 }
 0xc4d   : > { %5755 = vmatpush.msk.msra.mxu1 %vm7978_vm2, %v2241_v10  ;;  %5761 = vmatmul.msk.f32.gmra.mxu0 %vm1262_vm1, %v2277_v13 }
 0xc4f   : > { %2266 = vmatpush.msra.mxu1 %v2239_v11 }
 0xcb9   : > { %v2182_v14 = vpop.f32.mrf.mxu0 }
 0xcba   : > { %v2188_v16 = vmul.f32 0.35355338, %v2182_v14 }
 0xcbc   : > { %v2190_v17 = vsel %vm1296_vm3, %v2188_v16, -inf }
 0xcbd   : > { %2191 = vmax.xlane.f32.xlu0 %v2190_v17 }
 0xcbf   : > { %v2185_v20 = vpop.f32.mrf.mxu2 }
 0xcc0   : > { %v2189_v21 = vmul.f32 0.35355338, %v2185_v20 }
 0xcc2   : > { %v2307_v22 = vpop.f32.mrf.mxu0  ;;  %v2193_v23 = vsel %vm1300_vm4, %v2189_v21, -inf }
 0xcc3   : > { %2194 = vmax.xlane.f32.xlu2 %v2193_v23  ;;  %v2313_v25 = vmul.f32 0.35355338, %v2307_v22 }
 0xcc5   : > { %v2315_v27 = vsel %vm1296_vm3, %v2313_v25, -inf }
 0xcca   : > { %v2310_v26 = vpop.f32.mrf.mxu0 }
 0xccb   : > { %v2314_v28 = vmul.f32 0.35355338, %v2310_v26  ;;  %2316 = vmax.xlane.f32.xlu2 %v2315_v27 }
 0xccd   : > { %v2318_v29 = vsel %vm1300_vm4, %v2314_v28, -inf }
 0xcce   : > { %2319 = vmax.xlane.f32.xlu1 %v2318_v29 }
 0xcd1   : > { %2528 = vrot.lane.b32.xlu0 %v7204_v61, %s8062_s13 }
 0xce3   : > { %2405 = vrot.lane.b32.xlu2 %v7208_v63, %s8063_s2 }
 0xce7   : > { %2524 = vrot.lane.b32.xlu1 %v7204_v61, %s8064_s1 }
 0xd30   : > { %v2192_v15 = vpop.xlane.xlu0 %2191 }
 0xd31   : > { %v2196_v30 = vsub.f32 %v2188_v16, %v2192_v15 }
 0xd33   : > { %v2198_v31 = vmul.f32 1.442695, %v2196_v30 }
 0xd35   : > { %6476 = vpow2.f32 %v2198_v31 }
 0xd36   : > { %v2195_v32 = vpop.xlane.xlu2 %2194 }
 0xd37   : > { %v2197_v33 = vsub.f32 %v2189_v21, %v2195_v32 }
 0xd39   : > { %v2200_v34 = vmul.f32 1.442695, %v2197_v33 }
 0xd3b   : > { %v6477_v35 = vpop.eup %6476  ;;  %6478 = vpow2.f32 %v2200_v34 }
 0xd3c   : > { %v2202_v36 = vsel %vm1296_vm3, %v6477_v35, 0.0 }
 0xd3d   : > { %2203 = vadd.xlane.f32.xlu1 %v2202_v36 }
 0xd3e   : > { %v2317_v37 = vpop.xlane.xlu2 %2316 }
 0xd3f   : > { %v2321_v38 = vsub.f32 %v2313_v25, %v2317_v37 }
 0xd41   : > { %v7256_v24 = vpop.eup %6478  ;;  %v2323_v19 = vmul.f32 1.442695, %v2321_v38  ;;  %v2320_v39 = vpop.xlane.xlu1 %2319 }
 0xd42   : > { %v2322_v40 = vsub.f32 %v2314_v28, %v2320_v39  ;;  %v2205_v41 = vsel %vm1300_vm4, %v7256_v24, 0.0 }
 0xd43   : > { %6480 = vpow2.f32 %v2323_v19  ;;  %2206 = vadd.xlane.f32.xlu0 %v2205_v41  ;;  %v2529_v42 = vpop.permute.xlu0 %2528 }
 0xd44   : > { %v2325_v43 = vmul.f32 1.442695, %v2322_v40  ;;  %5773 = vmatpush.xpose.msk.msrb.mxu2 %vm1262_vm1, %v2529_v42 }
 0xd46   : > { %6482 = vpow2.f32 %v2325_v43  ;;  %v2406_v44 = vpop.permute.xlu2 %2405 }
 0xd47   : > { %5765 = vmatpush.xpose.msk.msrb.mxu1 %vm1262_vm1, %v2406_v44 }
 0xd49   : > { %v7262_v45 = vpop.eup %6480 }
 0xd4a   : > { %v2327_v18 = vsel %vm1296_vm3, %v7262_v45, 0.0 }
 0xd4b   : > { %2328 = vadd.xlane.f32.xlu0 %v2327_v18 }
 0xd4c   : > { %v7266_v46 = vpop.eup %6482 }
 0xd4d   : > { %v2330_v47 = vsel %vm1300_vm4, %v7266_v46, 0.0 }
 0xd4e   : > { %2331 = vadd.xlane.f32.xlu2 %v2330_v47 }
 0xd56   : > { %2526 = vrot.lane.b32.xlu1 %v7208_v63, %s8064_s1 }
 0xd59   : > { %v7278_v48 = vpop.permute.xlu1 %2524 }
 0xd5f   : > { %2403 = vrot.lane.b32.xlu0 %v7204_v61, %s8063_s2 }
 0xd66   : > { %2399 = vrot.lane.b32.xlu2 %v7204_v61, %s8065_s17 }
 0xd67   : > { %2401 = vrot.lane.b32.xlu0 %v7208_v63, %s8065_s17 }
 0xdb0   : > { %v2204_v49 = vpop.xlane.xlu1 %2203 }
 0xdb1   : > { %6484 = vrcp.f32 %v2204_v49  ;;  %v2219_v54 = vand.u32 2147483648, %v2204_v49  ;;  %v2217_v55 = vand.u32 2147483647, %v2204_v49  ;;  %vm2213_vm7 = vweird.f32 %v2204_v49 }
 0xdb3   : > { %v2220_v62 = vor.u32 1.1754944e-38, %v2219_v54  ;;  %vm2218_vm9 = vcmp.eq.f32.partialorder %v2217_v55, 8.507059e+37 }
 0xdb6   : > { %v2207_v50 = vpop.xlane.xlu0 %2206 }
 0xdb7   : > { %v6485_v51 = vpop.eup %6484  ;;  %6486 = vrcp.f32 %v2207_v50  ;;  %v2232_v3 = vand.u32 2147483647, %v2207_v50  ;;  %v2234_v4 = vand.u32 2147483648, %v2207_v50  ;;  %vm2228_vm11 = vweird.f32 %v2207_v50 }
 0xdb8   : > { %v2209_v52 = vmul.f32 %v6485_v51, %v2204_v49  ;;  %vm2214_vm13 = vweird.f32 %v6485_v51 }
 0xdb9   : > { %vm2215_vm8 = vmor %vm2213_vm7, %vm2214_vm13  ;;  %v2235_v11 = vor.u32 1.1754944e-38, %v2234_v4  ;;  %vm2233_vm13 = vcmp.eq.f32.partialorder %v2232_v3, 8.507059e+37 }
 0xdba   : > { %v2210_v53 = vsub.f32 1.0, %v2209_v52 }
 0xdbc   : > { %v2211_v7 = vmul.f32 %v6485_v51, %v2210_v53 }
 0xdbd   : > { %v6487_v6 = vpop.eup %6486 }
 0xdbe   : > { %v2212_v58 = vadd.f32 %v6485_v51, %v2211_v7  ;;  %v2224_v59 = vmul.f32 %v6487_v6, %v2207_v50  ;;  %v2329_v60 = vpop.xlane.xlu0 %2328  ;;  %vm2229_vm10 = vweird.f32 %v6487_v6 }
 0xdbf   : > { %6488 = vrcp.f32 %v2329_v60  ;;  %vm2230_vm12 = vmor %vm2228_vm11, %vm2229_vm10  ;;  %v2344_v22 = vand.u32 2147483648, %v2329_v60  ;;  %v2342_v26 = vand.u32 2147483647, %v2329_v60 }
 0xdc0   : > { %v2216_v0 = vsel %vm2215_vm8, %v6485_v51, %v2212_v58  ;;  %v2225_v12 = vsub.f32 1.0, %v2224_v59  ;;  %vm2338_vm8 = vweird.f32 %v2329_v60 }
 0xdc1   : > { %v2221_v2 = vsel %vm2218_vm9, %v2220_v62, %v2216_v0  ;;  %v2332_v13 = vpop.xlane.xlu2 %2331  ;;  %v2345_v15 = vor.u32 1.1754944e-38, %v2344_v22  ;;  %vm2343_vm10 = vcmp.eq.f32.partialorder %v2342_v26, 8.507059e+37 }
 0xdc2   : > { %6490 = vrcp.f32 %v2332_v13  ;;  %v2222_v5 = vmul.f32 %v6477_v35, %v2221_v2  ;;  %v2226_v8 = vmul.f32 %v6487_v6, %v2225_v12  ;;  %v2359_v34 = vand.u32 2147483648, %v2332_v13 }
 0xdc3   : > { %v2357_v36 = vand.u32 2147483647, %v2332_v13 }
 0xdc4   : > { %5756 = vmatmul.msk.f32.vlgmr.msra.gmra.mxu1 %vm1296_vm3, %v2222_v5  ;;  %v2227_v9 = vadd.f32 %v6487_v6, %v2226_v8 }
 0xdc5   : > { %v6489_v10 = vpop.eup %6488 }
 0xdc6   : > { %v2334_v14 = vmul.f32 %v6489_v10, %v2329_v60  ;;  %v2231_v16 = vsel %vm2230_vm12, %v6487_v6, %v2227_v9  ;;  %vm2339_vm7 = vweird.f32 %v6489_v10  ;;  %vm2353_vm12 = vweird.f32 %v2332_v13 }
 0xdc7   : > { %v2236_v17 = vsel %vm2233_vm13, %v2235_v11, %v2231_v16  ;;  %vm2340_vm9 = vmor %vm2338_vm8, %vm2339_vm7  ;;  %vm2358_vm7 = vcmp.eq.f32.partialorder %v2357_v36, 8.507059e+37 }
 0xdc8   : > { %v6491_v20 = vpop.eup %6490  ;;  %v2335_v21 = vsub.f32 1.0, %v2334_v14  ;;  %v2237_v27 = vmul.f32 %v7256_v24, %v2236_v17  ;;  %v2360_v24 = vor.u32 1.1754944e-38, %v2359_v34  ;;  %v2527_v42 = vpop.permute.xlu1 %2526 }
 0xdc9   : > { %v2349_v23 = vmul.f32 %v6491_v20, %v2332_v13  ;;  %vm2354_vm11 = vweird.f32 %v6491_v20  ;;  %v2400_v19 = vpop.permute.xlu2 %2399 }
 0xdca   : > { %v2336_v25 = vmul.f32 %v6489_v10, %v2335_v21  ;;  %vm2355_vm13 = vmor %vm2353_vm12, %vm2354_vm11 }
 0xdcb   : > { %v2350_v28 = vsub.f32 1.0, %v2349_v23 }
 0xdcc   : > { %v2337_v29 = vadd.f32 %v6489_v10, %v2336_v25  ;;  %5757 = vmatmul.msk.f32.gmra.mxu1 %vm1296_vm3, %v2237_v27 }
 0xdcd   : > { %v2351_v30 = vmul.f32 %v6491_v20, %v2350_v28 }
 0xdce   : > { %v2341_v31 = vsel %vm2340_vm9, %v6489_v10, %v2337_v29 }
 0xdcf   : > { %v2346_v32 = vsel %vm2343_vm10, %v2345_v15, %v2341_v31  ;;  %v2352_v33 = vadd.f32 %v6491_v20, %v2351_v30 }
 0xdd0   : > { %v2347_v35 = vmul.f32 %v7262_v45, %v2346_v32 }
 0xdd1   : > { %v2404_v37 = vpop.permute.xlu0 %2403  ;;  %v2356_v38 = vsel %vm2355_vm13, %v6491_v20, %v2352_v33 }
 0xdd2   : > { %5763 = vmatmul.msk.f32.vlgmr.msra.gmra.mxu2 %vm1296_vm3, %v2347_v35  ;;  %5766 = vmatpush.xpose.msk.msrb.mxu1 %vm1262_vm1, %v2404_v37  ;;  %v2361_v39 = vsel %vm2358_vm7, %v2360_v24, %v2356_v38 }
 0xdd3   : > { %v2362_v40 = vmul.f32 %v7266_v46, %v2361_v39 }
 0xdd5   : > { %5767 = vmatmul.msk.f32.vlgmr.msrb.gmra.mxu1 %vm1262_vm1, %v2400_v19 }
 0xdd9   : > { %v2402_v41 = vpop.permute.xlu0 %2401 }
 0xdda   : > { %5764 = vmatmul.msk.f32.gmra.mxu2 %vm1296_vm3, %v2362_v40 }
 0xddd   : > { %5768 = vmatmul.msk.f32.gmra.mxu1 %vm1262_vm1, %v2402_v41 }
 0xde2   : > { %5774 = vmatmul.msk.f32.vlgmr.msrb.gmra.mxu2 %vm1262_vm1, %v7278_v48 }
 0xdea   : > { %5775 = vmatmul.msk.f32.gmra.mxu2 %vm1262_vm1, %v2527_v42 }
 0xe41   : > { %v7293_v43 = vpop.f32.mrf.mxu1 }
 0xe49   : > { %v7295_v44 = vpop.f32.mrf.mxu1 }
 0xe52   : > { %v2432_v45 = vpop.f32.mrf.mxu1 }
 0xe53   : > { %v2438_v18 = vmul.f32 0.35355338, %v2432_v45 }
 0xe55   : > { %v2393_v47 = vpop.f32.mrf.mxu2  ;;  %v2440_v46 = vsel %vm1296_vm3, %v2438_v18, -inf }
 0xe56   : > { %2441 = vmax.xlane.f32.xlu2 %v2440_v46 }
 0xe5a   : > { %v2435_v49 = vpop.f32.mrf.mxu1 }
 0xe5b   : > { %v2439_v50 = vmul.f32 0.35355338, %v2435_v49 }
 0xe5d   : > { %v2396_v51 = vpop.f32.mrf.mxu2  ;;  %v2443_v52 = vsel %vm1300_vm4, %v2439_v50, -inf }
 0xe5e   : > { %v6374_v53 = vpack.i.bf16 %v2396_v51, %v2393_v47  ;;  %2444 = vmax.xlane.f32.xlu0 %v2443_v52 }
 0xe65   : > { %v2557_v48 = vpop.f32.mrf.mxu2 }
 0xe66   : > { %v2563_v54 = vmul.f32 0.35355338, %v2557_v48 }
 0xe68   : > { %v2565_v7 = vsel %vm1296_vm3, %v2563_v54, -inf }
 0xe69   : > { %2566 = vmax.xlane.f32.xlu1 %v2565_v7 }
 0xe6d   : > { %v2560_v55 = vpop.f32.mrf.mxu2 }
 0xe6e   : > { %v2564_v6 = vmul.f32 0.35355338, %v2560_v55 }
 0xe70   : > { %v2568_v58 = vsel %vm1300_vm4, %v2564_v6, -inf }
 0xe71   : > { %2569 = vmax.xlane.f32.xlu2 %v2568_v58 }
 0xe72   : > { %2490 = vrot.lane.b32.xlu0 %v7208_v63, %s8066_s18 }
 0xec9   : > { %v2442_v59 = vpop.xlane.xlu2 %2441 }
 0xeca   : > { %v2446_v60 = vsub.f32 %v2438_v18, %v2442_v59 }
 0xecc   : > { %v2448_v62 = vmul.f32 1.442695, %v2446_v60 }
 0xece   : > { %6492 = vpow2.f32 %v2448_v62 }
 0xed1   : > { %v2445_v0 = vpop.xlane.xlu0 %2444 }
 0xed2   : > { %v2447_v12 = vsub.f32 %v2439_v50, %v2445_v0 }
 0xed4   : > { %v7303_v2 = vpop.eup %6492  ;;  %v2450_v13 = vmul.f32 1.442695, %v2447_v12 }
 0xed5   : > { %v2452_v3 = vsel %vm1296_vm3, %v7303_v2, 0.0 }
 0xed6   : > { %6494 = vpow2.f32 %v2450_v13  ;;  %2453 = vadd.xlane.f32.xlu1 %v2452_v3 }
 0xedc   : > { %v7307_v4 = vpop.eup %6494  ;;  %v2567_v5 = vpop.xlane.xlu1 %2566 }
 0xedd   : > { %v2571_v8 = vsub.f32 %v2563_v54, %v2567_v5  ;;  %v2455_v9 = vsel %vm1300_vm4, %v7307_v4, 0.0 }
 0xede   : > { %2456 = vadd.xlane.f32.xlu2 %v2455_v9 }
 0xedf   : > { %v2573_v10 = vmul.f32 1.442695, %v2571_v8 }
 0xee1   : > { %6496 = vpow2.f32 %v2573_v10 }
 0xee4   : > { %v2491_v11 = vpop.permute.xlu0 %2490  ;;  %v2570_v14 = vpop.xlane.xlu2 %2569 }
 0xee5   : > { %v2572_v16 = vsub.f32 %v2564_v6, %v2570_v14  ;;  %5769 = vmatpush.msk.msrb.mxu0 %vm7978_vm2, %v2491_v11 }
 0xee7   : > { %v6497_v17 = vpop.eup %6496  ;;  %v2575_v20 = vmul.f32 1.442695, %v2572_v16 }
 0xee8   : > { %v2577_v21 = vsel %vm1296_vm3, %v6497_v17, 0.0 }
 0xee9   : > { %6498 = vpow2.f32 %v2575_v20  ;;  %2578 = vadd.xlane.f32.xlu0 %v2577_v21 }
 0xeef   : > { %v7313_v22 = vpop.eup %6498 }
 0xef0   : > { %v2580_v23 = vsel %vm1300_vm4, %v7313_v22, 0.0 }
 0xef1   : > { %2581 = vadd.xlane.f32.xlu1 %v2580_v23  ;;  %v6206_v23 = vld [vmem:[%s8044_s21 + $0x18] sm:$0xff] }
 0xef6   : > { %2615 = vrot.lane.b32.xlu2 %v7208_v63, %s8067_s26 }
 0xefd   : > { %2613 = vrot.lane.b32.xlu0 %v7204_v61, %s8067_s26 }
 0xefe   : > { %6375 = vrot.lane.b32.xlu2 %v6374_v53, %s8068_s10 }
 0xf0a   : > { %2488 = vrot.lane.b32.xlu1 %v7204_v61, %s8066_s18 }
 0xf49   : > { %v2454_v26 = vpop.xlane.xlu1 %2453 }
 0xf4a   : > { %6500 = vrcp.f32 %v2454_v26  ;;  %v2469_v48 = vand.u32 2147483648, %v2454_v26  ;;  %v2467_v7 = vand.u32 2147483647, %v2454_v26 }
 0xf4c   : > { %v2470_v62 = vor.u32 1.1754944e-38, %v2469_v48 }
 0xf50   : > { %v6501_v29 = vpop.eup %6500 }
 0xf51   : > { %v7324_v25 = vpop.xlane.xlu2 %2456  ;;  %v2459_v31 = vmul.f32 %v6501_v29, %v2454_v26  ;;  %vm2464_vm12 = vweird.f32 %v6501_v29 }
 0xf52   : > { %v2484_v13 = vand.u32 2147483648, %v7324_v25  ;;  %v2482_v8 = vand.u32 2147483647, %v7324_v25 }
 0xf53   : > { %v2460_v36 = vsub.f32 1.0, %v2459_v31  ;;  %v6215_v31 = vld [vmem:[%s6807_s27 + $0x10] sm:$0xff] }
 0xf54   : > { %v2485_v10 = vor.u32 1.1754944e-38, %v2484_v13 }
 0xf55   : > { %v2461_v41 = vmul.f32 %v6501_v29, %v2460_v36 }
 0xf57   : > { %v2462_v51 = vadd.f32 %v6501_v29, %v2461_v41 }
 0xf59   : > { %v2616_v27 = vpop.permute.xlu2 %2615 }
 0xf5a   : > { %5776 = vmatpush.msk.msra.mxu1 %vm7978_vm2, %v2616_v27  ;;  %v6205_v27 = vld [vmem:[%s8044_s21 + $0x10] sm:$0xff]  ;;  %s5624_s21 = sshll.u32 %s6979_s11, 3  ;;  %s8072_s11 = sld [smem:[#allocation21_spill]] }
 0xf5b   : > { %s1169_s12 = scalar_lea.vmem %s8071_s7, %s5624_s21  ;;  %s8073_s21 = smov 96  }
 0xf5c   : > { %v2579_v28 = vpop.xlane.xlu0 %2578  ;;  %s8075_s7 = sld [smem:[#allocation22_spill]] }
 0xf5d   : > { %6502 = vrcp.f32 %v2579_v28  ;;  %v2594_v33 = vand.u32 2147483648, %v2579_v28  ;;  %v2592_v34 = vand.u32 2147483647, %v2579_v28  ;;  %vm2588_vm8 = vweird.f32 %v2579_v28 }
 0xf5e   : > { %6504 = vrcp.f32 %v7324_v25 }
 0xf5f   : > { %v2595_v24 = vor.u32 1.1754944e-38, %v2594_v33  ;;  %vm2593_vm10 = vcmp.eq.f32.partialorder %v2592_v34, 8.507059e+37  ;;  %v6214_v33 = vld [vmem:[%s6807_s27 + $0x8] sm:$0xff] }
 0xf60   : > { %v3068_v34 = vsel %vm1220_vm0, %v6214_v33, 0 }
 0xf63   : > { %v6503_v15 = vpop.eup %6502 }
 0xf64   : > { %v2584_v63 = vmul.f32 %v6503_v15, %v2579_v28  ;;  %v2582_v30 = vpop.xlane.xlu1 %2581  ;;  %vm2589_vm4 = vweird.f32 %v6503_v15  ;;  %v6505_v35 = vpop.eup %6504  ;;  %v2699_v28 = vsel %vm1220_vm0, %v6205_v27, 0 }
 0xf65   : > { %6506 = vrcp.f32 %v2582_v30  ;;  %vm2590_vm9 = vmor %vm2588_vm8, %vm2589_vm4  ;;  %v2474_v42 = vmul.f32 %v6505_v35, %v7324_v25  ;;  %v2609_v47 = vand.u32 2147483648, %v2582_v30  ;;  %v2607_v50 = vand.u32 2147483647, %v2582_v30 }
 0xf66   : > { %v2585_v32 = vsub.f32 1.0, %v2584_v63  ;;  %vm2603_vm13 = vweird.f32 %v2582_v30  ;;  %vm2463_vm4 = vweird.f32 %v2454_v26  ;;  %vm2479_vm2 = vweird.f32 %v6505_v35  ;;  %v6216_v63 = vld [vmem:[%s6807_s27 + $0x18] sm:$0xff] }
 0xf67   : > { %v2475_v52 = vsub.f32 1.0, %v2474_v42  ;;  %v2610_v54 = vor.u32 1.1754944e-38, %v2609_v47  ;;  %vm2608_vm8 = vcmp.eq.f32.partialorder %v2607_v50, 8.507059e+37 }
 0xf68   : > { %v2586_v61 = vmul.f32 %v6503_v15, %v2585_v32  ;;  %v3071_v32 = vsel %vm1220_vm0, %v6215_v31, 0 }
 0xf69   : > { %v2476_v59 = vmul.f32 %v6505_v35, %v2475_v52  ;;  %v7367_v52 = vld [vmem:[%s1169_s12] sm:$0xff]  ;;  %s8074_s12 = smov 56  }
 0xf6a   : > { %v2587_v37 = vadd.f32 %v6503_v15, %v2586_v61  ;;  %v6376_v61 = vpop.permute.xlu2 %6375 }
 0xf6b   : > { %v6507_v38 = vpop.eup %6506  ;;  %v2477_v12 = vadd.f32 %v6505_v35, %v2476_v59  ;;  %v6377_v36 = vunpack.i.l.bf16 %v6376_v61 }
 0xf6c   : > { %v2591_v19 = vsel %vm2590_vm9, %v6503_v15, %v2587_v37  ;;  %v2599_v39 = vmul.f32 %v6507_v38, %v2582_v30  ;;  %vm2604_vm11 = vweird.f32 %v6507_v38  ;;  %vm2465_vm9 = vmor %vm2463_vm4, %vm2464_vm12  ;;  %v3074_v30 = vsel %vm1220_vm0, %v6216_v63, 0 }
 0xf6d   : > { %v2596_v40 = vsel %vm2593_vm10, %v2595_v24, %v2591_v19  ;;  %vm2605_vm7 = vmor %vm2603_vm13, %vm2604_vm11  ;;  %v2466_v58 = vsel %vm2465_vm9, %v6501_v29, %v2462_v51  ;;  %vm2468_vm10 = vcmp.eq.f32.partialorder %v2467_v7, 8.507059e+37  ;;  %vm2478_vm11 = vweird.f32 %v7324_v25  ;;  %v6218_v25 = vld [vmem:[%s6807_s27 + $0x28] sm:$0xff]  ;;  %v6217_v29 = vld [vmem:[%s6807_s27 + $0x20] sm:$0xff] }
 0xf6e   : > { %v2600_v45 = vsub.f32 1.0, %v2599_v39  ;;  %v2597_v18 = vmul.f32 %v6497_v17, %v2596_v40  ;;  %v2471_v0 = vsel %vm2468_vm10, %v2470_v62, %v2466_v58  ;;  %vm2480_vm12 = vmor %vm2478_vm11, %vm2479_vm2  ;;  %vm2483_vm13 = vcmp.eq.f32.partialorder %v2482_v8, 8.507059e+37 }
 0xf6f   : > { %v2614_v46 = vpop.permute.xlu0 %2613  ;;  %v2472_v5 = vmul.f32 %v7303_v2, %v2471_v0  ;;  %v2481_v9 = vsel %vm2480_vm12, %v6505_v35, %v2477_v12  ;;  %v3080_v26 = vsel %vm1220_vm0, %v6218_v25, 0  ;;  %v3077_v15 = vsel %vm1220_vm0, %v6217_v29, 0  ;;  %v6399_v0 = vld [vmem:[%s8072_s11] ss:$0 sm:$0xff] }
 0xf70   : > { %v2601_v49 = vmul.f32 %v6507_v38, %v2600_v45  ;;  %2641 = vmatpush.msra.mxu1 %v2614_v46  ;;  %v2486_v11 = vsel %vm2483_vm13, %v2485_v10, %v2481_v9  ;;  %v6378_v35 = vunpack.i.h.bf16 %v6376_v61  ;;  %v2673_v41 = vsel %vm1262_vm1, %v7293_v43, %v6377_v36  ;;  %v6207_v25 = vld [vmem:[%s8041_s8 + $0x20] sm:$0xff] }
 0xf71   : > { %5777 = vmatmul.msk.f32.vlgmr.msra.gmra.mxu1 %vm1296_vm3, %v2597_v18  ;;  %v2487_v14 = vmul.f32 %v7307_v4, %v2486_v11  ;;  %v2702_v4 = vsel %vm1220_vm0, %v6206_v23, 0  ;;  %v3026_v43 = vpack.c.bf16 %v7367_v52, %v7367_v52 }
 0xf72   : > { %v2602_v53 = vadd.f32 %v6507_v38, %v2601_v49  ;;  %2710 = vmatpush.bf16.xpose.msrb.mxu3 %v2702_v4  ;;  %3084 = vmatpush.bf16.xpose.msrb.mxu1 %v3080_v26  ;;  %v2674_v40 = vsel %vm1262_vm1, %v7295_v44, %v6378_v35  ;;  %v6398_v44 = vld [vmem:[%s8037_s25 + $0x1] ss:$0 sm:$0xff]  ;;  %v2824_v26 = vsel %vm1220_vm0, %v6207_v25, 0  ;;  %s8082_s25 = sld [smem:[#allocation20_spill]] }
 0xf74   : > { %v2606_v55 = vsel %vm2605_vm7, %v6507_v38, %v2602_v53  ;;  %v6213_v38 = vld [vmem:[%s6807_s27] sm:$0xff] }
 0xf75   : > { %v2611_v6 = vsel %vm2608_vm8, %v2610_v54, %v2606_v55  ;;  %v3065_v46 = vsel %vm1220_vm0, %v6213_v38, 0 }
 0xf76   : > { %v2612_v60 = vmul.f32 %v7313_v22, %v2611_v6 }
 0xf79   : > { %5778 = vmatmul.msk.f32.gmra.mxu1 %vm1296_vm3, %v2612_v60 }
 0xf7a   : > { %2711 = vmatpush.bf16.xpose.msrb.mxu3 %v2699_v28  ;;  %3085 = vmatpush.bf16.xpose.msrb.mxu1 %v3077_v15 }
 0xf7c   : > { %v2489_v3 = vpop.permute.xlu1 %2488 }
 0xf7d   : > { %2516 = vmatpush.msrb.mxu0 %v2489_v3 }
 0xf7e   : > { %5770 = vmatmul.msk.f32.vlgmr.msrb.gmra.mxu0 %vm1296_vm3, %v2472_v5 }
 0xf82   : > { %3086 = vmatpush.bf16.xpose.msrb.mxu1 %v3074_v30 }
 0xf86   : > { %5771 = vmatmul.msk.f32.gmra.mxu0 %vm1296_vm3, %v2487_v14 }
 0xf8a   : > { %3087 = vmatpush.bf16.xpose.msrb.mxu1 %v3071_v32 }
 0xf92   : > { %3088 = vmatpush.bf16.xpose.msrb.mxu1 %v3068_v34 }
 0xf9a   : > { %3089 = vmatpush.bf16.xpose.msrb.mxu1 %v3065_v46 }
 0xfa1   : > { %5861 = vmatmul.msk.bf16.vlgmr.msrb.gmra.mxu1 %vm1220_vm0, %v3026_v43 }
 0xfee   : > { %v2643_v16 = vpop.f32.mrf.mxu1 }
 0xff6   : > { %v2646_v17 = vpop.f32.mrf.mxu1 }
 0xff7   : > { %v6384_v2 = vpack.i.bf16 %v2646_v17, %v2643_v16  ;;  %v6210_v17 = vld [vmem:[%s8041_s8 + $0x38] sm:$0xff] }
 0xff9   : > { %6385 = vrot.lane.b32.xlu1 %v6384_v2, %s8069_s15  ;;  %v2833_v2 = vsel %vm1220_vm0, %v6210_v17, 0 }
 0xffa   : > { %2839 = vmatpush.bf16.xpose.msra.mxu2 %v2833_v2  ;;  %v7429_v2 = vld [vmem:[%s8038_s24 + $0x1] ss:$0 sm:$0xff]  ;;  %s8081_s24 = sld [smem:[#allocation19_spill]] }
 0xffb   : > { %v2518_v20 = vpop.f32.mrf.mxu0 }
0x1003   : > { %v2521_v21 = vpop.f32.mrf.mxu0 }
0x1004   : > { %v6379_v22 = vpack.i.bf16 %v2521_v21, %v2518_v20  ;;  %v6209_v20 = vld [vmem:[%s8041_s8 + $0x30] sm:$0xff] }
0x1005   : > { %v2830_v21 = vsel %vm1220_vm0, %v6209_v20, 0 }
0x1006   : > { %6380 = vrot.lane.b32.xlu0 %v6379_v22, %s8070_s22  ;;  %2840 = vmatpush.bf16.xpose.msra.mxu2 %v2830_v21  ;;  %v6208_v22 = vld [vmem:[%s8041_s8 + $0x28] sm:$0xff]  ;;  %s8078_s8 = sld [smem:[#allocation24_spill]] }
0x1007   : > { %v2827_v23 = vsel %vm1220_vm0, %v6208_v22, 0 }
0x100e   : > { %2841 = vmatpush.bf16.xpose.msra.mxu2 %v2827_v23 }
0x1016   : > { %2842 = vmatpush.bf16.xpose.msra.mxu2 %v2824_v26 }
0x101e   : > { %v3091_v48 = vpop.f32.mrf.mxu1 }
0x101f   : > { %v7379_v12 = vadd.f32 %v6399_v0, %v3091_v48  ;;  %v6212_v48 = vld [vmem:[%s8039_s19 + $0x18] sm:$0xff] }
0x1026   : > { %v3093_v58 = vpop.f32.mrf.mxu1 }
0x106b   : > { %v6386_v37 = vpop.permute.xlu1 %6385 }
0x106c   : > { %v6388_v42 = vunpack.i.h.bf16 %v6386_v37  ;;  %v6387_v45 = vunpack.i.l.bf16 %v6386_v37 }
0x1078   : > { %v6381_v24 = vpop.permute.xlu0 %6380 }
0x1079   : > { %v6383_v19 = vunpack.i.h.bf16 %v6381_v24  ;;  %v6382_v39 = vunpack.i.l.bf16 %v6381_v24 }
0x107b   : > { %v2676_v18 = vsel %vm1784_vm15, %v2674_v40, %v6383_v19  ;;  %v2675_v47 = vsel %vm1784_vm15, %v2673_v41, %v6382_v39  ;;  %v6400_v39 = vld [vmem:[%s8036_s29 + $0x1] ss:$0 sm:$0xff]  ;;  %s8088_s29 = sld [smem:[#allocation32_spill]] }
0x107c   : > { %v2677_v49 = vsel %vm1787_vm5, %v2675_v47, %v6387_v45  ;;  %v2678_v50 = vsel %vm1787_vm5, %v2676_v18, %v6388_v42  ;;  %v6401_v45 = vld [vmem:[%s8043_s3 + $0x1] ss:$0 sm:$0xff]  ;;  %s8076_s3 = sld [smem:[#allocation23_spill]] }
0x107d   : > { %v2684_v51 = vpack.c.bf16 %v2678_v50, %v2677_v49 }
0x107f   : > { %5791 = vmatmul.msk.bf16.vlgmr.msrb.gmra.mxu3 %vm1220_vm0, %v2684_v51 }
0x1102   : > { %v2713_v53 = vpop.f32.mrf.mxu3 }
0x1103   : > { %v2718_v54 = vadd.f32 %v2713_v53, %v7196_v56 }
0x1105   : > { %v2725_v7 = vadd.f32 %v6398_v44, %v2718_v54  ;;  %v2874_v54 = vsel %vm1979_vm14, %v6212_v48, 0 }
0x1106   : > { %2882 = vmatpush.bf16.xpose.msrb.mxu2 %v2874_v54 }
0x1107   : > { %v2731_v55 = vsel %vm1220_vm0, %v2725_v7, 0.0 }
0x1108   : > { %2732 = vadd.xlane.f32.xlu2 %v2731_v55 }
0x110a   : > { %v2715_v6 = vpop.f32.mrf.mxu3 }
0x110b   : > { %v2719_v59 = vadd.f32 %v2715_v6, %v7198_v57 }
0x110d   : > { %v2726_v60 = vadd.f32 %v6398_v44, %v2719_v59 }
0x110f   : > { %v2734_v62 = vsel %vm1841_vm6, %v2726_v60, 0.0 }
0x1110   : > { %2735 = vadd.xlane.f32.xlu0 %v2734_v62 }
0x1124   : > { %3096 = vrot.lane.b32.xlu0 %v7379_v12, %s8073_s21 }
0x117b   : > { %v2733_v13 = vpop.xlane.xlu2 %2732 }
0x117c   : > { %v2737_v56 = vmul.f32 %v2733_v13, %v7148_v1 }
0x117e   : > { %v2739_v3 = vsub.f32 %v2725_v7, %v2737_v56  ;;  %v6211_v7 = vld [vmem:[%s8039_s19 + $0x10] sm:$0xff]  ;;  %v6402_v56 = vld [vmem:[%s8040_s14 + $0x1] ss:$0 sm:$0xff]  ;;  %s8079_s14 = sld [smem:[#allocation25_spill]] }
0x117f   : > { %v2871_v55 = vsel %vm1979_vm14, %v6211_v7, 0  ;;  %s8080_s19 = sld [smem:[#allocation27_spill]] }
0x1180   : > { %v2741_v5 = vmul.f32 %v2739_v3, %v2739_v3  ;;  %2883 = vmatpush.bf16.xpose.msrb.mxu2 %v2871_v55 }
0x1182   : > { %v2743_v8 = vsel %vm1220_vm0, %v2741_v5, 0.0 }
0x1183   : > { %2744 = vadd.xlane.f32.xlu1 %v2743_v8  ;;  %v2736_v57 = vpop.xlane.xlu0 %2735 }
0x1184   : > { %v2738_v9 = vmul.f32 %v2736_v57, %v7148_v1 }
0x1186   : > { %v2740_v10 = vsub.f32 %v2726_v60, %v2738_v9 }
0x1188   : > { %v2742_v11 = vmul.f32 %v2740_v10, %v2740_v10 }
0x118a   : > { %v2746_v14 = vsel %vm1841_vm6, %v2742_v11, 0.0 }
0x118b   : > { %2747 = vadd.xlane.f32.xlu2 %v2746_v14 }
0x1196   : > { %v3097_v16 = vpop.permute.xlu0 %3096 }
0x1197   : > { %5862 = vmatpush.xpose.msk.msra.mxu3 %vm1262_vm1, %v3097_v16 }
0x119a   : > { %5863 = vmatmul.msk.f32.vlgmr.msra.gmra.mxu3 %vm1262_vm1, %v7379_v12 }
0x119c   : > { %3175 = vrot.lane.b32.xlu1 %v7379_v12, %s8059_s28 }
0x11a3   : > { %3173 = vrot.lane.b32.xlu2 %v7379_v12, %s8060_s23 }
0x11f6   : > { %v2745_v4 = vpop.xlane.xlu1 %2744 }
0x11f7   : > { %v2749_v27 = vmul.f32 %v2745_v4, %v7148_v1 }
0x11f9   : > { %v2751_v28 = vadd.f32 1e-05, %v2749_v27 }
0x11fb   : > { %6508 = vrsqrt.f32 %v2751_v28  ;;  %vm2759_vm7 = vweird.f32 %v2751_v28 }
0x11fe   : > { %v2748_v29 = vpop.xlane.xlu2 %2747 }
0x11ff   : > { %v2750_v15 = vmul.f32 %v2748_v29, %v7148_v1 }
0x1201   : > { %v6509_v63 = vpop.eup %6508  ;;  %v2752_v30 = vadd.f32 1e-05, %v2750_v15 }
0x1202   : > { %v2754_v31 = vmul.f32 %v6509_v63, %v2751_v28  ;;  %vm2760_vm2 = vweird.f32 %v6509_v63 }
0x1203   : > { %6510 = vrsqrt.f32 %v2752_v30  ;;  %vm2761_vm4 = vmor %vm2759_vm7, %vm2760_vm2  ;;  %vm2769_vm9 = vweird.f32 %v2752_v30 }
0x1204   : > { %v2755_v32 = vmul.f32 %v6509_v63, %v2754_v31 }
0x1206   : > { %v2756_v33 = vmul.f32 0.5, %v2755_v32  ;;  %v3174_v11 = vpop.permute.xlu2 %3173 }
0x1208   : > { %v2757_v61 = vsub.f32 1.5, %v2756_v33 }
0x1209   : > { %v6511_v34 = vpop.eup %6510 }
0x120a   : > { %v2758_v35 = vmul.f32 %v6509_v63, %v2757_v61  ;;  %v2764_v36 = vmul.f32 %v6511_v34, %v2752_v30  ;;  %vm2770_vm8 = vweird.f32 %v6511_v34 }
0x120b   : > { %vm2771_vm10 = vmor %vm2769_vm9, %vm2770_vm8 }
0x120c   : > { %v2765_v37 = vmul.f32 %v6511_v34, %v2764_v36  ;;  %v2762_v38 = vsel %vm2761_vm4, %v6509_v63, %v2758_v35 }
0x120d   : > { %v2773_v40 = vmul.f32 %v2762_v38, %v2739_v3 }
0x120e   : > { %v2766_v24 = vmul.f32 0.5, %v2765_v37  ;;  %v3176_v6 = vpop.permute.xlu1 %3175 }
0x120f   : > { %v2778_v18 = vmul.f32 %v6400_v39, %v2773_v40 }
0x1210   : > { %v2767_v19 = vsub.f32 1.5, %v2766_v24 }
0x1211   : > { %v7406_v49 = vadd.f32 %v6401_v45, %v2778_v18 }
0x1212   : > { %v2768_v41 = vmul.f32 %v6511_v34, %v2767_v19 }
0x1214   : > { %v2772_v42 = vsel %vm2771_vm10, %v6511_v34, %v2768_v41 }
0x1215   : > { %v2774_v47 = vmul.f32 %v2772_v42, %v2740_v10 }
0x1217   : > { %v2779_v46 = vmul.f32 %v6400_v39, %v2774_v47 }
0x1219   : > { %v2784_v50 = vadd.f32 %v6401_v45, %v2779_v46 }
0x121b   : > { %v2794_v51 = vpack.c.bf16 %v2784_v50, %v7406_v49 }
0x121d   : > { %5820 = vmatmul.msk.bf16.vlgmr.msra.gmra.mxu2 %vm1220_vm0, %v2794_v51  ;;  %v3119_v43 = vpop.f32.mrf.mxu3 }
0x121e   : > { %v3122_v44 = vmul.f32 0.35355338, %v3119_v43  ;;  %5865 = vmatpush.xpose.msk.msra.mxu2 %vm1262_vm1, %v3176_v6 }
0x1220   : > { %v3123_v53 = vsel %vm1262_vm1, %v3122_v44, -inf }
0x1221   : > { %3124 = vmax.xlane.f32.xlu0 %v3123_v53 }
0x1235   : > { %3226 = vrot.lane.b32.xlu0 %v7379_v12, %s8074_s12 }
0x1294   : > { %v3125_v58 = vpop.xlane.xlu0 %3124 }
0x1295   : > { %v3126_v59 = vsub.f32 %v3122_v44, %v3125_v58 }
0x1297   : > { %v3127_v60 = vmul.f32 1.442695, %v3126_v59 }
0x1299   : > { %6512 = vpow2.f32 %v3127_v60 }
0x129f   : > { %v6513_v62 = vpop.eup %6512 }
0x12a0   : > { %v2844_v0 = vpop.f32.mrf.mxu2  ;;  %v3129_v13 = vsel %vm1262_vm1, %v6513_v62, 0.0 }
0x12a1   : > { %3130 = vadd.xlane.f32.xlu2 %v3129_v13  ;;  %v2845_v3 = vadd.f32 %v6402_v56, %v2844_v0 }
0x12a3   : > { %v2849_v57 = vmax.f32 %v2845_v3, 0.0 }
0x12a7   : > { %v3227_v19 = vpop.permute.xlu0 %3226 }
0x12a8   : > { %v2846_v5 = vpop.f32.mrf.mxu2 }
0x12a9   : > { %v2847_v8 = vadd.f32 %v6402_v56, %v2846_v5 }
0x12ab   : > { %v2850_v9 = vmax.f32 %v2847_v8, 0.0 }
0x12ad   : > { %v2856_v10 = vpack.c.bf16 %v2850_v9, %v2849_v57 }
0x12af   : > { %5833 = vmatmul.msk.bf16.vlgmr.msrb.gmra.mxu2 %vm1979_vm14, %v2856_v10 }
0x12b9   : > { %3333 = vrot.lane.b32.xlu2 %v7379_v12, %s8062_s13 }
0x12bf   : > { %5866 = vmatmul.msk.f32.vlgmr.msra.gmra.mxu2 %vm1262_vm1, %v3174_v11 }
0x12c1   : > { %3252 = vrot.lane.b32.xlu2 %v7379_v12, %s8065_s17 }
0x1314   : > { %v3131_v25 = vpop.xlane.xlu2 %3130 }
0x1315   : > { %6514 = vrcp.f32 %v3131_v25  ;;  %vm3137_vm11 = vweird.f32 %v3131_v25  ;;  %v3143_v32 = vand.u32 2147483648, %v3131_v25  ;;  %v3141_v61 = vand.u32 2147483647, %v3131_v25 }
0x1317   : > { %v3144_v34 = vor.u32 1.1754944e-38, %v3143_v32  ;;  %vm3142_vm2 = vcmp.eq.f32.partialorder %v3141_v61, 8.507059e+37 }
0x131b   : > { %v6515_v4 = vpop.eup %6514 }
0x131c   : > { %v3133_v28 = vmul.f32 %v6515_v4, %v3131_v25  ;;  %vm3138_vm12 = vweird.f32 %v6515_v4  ;;  %v3334_v24 = vpop.permute.xlu2 %3333 }
0x131d   : > { %vm3139_vm13 = vmor %vm3137_vm11, %vm3138_vm12 }
0x131e   : > { %v3134_v15 = vsub.f32 1.0, %v3133_v28 }
0x1320   : > { %v3135_v63 = vmul.f32 %v6515_v4, %v3134_v15 }
0x1322   : > { %v3136_v33 = vadd.f32 %v6515_v4, %v3135_v63 }
0x1324   : > { %v3140_v35 = vsel %vm3139_vm13, %v6515_v4, %v3136_v33  ;;  %v3253_v40 = vpop.permute.xlu2 %3252 }
0x1325   : > { %v3145_v36 = vsel %vm3142_vm2, %v3144_v34, %v3140_v35 }
0x1326   : > { %v3146_v38 = vmul.f32 %v6513_v62, %v3145_v36 }
0x1332   : > { %v7426_v14 = vpop.f32.mrf.mxu2 }
0x1333   : > { %v2890_v58 = vadd.f32 %v7426_v14, %v7406_v49 }
0x1335   : > { %v7454_v59 = vadd.f32 %v7429_v2, %v2890_v58 }
0x1337   : > { %v2903_v60 = vsel %vm1220_vm0, %v7454_v59, 0.0 }
0x133a   : > { %v2887_v16 = vpop.f32.mrf.mxu2 }
0x133b   : > { %v2891_v17 = vadd.f32 %v2887_v16, %v2784_v50 }
0x133d   : > { %v7432_v20 = vadd.f32 %v7429_v2, %v2891_v17 }
0x1342   : > { %v3198_v21 = vpop.f32.mrf.mxu2 }
0x1343   : > { %v3201_v22 = vmul.f32 0.35355338, %v3198_v21 }
0x1345   : > { %v3202_v23 = vsel %vm1262_vm1, %v3201_v22, -inf }
0x1346   : > { %3203 = vmax.xlane.f32.xlu1 %v3202_v23 }
0x135f   : > { %3147 = vrot.lane.b32.xlu1 %v7379_v12, %s8061_s5 }
0x1367   : > { %3254 = vrot.lane.b32.xlu1 %v7379_v12, %s8063_s2 }
0x13b9   : > { %v3204_v26 = vpop.xlane.xlu1 %3203 }
0x13ba   : > { %v3205_v27 = vsub.f32 %v3201_v22, %v3204_v26 }
0x13bc   : > { %v3206_v29 = vmul.f32 1.442695, %v3205_v27 }
0x13be   : > { %6516 = vpow2.f32 %v3206_v29 }
0x13c4   : > { %v6517_v30 = vpop.eup %6516 }
0x13c5   : > { %v3208_v31 = vsel %vm1262_vm1, %v6517_v30, 0.0 }
0x13c6   : > { %3209 = vadd.xlane.f32.xlu0 %v3208_v31 }
0x13d1   : > { %v3148_v37 = vpop.permute.xlu1 %3147 }
0x13d2   : > { %3168 = vmatpush.msrb.mxu3 %v3148_v37 }
0x13d3   : > { %5864 = vmatmul.msk.f32.vlgmr.msrb.gmra.mxu3 %vm1262_vm1, %v3146_v38 }
0x13d4   : > { %3247 = vmatpush.msra.mxu3 %v3227_v19 }
0x13d6   : > { %5871 = vmatpush.xpose.msk.msrb.mxu3 %vm1262_vm1, %v3334_v24 }
0x13d9   : > { %v3255_v39 = vpop.permute.xlu1 %3254 }
0x13da   : > { %5868 = vmatpush.xpose.msk.msrb.mxu2 %vm1262_vm1, %v3255_v39  ;;  %3331 = vrot.lane.b32.xlu0 %v7379_v12, %s8064_s1 }
0x13dd   : > { %5869 = vmatmul.msk.f32.vlgmr.msrb.gmra.mxu2 %vm1262_vm1, %v3253_v40 }
0x1439   : > { %v3210_v41 = vpop.xlane.xlu0 %3209 }
0x143a   : > { %6518 = vrcp.f32 %v3210_v41  ;;  %v3222_v47 = vand.u32 2147483648, %v3210_v41  ;;  %v3220_v50 = vand.u32 2147483647, %v3210_v41  ;;  %vm3216_vm4 = vweird.f32 %v3210_v41 }
0x143c   : > { %v3223_v43 = vor.u32 1.1754944e-38, %v3222_v47  ;;  %vm3221_vm9 = vcmp.eq.f32.partialorder %v3220_v50, 8.507059e+37  ;;  %v2906_v47 = vsel %vm1841_vm6, %v7432_v20, 0.0 }
0x1440   : > { %v6519_v42 = vpop.eup %6518 }
0x1441   : > { %v3212_v45 = vmul.f32 %v6519_v42, %v3210_v41  ;;  %vm3217_vm7 = vweird.f32 %v6519_v42 }
0x1442   : > { %vm3218_vm8 = vmor %vm3216_vm4, %vm3217_vm7 }
0x1443   : > { %v3213_v18 = vsub.f32 1.0, %v3212_v45 }
0x1445   : > { %v3214_v46 = vmul.f32 %v6519_v42, %v3213_v18 }
0x1447   : > { %v3215_v51 = vadd.f32 %v6519_v42, %v3214_v46 }
0x1449   : > { %v3219_v44 = vsel %vm3218_vm8, %v6519_v42, %v3215_v51  ;;  %v6220_v42 = vld [vmem:[%s8075_s7 + $0x8] sm:$0xff] }
0x144a   : > { %v3224_v53 = vsel %vm3221_vm9, %v3223_v43, %v3219_v44  ;;  %v3447_v45 = vsel %vm1220_vm0, %v6220_v42, 0  ;;  %v6219_v44 = vld [vmem:[%s8075_s7] sm:$0xff] }
0x144b   : > { %v3225_v48 = vmul.f32 %v6517_v30, %v3224_v53  ;;  %v3444_v53 = vsel %vm1220_vm0, %v6219_v44, 0 }
0x144c   : > { %v3332_v54 = vpop.permute.xlu0 %3331 }
0x144d   : > { %5867 = vmatmul.msk.f32.vlgmr.msra.gmra.mxu3 %vm1262_vm1, %v3225_v48 }
0x1455   : > { %5872 = vmatmul.msk.f32.vlgmr.msrb.gmra.mxu3 %vm1262_vm1, %v3332_v54 }
0x1456   : > { %v7458_v62 = vpop.f32.mrf.mxu3 }
0x1460   : > { %v3277_v7 = vpop.f32.mrf.mxu2 }
0x1461   : > { %v3280_v55 = vmul.f32 0.35355338, %v3277_v7 }
0x1463   : > { %v3281_v6 = vsel %vm1262_vm1, %v3280_v55, -inf }
0x1464   : > { %3282 = vmax.xlane.f32.xlu1 %v3281_v6 }
0x147d   : > { %3384 = vrot.lane.b32.xlu1 %v7379_v12, %s8067_s26 }
0x14a7   : > { %2904 = vadd.xlane.f32.xlu1 %v2903_v60 }
0x14d0   : > { %v3249_v0 = vpop.f32.mrf.mxu3 }
0x14d7   : > { %v3283_v13 = vpop.xlane.xlu1 %3282 }
0x14d8   : > { %v3284_v56 = vsub.f32 %v3280_v55, %v3283_v13  ;;  %v3356_v3 = vpop.f32.mrf.mxu3 }
0x14d9   : > { %v3359_v5 = vmul.f32 0.35355338, %v3356_v3 }
0x14da   : > { %v3285_v8 = vmul.f32 1.442695, %v3284_v56 }
0x14db   : > { %v3360_v57 = vsel %vm1262_vm1, %v3359_v5, -inf }
0x14dc   : > { %6520 = vpow2.f32 %v3285_v8  ;;  %3361 = vmax.xlane.f32.xlu0 %v3360_v57 }
0x14e2   : > { %v6521_v49 = vpop.eup %6520 }
0x14e3   : > { %v3287_v9 = vsel %vm1262_vm1, %v6521_v49, 0.0 }
0x14e4   : > { %3288 = vadd.xlane.f32.xlu0 %v3287_v9 }
0x14ef   : > { %v3385_v10 = vpop.permute.xlu1 %3384 }
0x14f0   : > { %3405 = vmatpush.msra.mxu2 %v3385_v10 }
0x14f8   : > { %3411 = vrot.lane.b32.xlu0 %v3249_v0, %s8068_s10 }
0x151a   : > { %v2905_v18 = vpop.xlane.xlu1 %2904 }
0x151b   : > { %v2909_v46 = vmul.f32 %v2905_v18, %v7148_v1 }
0x151d   : > { %v2911_v50 = vsub.f32 %v7454_v59, %v2909_v46 }
0x151f   : > { %v2913_v51 = vmul.f32 %v2911_v50, %v2911_v50 }
0x1521   : > { %v2915_v43 = vsel %vm1220_vm0, %v2913_v51, 0.0 }
0x154f   : > { %v3362_v11 = vpop.xlane.xlu0 %3361 }
0x1550   : > { %v3363_v14 = vsub.f32 %v3359_v5, %v3362_v11 }
0x1552   : > { %v3364_v16 = vmul.f32 1.442695, %v3363_v14 }
0x1554   : > { %6522 = vpow2.f32 %v3364_v16 }
0x1557   : > { %v3289_v21 = vpop.xlane.xlu0 %3288 }
0x1558   : > { %6524 = vrcp.f32 %v3289_v21  ;;  %v3301_v27 = vand.u32 2147483648, %v3289_v21  ;;  %vm3295_vm11 = vweird.f32 %v3289_v21  ;;  %v3299_v28 = vand.u32 2147483647, %v3289_v21 }
0x155a   : > { %v6523_v17 = vpop.eup %6522  ;;  %v3302_v63 = vor.u32 1.1754944e-38, %v3301_v27  ;;  %vm3300_vm13 = vcmp.eq.f32.partialorder %v3299_v28, 8.507059e+37 }
0x155b   : > { %v3366_v2 = vsel %vm1262_vm1, %v6523_v17, 0.0 }
0x155c   : > { %3367 = vadd.xlane.f32.xlu2 %v3366_v2  ;;  %v6405_v2 = vld [vmem:[%s8042_s6 + $0x1] ss:$0 sm:$0xff]  ;;  %s8077_s6 = sld [smem:[#allocation26_spill]] }
0x155e   : > { %v6525_v22 = vpop.eup %6524 }
0x155f   : > { %v3291_v23 = vmul.f32 %v6525_v22, %v3289_v21  ;;  %vm3296_vm10 = vweird.f32 %v6525_v22 }
0x1560   : > { %vm3297_vm12 = vmor %vm3295_vm11, %vm3296_vm10 }
0x1561   : > { %v3292_v25 = vsub.f32 1.0, %v3291_v23 }
0x1563   : > { %v3293_v4 = vmul.f32 %v6525_v22, %v3292_v25  ;;  %v6406_v25 = vld [vmem:[%s8076_s3] ss:$0 sm:$0xff] }
0x1565   : > { %v3294_v26 = vadd.f32 %v6525_v22, %v3293_v4 }
0x1567   : > { %v3298_v15 = vsel %vm3297_vm12, %v6525_v22, %v3294_v26 }
0x1568   : > { %v3303_v30 = vsel %vm3300_vm13, %v3302_v63, %v3298_v15 }
0x1569   : > { %v3304_v33 = vmul.f32 %v6521_v49, %v3303_v30 }
0x156a   : > { %v3412_v48 = vpop.permute.xlu0 %3411 }
0x156b   : > { %v3422_v54 = vsel %vm1262_vm1, %v7458_v62, %v3412_v48  ;;  %v6222_v48 = vld [vmem:[%s8077_s6 + $0x8] sm:$0xff] }
0x1574   : > { %3305 = vrot.lane.b32.xlu2 %v7379_v12, %s8066_s18 }
0x15cf   : > { %v3368_v29 = vpop.xlane.xlu2 %3367 }
0x15d0   : > { %6526 = vrcp.f32 %v3368_v29  ;;  %v3380_v34 = vand.u32 2147483648, %v3368_v29  ;;  %v3378_v36 = vand.u32 2147483647, %v3368_v29  ;;  %vm3374_vm7 = vweird.f32 %v3368_v29 }
0x15d2   : > { %v3381_v38 = vor.u32 1.1754944e-38, %v3380_v34  ;;  %vm3379_vm8 = vcmp.eq.f32.partialorder %v3378_v36, 8.507059e+37 }
0x15d6   : > { %v6527_v31 = vpop.eup %6526 }
0x15d7   : > { %v3370_v12 = vmul.f32 %v6527_v31, %v3368_v29  ;;  %v3306_v32 = vpop.permute.xlu2 %3305  ;;  %vm3375_vm2 = vweird.f32 %v6527_v31 }
0x15d8   : > { %3326 = vmatpush.msra.mxu0 %v3306_v32  ;;  %vm3376_vm4 = vmor %vm3374_vm7, %vm3375_vm2 }
0x15d9   : > { %v3371_v61 = vsub.f32 1.0, %v3370_v12  ;;  %5870 = vmatmul.msk.f32.vlgmr.msra.gmra.mxu0 %vm1262_vm1, %v3304_v33 }
0x15da   : > { %3455 = vmatpush.bf16.xpose.msrb.mxu0 %v3447_v45 }
0x15db   : > { %v3372_v35 = vmul.f32 %v6527_v31, %v3371_v61 }
0x15dd   : > { %v3373_v37 = vadd.f32 %v6527_v31, %v3372_v35 }
0x15df   : > { %v3377_v24 = vsel %vm3376_vm4, %v6527_v31, %v3373_v37 }
0x15e0   : > { %v3382_v19 = vsel %vm3379_vm8, %v3381_v38, %v3377_v24 }
0x15e1   : > { %v3383_v39 = vmul.f32 %v6523_v17, %v3382_v19 }
0x15e2   : > { %3456 = vmatpush.bf16.xpose.msrb.mxu0 %v3444_v53 }
0x15e3   : > { %5873 = vmatmul.msk.f32.vlgmr.msra.gmra.mxu2 %vm1262_vm1, %v3383_v39 }
0x1656   : > { %v3328_v40 = vpop.f32.mrf.mxu0 }
0x1657   : > { %3415 = vrot.lane.b32.xlu0 %v3328_v40, %s8070_s22 }
0x1666   : > { %v3407_v41 = vpop.f32.mrf.mxu2 }
0x1667   : > { %3419 = vrot.lane.b32.xlu2 %v3407_v41, %s8069_s15 }
0x1681   : > { %2907 = vadd.xlane.f32.xlu0 %v2906_v47 }
0x1690   : > { %2916 = vadd.xlane.f32.xlu2 %v2915_v43 }
0x16c1   : > { %v3420_v55 = vpop.permute.xlu2 %3419 }
0x16c9   : > { %v3416_v7 = vpop.permute.xlu0 %3415 }
0x16ca   : > { %v3423_v6 = vsel %vm1784_vm15, %v3422_v54, %v3416_v7  ;;  %v3534_v54 = vsel %vm1220_vm0, %v6222_v48, 0  ;;  %v6221_v7 = vld [vmem:[%s8077_s6] sm:$0xff] }
0x16cb   : > { %v3424_v58 = vsel %vm1787_vm5, %v3423_v6, %v3420_v55  ;;  %3542 = vmatpush.bf16.xpose.msra.mxu3 %v3534_v54  ;;  %v3531_v55 = vsel %vm1220_vm0, %v6221_v7, 0  ;;  %v6226_v6 = vld [vmem:[%s8077_s6 + $0x28] sm:$0xff] }
0x16cc   : > { %v3429_v60 = vpack.c.bf16 %v3424_v58, %v3424_v58 }
0x16ce   : > { %5882 = vmatmul.msk.bf16.vlgmr.msrb.gmra.mxu0 %vm1220_vm0, %v3429_v60 }
0x16d3   : > { %3543 = vmatpush.bf16.xpose.msra.mxu3 %v3531_v55 }
0x16f4   : > { %v2908_v59 = vpop.xlane.xlu0 %2907 }
0x16f5   : > { %v2910_v0 = vmul.f32 %v2908_v59, %v7148_v1  ;;  %v3586_v59 = vsel %vm1220_vm0, %v6226_v6, 0 }
0x16f6   : > { %3592 = vmatpush.bf16.xpose.msrb.mxu2 %v3586_v59 }
0x16f7   : > { %v2912_v13 = vsub.f32 %v7432_v20, %v2910_v0  ;;  %v6404_v20 = vld [vmem:[%s8035_s30 + $0x1] ss:$0 sm:$0xff]  ;;  %s8089_s30 = sld [smem:[#allocation34_spill]] }
0x16f9   : > { %v2914_v56 = vmul.f32 %v2912_v13, %v2912_v13 }
0x16fb   : > { %v2918_v3 = vsel %vm1841_vm6, %v2914_v56, 0.0 }
0x16fc   : > { %2919 = vadd.xlane.f32.xlu1 %v2918_v3 }
0x1703   : > { %v2917_v62 = vpop.xlane.xlu2 %2916 }
0x1704   : > { %v2921_v5 = vmul.f32 %v2917_v62, %v7148_v1 }
0x1706   : > { %v2923_v8 = vadd.f32 1e-05, %v2921_v5 }
0x1708   : > { %6528 = vrsqrt.f32 %v2923_v8  ;;  %vm2931_vm10 = vweird.f32 %v2923_v8 }
0x170e   : > { %v6529_v57 = vpop.eup %6528 }
0x170f   : > { %v2926_v49 = vmul.f32 %v6529_v57, %v2923_v8  ;;  %vm2932_vm9 = vweird.f32 %v6529_v57 }
0x1710   : > { %vm2933_vm11 = vmor %vm2931_vm10, %vm2932_vm9 }
0x1711   : > { %v2927_v9 = vmul.f32 %v6529_v57, %v2926_v49 }
0x1713   : > { %v2928_v10 = vmul.f32 0.5, %v2927_v9  ;;  %v6410_v9 = vld [vmem:[%s8079_s14] ss:$0 sm:$0xff] }
0x1715   : > { %v2929_v11 = vsub.f32 1.5, %v2928_v10 }
0x1717   : > { %v2930_v14 = vmul.f32 %v6529_v57, %v2929_v11 }
0x1719   : > { %v2934_v16 = vsel %vm2933_vm11, %v6529_v57, %v2930_v14  ;;  %v6409_v57 = vld [vmem:[%s8078_s8] ss:$0 sm:$0xff] }
0x171a   : > { %v2945_v17 = vmul.f32 %v2934_v16, %v2911_v50  ;;  %v6225_v16 = vld [vmem:[%s8077_s6 + $0x20] sm:$0xff] }
0x171c   : > { %v2950_v21 = vmul.f32 %v6404_v20, %v2945_v17 }
0x171e   : > { %v2955_v22 = vadd.f32 %v6405_v2, %v2950_v21 }
0x1720   : > { %v2959_v23 = vsel %vm1220_vm0, %v2955_v22, 0.0 }
0x1721   : > { %2960 = vadd.xlane.f32.xlu2 %v2959_v23 }
0x174b   : > { %v3458_v4 = vpop.f32.mrf.mxu0 }
0x174c   : > { %v3462_v26 = vadd.f32 %v3458_v4, %v7367_v52  ;;  %v6223_v4 = vld [vmem:[%s8077_s6 + $0x10] sm:$0xff] }
0x174e   : > { %v3467_v27 = vadd.f32 %v6406_v25, %v3462_v26  ;;  %v3577_v26 = vsel %vm1220_vm0, %v6223_v4, 0 }
0x1750   : > { %v3470_v28 = vsel %vm1220_vm0, %v3467_v27, 0.0 }
0x1751   : > { %3471 = vadd.xlane.f32.xlu1 %v3470_v28 }
0x1753   : > { %v3460_v29 = vpop.f32.mrf.mxu0 }
0x1754   : > { %v6411_v29 = vld [vmem:[%s8080_s19] ss:$0 sm:$0xff] }
0x176f   : > { %v2920_v15 = vpop.xlane.xlu1 %2919 }
0x1770   : > { %v2922_v63 = vmul.f32 %v2920_v15, %v7148_v1 }
0x1772   : > { %v2924_v30 = vadd.f32 1e-05, %v2922_v63 }
0x1774   : > { %6530 = vrsqrt.f32 %v2924_v30  ;;  %vm2941_vm13 = vweird.f32 %v2924_v30 }
0x177a   : > { %v6531_v31 = vpop.eup %6530 }
0x177b   : > { %v2936_v12 = vmul.f32 %v6531_v31, %v2924_v30  ;;  %vm2942_vm12 = vweird.f32 %v6531_v31 }
0x177c   : > { %vm2943_vm2 = vmor %vm2941_vm13, %vm2942_vm12 }
0x177d   : > { %v2937_v32 = vmul.f32 %v6531_v31, %v2936_v12 }
0x177f   : > { %v2938_v33 = vmul.f32 0.5, %v2937_v32 }
0x1781   : > { %v2939_v61 = vsub.f32 1.5, %v2938_v33 }
0x1783   : > { %v2940_v34 = vmul.f32 %v6531_v31, %v2939_v61 }
0x1785   : > { %v2944_v52 = vsel %vm2943_vm2, %v6531_v31, %v2940_v34  ;;  %vm8083_vm2 = vcmask 1041408  }
0x1786   : > { %v2946_v35 = vmul.f32 %v2944_v52, %v2912_v13 }
0x1788   : > { %v2951_v36 = vmul.f32 %v6404_v20, %v2946_v35 }
0x178a   : > { %v2956_v37 = vadd.f32 %v6405_v2, %v2951_v36  ;;  %v3583_v2 = vsel %vm1220_vm0, %v6225_v16, 0 }
0x178b   : > { %3593 = vmatpush.bf16.xpose.msrb.mxu2 %v3583_v2 }
0x178c   : > { %v2962_v38 = vsel %vm1841_vm6, %v2956_v37, 0.0 }
0x178d   : > { %2963 = vadd.xlane.f32.xlu0 %v2962_v38  ;;  %v6407_v38 = vld [vmem:[%s8081_s24] ss:$0 sm:$0xff]  ;;  %s8087_s24 = sld [smem:[#allocation29_spill]] }
0x1794   : > { %v2961_v24 = vpop.xlane.xlu2 %2960 }
0x1795   : > { %v2965_v19 = vmul.f32 %v2961_v24, %v7148_v1 }
0x1797   : > { %v7497_v39 = vsub.f32 %v2955_v22, %v2965_v19  ;;  %v6224_v22 = vld [vmem:[%s8077_s6 + $0x18] sm:$0xff] }
0x1798   : > { %v3580_v25 = vsel %vm1220_vm0, %v6224_v22, 0 }
0x1799   : > { %v2969_v40 = vmul.f32 %v7497_v39, %v7497_v39  ;;  %3594 = vmatpush.bf16.xpose.msrb.mxu2 %v3580_v25 }
0x179b   : > { %v2971_v41 = vsel %vm1220_vm0, %v2969_v40, 0.0 }
0x179c   : > { %2972 = vadd.xlane.f32.xlu2 %v2971_v41  ;;  %v6408_v41 = vld [vmem:[%s8082_s25] ss:$0 sm:$0xff]  ;;  %s8086_s25 = sld [smem:[#allocation28_spill]] }
0x17a1   : > { %3595 = vmatpush.bf16.xpose.msrb.mxu2 %v3577_v26 }
0x17b4   : > { %3570 = vrot.lane.b32.xlu2 %v6411_v29, %s8073_s21 }
0x17c4   : > { %v3472_v42 = vpop.xlane.xlu1 %3471 }
0x17c5   : > { %v3473_v45 = vmul.f32 %v3472_v42, %v7148_v1 }
0x17c7   : > { %v3474_v18 = vsub.f32 %v3467_v27, %v3473_v45 }
0x17c9   : > { %v3475_v47 = vmul.f32 %v3474_v18, %v3474_v18 }
0x17cb   : > { %v3476_v46 = vsel %vm1220_vm0, %v3475_v47, 0.0 }
0x17cc   : > { %3477 = vadd.xlane.f32.xlu1 %v3476_v46 }
0x1800   : > { %v2964_v50 = vpop.xlane.xlu0 %2963 }
0x1801   : > { %v2966_v51 = vmul.f32 %v2964_v50, %v7148_v1 }
0x1803   : > { %v7505_v43 = vsub.f32 %v2956_v37, %v2966_v51 }
0x1805   : > { %v2970_v44 = vmul.f32 %v7505_v43, %v7505_v43 }
0x1807   : > { %v2974_v53 = vsel %vm1841_vm6, %v2970_v44, 0.0 }
0x1808   : > { %2975 = vadd.xlane.f32.xlu0 %v2974_v53 }
0x180f   : > { %v2973_v17 = vpop.xlane.xlu2 %2972 }
0x1810   : > { %v2977_v21 = vmul.f32 %v2973_v17, %v7148_v1 }
0x1812   : > { %v2979_v23 = vadd.f32 1e-05, %v2977_v21 }
0x1814   : > { %vm2987_vm9 = vweird.f32 %v2979_v23 }
0x1817   : > { %v3571_v53 = vpop.permute.xlu2 %3570 }
0x183f   : > { %v3478_v58 = vpop.xlane.xlu1 %3477 }
0x1840   : > { %v3479_v60 = vmul.f32 %v3478_v58, %v7148_v1 }
0x1842   : > { %v3480_v0 = vadd.f32 1e-05, %v3479_v60 }
0x1844   : > { %6532 = vrsqrt.f32 %v3480_v0  ;;  %vm3487_vm7 = vweird.f32 %v3480_v0 }
0x1845   : > { %6534 = vrsqrt.f32 %v2979_v23 }
0x184a   : > { %v6533_v13 = vpop.eup %6532 }
0x184b   : > { %v3482_v56 = vmul.f32 %v6533_v13, %v3480_v0  ;;  %vm3488_vm6 = vweird.f32 %v6533_v13  ;;  %v6535_v27 = vpop.eup %6534 }
0x184c   : > { %vm3489_vm4 = vmor %vm3487_vm7, %vm3488_vm6  ;;  %v2982_v28 = vmul.f32 %v6535_v27, %v2979_v23  ;;  %vm2988_vm8 = vweird.f32 %v6535_v27 }
0x184d   : > { %v3483_v3 = vmul.f32 %v6533_v13, %v3482_v56  ;;  %vm2989_vm10 = vmor %vm2987_vm9, %vm2988_vm8 }
0x184e   : > { %v2983_v15 = vmul.f32 %v6535_v27, %v2982_v28  ;;  %vm8084_vm6 = vmmov %vm8083_vm2 }
0x184f   : > { %v3484_v62 = vmul.f32 0.5, %v3483_v3 }
0x1850   : > { %v2984_v12 = vmul.f32 0.5, %v2983_v15 }
0x1851   : > { %v3485_v5 = vsub.f32 1.5, %v3484_v62 }
0x1852   : > { %v2985_v32 = vsub.f32 1.5, %v2984_v12 }
0x1853   : > { %v3486_v8 = vmul.f32 %v6533_v13, %v3485_v5 }
0x1854   : > { %v2986_v61 = vmul.f32 %v6535_v27, %v2985_v32 }
0x1855   : > { %v3490_v49 = vsel %vm3489_vm4, %v6533_v13, %v3486_v8 }
0x1856   : > { %v3491_v10 = vmul.f32 %v3490_v49, %v3474_v18  ;;  %v2990_v35 = vsel %vm2989_vm10, %v6535_v27, %v2986_v61 }
0x1857   : > { %v3001_v24 = vmul.f32 %v2990_v35, %v7497_v39 }
0x1858   : > { %v3495_v11 = vmul.f32 %v6409_v57, %v3491_v10 }
0x1859   : > { %v3006_v42 = vmul.f32 %v6407_v38, %v3001_v24 }
0x185a   : > { %v7519_v14 = vadd.f32 %v6410_v9, %v3495_v11 }
0x185b   : > { %v3011_v47 = vadd.f32 %v6408_v41, %v3006_v42 }
0x185c   : > { %v3513_v20 = vpack.c.bf16 %v7519_v14, %v7519_v14 }
0x185e   : > { %5891 = vmatmul.msk.bf16.vlgmr.msra.gmra.mxu3 %vm1220_vm0, %v3513_v20 }
0x187b   : > { %v2976_v63 = vpop.xlane.xlu0 %2975 }
0x187c   : > { %v2978_v30 = vmul.f32 %v2976_v63, %v7148_v1 }
0x187e   : > { %v2980_v31 = vadd.f32 1e-05, %v2978_v30 }
0x1880   : > { %6536 = vrsqrt.f32 %v2980_v31  ;;  %vm2997_vm12 = vweird.f32 %v2980_v31 }
0x1886   : > { %v6537_v33 = vpop.eup %6536 }
0x1887   : > { %v2992_v34 = vmul.f32 %v6537_v33, %v2980_v31  ;;  %vm2998_vm11 = vweird.f32 %v6537_v33 }
0x1888   : > { %vm2999_vm13 = vmor %vm2997_vm12, %vm2998_vm11 }
0x1889   : > { %v2993_v52 = vmul.f32 %v6537_v33, %v2992_v34 }
0x188b   : > { %v2994_v36 = vmul.f32 0.5, %v2993_v52 }
0x188d   : > { %v2995_v37 = vsub.f32 1.5, %v2994_v36 }
0x188f   : > { %v2996_v19 = vmul.f32 %v6537_v33, %v2995_v37 }
0x1891   : > { %v3000_v40 = vsel %vm2999_vm13, %v6537_v33, %v2996_v19 }
0x1892   : > { %v3002_v45 = vmul.f32 %v3000_v40, %v7505_v43 }
0x1894   : > { %v3007_v18 = vmul.f32 %v6407_v38, %v3002_v45 }
0x1896   : > { %v3012_v46 = vadd.f32 %v6408_v41, %v3007_v18 }
0x1898   : > { %v7538_v50 = vpack.c.bf16 %v3012_v46, %v3011_v47 }
0x189a   : > { %5908 = vmatmul.msk.bf16.vlgmr.msrb.gmra.mxu2 %vm1220_vm0, %v7538_v50 }
0x18e1   : > { %v3545_v51 = vpop.f32.mrf.mxu3 }
0x18e2   : > { %v3546_v43 = vadd.f32 %v6411_v29, %v3545_v51 }
0x18e9   : > { %v3547_v44 = vpop.f32.mrf.mxu3 }
0x191d   : > { %v3597_v39 = vpop.f32.mrf.mxu2 }
0x191e   : > { %v7542_v48 = vadd.f32 %v3597_v39, %v3571_v53 }
0x1920   : > { %3688 = vrot.lane.b32.xlu1 %v7542_v48, %s8060_s23 }
0x1925   : > { %v3599_v54 = vpop.f32.mrf.mxu2 }
0x1926   : > { %v7546_v7 = vadd.f32 %v3599_v54, %v3571_v53 }
0x1928   : > { %3864 = vrot.lane.b32.xlu2 %v7546_v7, %s8064_s1  ;;  %3690 = vrot.lane.b32.xlu0 %v7546_v7, %s8060_s23 }
0x1929   : > { %5909 = vmatpush.xpose.msk.msra.mxu1 %vm1262_vm1, %v7546_v7 }
0x192d   : > { %5910 = vmatpush.xpose.msk.msra.mxu1 %vm1262_vm1, %v7542_v48 }
0x1930   : > { %5911 = vmatmul.msk.f32.vlgmr.msra.gmra.mxu1 %vm1262_vm1, %v3546_v43  ;;  %3686 = vrot.lane.b32.xlu0 %v3546_v43, %s8060_s23 }
0x1938   : > { %3743 = vrot.lane.b32.xlu0 %v7542_v48, %s8059_s28 }
0x1940   : > { %3658 = vrot.lane.b32.xlu0 %v7546_v7, %s8073_s21 }
0x1948   : > { %3777 = vrot.lane.b32.xlu0 %v7546_v7, %s8065_s17 }
0x1982   : > { %v3865_v49 = vpop.permute.xlu2 %3864 }
0x1992   : > { %v3689_v6 = vpop.permute.xlu1 %3688 }
0x199a   : > { %v3691_v55 = vpop.permute.xlu0 %3690 }
0x199b   : > { %5914 = vmatpush.xpose.msk.msrb.mxu1 %vm1262_vm1, %v3691_v55 }
0x199f   : > { %5915 = vmatpush.xpose.msk.msrb.mxu1 %vm1262_vm1, %v3689_v6 }
0x19a2   : > { %v3687_v58 = vpop.permute.xlu0 %3686 }
0x19a3   : > { %5916 = vmatmul.msk.f32.vlgmr.msrb.gmra.mxu1 %vm1262_vm1, %v3687_v58 }
0x19aa   : > { %v3744_v60 = vpop.permute.xlu0 %3743 }
0x19ad   : > { %v3628_v59 = vpop.f32.mrf.mxu1 }
0x19ae   : > { %v3631_v0 = vmul.f32 0.35355338, %v3628_v59 }
0x19b0   : > { %v3632_v13 = vsel %vm1296_vm3, %v3631_v0, -inf }
0x19b1   : > { %3633 = vmax.xlane.f32.xlu1 %v3632_v13 }
0x19b2   : > { %v3659_v56 = vpop.permute.xlu0 %3658 }
0x19b3   : > { %5912 = vmatpush.msk.msra.mxu0 %vm8083_vm2, %v3659_v56 }
0x19ba   : > { %v3778_v10 = vpop.permute.xlu0 %3777 }
0x19ca   : > { %3745 = vrot.lane.b32.xlu1 %v7546_v7, %s8059_s28 }
0x19d2   : > { %3656 = vrot.lane.b32.xlu1 %v7542_v48, %s8073_s21 }
0x19da   : > { %3860 = vrot.lane.b32.xlu1 %v3546_v43, %s8064_s1 }
0x1a20   : > { %v3715_v3 = vpop.f32.mrf.mxu1 }
0x1a21   : > { %v3718_v62 = vmul.f32 0.35355338, %v3715_v3 }
0x1a23   : > { %v3719_v5 = vsel %vm1296_vm3, %v3718_v62, -inf }
0x1a24   : > { %3720 = vmax.xlane.f32.xlu2 %v3719_v5  ;;  %v3634_v8 = vpop.xlane.xlu1 %3633 }
0x1a25   : > { %v3635_v11 = vsub.f32 %v3631_v0, %v3634_v8 }
0x1a27   : > { %v3636_v20 = vmul.f32 1.442695, %v3635_v11 }
0x1a29   : > { %6538 = vpow2.f32 %v3636_v20 }
0x1a2f   : > { %v6539_v16 = vpop.eup %6538 }
0x1a30   : > { %v3638_v17 = vsel %vm1296_vm3, %v6539_v16, 0.0 }
0x1a3c   : > { %v3746_v57 = vpop.permute.xlu1 %3745  ;;  %3862 = vrot.lane.b32.xlu2 %v7542_v48, %s8064_s1 }
0x1a3d   : > { %5917 = vmatpush.msk.msrb.mxu3 %vm8084_vm6, %v3746_v57  ;;  %vm8085_vm6 = vmmov %vm8083_vm2 }
0x1a3f   : > { %3768 = vmatpush.msrb.mxu3 %v3744_v60 }
0x1a41   : > { %5924 = vmatpush.xpose.msk.msra.mxu3 %vm1262_vm1, %v3865_v49 }
0x1a44   : > { %v3657_v9 = vpop.permute.xlu1 %3656 }
0x1a45   : > { %3681 = vmatpush.msra.mxu0 %v3657_v9 }
0x1a47   : > { %5919 = vmatpush.xpose.msk.msrb.mxu0 %vm1262_vm1, %v3778_v10 }
0x1a4c   : > { %v3861_v46 = vpop.permute.xlu1 %3860 }
0x1a65   : > { %3639 = vadd.xlane.f32.xlu2 %v3638_v17 }
0x1a7d   : > { %3775 = vrot.lane.b32.xlu2 %v7542_v48, %s8065_s17 }
0x1a97   : > { %v3721_v2 = vpop.xlane.xlu2 %3720 }
0x1a98   : > { %v3722_v21 = vsub.f32 %v3718_v62, %v3721_v2 }
0x1a9a   : > { %v3723_v22 = vmul.f32 1.442695, %v3722_v21 }
0x1a9c   : > { %6540 = vpow2.f32 %v3723_v22 }
0x1a9f   : > { %v3863_v23 = vpop.permute.xlu2 %3862 }
0x1aa0   : > { %5925 = vmatpush.xpose.msk.msra.mxu3 %vm1262_vm1, %v3863_v23 }
0x1aa2   : > { %v6541_v25 = vpop.eup %6540 }
0x1aa3   : > { %v3725_v4 = vsel %vm1296_vm3, %v6541_v25, 0.0 }
0x1aa4   : > { %3726 = vadd.xlane.f32.xlu0 %v3725_v4 }
0x1ab8   : > { %3773 = vrot.lane.b32.xlu0 %v3546_v43, %s8065_s17 }
0x1ac0   : > { %3919 = vrot.lane.b32.xlu0 %v7546_v7, %s8062_s13 }
0x1ad8   : > { %v3640_v26 = vpop.xlane.xlu2 %3639 }
0x1ad9   : > { %6542 = vrcp.f32 %v3640_v26  ;;  %v3652_v63 = vand.u32 2147483648, %v3640_v26  ;;  %v3650_v31 = vand.u32 2147483647, %v3640_v26  ;;  %vm3646_vm4 = vweird.f32 %v3640_v26 }
0x1adb   : > { %v3653_v32 = vor.u32 1.1754944e-38, %v3652_v63  ;;  %vm3651_vm9 = vcmp.eq.f32.partialorder %v3650_v31, 8.507059e+37 }
0x1adf   : > { %v6543_v27 = vpop.eup %6542 }
0x1ae0   : > { %v3642_v28 = vmul.f32 %v6543_v27, %v3640_v26  ;;  %v3776_v29 = vpop.permute.xlu2 %3775  ;;  %vm3647_vm7 = vweird.f32 %v6543_v27 }
0x1ae1   : > { %5920 = vmatpush.xpose.msk.msrb.mxu0 %vm1262_vm1, %v3776_v29  ;;  %vm3648_vm8 = vmor %vm3646_vm4, %vm3647_vm7 }
0x1ae2   : > { %v3643_v15 = vsub.f32 1.0, %v3642_v28 }
0x1ae4   : > { %v3644_v30 = vmul.f32 %v6543_v27, %v3643_v15 }
0x1ae6   : > { %v3645_v12 = vadd.f32 %v6543_v27, %v3644_v30 }
0x1ae8   : > { %v3649_v33 = vsel %vm3648_vm8, %v6543_v27, %v3645_v12 }
0x1ae9   : > { %v3654_v61 = vsel %vm3651_vm9, %v3653_v32, %v3649_v33 }
0x1aea   : > { %v3655_v34 = vmul.f32 %v6539_v16, %v3654_v61 }
0x1aec   : > { %5913 = vmatmul.msk.f32.vlgmr.msra.gmra.mxu0 %vm1296_vm3, %v3655_v34  ;;  %v6228_v34 = vld [vmem:[%s8086_s25 + $0x8] sm:$0xff] }
0x1b17   : > { %v3727_v52 = vpop.xlane.xlu0 %3726 }
0x1b18   : > { %6544 = vrcp.f32 %v3727_v52  ;;  %v3739_v38 = vand.u32 2147483648, %v3727_v52  ;;  %v3737_v19 = vand.u32 2147483647, %v3727_v52  ;;  %vm3733_vm11 = vweird.f32 %v3727_v52 }
0x1b1a   : > { %v3740_v41 = vor.u32 1.1754944e-38, %v3739_v38  ;;  %vm3738_vm13 = vcmp.eq.f32.partialorder %v3737_v19, 8.507059e+37 }
0x1b1e   : > { %v6545_v35 = vpop.eup %6544 }
0x1b1f   : > { %v3729_v36 = vmul.f32 %v6545_v35, %v3727_v52  ;;  %vm3734_vm10 = vweird.f32 %v6545_v35  ;;  %v3984_v52 = vsel %vm1220_vm0, %v6228_v34, 0 }
0x1b20   : > { %vm3735_vm12 = vmor %vm3733_vm11, %vm3734_vm10  ;;  %3992 = vmatpush.bf16.xpose.msra.mxu2 %v3984_v52 }
0x1b21   : > { %v3730_v37 = vsub.f32 1.0, %v3729_v36 }
0x1b23   : > { %v3731_v24 = vmul.f32 %v6545_v35, %v3730_v37  ;;  %v6227_v37 = vld [vmem:[%s8086_s25] sm:$0xff] }
0x1b24   : > { %v3981_v38 = vsel %vm1220_vm0, %v6227_v37, 0  ;;  %v6239_v37 = vld [vmem:[%s6807_s27 + $0x50] sm:$0xff] }
0x1b25   : > { %v3732_v40 = vadd.f32 %v6545_v35, %v3731_v24 }
0x1b27   : > { %v3736_v42 = vsel %vm3735_vm12, %v6545_v35, %v3732_v40 }
0x1b28   : > { %v3741_v45 = vsel %vm3738_vm13, %v3740_v41, %v3736_v42  ;;  %3993 = vmatpush.bf16.xpose.msra.mxu2 %v3981_v38  ;;  %v4239_v38 = vsel %vm1220_vm0, %v6239_v37, 0 }
0x1b29   : > { %v3742_v18 = vmul.f32 %v6541_v25, %v3741_v45 }
0x1b2a   : > { %v3774_v47 = vpop.permute.xlu0 %3773 }
0x1b2b   : > { %5918 = vmatmul.msk.f32.vlgmr.msrb.gmra.mxu3 %vm1296_vm3, %v3742_v18  ;;  %5921 = vmatmul.msk.f32.vlgmr.msrb.gmra.mxu0 %vm1262_vm1, %v3774_v47  ;;  %v6412_v47 = vld [vmem:[%s8087_s24] ss:$0 sm:$0xff] }
0x1b32   : > { %v3920_v51 = vpop.permute.xlu0 %3919 }
0x1b33   : > { %5926 = vmatmul.msk.f32.vlgmr.msra.gmra.mxu3 %vm1262_vm1, %v3861_v46  ;;  %5927 = vmatpush.msk.msra.mxu0 %vm8083_vm2, %v3920_v51 }
0x1b69   : > { %v7594_v44 = vpop.f32.mrf.mxu0 }
0x1ba8   : > { %v3802_v53 = vpop.f32.mrf.mxu0 }
0x1ba9   : > { %v3805_v39 = vmul.f32 0.35355338, %v3802_v53 }
0x1bab   : > { %v3806_v54 = vsel %vm1296_vm3, %v3805_v39, -inf }
0x1bac   : > { %3807 = vmax.xlane.f32.xlu1 %v3806_v54  ;;  %v6232_v54 = vld [vmem:[%s8088_s29 + $0x18] sm:$0xff] }
0x1bae   : > { %v3770_v43 = vpop.f32.mrf.mxu3 }
0x1bb6   : > { %v3889_v55 = vpop.f32.mrf.mxu3 }
0x1bb7   : > { %v3892_v6 = vmul.f32 0.35355338, %v3889_v55 }
0x1bb9   : > { %v3893_v58 = vsel %vm1296_vm3, %v3892_v6, -inf }
0x1bba   : > { %3894 = vmax.xlane.f32.xlu2 %v3893_v58 }
0x1bd2   : > { %3832 = vrot.lane.b32.xlu2 %v7546_v7, %s8063_s2 }
0x1bda   : > { %3948 = vrot.lane.b32.xlu2 %v3770_v43, %s8068_s10  ;;  %v4083_v43 = vsel %vm1220_vm0, %v6232_v54, 0 }
0x1c1f   : > { %v3808_v60 = vpop.xlane.xlu1 %3807 }
0x1c20   : > { %v3809_v59 = vsub.f32 %v3805_v39, %v3808_v60 }
0x1c22   : > { %v3810_v0 = vmul.f32 1.442695, %v3809_v59 }
0x1c24   : > { %6546 = vpow2.f32 %v3810_v0 }
0x1c2a   : > { %v6547_v13 = vpop.eup %6546 }
0x1c2b   : > { %v3812_v56 = vsel %vm1296_vm3, %v6547_v13, 0.0 }
0x1c2c   : > { %3813 = vadd.xlane.f32.xlu0 %v3812_v56 }
0x1c2d   : > { %v3895_v3 = vpop.xlane.xlu2 %3894 }
0x1c2e   : > { %v3896_v62 = vsub.f32 %v3892_v6, %v3895_v3  ;;  %v6229_v3 = vld [vmem:[%s8088_s29] sm:$0xff] }
0x1c30   : > { %v3897_v5 = vmul.f32 1.442695, %v3896_v62  ;;  %v4074_v62 = vsel %vm1220_vm0, %v6229_v3, 0 }
0x1c32   : > { %6548 = vpow2.f32 %v3897_v5  ;;  %v6234_v5 = vld [vmem:[%s8089_s30 + $0x8] sm:$0xff] }
0x1c35   : > { %v3833_v8 = vpop.permute.xlu2 %3832 }
0x1c36   : > { %5922 = vmatpush.msk.msra.mxu1 %vm8085_vm6, %v3833_v8 }
0x1c38   : > { %v6549_v57 = vpop.eup %6548 }
0x1c39   : > { %v3899_v7 = vsel %vm1296_vm3, %v6549_v57, 0.0 }
0x1c3a   : > { %3900 = vadd.xlane.f32.xlu1 %v3899_v7  ;;  %v4121_v7 = vsel %vm1979_vm14, %v6234_v5, 0 }
0x1c3b   : > { %4129 = vmatpush.bf16.xpose.msrb.mxu3 %v4121_v7  ;;  %v6419_v7 = vld [vmem:[%s8072_s11 + $0x1] ss:$0 sm:$0xff] }
0x1c3d   : > { %v3949_v24 = vpop.permute.xlu2 %3948 }
0x1c3e   : > { %v3959_v19 = vsel %vm1262_vm1, %v7594_v44, %v3949_v24  ;;  %v6238_v24 = vld [vmem:[%s6807_s27 + $0x48] sm:$0xff] }
0x1c40   : > { %3917 = vrot.lane.b32.xlu0 %v7542_v48, %s8062_s13 }
0x1c53   : > { %3830 = vrot.lane.b32.xlu1 %v7542_v48, %s8063_s2 }
0x1c9f   : > { %v3814_v49 = vpop.xlane.xlu0 %3813 }
0x1ca0   : > { %6550 = vrcp.f32 %v3814_v49  ;;  %v3826_v27 = vand.u32 2147483648, %v3814_v49  ;;  %vm3820_vm10 = vweird.f32 %v3814_v49  ;;  %v3824_v29 = vand.u32 2147483647, %v3814_v49 }
0x1ca2   : > { %v3827_v12 = vor.u32 1.1754944e-38, %v3826_v27  ;;  %vm3825_vm13 = vcmp.eq.f32.partialorder %v3824_v29, 8.507059e+37 }
0x1ca6   : > { %v6551_v9 = vpop.eup %6550 }
0x1ca7   : > { %v3816_v11 = vmul.f32 %v6551_v9, %v3814_v49  ;;  %vm3821_vm4 = vweird.f32 %v6551_v9 }
0x1ca8   : > { %vm3822_vm12 = vmor %vm3820_vm10, %vm3821_vm4 }
0x1ca9   : > { %v3817_v16 = vsub.f32 1.0, %v3816_v11 }
0x1cab   : > { %v3818_v21 = vmul.f32 %v6551_v9, %v3817_v16 }
0x1cad   : > { %v3901_v10 = vpop.xlane.xlu1 %3900  ;;  %v3819_v26 = vadd.f32 %v6551_v9, %v3818_v21 }
0x1cae   : > { %6552 = vrcp.f32 %v3901_v10  ;;  %v3913_v23 = vand.u32 2147483648, %v3901_v10  ;;  %v3911_v4 = vand.u32 2147483647, %v3901_v10  ;;  %vm3907_vm8 = vweird.f32 %v3901_v10 }
0x1caf   : > { %v3823_v30 = vsel %vm3822_vm12, %v6551_v9, %v3819_v26 }
0x1cb0   : > { %v3914_v28 = vor.u32 1.1754944e-38, %v3913_v23  ;;  %vm3912_vm11 = vcmp.eq.f32.partialorder %v3911_v4, 8.507059e+37  ;;  %v3828_v32 = vsel %vm3825_vm13, %v3827_v12, %v3823_v30  ;;  %v6416_v12 = vld [vmem:[%s8094_s9] ss:$0 sm:$0xff] }
0x1cb1   : > { %v3829_v61 = vmul.f32 %v6547_v13, %v3828_v32  ;;  %v6230_v13 = vld [vmem:[%s8088_s29 + $0x8] sm:$0xff] }
0x1cb2   : > { %v3918_v20 = vpop.permute.xlu0 %3917  ;;  %v4077_v56 = vsel %vm1220_vm0, %v6230_v13, 0 }
0x1cb3   : > { %3942 = vmatpush.msra.mxu0 %v3918_v20 }
0x1cb4   : > { %v6553_v17 = vpop.eup %6552 }
0x1cb5   : > { %v3903_v2 = vmul.f32 %v6553_v17, %v3901_v10  ;;  %vm3908_vm7 = vweird.f32 %v6553_v17 }
0x1cb6   : > { %vm3909_vm9 = vmor %vm3907_vm8, %vm3908_vm7 }
0x1cb7   : > { %v3904_v22 = vsub.f32 1.0, %v3903_v2  ;;  %v6413_v2 = vld [vmem:[%s8090_s0] ss:$0 sm:$0xff] }
0x1cb9   : > { %v3905_v25 = vmul.f32 %v6553_v17, %v3904_v22  ;;  %v6414_v22 = vld [vmem:[%s8091_s16] ss:$0 sm:$0xff]  ;;  %s8095_s16 = sld [smem:[#allocation36_spill]] }
0x1cbb   : > { %v3906_v48 = vadd.f32 %v6553_v17, %v3905_v25 }
0x1cbd   : > { %v3910_v15 = vsel %vm3909_vm9, %v6553_v17, %v3906_v48  ;;  %v6233_v48 = vld [vmem:[%s8089_s30] sm:$0xff] }
0x1cbe   : > { %v3915_v63 = vsel %vm3912_vm11, %v3914_v28, %v3910_v15  ;;  %v4118_v27 = vsel %vm1979_vm14, %v6233_v48, 0  ;;  %v6415_v28 = vld [vmem:[%s8093_s20] ss:$0 sm:$0xff]  ;;  %s8097_s20 = sld [smem:[#allocation37_spill]] }
0x1cbf   : > { %v3916_v31 = vmul.f32 %v6549_v57, %v3915_v63  ;;  %4130 = vmatpush.bf16.xpose.msrb.mxu3 %v4118_v27  ;;  %s8096_s9 = smov %s8095_s16  ;;  %v6417_v13 = vld [vmem:[%s8095_s16] ss:$0 sm:$0xff] }
0x1cc1   : > { %5928 = vmatmul.msk.f32.vlgmr.msra.gmra.mxu0 %vm1296_vm3, %v3916_v31 }
0x1cc4   : > { %v6418_v3 = vld [vmem:[%s8097_s20] ss:$0 sm:$0xff] }
0x1cc5   : > { %v3831_v33 = vpop.permute.xlu1 %3830 }
0x1cc6   : > { %3855 = vmatpush.msra.mxu1 %v3831_v33 }
0x1cc7   : > { %5923 = vmatmul.msk.f32.vlgmr.msra.gmra.mxu1 %vm1296_vm3, %v3829_v61 }
0x1cc8   : > { %4089 = vmatpush.bf16.xpose.msrb.mxu1 %v4083_v43 }
0x1d3e   : > { %v3944_v35 = vpop.f32.mrf.mxu0 }
0x1d3f   : > { %3956 = vrot.lane.b32.xlu1 %v3944_v35, %s8069_s15  ;;  %v6240_v35 = vld [vmem:[%s6807_s27 + $0x58] sm:$0xff] }
0x1d44   : > { %v3857_v36 = vpop.f32.mrf.mxu1 }
0x1d45   : > { %3952 = vrot.lane.b32.xlu0 %v3857_v36, %s8070_s22  ;;  %v4242_v36 = vsel %vm1220_vm0, %v6240_v35, 0 }
0x1d46   : > { %4246 = vmatpush.bf16.xpose.msrb.mxu0 %v4242_v36 }
0x1d4e   : > { %4247 = vmatpush.bf16.xpose.msrb.mxu0 %v4239_v38 }
0x1db1   : > { %v3957_v41 = vpop.permute.xlu1 %3956 }
0x1db7   : > { %v3953_v40 = vpop.permute.xlu0 %3952 }
0x1db8   : > { %v3960_v42 = vsel %vm1784_vm15, %v3959_v19, %v3953_v40  ;;  %v4236_v19 = vsel %vm1220_vm0, %v6238_v24, 0 }
0x1db9   : > { %v3961_v45 = vsel %vm1787_vm5, %v3960_v42, %v3957_v41  ;;  %4248 = vmatpush.bf16.xpose.msrb.mxu0 %v4236_v19 }
0x1dba   : > { %v3966_v18 = vpack.c.bf16 %v3961_v45, %v3961_v45 }
0x1dbc   : > { %5937 = vmatmul.msk.bf16.vlgmr.msra.gmra.mxu2 %vm1220_vm0, %v3966_v18 }
0x1e3f   : > { %v3995_v46 = vpop.f32.mrf.mxu2 }
0x1e40   : > { %v3999_v51 = vadd.f32 %v3995_v46, %v7519_v14  ;;  %v6231_v14 = vld [vmem:[%s8088_s29 + $0x10] sm:$0xff] }
0x1e41   : > { %v4080_v0 = vsel %vm1220_vm0, %v6231_v14, 0 }
0x1e42   : > { %v4004_v53 = vadd.f32 %v6412_v47, %v3999_v51  ;;  %4090 = vmatpush.bf16.xpose.msrb.mxu1 %v4080_v0  ;;  %v6237_v47 = vld [vmem:[%s6807_s27 + $0x40] sm:$0xff]  ;;  %v6236_v51 = vld [vmem:[%s6807_s27 + $0x38] sm:$0xff] }
0x1e43   : > { %v4233_v46 = vsel %vm1220_vm0, %v6237_v47, 0 }
0x1e44   : > { %v4007_v39 = vsel %vm1220_vm0, %v4004_v53, 0.0  ;;  %4249 = vmatpush.bf16.xpose.msrb.mxu0 %v4233_v46 }
0x1e45   : > { %4008 = vadd.xlane.f32.xlu2 %v4007_v39  ;;  %v6235_v39 = vld [vmem:[%s6807_s27 + $0x30] sm:$0xff] }
0x1e47   : > { %v3997_v44 = vpop.f32.mrf.mxu2 }
0x1e48   : > { %v4227_v44 = vsel %vm1220_vm0, %v6235_v39, 0 }
0x1e4a   : > { %4091 = vmatpush.bf16.xpose.msrb.mxu1 %v4077_v56 }
0x1e52   : > { %4092 = vmatpush.bf16.xpose.msrb.mxu1 %v4074_v62 }
0x1eb8   : > { %v4009_v55 = vpop.xlane.xlu2 %4008 }
0x1eb9   : > { %v4010_v6 = vmul.f32 %v4009_v55, %v7148_v1 }
0x1ebb   : > { %v4011_v58 = vsub.f32 %v4004_v53, %v4010_v6  ;;  %v4230_v53 = vsel %vm1220_vm0, %v6236_v51, 0 }
0x1ebc   : > { %4250 = vmatpush.bf16.xpose.msrb.mxu0 %v4230_v53 }
0x1ebd   : > { %v4012_v60 = vmul.f32 %v4011_v58, %v4011_v58 }
0x1ebf   : > { %v4013_v59 = vsel %vm1220_vm0, %v4012_v60, 0.0 }
0x1ec0   : > { %4014 = vadd.xlane.f32.xlu0 %v4013_v59 }
0x1ec4   : > { %4251 = vmatpush.bf16.xpose.msrb.mxu0 %v4227_v44 }
0x1f33   : > { %v4015_v8 = vpop.xlane.xlu0 %4014 }
0x1f34   : > { %v4016_v57 = vmul.f32 %v4015_v8, %v7148_v1 }
0x1f36   : > { %v4017_v49 = vadd.f32 1e-05, %v4016_v57 }
0x1f38   : > { %6554 = vrsqrt.f32 %v4017_v49  ;;  %vm4024_vm6 = vweird.f32 %v4017_v49 }
0x1f3e   : > { %v6555_v9 = vpop.eup %6554 }
0x1f3f   : > { %v4019_v10 = vmul.f32 %v6555_v9, %v4017_v49  ;;  %vm4025_vm2 = vweird.f32 %v6555_v9 }
0x1f40   : > { %vm4026_vm7 = vmor %vm4024_vm6, %vm4025_vm2 }
0x1f41   : > { %v4020_v11 = vmul.f32 %v6555_v9, %v4019_v10 }
0x1f43   : > { %v4021_v20 = vmul.f32 0.5, %v4020_v11 }
0x1f45   : > { %v4022_v16 = vsub.f32 1.5, %v4021_v20 }
0x1f47   : > { %v4023_v17 = vmul.f32 %v6555_v9, %v4022_v16 }
0x1f49   : > { %v4027_v21 = vsel %vm4026_vm7, %v6555_v9, %v4023_v17 }
0x1f4a   : > { %v4028_v23 = vmul.f32 %v4027_v21, %v4011_v58 }
0x1f4c   : > { %v4032_v25 = vmul.f32 %v6413_v2, %v4028_v23 }
0x1f4e   : > { %v4036_v4 = vadd.f32 %v6414_v22, %v4032_v25 }
0x1f50   : > { %v4045_v26 = vpack.c.bf16 %v4036_v4, %v4036_v4 }
0x1f52   : > { %5954 = vmatmul.msk.bf16.vlgmr.msrb.gmra.mxu1 %vm1220_vm0, %v4045_v26 }
0x1fcf   : > { %v4094_v29 = vpop.f32.mrf.mxu1 }
0x1fd0   : > { %v4095_v15 = vadd.f32 %v6415_v28, %v4094_v29 }
0x1fd2   : > { %v4098_v63 = vmax.f32 %v4095_v15, 0.0 }
0x1fd4   : > { %v4103_v30 = vpack.c.bf16 %v4098_v63, %v4098_v63 }
0x1fd6   : > { %5963 = vmatmul.msk.bf16.vlgmr.msrb.gmra.mxu3 %vm1979_vm14, %v4103_v30 }
0x1fd7   : > { %v4096_v31 = vpop.f32.mrf.mxu1 }
0x2059   : > { %v4132_v32 = vpop.f32.mrf.mxu3 }
0x205a   : > { %v4136_v33 = vadd.f32 %v4132_v32, %v4036_v4 }
0x205c   : > { %v4141_v61 = vadd.f32 %v6416_v12, %v4136_v33 }
0x205e   : > { %v4144_v34 = vsel %vm1220_vm0, %v4141_v61, 0.0 }
0x205f   : > { %4145 = vadd.xlane.f32.xlu1 %v4144_v34 }
0x2061   : > { %v4134_v52 = vpop.f32.mrf.mxu3 }
0x20d2   : > { %v4146_v40 = vpop.xlane.xlu1 %4145 }
0x20d3   : > { %v4147_v41 = vmul.f32 %v4146_v40, %v7148_v1 }
0x20d5   : > { %v4148_v42 = vsub.f32 %v4141_v61, %v4147_v41 }
0x20d7   : > { %v4149_v45 = vmul.f32 %v4148_v42, %v4148_v42 }
0x20d9   : > { %v4150_v18 = vsel %vm1220_vm0, %v4149_v45, 0.0 }
0x20da   : > { %4151 = vadd.xlane.f32.xlu2 %v4150_v18 }
0x214d   : > { %v4152_v54 = vpop.xlane.xlu2 %4151 }
0x214e   : > { %v4153_v43 = vmul.f32 %v4152_v54, %v7148_v1 }
0x2150   : > { %v4154_v55 = vadd.f32 1e-05, %v4153_v43 }
0x2152   : > { %6556 = vrsqrt.f32 %v4154_v55  ;;  %vm4161_vm8 = vweird.f32 %v4154_v55 }
0x2158   : > { %v6557_v6 = vpop.eup %6556 }
0x2159   : > { %v4156_v58 = vmul.f32 %v6557_v6, %v4154_v55  ;;  %vm4162_vm4 = vweird.f32 %v6557_v6 }
0x215a   : > { %vm4163_vm9 = vmor %vm4161_vm8, %vm4162_vm4 }
0x215b   : > { %v4157_v60 = vmul.f32 %v6557_v6, %v4156_v58 }
0x215d   : > { %v4158_v59 = vmul.f32 0.5, %v4157_v60 }
0x215f   : > { %v4159_v14 = vsub.f32 1.5, %v4158_v59 }
0x2161   : > { %v4160_v0 = vmul.f32 %v6557_v6, %v4159_v14 }
0x2163   : > { %v4164_v56 = vsel %vm4163_vm9, %v6557_v6, %v4160_v0 }
0x2164   : > { %v4165_v62 = vmul.f32 %v4164_v56, %v4148_v42 }
0x2166   : > { %v4169_v5 = vmul.f32 %v6417_v13, %v4165_v62 }
0x2168   : > { %v7663_v8 = vadd.f32 %v6418_v3, %v4169_v5 }
0x216a   : > { %v4187_v57 = vpack.c.bf16 %v7663_v8, %v7663_v8 }
0x216c   : > { %6001 = vmatmul.msk.bf16.vlgmr.msrb.gmra.mxu0 %vm1220_vm0, %v4187_v57 }
0x21e9   : > { %v4253_v49 = vpop.f32.mrf.mxu0 }
0x21ea   : > { %v7669_v9 = vadd.f32 %v6419_v7, %v4253_v49 }
0x21ec   : > { %4335 = vrot.lane.b32.xlu2 %v7669_v9, %s8060_s23  ;;  %4337 = vrot.lane.b32.xlu1 %v7669_v9, %s8059_s28 }
0x21ed   : > { %4258 = vrot.lane.b32.xlu0 %v7669_v9, %s8073_s21 }
0x21f1   : > { %v4255_v10 = vpop.f32.mrf.mxu0 }
0x21f4   : > { %4388 = vrot.lane.b32.xlu1 %v7669_v9, %s8074_s12 }
0x2246   : > { %v4336_v16 = vpop.permute.xlu2 %4335 }
0x225e   : > { %v4338_v11 = vpop.permute.xlu1 %4337 }
0x225f   : > { %v4259_v20 = vpop.permute.xlu0 %4258 }
0x2260   : > { %6002 = vmatpush.xpose.msk.msrb.mxu2 %vm1262_vm1, %v4259_v20 }
0x2263   : > { %6003 = vmatmul.msk.f32.vlgmr.msrb.gmra.mxu2 %vm1262_vm1, %v7669_v9 }
0x2264   : > { %6005 = vmatpush.xpose.msk.msra.mxu2 %vm1262_vm1, %v4338_v11 }
0x2266   : > { %v4389_v31 = vpop.permute.xlu1 %4388 }
0x226b   : > { %6006 = vmatmul.msk.f32.vlgmr.msra.gmra.mxu2 %vm1262_vm1, %v4336_v16 }
0x22e6   : > { %v4281_v17 = vpop.f32.mrf.mxu2 }
0x22e7   : > { %v4284_v2 = vmul.f32 0.35355338, %v4281_v17 }
0x22e9   : > { %v4285_v21 = vsel %vm1262_vm1, %v4284_v2, -inf }
0x22ea   : > { %4286 = vmax.xlane.f32.xlu0 %v4285_v21 }
0x22ee   : > { %v4360_v22 = vpop.f32.mrf.mxu2 }
0x22ef   : > { %v4363_v23 = vmul.f32 0.35355338, %v4360_v22 }
0x22f1   : > { %v4364_v25 = vsel %vm1262_vm1, %v4363_v23, -inf }
0x22f2   : > { %4365 = vmax.xlane.f32.xlu2 %v4364_v25  ;;  %v6248_v25 = vld [vmem:[%s8077_s6 + $0x58] sm:$0xff] }
0x22fe   : > { %4495 = vrot.lane.b32.xlu0 %v7669_v9, %s8062_s13 }
0x230a   : > { %4309 = vrot.lane.b32.xlu2 %v7669_v9, %s8061_s5  ;;  %s8102_s5 = sld [smem:[#allocation33_spill]] }
0x2312   : > { %4493 = vrot.lane.b32.xlu2 %v7669_v9, %s8064_s1 }
0x235d   : > { %v4287_v4 = vpop.xlane.xlu0 %4286 }
0x235e   : > { %v4288_v26 = vsub.f32 %v4284_v2, %v4287_v4  ;;  %v4750_v4 = vsel %vm1220_vm0, %v6248_v25, 0 }
0x2360   : > { %v4289_v48 = vmul.f32 1.442695, %v4288_v26  ;;  %v6247_v26 = vld [vmem:[%s8077_s6 + $0x50] sm:$0xff] }
0x2362   : > { %6558 = vpow2.f32 %v4289_v48  ;;  %v4747_v48 = vsel %vm1220_vm0, %v6247_v26, 0 }
0x2365   : > { %v4366_v27 = vpop.xlane.xlu2 %4365 }
0x2366   : > { %v4367_v28 = vsub.f32 %v4363_v23, %v4366_v27  ;;  %v6246_v27 = vld [vmem:[%s8077_s6 + $0x48] sm:$0xff] }
0x2368   : > { %v6559_v29 = vpop.eup %6558  ;;  %v4368_v15 = vmul.f32 1.442695, %v4367_v28  ;;  %v4744_v28 = vsel %vm1220_vm0, %v6246_v27, 0  ;;  %v6243_v27 = vld [vmem:[%s8077_s6 + $0x30] sm:$0xff] }
0x2369   : > { %v4291_v63 = vsel %vm1262_vm1, %v6559_v29, 0.0 }
0x236a   : > { %6560 = vpow2.f32 %v4368_v15  ;;  %4292 = vadd.xlane.f32.xlu1 %v4291_v63 }
0x236d   : > { %v4310_v30 = vpop.permute.xlu2 %4309 }
0x236e   : > { %4330 = vmatpush.msra.mxu3 %v4310_v30 }
0x2370   : > { %4409 = vmatpush.msrb.mxu3 %v4389_v31  ;;  %v6561_v12 = vpop.eup %6560  ;;  %v4496_v33 = vpop.permute.xlu0 %4495 }
0x2371   : > { %v4370_v32 = vsel %vm1262_vm1, %v6561_v12, 0.0 }
0x2372   : > { %4371 = vadd.xlane.f32.xlu0 %v4370_v32 }
0x2375   : > { %v4494_v59 = vpop.permute.xlu2 %4493 }
0x2383   : > { %4414 = vrot.lane.b32.xlu1 %v7669_v9, %s8065_s17 }
0x2386   : > { %4416 = vrot.lane.b32.xlu0 %v7669_v9, %s8063_s2 }
0x23dd   : > { %v4293_v61 = vpop.xlane.xlu1 %4292 }
0x23de   : > { %6562 = vrcp.f32 %v4293_v61  ;;  %v4305_v37 = vand.u32 2147483648, %v4293_v61  ;;  %v4303_v24 = vand.u32 2147483647, %v4293_v61  ;;  %vm4299_vm11 = vweird.f32 %v4293_v61 }
0x23e0   : > { %v4306_v41 = vor.u32 1.1754944e-38, %v4305_v37  ;;  %vm4304_vm13 = vcmp.eq.f32.partialorder %v4303_v24, 8.507059e+37 }
0x23e4   : > { %v6563_v34 = vpop.eup %6562 }
0x23e5   : > { %v4295_v52 = vmul.f32 %v6563_v34, %v4293_v61  ;;  %v4372_v35 = vpop.xlane.xlu0 %4371  ;;  %vm4300_vm10 = vweird.f32 %v6563_v34 }
0x23e6   : > { %6564 = vrcp.f32 %v4372_v35  ;;  %vm4301_vm12 = vmor %vm4299_vm11, %vm4300_vm10  ;;  %v4384_v51 = vand.u32 2147483648, %v4372_v35  ;;  %v4382_v39 = vand.u32 2147483647, %v4372_v35  ;;  %vm4378_vm6 = vweird.f32 %v4372_v35 }
0x23e7   : > { %v4296_v36 = vsub.f32 1.0, %v4295_v52 }
0x23e8   : > { %v4385_v54 = vor.u32 1.1754944e-38, %v4384_v51  ;;  %vm4383_vm4 = vcmp.eq.f32.partialorder %v4382_v39, 8.507059e+37  ;;  %v6242_v39 = vld [vmem:[%s8075_s7 + $0x18] sm:$0xff] }
0x23e9   : > { %v4297_v38 = vmul.f32 %v6563_v34, %v4296_v36 }
0x23eb   : > { %v4298_v19 = vadd.f32 %v6563_v34, %v4297_v38 }
0x23ec   : > { %v6565_v40 = vpop.eup %6564 }
0x23ed   : > { %v4302_v42 = vsel %vm4301_vm12, %v6563_v34, %v4298_v19  ;;  %v4374_v45 = vmul.f32 %v6565_v40, %v4372_v35  ;;  %vm4379_vm2 = vweird.f32 %v6565_v40 }
0x23ee   : > { %v4307_v18 = vsel %vm4304_vm13, %v4306_v41, %v4302_v42  ;;  %vm4380_vm7 = vmor %vm4378_vm6, %vm4379_vm2 }
0x23ef   : > { %v4375_v47 = vsub.f32 1.0, %v4374_v45  ;;  %v4308_v46 = vmul.f32 %v6559_v29, %v4307_v18  ;;  %v6245_v29 = vld [vmem:[%s8077_s6 + $0x40] sm:$0xff] }
0x23f0   : > { %v4741_v15 = vsel %vm1220_vm0, %v6245_v29, 0 }
0x23f1   : > { %v4376_v53 = vmul.f32 %v6565_v40, %v4375_v47  ;;  %6004 = vmatmul.msk.f32.vlgmr.msra.gmra.mxu3 %vm1262_vm1, %v4308_v46 }
0x23f2   : > { %6011 = vmatpush.xpose.msk.msra.mxu3 %vm1262_vm1, %v4496_v33 }
0x23f3   : > { %v4377_v44 = vadd.f32 %v6565_v40, %v4376_v53 }
0x23f5   : > { %v4381_v43 = vsel %vm4380_vm7, %v6565_v40, %v4377_v44  ;;  %v4415_v60 = vpop.permute.xlu1 %4414  ;;  %v4610_v44 = vsel %vm1220_vm0, %v6242_v39, 0  ;;  %vm8098_vm7 = vcmask 1041408  }
0x23f6   : > { %v4386_v55 = vsel %vm4383_vm4, %v4385_v54, %v4381_v43  ;;  %v6241_v54 = vld [vmem:[%s8075_s7 + $0x10] sm:$0xff] }
0x23f7   : > { %v4387_v6 = vmul.f32 %v6561_v12, %v4386_v55  ;;  %v4607_v43 = vsel %vm1220_vm0, %v6241_v54, 0 }
0x23f8   : > { %v4417_v58 = vpop.permute.xlu0 %4416 }
0x23f9   : > { %6007 = vmatmul.msk.f32.vlgmr.msrb.gmra.mxu3 %vm1262_vm1, %v4387_v6  ;;  %6008 = vmatpush.xpose.msk.msrb.mxu2 %vm1262_vm1, %v4417_v58  ;;  %v7734_v58 = vld [vmem:[%s8080_s19 + $0x1] ss:$0 sm:$0xff] }
0x23fc   : > { %6009 = vmatmul.msk.f32.vlgmr.msrb.gmra.mxu2 %vm1262_vm1, %v4415_v60 }
0x2401   : > { %6012 = vmatmul.msk.f32.vlgmr.msra.gmra.mxu3 %vm1262_vm1, %v4494_v59 }
0x2474   : > { %v7704_v14 = vpop.f32.mrf.mxu3 }
0x247c   : > { %v4411_v0 = vpop.f32.mrf.mxu3 }
0x247f   : > { %v4439_v13 = vpop.f32.mrf.mxu2 }
0x2480   : > { %v4442_v56 = vmul.f32 0.35355338, %v4439_v13 }
0x2482   : > { %v4443_v3 = vsel %vm1262_vm1, %v4442_v56, -inf }
0x2483   : > { %4444 = vmax.xlane.f32.xlu0 %v4443_v3 }
0x2484   : > { %v4518_v62 = vpop.f32.mrf.mxu3 }
0x2485   : > { %v4521_v5 = vmul.f32 0.35355338, %v4518_v62 }
0x2487   : > { %v4522_v57 = vsel %vm1262_vm1, %v4521_v5, -inf }
0x2488   : > { %4523 = vmax.xlane.f32.xlu2 %v4522_v57 }
0x2497   : > { %4546 = vrot.lane.b32.xlu0 %v7669_v9, %s8067_s26  ;;  %s8108_s26 = sld [smem:[#allocation44_spill]] }
0x24f6   : > { %v4445_v7 = vpop.xlane.xlu0 %4444 }
0x24f7   : > { %v4446_v49 = vsub.f32 %v4442_v56, %v4445_v7 }
0x24f9   : > { %v4447_v10 = vmul.f32 1.442695, %v4446_v49 }
0x24fb   : > { %6566 = vpow2.f32 %v4447_v10  ;;  %v4524_v11 = vpop.xlane.xlu2 %4523  ;;  %v6421_v10 = vld [vmem:[%s8076_s3 + $0x1] ss:$0 sm:$0xff] }
0x24fc   : > { %v4525_v20 = vsub.f32 %v4521_v5, %v4524_v11 }
0x24fe   : > { %v4526_v16 = vmul.f32 1.442695, %v4525_v20 }
0x2500   : > { %6568 = vpow2.f32 %v4526_v16 }
0x2501   : > { %v6567_v17 = vpop.eup %6566 }
0x2502   : > { %v4449_v2 = vsel %vm1262_vm1, %v6567_v17, 0.0 }
0x2503   : > { %4450 = vadd.xlane.f32.xlu2 %v4449_v2 }
0x2506   : > { %v6569_v21 = vpop.eup %6568 }
0x2507   : > { %v4528_v22 = vsel %vm1262_vm1, %v6569_v21, 0.0 }
0x2508   : > { %4529 = vadd.xlane.f32.xlu1 %v4528_v22 }
0x2509   : > { %v4547_v23 = vpop.permute.xlu0 %4546 }
0x250a   : > { %4567 = vmatpush.msra.mxu2 %v4547_v23 }
0x250c   : > { %4756 = vmatpush.bf16.xpose.msrb.mxu2 %v4750_v4 }
0x2514   : > { %4757 = vmatpush.bf16.xpose.msrb.mxu2 %v4747_v48  ;;  %v6244_v48 = vld [vmem:[%s8077_s6 + $0x38] sm:$0xff] }
0x251b   : > { %4573 = vrot.lane.b32.xlu2 %v4411_v0, %s8068_s10 }
0x251c   : > { %4758 = vmatpush.bf16.xpose.msrb.mxu2 %v4744_v28  ;;  %v4699_v28 = vsel %vm1220_vm0, %v6243_v27, 0 }
0x2521   : > { %4467 = vrot.lane.b32.xlu1 %v7669_v9, %s8066_s18  ;;  %s8106_s18 = sld [smem:[#allocation39_spill]] }
0x2524   : > { %4759 = vmatpush.bf16.xpose.msrb.mxu2 %v4741_v15 }
0x2576   : > { %v4451_v63 = vpop.xlane.xlu2 %4450 }
0x2577   : > { %6570 = vrcp.f32 %v4451_v63  ;;  %v4463_v24 = vand.u32 2147483648, %v4451_v63  ;;  %vm4457_vm12 = vweird.f32 %v4451_v63  ;;  %v4461_v40 = vand.u32 2147483647, %v4451_v63 }
0x2579   : > { %v4464_v47 = vor.u32 1.1754944e-38, %v4463_v24  ;;  %vm4462_vm6 = vcmp.eq.f32.partialorder %v4461_v40, 8.507059e+37 }
0x257b   : > { %v4530_v30 = vpop.xlane.xlu1 %4529 }
0x257c   : > { %6572 = vrcp.f32 %v4530_v30  ;;  %v4542_v52 = vand.u32 2147483648, %v4530_v30  ;;  %v4540_v36 = vand.u32 2147483647, %v4530_v30  ;;  %vm4536_vm10 = vweird.f32 %v4530_v30 }
0x257d   : > { %v6571_v9 = vpop.eup %6570 }
0x257e   : > { %v4453_v31 = vmul.f32 %v6571_v9, %v4451_v63  ;;  %vm4458_vm9 = vweird.f32 %v6571_v9  ;;  %v4543_v19 = vor.u32 1.1754944e-38, %v4542_v52  ;;  %vm4541_vm13 = vcmp.eq.f32.partialorder %v4540_v36, 8.507059e+37 }
0x257f   : > { %vm4459_vm2 = vmor %vm4457_vm12, %vm4458_vm9 }
0x2580   : > { %v4454_v12 = vsub.f32 1.0, %v4453_v31 }
0x2582   : > { %v6573_v32 = vpop.eup %6572  ;;  %v4455_v61 = vmul.f32 %v6571_v9, %v4454_v12 }
0x2583   : > { %v4532_v33 = vmul.f32 %v6573_v32, %v4530_v30  ;;  %vm4537_vm8 = vweird.f32 %v6573_v32 }
0x2584   : > { %v4456_v37 = vadd.f32 %v6571_v9, %v4455_v61  ;;  %vm4538_vm11 = vmor %vm4536_vm10, %vm4537_vm8 }
0x2585   : > { %v4533_v34 = vsub.f32 1.0, %v4532_v33  ;;  %vm8099_vm10 = vmmov %vm8098_vm7 }
0x2586   : > { %v4460_v45 = vsel %vm4459_vm2, %v6571_v9, %v4456_v37 }
0x2587   : > { %v4534_v35 = vmul.f32 %v6573_v32, %v4533_v34  ;;  %v4465_v46 = vsel %vm4462_vm6, %v4464_v47, %v4460_v45  ;;  %v6422_v34 = vld [vmem:[%s8078_s8 + $0x1] ss:$0 sm:$0xff] }
0x2588   : > { %v4466_v53 = vmul.f32 %v6567_v17, %v4465_v46 }
0x2589   : > { %v4535_v38 = vadd.f32 %v6573_v32, %v4534_v35  ;;  %v6423_v35 = vld [vmem:[%s8079_s14 + $0x1] ss:$0 sm:$0xff] }
0x258b   : > { %v4539_v41 = vsel %vm4538_vm11, %v6573_v32, %v4535_v38 }
0x258c   : > { %v4544_v42 = vsel %vm4541_vm13, %v4543_v19, %v4539_v41 }
0x258d   : > { %v4545_v18 = vmul.f32 %v6569_v21, %v4544_v42 }
0x258f   : > { %6013 = vmatmul.msk.f32.vlgmr.msra.gmra.mxu2 %vm1262_vm1, %v4545_v18 }
0x2593   : > { %v4468_v51 = vpop.permute.xlu1 %4467 }
0x2594   : > { %4488 = vmatpush.msra.mxu1 %v4468_v51 }
0x2595   : > { %6010 = vmatmul.msk.f32.vlgmr.msra.gmra.mxu1 %vm1262_vm1, %v4466_v53 }
0x2596   : > { %4618 = vmatpush.bf16.xpose.msrb.mxu1 %v4610_v44 }
0x2597   : > { %6068 = vmatmul.msk.bf16.vlgmr.msrb.gmra.mxu2 %vm1220_vm0, %v7538_v50  ;;  %v4574_v50 = vpop.permute.xlu2 %4573 }
0x2598   : > { %v4584_v59 = vsel %vm1262_vm1, %v7704_v14, %v4574_v50 }
0x259e   : > { %4619 = vmatpush.bf16.xpose.msrb.mxu1 %v4607_v43 }
0x2612   : > { %v4490_v55 = vpop.f32.mrf.mxu1  ;;  %v4569_v6 = vpop.f32.mrf.mxu2 }
0x2613   : > { %4577 = vrot.lane.b32.xlu0 %v4490_v55, %s8070_s22  ;;  %4581 = vrot.lane.b32.xlu1 %v4569_v6, %s8069_s15 }
0x261a   : > { %v4761_v60 = vpop.f32.mrf.mxu2 }
0x261b   : > { %4737 = vrot.lane.b32.xlu1 %v7734_v58, %s8073_s21 }
0x2622   : > { %v4763_v5 = vpop.f32.mrf.mxu2 }
0x2685   : > { %v4582_v0 = vpop.permute.xlu1 %4581  ;;  %v4578_v13 = vpop.permute.xlu0 %4577 }
0x2686   : > { %v4585_v56 = vsel %vm1784_vm15, %v4584_v59, %v4578_v13 }
0x2687   : > { %v4586_v3 = vsel %vm1787_vm5, %v4585_v56, %v4582_v0 }
0x2688   : > { %v4592_v62 = vpack.c.bf16 %v4586_v3, %v4586_v3 }
0x268a   : > { %6026 = vmatmul.msk.bf16.vlgmr.msrb.gmra.mxu1 %vm1220_vm0, %v4592_v62 }
0x268d   : > { %v4738_v57 = vpop.permute.xlu1 %4737 }
0x268e   : > { %v7743_v7 = vadd.f32 %v4763_v5, %v4738_v57  ;;  %v7749_v14 = vadd.f32 %v4761_v60, %v4738_v57 }
0x2690   : > { %4854 = vrot.lane.b32.xlu1 %v7743_v7, %s8060_s23  ;;  %6069 = vmatpush.xpose.msk.msra.mxu0 %vm1262_vm1, %v7743_v7 }
0x2694   : > { %6070 = vmatpush.xpose.msk.msra.mxu0 %vm1262_vm1, %v7749_v14 }
0x2698   : > { %4852 = vrot.lane.b32.xlu1 %v7749_v14, %s8060_s23 }
0x2702   : > { %v4855_v49 = vpop.permute.xlu1 %4854 }
0x2703   : > { %6074 = vmatpush.xpose.msk.msra.mxu1 %vm1262_vm1, %v4855_v49 }
0x2707   : > { %v4621_v11 = vpop.f32.mrf.mxu1 }
0x2708   : > { %v4625_v20 = vadd.f32 %v4621_v11, %v7663_v8  ;;  %v4702_v8 = vsel %vm1220_vm0, %v6244_v48, 0 }
0x2709   : > { %4710 = vmatpush.bf16.xpose.msrb.mxu3 %v4702_v8 }
0x270a   : > { %v4631_v16 = vadd.f32 %v6421_v10, %v4625_v20  ;;  %v4853_v17 = vpop.permute.xlu1 %4852 }
0x270b   : > { %6075 = vmatpush.xpose.msk.msra.mxu1 %vm1262_vm1, %v4853_v17 }
0x270c   : > { %v4636_v2 = vsel %vm1220_vm0, %v4631_v16, 0.0 }
0x270d   : > { %4637 = vadd.xlane.f32.xlu0 %v4636_v2 }
0x270f   : > { %v4623_v21 = vpop.f32.mrf.mxu1 }
0x2711   : > { %4711 = vmatpush.bf16.xpose.msrb.mxu3 %v4699_v28 }
0x2780   : > { %v4638_v22 = vpop.xlane.xlu0 %4637 }
0x2781   : > { %v4639_v23 = vmul.f32 %v4638_v22, %v7148_v1 }
0x2783   : > { %v4640_v25 = vsub.f32 %v4631_v16, %v4639_v23 }
0x2785   : > { %v4641_v4 = vmul.f32 %v4640_v25, %v4640_v25 }
0x2787   : > { %v4642_v26 = vsel %vm1220_vm0, %v4641_v4, 0.0 }
0x2788   : > { %4643 = vadd.xlane.f32.xlu2 %v4642_v26 }
0x27a0   : > { %4909 = vrot.lane.b32.xlu2 %v7743_v7, %s8059_s28 }
0x27a8   : > { %5028 = vrot.lane.b32.xlu2 %v7743_v7, %s8064_s1 }
0x27b0   : > { %5026 = vrot.lane.b32.xlu2 %v7749_v14, %s8064_s1 }
0x27fb   : > { %v4644_v29 = vpop.xlane.xlu2 %4643 }
0x27fc   : > { %v4645_v15 = vmul.f32 %v4644_v29, %v7148_v1 }
0x27fe   : > { %v4646_v63 = vadd.f32 1e-05, %v4645_v15 }
0x2800   : > { %6574 = vrsqrt.f32 %v4646_v63  ;;  %vm4653_vm8 = vweird.f32 %v4646_v63 }
0x2803   : > { %v4910_v30 = vpop.permute.xlu2 %4909 }
0x2804   : > { %6077 = vmatpush.msk.msra.mxu3 %vm8098_vm7, %v4910_v30 }
0x2806   : > { %v6575_v9 = vpop.eup %6574 }
0x2807   : > { %v4648_v31 = vmul.f32 %v6575_v9, %v4646_v63  ;;  %vm4654_vm4 = vweird.f32 %v6575_v9 }
0x2808   : > { %vm4655_vm9 = vmor %vm4653_vm8, %vm4654_vm4 }
0x2809   : > { %v4649_v12 = vmul.f32 %v6575_v9, %v4648_v31 }
0x280b   : > { %v4650_v32 = vmul.f32 0.5, %v4649_v12  ;;  %v5029_v6 = vpop.permute.xlu2 %5028 }
0x280d   : > { %v4651_v33 = vsub.f32 1.5, %v4650_v32 }
0x280f   : > { %v4652_v61 = vmul.f32 %v6575_v9, %v4651_v33 }
0x2811   : > { %v4656_v52 = vsel %vm4655_vm9, %v6575_v9, %v4652_v61  ;;  %vm8100_vm9 = vmmov %vm8099_vm10 }
0x2812   : > { %v4657_v36 = vmul.f32 %v4656_v52, %v4640_v25 }
0x2813   : > { %v5027_v50 = vpop.permute.xlu2 %5026 }
0x2814   : > { %v4661_v37 = vmul.f32 %v6422_v34, %v4657_v36 }
0x2816   : > { %v7776_v38 = vadd.f32 %v6423_v35, %v4661_v37 }
0x2818   : > { %v4681_v24 = vpack.c.bf16 %v7776_v38, %v7776_v38 }
0x281a   : > { %6051 = vmatmul.msk.bf16.vlgmr.msrb.gmra.mxu3 %vm1220_vm0, %v4681_v24 }
0x289d   : > { %v4713_v19 = vpop.f32.mrf.mxu3 }
0x289e   : > { %v7782_v40 = vadd.f32 %v7734_v58, %v4713_v19 }
0x28a0   : > { %5024 = vrot.lane.b32.xlu2 %v7782_v40, %s8064_s1  ;;  %4850 = vrot.lane.b32.xlu1 %v7782_v40, %s8060_s23  ;;  %s1158_s1 = sand.u32 1, %s8108_s26  }
0x28a1   : > { %6071 = vmatmul.msk.f32.vlgmr.msra.gmra.mxu0 %vm1262_vm1, %v7782_v40  ;;  %s5621_s23 = sshll.u32 %s1158_s1, 3 }
0x28a2   : > { %s1160_s16 = scalar_lea.vmem [#allocation2], %s5621_s23 }
0x28a5   : > { %v4715_v41 = vpop.f32.mrf.mxu3 }
0x28fa   : > { %v5025_v26 = vpop.permute.xlu2 %5024 }
0x2912   : > { %v4851_v42 = vpop.permute.xlu1 %4850 }
0x2913   : > { %6076 = vmatmul.msk.f32.vlgmr.msra.gmra.mxu1 %vm1262_vm1, %v4851_v42 }
0x291e   : > { %v4792_v45 = vpop.f32.mrf.mxu0 }
0x291f   : > { %v4795_v18 = vmul.f32 0.35355338, %v4792_v45 }
0x2921   : > { %v4796_v47 = vsel %vm1296_vm3, %v4795_v18, -inf }
0x2922   : > { %4797 = vmax.xlane.f32.xlu0 %v4796_v47 }
0x2936   : > { %4907 = vrot.lane.b32.xlu0 %v7749_v14, %s8059_s28 }
0x293e   : > { %4822 = vrot.lane.b32.xlu0 %v7743_v7, %s8073_s21 }
0x2946   : > { %4941 = vrot.lane.b32.xlu0 %v7743_v7, %s8065_s17 }
0x2990   : > { %v4879_v46 = vpop.f32.mrf.mxu1 }
0x2991   : > { %v4882_v51 = vmul.f32 0.35355338, %v4879_v46 }
0x2993   : > { %v4883_v53 = vsel %vm1296_vm3, %v4882_v51, -inf }
0x2994   : > { %4884 = vmax.xlane.f32.xlu1 %v4883_v53 }
0x2995   : > { %v4798_v39 = vpop.xlane.xlu0 %4797 }
0x2996   : > { %v4799_v44 = vsub.f32 %v4795_v18, %v4798_v39 }
0x2998   : > { %v4800_v54 = vmul.f32 1.442695, %v4799_v44 }
0x299a   : > { %6576 = vpow2.f32 %v4800_v54 }
0x29a0   : > { %v6577_v43 = vpop.eup %6576 }
0x29a1   : > { %v4802_v55 = vsel %vm1296_vm3, %v6577_v43, 0.0 }
0x29a2   : > { %4803 = vadd.xlane.f32.xlu0 %v4802_v55 }
0x29a8   : > { %v4908_v58 = vpop.permute.xlu0 %4907 }
0x29a9   : > { %4932 = vmatpush.msra.mxu3 %v4908_v58 }
0x29ab   : > { %6084 = vmatpush.xpose.msk.msrb.mxu3 %vm1262_vm1, %v5029_v6 }
0x29ad   : > { %4820 = vrot.lane.b32.xlu1 %v7749_v14, %s8073_s21 }
0x29af   : > { %6085 = vmatpush.xpose.msk.msrb.mxu3 %vm1262_vm1, %v5027_v50 }
0x29b0   : > { %v4823_v60 = vpop.permute.xlu0 %4822 }
0x29b1   : > { %6072 = vmatpush.msk.msrb.mxu0 %vm8099_vm10, %v4823_v60  ;;  %vm8101_vm10 = vmmov %vm8100_vm9 }
0x29b6   : > { %4939 = vrot.lane.b32.xlu0 %v7749_v14, %s8065_s17 }
0x29b8   : > { %v4942_v56 = vpop.permute.xlu0 %4941 }
0x2a07   : > { %v4885_v59 = vpop.xlane.xlu1 %4884 }
0x2a08   : > { %v4886_v0 = vsub.f32 %v4882_v51, %v4885_v59 }
0x2a0a   : > { %v4887_v13 = vmul.f32 1.442695, %v4886_v0 }
0x2a0c   : > { %6578 = vpow2.f32 %v4887_v13 }
0x2a12   : > { %v6579_v3 = vpop.eup %6578 }
0x2a13   : > { %v4889_v62 = vsel %vm1296_vm3, %v6579_v3, 0.0 }
0x2a14   : > { %4890 = vadd.xlane.f32.xlu2 %v4889_v62 }
0x2a15   : > { %v4804_v5 = vpop.xlane.xlu0 %4803 }
0x2a16   : > { %6580 = vrcp.f32 %v4804_v5  ;;  %v4816_v20 = vand.u32 2147483648, %v4804_v5  ;;  %v4814_v17 = vand.u32 2147483647, %v4804_v5  ;;  %vm4810_vm12 = vweird.f32 %v4804_v5 }
0x2a18   : > { %v4817_v21 = vor.u32 1.1754944e-38, %v4816_v20  ;;  %vm4815_vm2 = vcmp.eq.f32.partialorder %v4814_v17, 8.507059e+37 }
0x2a1c   : > { %v6581_v57 = vpop.eup %6580 }
0x2a1d   : > { %v4806_v49 = vmul.f32 %v6581_v57, %v4804_v5  ;;  %vm4811_vm11 = vweird.f32 %v6581_v57 }
0x2a1e   : > { %vm4812_vm13 = vmor %vm4810_vm12, %vm4811_vm11 }
0x2a1f   : > { %v4807_v10 = vsub.f32 1.0, %v4806_v49  ;;  %v4821_v11 = vpop.permute.xlu1 %4820 }
0x2a20   : > { %4845 = vmatpush.msrb.mxu0 %v4821_v11 }
0x2a21   : > { %v4808_v16 = vmul.f32 %v6581_v57, %v4807_v10 }
0x2a22   : > { %6079 = vmatpush.xpose.msk.msra.mxu0 %vm1262_vm1, %v4942_v56 }
0x2a23   : > { %v4809_v2 = vadd.f32 %v6581_v57, %v4808_v16 }
0x2a25   : > { %v4813_v22 = vsel %vm4812_vm13, %v6581_v57, %v4809_v2 }
0x2a26   : > { %v4818_v23 = vsel %vm4815_vm2, %v4817_v21, %v4813_v22 }
0x2a27   : > { %v4819_v25 = vmul.f32 %v6577_v43, %v4818_v23 }
0x2a28   : > { %v4940_v4 = vpop.permute.xlu0 %4939 }
0x2a29   : > { %6073 = vmatmul.msk.f32.vlgmr.msrb.gmra.mxu0 %vm1296_vm3, %v4819_v25 }
0x2a2a   : > { %6080 = vmatpush.xpose.msk.msra.mxu0 %vm1262_vm1, %v4940_v4 }
0x2a2c   : > { %4937 = vrot.lane.b32.xlu2 %v7782_v40, %s8065_s17  ;;  %s8104_s17 = sld [smem:[#allocation40_spill]] }
0x2a87   : > { %v4891_v48 = vpop.xlane.xlu2 %4890 }
0x2a88   : > { %6582 = vrcp.f32 %v4891_v48  ;;  %v4903_v15 = vand.u32 2147483648, %v4891_v48  ;;  %v4901_v30 = vand.u32 2147483647, %v4891_v48  ;;  %vm4897_vm7 = vweird.f32 %v4891_v48 }
0x2a8a   : > { %v4904_v31 = vor.u32 1.1754944e-38, %v4903_v15  ;;  %vm4902_vm8 = vcmp.eq.f32.partialorder %v4901_v30, 8.507059e+37 }
0x2a8e   : > { %v6583_v8 = vpop.eup %6582 }
0x2a8f   : > { %v4893_v27 = vmul.f32 %v6583_v8, %v4891_v48  ;;  %v4938_v28 = vpop.permute.xlu2 %4937  ;;  %vm4898_vm6 = vweird.f32 %v6583_v8 }
0x2a90   : > { %6081 = vmatmul.msk.f32.vlgmr.msra.gmra.mxu0 %vm1262_vm1, %v4938_v28  ;;  %vm4899_vm4 = vmor %vm4897_vm7, %vm4898_vm6 }
0x2a91   : > { %v4894_v29 = vsub.f32 1.0, %v4893_v27 }
0x2a93   : > { %v4895_v63 = vmul.f32 %v6583_v8, %v4894_v29 }
0x2a95   : > { %v4896_v9 = vadd.f32 %v6583_v8, %v4895_v63 }
0x2a97   : > { %v4900_v12 = vsel %vm4899_vm4, %v6583_v8, %v4896_v9  ;;  %v6249_v8 = vld [vmem:[%s8086_s25 + $0x10] sm:$0xff] }
0x2a98   : > { %v4905_v32 = vsel %vm4902_vm8, %v4904_v31, %v4900_v12  ;;  %v5146_v27 = vsel %vm1220_vm0, %v6249_v8, 0  ;;  %v6424_v12 = vld [vmem:[%s8087_s24 + $0x1] ss:$0 sm:$0xff] }
0x2a99   : > { %v4906_v33 = vmul.f32 %v6579_v3, %v4905_v32 }
0x2a9b   : > { %6078 = vmatmul.msk.f32.vlgmr.msra.gmra.mxu3 %vm1296_vm3, %v4906_v33 }
0x2aa3   : > { %6086 = vmatmul.msk.f32.vlgmr.msrb.gmra.mxu3 %vm1262_vm1, %v5025_v26  ;;  %v6250_v26 = vld [vmem:[%s8086_s25 + $0x18] sm:$0xff] }
0x2aa4   : > { %v5149_v48 = vsel %vm1220_vm0, %v6250_v26, 0 }
0x2aa5   : > { %5157 = vmatpush.bf16.xpose.msra.mxu2 %v5149_v48 }
0x2aa6   : > { %v7816_v61 = vpop.f32.mrf.mxu0 }
0x2aad   : > { %5158 = vmatpush.bf16.xpose.msra.mxu2 %v5146_v27 }
0x2b0d   : > { %v4966_v34 = vpop.f32.mrf.mxu0 }
0x2b0e   : > { %v4969_v52 = vmul.f32 0.35355338, %v4966_v34 }
0x2b10   : > { %v4970_v35 = vsel %vm1296_vm3, %v4969_v52, -inf }
0x2b11   : > { %4971 = vmax.xlane.f32.xlu0 %v4970_v35 }
0x2b1e   : > { %v4934_v36 = vpop.f32.mrf.mxu3 }
0x2b25   : > { %4994 = vrot.lane.b32.xlu0 %v7749_v14, %s8063_s2 }
0x2b26   : > { %v5053_v37 = vpop.f32.mrf.mxu3 }
0x2b27   : > { %v5056_v24 = vmul.f32 0.35355338, %v5053_v37 }
0x2b29   : > { %v5057_v19 = vsel %vm1296_vm3, %v5056_v24, -inf }
0x2b2a   : > { %5058 = vmax.xlane.f32.xlu1 %v5057_v19 }
0x2b43   : > { %4996 = vrot.lane.b32.xlu1 %v7743_v7, %s8063_s2  ;;  %s8109_s2 = sld [smem:[#allocation47_spill]] }
0x2b49   : > { %s6181_s28 = sshll.u32 %s8109_s2, 3 }
0x2b84   : > { %v4972_v40 = vpop.xlane.xlu0 %4971 }
0x2b85   : > { %v4973_v41 = vsub.f32 %v4969_v52, %v4972_v40 }
0x2b87   : > { %v4974_v42 = vmul.f32 1.442695, %v4973_v41 }
0x2b89   : > { %6584 = vpow2.f32 %v4974_v42 }
0x2b8f   : > { %v6585_v45 = vpop.eup %6584 }
0x2b90   : > { %v4976_v18 = vsel %vm1296_vm3, %v6585_v45, 0.0 }
0x2b91   : > { %4977 = vadd.xlane.f32.xlu2 %v4976_v18 }
0x2b97   : > { %v4995_v54 = vpop.permute.xlu0 %4994 }
0x2b9d   : > { %v5059_v47 = vpop.xlane.xlu1 %5058 }
0x2b9e   : > { %v5060_v46 = vsub.f32 %v5056_v24, %v5059_v47  ;;  %v6251_v47 = vld [vmem:[%s8088_s29 + $0x20] sm:$0xff] }
0x2ba0   : > { %v5061_v51 = vmul.f32 1.442695, %v5060_v46  ;;  %v5244_v46 = vsel %vm1220_vm0, %v6251_v47, 0 }
0x2ba2   : > { %6586 = vpow2.f32 %v5061_v51  ;;  %v6256_v51 = vld [vmem:[%s8089_s30 + $0x18] sm:$0xff] }
0x2ba8   : > { %v6587_v53 = vpop.eup %6586 }
0x2ba9   : > { %5083 = vrot.lane.b32.xlu2 %v7743_v7, %s8062_s13  ;;  %v5063_v39 = vsel %vm1296_vm3, %v6587_v53, 0.0 }
0x2baa   : > { %5064 = vadd.xlane.f32.xlu0 %v5063_v39 }
0x2bb1   : > { %5112 = vrot.lane.b32.xlu2 %v4934_v36, %s8068_s10  ;;  %s8110_s10 = sld [smem:[#allocation42_spill]] }
0x2bb5   : > { %v4997_v44 = vpop.permute.xlu1 %4996 }
0x2bb6   : > { %6082 = vmatpush.msk.msrb.mxu1 %vm8100_vm9, %v4997_v44  ;;  %v5292_v44 = vsel %vm1979_vm14, %v6256_v51, 0 }
0x2bb7   : > { %5300 = vmatpush.bf16.xpose.msra.mxu3 %v5292_v44  ;;  %s5503_s12 = scalar_lea.hbm %s8110_s10, %s6181_s28  ;;  %s6622_s26 = scalar_lea.hbm %s8110_s10, 16 }
0x2bb8   : > { %5019 = vmatpush.msrb.mxu1 %v4995_v54 }
0x2bbe   : > { %5081 = vrot.lane.b32.xlu0 %v7749_v14, %s8062_s13  ;;  %s8103_s13 = sld [smem:[#allocation35_spill]] }
0x2c04   : > { %v4978_v43 = vpop.xlane.xlu2 %4977 }
0x2c05   : > { %6588 = vrcp.f32 %v4978_v43  ;;  %v4990_v50 = vand.u32 2147483648, %v4978_v43  ;;  %v4988_v59 = vand.u32 2147483647, %v4978_v43  ;;  %vm4984_vm12 = vweird.f32 %v4978_v43 }
0x2c07   : > { %v4991_v13 = vor.u32 1.1754944e-38, %v4990_v50  ;;  %vm4989_vm2 = vcmp.eq.f32.partialorder %v4988_v59, 8.507059e+37 }
0x2c0b   : > { %v6589_v55 = vpop.eup %6588 }
0x2c0c   : > { %v4980_v6 = vmul.f32 %v6589_v55, %v4978_v43  ;;  %v5084_v58 = vpop.permute.xlu2 %5083  ;;  %vm4985_vm11 = vweird.f32 %v6589_v55 }
0x2c0d   : > { %6087 = vmatpush.msk.msrb.mxu0 %vm8101_vm10, %v5084_v58  ;;  %vm4986_vm13 = vmor %vm4984_vm12, %vm4985_vm11 }
0x2c0e   : > { %v4981_v7 = vsub.f32 1.0, %v4980_v6 }
0x2c10   : > { %v4982_v60 = vmul.f32 %v6589_v55, %v4981_v7 }
0x2c12   : > { %v4983_v0 = vadd.f32 %v6589_v55, %v4982_v60  ;;  %v6425_v60 = vld [vmem:[%s8090_s0 + $0x1] ss:$0 sm:$0xff] }
0x2c14   : > { %v4987_v56 = vsel %vm4986_vm13, %v6589_v55, %v4983_v0  ;;  %v5113_v28 = vpop.permute.xlu2 %5112  ;;  %v6426_v0 = vld [vmem:[%s8092_s4 + $0x1] ss:$0 sm:$0xff] }
0x2c15   : > { %v4992_v3 = vsel %vm4989_vm2, %v4991_v13, %v4987_v56  ;;  %v5123_v15 = vsel %vm1262_vm1, %v7816_v61, %v5113_v28  ;;  %v6254_v61 = vld [vmem:[%s8088_s29 + $0x38] sm:$0xff] }
0x2c16   : > { %v4993_v14 = vmul.f32 %v6585_v45, %v4992_v3  ;;  %v5253_v36 = vsel %vm1220_vm0, %v6254_v61, 0  ;;  %v6252_v45 = vld [vmem:[%s8088_s29 + $0x28] sm:$0xff] }
0x2c17   : > { %5259 = vmatpush.bf16.xpose.msra.mxu1 %v5253_v36  ;;  %v5247_v18 = vsel %vm1220_vm0, %v6252_v45, 0  ;;  %v6261_v45 = vld [vmem:[%s8104_s17 + $0x20] sm:$0xff] }
0x2c18   : > { %6083 = vmatmul.msk.f32.vlgmr.msrb.gmra.mxu1 %vm1296_vm3, %v4993_v14  ;;  %v5457_v47 = vsel %vm1220_vm0, %v6261_v45, 0 }
0x2c1d   : > { %v5065_v62 = vpop.xlane.xlu0 %5064 }
0x2c1e   : > { %6590 = vrcp.f32 %v5065_v62  ;;  %v5077_v10 = vand.u32 2147483648, %v5065_v62  ;;  %v5075_v20 = vand.u32 2147483647, %v5065_v62  ;;  %vm5071_vm7 = vweird.f32 %v5065_v62 }
0x2c20   : > { %v5078_v17 = vor.u32 1.1754944e-38, %v5077_v10  ;;  %vm5076_vm8 = vcmp.eq.f32.partialorder %v5075_v20, 8.507059e+37 }
0x2c24   : > { %v6591_v5 = vpop.eup %6590 }
0x2c25   : > { %v5067_v57 = vmul.f32 %v6591_v5, %v5065_v62  ;;  %vm5072_vm6 = vweird.f32 %v6591_v5  ;;  %v6255_v62 = vld [vmem:[%s8089_s30 + $0x10] sm:$0xff] }
0x2c26   : > { %vm5073_vm4 = vmor %vm5071_vm7, %vm5072_vm6 }
0x2c27   : > { %v5068_v49 = vsub.f32 1.0, %v5067_v57  ;;  %v6427_v57 = vld [vmem:[%s8102_s5 + $0x1] ss:$0 sm:$0xff]  ;;  %s5505_s5 = sshll.u32 %s1160_s16, 4  ;;  %s5506_s5 = int_to_ptr.vmem [resolvable:$true] %s5505_s5 }
0x2c29   : > { %v5069_v11 = vmul.f32 %v6591_v5, %v5068_v49 }
0x2c2b   : > { %v5070_v16 = vadd.f32 %v6591_v5, %v5069_v11 }
0x2c2d   : > { %v5074_v2 = vsel %vm5073_vm4, %v6591_v5, %v5070_v16  ;;  %v5289_v5 = vsel %vm1979_vm14, %v6255_v62, 0 }
0x2c2e   : > { %v5079_v21 = vsel %vm5076_vm8, %v5078_v17, %v5074_v2  ;;  %5301 = vmatpush.bf16.xpose.msra.mxu3 %v5289_v5  ;;  %v6428_v17 = vld [vmem:[%s8103_s13 + $0x1] ss:$0 sm:$0xff]  ;;  %s5507_s13 = sshll.u32 %s5503_s12, 4  ;;  %s5508_s13 = int_to_ptr.hbm [resolvable:$true] %s5507_s13 }
0x2c2f   : > { %v5080_v22 = vmul.f32 %v6587_v53, %v5079_v21 }
0x2c30   : > { %v5082_v23 = vpop.permute.xlu0 %5081 }
0x2c31   : > { %5106 = vmatpush.msrb.mxu0 %v5082_v23 }
0x2c32   : > { %6088 = vmatmul.msk.f32.vlgmr.msrb.gmra.mxu0 %vm1296_vm3, %v5080_v22 }
0x2c95   : > { %v5021_v25 = vpop.f32.mrf.mxu1 }
0x2c96   : > { %5116 = vrot.lane.b32.xlu1 %v5021_v25, %s8070_s22  ;;  %s8107_s22 = sld [smem:[#allocation41_spill]] }
0x2caf   : > { %v5108_v4 = vpop.f32.mrf.mxu0 }
0x2cb0   : > { %5120 = vrot.lane.b32.xlu0 %v5108_v4, %s8069_s15  ;;  %s8105_s15 = sld [smem:[#allocation38_spill]] }
0x2d08   : > { %v5117_v29 = vpop.permute.xlu1 %5116 }
0x2d09   : > { %v5124_v63 = vsel %vm1784_vm15, %v5123_v15, %v5117_v29 }
0x2d22   : > { %v5121_v30 = vpop.permute.xlu0 %5120 }
0x2d23   : > { %v5125_v9 = vsel %vm1787_vm5, %v5124_v63, %v5121_v30 }
0x2d24   : > { %v5131_v31 = vpack.c.bf16 %v5125_v9, %v5125_v9 }
0x2d26   : > { %6101 = vmatmul.msk.bf16.vlgmr.msra.gmra.mxu2 %vm1220_vm0, %v5131_v31 }
0x2da9   : > { %v5160_v32 = vpop.f32.mrf.mxu2 }
0x2daa   : > { %v5164_v33 = vadd.f32 %v5160_v32, %v7776_v38  ;;  %v6253_v38 = vld [vmem:[%s8088_s29 + $0x30] sm:$0xff] }
0x2dab   : > { %v5250_v42 = vsel %vm1220_vm0, %v6253_v38, 0  ;;  %v6262_v38 = vld [vmem:[%s8104_s17 + $0x28] sm:$0xff] }
0x2dac   : > { %v5170_v34 = vadd.f32 %v6424_v12, %v5164_v33  ;;  %5260 = vmatpush.bf16.xpose.msra.mxu1 %v5250_v42  ;;  %v6429_v33 = vld [vmem:[%s8096_s9 + $0x1] ss:$0 sm:$0xff]  ;;  %v5460_v42 = vsel %vm1220_vm0, %v6262_v38, 0 }
0x2dae   : > { %v5175_v52 = vsel %vm1220_vm0, %v5170_v34, 0.0 }
0x2daf   : > { %5176 = vadd.xlane.f32.xlu2 %v5175_v52 }
0x2db1   : > { %v5162_v35 = vpop.f32.mrf.mxu2 }
0x2db2   : > { %v6430_v35 = vld [vmem:[%s8097_s20 + $0x1] ss:$0 sm:$0xff] }
0x2db4   : > { %5261 = vmatpush.bf16.xpose.msra.mxu1 %v5247_v18 }
0x2dbc   : > { %5262 = vmatpush.bf16.xpose.msra.mxu1 %v5244_v46 }
0x2e22   : > { %v5177_v37 = vpop.xlane.xlu2 %5176 }
0x2e23   : > { %v5178_v24 = vmul.f32 %v5177_v37, %v7148_v1 }
0x2e25   : > { %v5179_v19 = vsub.f32 %v5170_v34, %v5178_v24  ;;  %v6264_v24 = vld [vmem:[%s8104_s17 + $0x38] sm:$0xff] }
0x2e27   : > { %v5180_v40 = vmul.f32 %v5179_v19, %v5179_v19 }
0x2e29   : > { %v5181_v41 = vsel %vm1220_vm0, %v5180_v40, 0.0  ;;  %v6263_v40 = vld [vmem:[%s8104_s17 + $0x30] sm:$0xff] }
0x2e2a   : > { %5182 = vadd.xlane.f32.xlu1 %v5181_v41  ;;  %v5463_v41 = vsel %vm1220_vm0, %v6263_v40, 0 }
0x2e9d   : > { %v5183_v53 = vpop.xlane.xlu1 %5182 }
0x2e9e   : > { %v5184_v39 = vmul.f32 %v5183_v53, %v7148_v1  ;;  %v6260_v53 = vld [vmem:[%s8104_s17 + $0x18] sm:$0xff] }
0x2ea0   : > { %v5185_v54 = vadd.f32 1e-05, %v5184_v39 }
0x2ea2   : > { %6592 = vrsqrt.f32 %v5185_v54  ;;  %vm5192_vm3 = vweird.f32 %v5185_v54 }
0x2ea8   : > { %v6593_v43 = vpop.eup %6592 }
0x2ea9   : > { %v5187_v55 = vmul.f32 %v6593_v43, %v5185_v54  ;;  %vm5193_vm1 = vweird.f32 %v6593_v43  ;;  %v5454_v54 = vsel %vm1220_vm0, %v6260_v53, 0 }
0x2eaa   : > { %vm5194_vm15 = vmor %vm5192_vm3, %vm5193_vm1 }
0x2eab   : > { %v5188_v6 = vmul.f32 %v6593_v43, %v5187_v55 }
0x2ead   : > { %v5189_v58 = vmul.f32 0.5, %v5188_v6  ;;  %v6258_v6 = vld [vmem:[%s8104_s17 + $0x8] sm:$0xff] }
0x2eaf   : > { %v5190_v7 = vsub.f32 1.5, %v5189_v58  ;;  %v5448_v58 = vsel %vm1220_vm0, %v6258_v6, 0 }
0x2eb1   : > { %v5191_v50 = vmul.f32 %v6593_v43, %v5190_v7  ;;  %v6257_v7 = vld [vmem:[%s8104_s17] sm:$0xff] }
0x2eb3   : > { %v5195_v59 = vsel %vm5194_vm15, %v6593_v43, %v5191_v50  ;;  %v6259_v43 = vld [vmem:[%s8104_s17 + $0x10] sm:$0xff]  ;;  %v5445_v50 = vsel %vm1220_vm0, %v6257_v7, 0 }
0x2eb4   : > { %v5196_v13 = vmul.f32 %v5195_v59, %v5179_v19  ;;  %v5466_v19 = vsel %vm1220_vm0, %v6264_v24, 0  ;;  %v5451_v55 = vsel %vm1220_vm0, %v6259_v43, 0 }
0x2eb5   : > { %5468 = vmatpush.bf16.xpose.msra.mxu0 %v5466_v19 }
0x2eb6   : > { %v5200_v56 = vmul.f32 %v6425_v60, %v5196_v13 }
0x2eb8   : > { %v5204_v3 = vadd.f32 %v6426_v0, %v5200_v56 }
0x2eba   : > { %v5214_v14 = vpack.c.bf16 %v5204_v3, %v5204_v3 }
0x2ebc   : > { %6130 = vmatmul.msk.bf16.vlgmr.msra.gmra.mxu1 %vm1220_vm0, %v5214_v14 }
0x2ebd   : > { %5469 = vmatpush.bf16.xpose.msra.mxu0 %v5463_v41 }
0x2ec5   : > { %5470 = vmatpush.bf16.xpose.msra.mxu0 %v5460_v42 }
0x2ecd   : > { %5471 = vmatpush.bf16.xpose.msra.mxu0 %v5457_v47 }
0x2ed5   : > { %5472 = vmatpush.bf16.xpose.msra.mxu0 %v5454_v54 }
0x2edd   : > { %5473 = vmatpush.bf16.xpose.msra.mxu0 %v5451_v55 }
0x2ee5   : > { %5474 = vmatpush.bf16.xpose.msra.mxu0 %v5448_v58 }
0x2eed   : > { %5475 = vmatpush.bf16.xpose.msra.mxu0 %v5445_v50 }
0x2f39   : > { %v5264_v49 = vpop.f32.mrf.mxu1 }
0x2f3a   : > { %v5265_v10 = vadd.f32 %v6427_v57, %v5264_v49  ;;  %v6431_v57 = vld [vmem:[%s8105_s15] ss:$0 sm:$0xff]  ;;  %s5493_s15 = scalar_lea.sflag [#allocation3], %s1158_s1 }
0x2f3c   : > { %v5268_v11 = vmax.f32 %v5265_v10, 0.0 }
0x2f3e   : > { %v5274_v20 = vpack.c.bf16 %v5268_v11, %v5268_v11  ;;  %v6432_v11 = vld [vmem:[%s8106_s18] ss:$0 sm:$0xff]  ;;  %s6616_s18 = sshra.s32 %s5508_s13, 4  ;;  %s6617_s18 = int_to_ptr.hbm [resolvable:$true] %s6616_s18 }
0x2f3f   : > { %p6623_p0 = scmp.lt.s32.totalorder %s6617_s18, %s8110_s10 }
0x2f40   : > { %6143 = vmatmul.msk.bf16.vlgmr.msra.gmra.mxu3 %vm1979_vm14, %v5274_v20 }
0x2f41   : > { %v5266_v16 = vpop.f32.mrf.mxu1 }
0x2fc3   : > { %v5303_v2 = vpop.f32.mrf.mxu3 }
0x2fc4   : > { %v5307_v21 = vadd.f32 %v5303_v2, %v5204_v3 }
0x2fc6   : > { %v5313_v22 = vadd.f32 %v6428_v17, %v5307_v21  ;;  %v6433_v17 = vld [vmem:[%s8107_s22] ss:$0 sm:$0xff]  ;;  %s6618_s22 = scalar_lea.hbm %s6617_s18, 8 }
0x2fc7   : > { %p6619_p11 = scmp.ne.s32.totalorder %s6617_s18, %s6618_s22  ;;  %p6624_p1 = scmp.lt.s32.totalorder %s6622_s26, %s6618_s22 }
0x2fc8   : > { %v5318_v23 = vsel %vm1220_vm0, %v5313_v22, 0.0 }
0x2fc9   : > { %5319 = vadd.xlane.f32.xlu0 %v5318_v23  ;;  %p6620_p12 = pnand %p6619_p11, %p6957_p5  ;;  %p6625_p2 = por %p6624_p1, %p6623_p0 }
0x2fcb   : > { %v5305_v25 = vpop.f32.mrf.mxu3  ;;  %p6621_p13 = pneg %p6620_p12 }
0x2fcd   : > { %p6626_p3 = pnand %p6625_p2, %p6621_p13 }
0x303c   : > { %v5320_v4 = vpop.xlane.xlu0 %5319 }
0x303d   : > { %v5321_v26 = vmul.f32 %v5320_v4, %v7148_v1 }
0x303f   : > { %v5322_v48 = vsub.f32 %v5313_v22, %v5321_v26 }
0x3041   : > { %v5323_v8 = vmul.f32 %v5322_v48, %v5322_v48 }
0x3043   : > { %v5324_v27 = vsel %vm1220_vm0, %v5323_v8, 0.0 }
0x3044   : > { %5325 = vadd.xlane.f32.xlu2 %v5324_v27 }
0x30b7   : > { %v5326_v28 = vpop.xlane.xlu2 %5325 }
0x30b8   : > { %v5327_v29 = vmul.f32 %v5326_v28, %v7148_v1 }
0x30ba   : > { %v5328_v15 = vadd.f32 1e-05, %v5327_v29 }
0x30bc   : > { %6594 = vrsqrt.f32 %v5328_v15  ;;  %vm5335_vm14 = vweird.f32 %v5328_v15 }
0x30c2   : > { %v6595_v63 = vpop.eup %6594 }
0x30c3   : > { %v5330_v30 = vmul.f32 %v6595_v63, %v5328_v15  ;;  %vm5336_vm5 = vweird.f32 %v6595_v63 }
0x30c4   : > { %vm5337_vm9 = vmor %vm5335_vm14, %vm5336_vm5 }
0x30c5   : > { %v5331_v9 = vmul.f32 %v6595_v63, %v5330_v30 }
0x30c7   : > { %v5332_v31 = vmul.f32 0.5, %v5331_v9 }
0x30c9   : > { %v5333_v12 = vsub.f32 1.5, %v5332_v31 }
0x30cb   : > { %v5334_v32 = vmul.f32 %v6595_v63, %v5333_v12 }
0x30cd   : > { %v5338_v34 = vsel %vm5337_vm9, %v6595_v63, %v5334_v32 }
0x30ce   : > { %v5339_v52 = vmul.f32 %v5338_v34, %v5322_v48 }
0x30d0   : > { %v5343_v61 = vmul.f32 %v6429_v33, %v5339_v52 }
0x30d2   : > { %v5347_v36 = vadd.f32 %v6430_v35, %v5343_v61 }
0x30d4   : > { %v5350_v37 = vsel %vm1220_vm0, %v5347_v36, 0.0 }
0x30d5   : > { %5351 = vadd.xlane.f32.xlu1 %v5350_v37 }
0x3148   : > { %v5352_v18 = vpop.xlane.xlu1 %5351 }
0x3149   : > { %v5353_v46 = vmul.f32 %v5352_v18, %v7148_v1 }
0x314b   : > { %v5354_v51 = vsub.f32 %v5347_v36, %v5353_v46 }
0x314d   : > { %v5355_v39 = vmul.f32 %v5354_v51, %v5354_v51 }
0x314f   : > { %v5356_v44 = vsel %vm1220_vm0, %v5355_v39, 0.0 }
0x3150   : > { %5357 = vadd.xlane.f32.xlu2 %v5356_v44 }
0x31c3   : > { %v5358_v60 = vpop.xlane.xlu2 %5357 }
0x31c4   : > { %v5359_v59 = vmul.f32 %v5358_v60, %v7148_v1 }
0x31c6   : > { %v5360_v0 = vadd.f32 1e-05, %v5359_v59 }
0x31c8   : > { %6596 = vrsqrt.f32 %v5360_v0  ;;  %vm5367_vm11 = vweird.f32 %v5360_v0 }
0x31ce   : > { %v6597_v13 = vpop.eup %6596 }
0x31cf   : > { %v5362_v56 = vmul.f32 %v6597_v13, %v5360_v0  ;;  %vm5368_vm10 = vweird.f32 %v6597_v13 }
0x31d0   : > { %vm5369_vm12 = vmor %vm5367_vm11, %vm5368_vm10 }
0x31d1   : > { %v5363_v3 = vmul.f32 %v6597_v13, %v5362_v56 }
0x31d3   : > { %v5364_v14 = vmul.f32 0.5, %v5363_v3 }
0x31d5   : > { %v5365_v62 = vsub.f32 1.5, %v5364_v14 }
0x31d7   : > { %v5366_v5 = vmul.f32 %v6597_v13, %v5365_v62 }
0x31d9   : > { %v5370_v49 = vsel %vm5369_vm12, %v6597_v13, %v5366_v5 }
0x31da   : > { %v5371_v10 = vmul.f32 %v5370_v49, %v5354_v51 }
0x31dc   : > { %v5375_v20 = vmul.f32 %v6431_v57, %v5371_v10 }
0x31de   : > { %v5379_v16 = vadd.f32 %v6432_v11, %v5375_v20 }
0x31e0   : > { %v5396_v1 = vpack.c.bf16 %v5379_v16, %v5379_v16 }
0x31e2   : > { %6179 = vmatmul.msk.bf16.vlgmr.msra.gmra.mxu0 %vm1220_vm0, %v5396_v1 }
0x325f   : > { %v5477_v2 = vpop.f32.mrf.mxu0 }
0x3260   : > { %v5478_v21 = vadd.f32 %v6433_v17, %v5477_v2 }
0x3262   : > { %5481 = vmax.xlane.f32.xlu0 %v5478_v21 }
0x3267   : > { %v5479_v22 = vpop.f32.mrf.mxu0 }
0x32d5   : > { %v5482_v23 = vpop.xlane.xlu0 %5481 }
0x32d6   : > { %v5483_v25 = vsub.f32 %v5478_v21, %v5482_v23 }
0x32d8   : > { %v5484_v4 = vmul.f32 1.442695, %v5483_v25 }
0x32da   : > { %6598 = vpow2.f32 %v5484_v4 }
0x32e0   : > { %v6599_v26 = vpop.eup %6598 }
0x32e1   : > { %5486 = vadd.xlane.f32.xlu1 %v6599_v26 }
0x3354   : > { %v5487_v48 = vpop.xlane.xlu1 %5486 }
0x3355   : > { %6600 = vlog2.f32 %v5487_v48 }
0x335b   : > { %v6601_v8 = vpop.eup %6600 }
0x335c   : > { %v5489_v27 = vmul.f32 0.6931472, %v6601_v8 }
0x335e   : > { %v5490_v28 = vsub.f32 %v5483_v25, %v5489_v27 }
0x3360   : > { %5491 = vst [vmem:[%s1160_s16] sm:$0xff] %v5490_v28 }
0x3361   : > { %6629 = shalt.err (!%p6626_p3)
}
0x3362   : > { %6267 = dma.vmem_to_hbm [thread:$0]  (%p6957_p5), %s5506_s5, 128, %s5508_s13, %s5493_s15  }
0x3363 PF: > { %s8112_s2 = sld [smem:[#allocation46_spill]] }
0x3364   : > { %s8113_s23 = sld [smem:[#allocation43_spill]] }
0x3369   : > { %p6273_p4 = scmp.ge.s32.totalorder %s8112_s2, 2 }
0x336a   : > { %s5519_s28 = sand.u32 1, %s8113_s23  }
0x336b   : > { %p6270_p7 = pnand %p6273_p4, %p6961_p6  ;;  %s5520_s12 = scalar_lea.sflag [#allocation3], %s5519_s28 }
0x336d   : > { %p6271_p8 = pneg %p6270_p7 }
0x336f   : > { %6647 = dma.done.wait (%p6271_p8), %s5520_s12, 128  }
0x3370   : > { %6649 = vsyncadd (%p6271_p8), %s5520_s12, 4294967168  ;;  %s8115_s22 = sld [smem:[#allocation48_spill]] }
0x3371   : > { %s8116_s15 = sld [smem:[#allocation44_spill]] }
0x3372   : > { %s8117_s16 = sld [smem:[#allocation45_spill]] }
0x3373   : > { %s8118_s18 = sld [smem:[#allocation49_spill]] }
0x3376   : > { %p87_p9 = scmp.ge.s32.totalorder %s8115_s22, 4  }
0x3378   :  { %89 = sbr.rel (!%p87_p9) target bundleno = 88 (0x58), region = 278 }
0x337d   :  { %5526 = vsyncpa [#allocation3], 1 }
0x337e   :  { %5528 = vsyncpa [#allocation3 + $0x1], 1 }

</bundles_post_ra>
